<compile_context>
chip_gen: v7x
topology: tpu7x:2x2x1
jax: 0.10.0
libtpu: 0.0.40
codegen_flags: <defaults>
</compile_context>

<pallas_src>
import functools

import jax
import jax.numpy as jnp
from jax.experimental import pallas as pl
from jax.experimental.pallas import tpu as pltpu

EPS = 1e-5


# ----------------------------------------------------------------------------
# Generation-aware compiler params
# ----------------------------------------------------------------------------
@functools.lru_cache(maxsize=None)
def _vmem_limit_bytes():
    try:
        cap = int(pltpu.get_tpu_info().vmem_capacity_bytes)
        # ~96 MiB on 128-MiB parts (v5e/v6e), ~48 MiB on 64-MiB parts (v7x).
        return max(32 << 20, min((cap * 3) // 4, 96 << 20))
    except Exception:  # older jax / info unavailable -> known-safe value
        return 32 << 20


def _compiler_params(n_axes=1):
    return pltpu.CompilerParams(
        dimension_semantics=("parallel",) * n_axes,
        vmem_limit_bytes=_vmem_limit_bytes(),
    )


def _pick_batch_tile(b, max_bt=8):
    """Batch tile that divides b; prefer >=2 grid steps (v7x has 2 TensorCores)."""
    if b <= 1:
        return 1
    for bt in range(min(max_bt, b // 2), 0, -1):
        if b % bt == 0:
            return bt
    return 1


# ----------------------------------------------------------------------------
# Pallas kernels
# ----------------------------------------------------------------------------
def conv3x3s2_stats_kernel(planes_ref, w_ref, y_ref, s_ref, *, ho, wo):
    """3x3 / stride-2 / pad-1 conv as 9 accumulated matmuls + BN partial stats.

    planes_ref: (6, bt, (ho+1)*wo, Cin) bf16  -- plane q = 3*(kh%2) + kw holds
                the stride-2 tap stream ap[2r+kh%2, kw+2c] flattened over (r,c)
    w_ref:      (9, Cin, Cout) bf16           -- tap-major conv weight (resident)
    y_ref:      (bt*ho*wo, Cout) bf16         -- conv output (pre-BN), per-image rows
    s_ref:      (1, 2, Cout) f32              -- per-tile [sum, centered M2]
    """
    rows, cout = y_ref.shape
    cin = w_ref.shape[1]
    img_rows = ho * wo

    acc = jnp.zeros((rows, cout), jnp.float32)
    for kh in range(3):
        dh = kh // 2
        for kw in range(3):
            q = 3 * (kh % 2) + kw
            # Contiguous row window of the tap plane: rows dh*wo .. dh*wo+ho*wo.
            lhs = planes_ref[q, :, dh * wo:dh * wo + img_rows, :]   # (bt, ho*wo, cin)
            acc = acc + jnp.dot(lhs.reshape(rows, cin), w_ref[3 * kh + kw],
                                preferred_element_type=jnp.float32)

    y_ref[...] = acc.astype(y_ref.dtype)

    # BatchNorm partials from the f32 accumulator (before the bf16 cast).
    ssum = jnp.sum(acc, axis=0, keepdims=True)                      # (1, Cout)
    mu = ssum * (1.0 / rows)
    m2 = jnp.sum((acc - mu) ** 2, axis=0, keepdims=True)            # (1, Cout)
    s_ref[...] = jnp.concatenate([ssum, m2], axis=0).reshape(1, 2, cout)


def bn_act_pool_fc_kernel(y_ref, scale_ref, shift_ref, w_ref, b_ref, o_ref, *,
                          negative_slope, rows_per_img):
    """Fused conv3 epilogue: BN + LeakyReLU + AvgPool(4,4) + Linear(512->4, padded).

    y_ref:     (bt*rows_per_img, 512) bf16
    scale_ref: (1, 512) f32,  shift_ref: (1, 512) f32
    w_ref:     (512, 128) bf16  (fc weight zero-padded to 128 lanes)
    b_ref:     (1, 128) f32
    o_ref:     (bt, 128) f32
    """
    y = y_ref[...].astype(jnp.float32) * scale_ref[...] + shift_ref[...]
    a = jnp.where(y > 0, y, negative_slope * y)
    bt = o_ref.shape[0]
    pooled = jnp.mean(a.reshape(bt, rows_per_img, a.shape[-1]), axis=1)   # (bt, 512)
    out = jnp.dot(pooled.astype(jnp.bfloat16), w_ref[...],
                  preferred_element_type=jnp.float32)
    o_ref[...] = out + b_ref[...]


# ----------------------------------------------------------------------------
# pallas_call wrappers
# ----------------------------------------------------------------------------
def conv3x3s2_with_stats(planes, w, ho, wo):
    _, B, prows, Cin = planes.shape
    Cout = w.shape[-1]
    bt = _pick_batch_tile(B)
    nt = B // bt
    img_rows = ho * wo
    R = B * img_rows

    flops = 2 * R * 9 * Cin * Cout
    bytes_accessed = (planes.size * planes.dtype.itemsize
                      + w.size * w.dtype.itemsize
                      + R * Cout * 2
                      + nt * 2 * Cout * 4)

    return pl.pallas_call(
        functools.partial(conv3x3s2_stats_kernel, ho=ho, wo=wo),
        out_shape=(
            jax.ShapeDtypeStruct((R, Cout), jnp.bfloat16),
            jax.ShapeDtypeStruct((nt, 2, Cout), jnp.float32),
        ),
        grid=(nt,),
        in_specs=[
            pl.BlockSpec((6, bt, prows, Cin), lambda i: (0, i, 0, 0)),   # plane stream
            pl.BlockSpec((9, Cin, Cout), lambda i: (0, 0, 0)),           # resident weight
        ],
        out_specs=(
            pl.BlockSpec((bt * img_rows, Cout), lambda i: (i, 0)),
            pl.BlockSpec((1, 2, Cout), lambda i: (i, 0, 0)),
        ),
        compiler_params=_compiler_params(1),
        cost_estimate=pl.CostEstimate(flops=flops, transcendentals=0,
                                      bytes_accessed=bytes_accessed),
    )(planes, w)


def bn_act_pool_fc(y2d, batch, rows_per_img, scale, shift, fc_w_pad, fc_b_pad,
                   negative_slope):
    C = y2d.shape[-1]
    # Pad batch so the fused, pipelined epilogue always runs (no fallback path).
    if batch % 8 == 0:
        b_pad, bt = batch, 8
    elif batch <= 8:
        b_pad, bt = batch, batch
    else:
        b_pad, bt = ((batch + 7) // 8) * 8, 8
        y2d = jnp.pad(y2d, ((0, (b_pad - batch) * rows_per_img), (0, 0)))
    nt = b_pad // bt
    tm = bt * rows_per_img
    n = fc_w_pad.shape[1]

    out = pl.pallas_call(
        functools.partial(bn_act_pool_fc_kernel, negative_slope=negative_slope,
                          rows_per_img=rows_per_img),
        out_shape=jax.ShapeDtypeStruct((b_pad, n), jnp.float32),
        grid=(nt,),
        in_specs=[
            pl.BlockSpec((tm, C), lambda i: (i, 0)),
            pl.BlockSpec((1, C), lambda i: (0, 0)),
            pl.BlockSpec((1, C), lambda i: (0, 0)),
            pl.BlockSpec((C, n), lambda i: (0, 0)),
            pl.BlockSpec((1, n), lambda i: (0, 0)),
        ],
        out_specs=pl.BlockSpec((bt, n), lambda i: (i, 0)),
        compiler_params=_compiler_params(1),
    )(y2d, scale.reshape(1, C), shift.reshape(1, C), fc_w_pad, fc_b_pad)
    return out[:batch]


# ----------------------------------------------------------------------------
# XLA glue (layout/statistics plumbing, fused by XLA)
# ----------------------------------------------------------------------------
def _shifted_planes(a):
    """(B, H, W, C) NHWC (H, W even) -> (6, B, (H//2+1)*(W//2), C) tap planes.

    Plane q = 3*(kh%2) + kw holds ap[2r + kh%2, kw + 2c] of the zero-padded
    input, flattened over (r, c), so each 3x3 tap of the stride-2 conv becomes
    a contiguous row window of one plane (no 9x im2col materialization).
    """
    B, H, W, C = a.shape
    assert H % 2 == 0 and W % 2 == 0, "stride-2 tap-plane split needs even H, W"
    Ho, Wo = H // 2, W // 2
    ap = jnp.pad(a, ((0, 0), (1, 1), (1, 1), (0, 0)))
    planes = []
    for ph in (0, 1):
        rows = ap[:, ph::2, :, :]                                   # (B, Ho+1, W+2, C)
        for kw in (0, 1, 2):
            cols = rows[:, :, kw:kw + 2 * Wo:2, :]                  # (B, Ho+1, Wo, C)
            planes.append(cols.reshape(B, (Ho + 1) * Wo, C))
    return jnp.stack(planes, axis=0)


def _bn_act_planes(y2d, b, ho, wo, scale, shift, negative_slope):
    """Fused-by-XLA BatchNorm apply + (Leaky)ReLU + pad + tap-plane split."""
    c = y2d.shape[-1]
    a = y2d.astype(jnp.float32) * scale + shift
    a = jnp.where(a > 0, a, negative_slope * a).astype(jnp.bfloat16)
    return _shifted_planes(a.reshape(b, ho, wo, c))


def _fold_stats(part, gamma, beta, n_tile, n_total):
    """Combine per-tile [sum, centered M2] (Chan) into BN scale/shift (biased var)."""
    sum_t = part[:, 0, :]                                           # (nt, C)
    m2_t = part[:, 1, :]
    mean = jnp.sum(sum_t, axis=0) / n_total
    mu_t = sum_t / n_tile
    var = (jnp.sum(m2_t, axis=0)
           + n_tile * jnp.sum((mu_t - mean) ** 2, axis=0)) / n_total
    var = jnp.maximum(var, 0.0)
    inv = jax.lax.rsqrt(var + EPS)
    scale = gamma * inv
    shift = beta - mean * scale
    return scale, shift


def _conv_bn(planes, w, gamma, beta, ho, wo, batch):
    y, part = conv3x3s2_with_stats(planes, w, ho, wo)
    nt = part.shape[0]
    n_tile = float((batch // nt) * ho * wo)
    n_total = float(batch * ho * wo)
    scale, shift = _fold_stats(part, gamma, beta, n_tile, n_total)
    return y, scale, shift


# ----------------------------------------------------------------------------
# Full forward pass
# ----------------------------------------------------------------------------
def discriminator_forward(feature_nchw, params):
    # GRL: identity in the forward pass (gradient reversal only affects backward).
    x = jnp.transpose(feature_nchw, (0, 2, 3, 1)).astype(jnp.bfloat16)   # NHWC, bf16
    B, H, W, _ = x.shape

    # --- Conv1(128->256, s2) + BN + ReLU ---
    h1, w1 = H // 2, W // 2
    y, sc, sh = _conv_bn(_shifted_planes(x), params["w1"],
                         params["g1"], params["b1"], h1, w1, B)

    # --- Conv2(256->256, s2) + BN + LeakyReLU(0.2) ---
    h2, w2 = h1 // 2, w1 // 2
    planes = _bn_act_planes(y, B, h1, w1, sc, sh, 0.0)
    y, sc, sh = _conv_bn(planes, params["w2"], params["g2"], params["b2"], h2, w2, B)

    # --- Conv3(256->512, s2) + BN + LeakyReLU(0.2) ---
    h3, w3 = h2 // 2, w2 // 2
    planes = _bn_act_planes(y, B, h2, w2, sc, sh, 0.2)
    y, sc, sh = _conv_bn(planes, params["w3"], params["g3"], params["b3"], h3, w3, B)

    # --- BN + LeakyReLU(0.2) + AvgPool(4,4) + Linear(512, 4) fused epilogue ---
    assert h3 == 4 and w3 == 4, "fc(512, 4) requires a 32x32 input feature map"
    logits_pad = bn_act_pool_fc(y, B, h3 * w3, sc, sh,
                                params["fc_w_pad"], params["fc_b_pad"], 0.2)
    return logits_pad[:, :4]


# ----------------------------------------------------------------------------
# Parameter init (PyTorch layouts, permuted / cast for the kernels)
# ----------------------------------------------------------------------------
def init_params(key):
    ks = jax.random.split(key, 5)

    def conv_w(k, cin, cout):
        # PyTorch (Cout, Cin, KH, KW) -> tap-major (9, Cin, Cout), bf16 for the MXU.
        w = jax.random.normal(k, (cout, cin, 3, 3), jnp.float32) * 0.05
        return jnp.transpose(w, (2, 3, 1, 0)).reshape(9, cin, cout).astype(jnp.bfloat16)

    w1 = conv_w(ks[0], 128, 256)
    w2 = conv_w(ks[1], 256, 256)
    w3 = conv_w(ks[2], 256, 512)
    # BatchNorm affine params (PyTorch default init: gamma=1, beta=0).
    g1, b1 = jnp.ones((256,), jnp.float32), jnp.zeros((256,), jnp.float32)
    g2, b2 = jnp.ones((256,), jnp.float32), jnp.zeros((256,), jnp.float32)
    g3, b3 = jnp.ones((512,), jnp.float32), jnp.zeros((512,), jnp.float32)
    # Linear(512, 4): PyTorch weight (4, 512) -> (512, 4), zero-padded to 128 lanes.
    fc_w = jax.random.normal(ks[3], (4, 512), jnp.float32) * 0.04
    fc_b = jax.random.normal(ks[4], (4,), jnp.float32) * 0.01
    fc_w_pad = (jnp.zeros((512, 128), jnp.float32).at[:, :4].set(fc_w.T)
                .astype(jnp.bfloat16))
    fc_b_pad = jnp.zeros((1, 128), jnp.float32).at[0, :4].set(fc_b)
    return dict(w1=w1, w2=w2, w3=w3, g1=g1, b1=b1, g2=g2, b2=b2, g3=g3, b3=b3,
                fc_w_pad=fc_w_pad, fc_b_pad=fc_b_pad)


if __name__ == "__main__":
    key = jax.random.PRNGKey(0)
    k_in, k_par = jax.random.split(key)

    # 32x32 spatial so three stride-2 convs + AvgPool(4,4) yield exactly 512 features.
    feature = jax.random.normal(k_in, (2, 128, 32, 32), jnp.float32)   # NCHW like PyTorch
    params = init_params(k_par)

    out = jax.jit(discriminator_forward)(feature, params)
    out = jax.block_until_ready(out)

    assert out.shape == (2, 4), out.shape
    assert bool(jnp.all(jnp.isfinite(out)))
    print("KERNEL_OK")
</pallas_src>

<mosaic_0001>
module attributes {stable_mosaic.version = 11 : i64} {
  func.func @conv3x3s2_stats_kernel(%arg0: i32, %arg1: memref<6x1x272x128xbf16, #tpu.memory_space<vmem>>, %arg2: memref<9x128x256xbf16, #tpu.memory_space<vmem>>, %arg3: memref<256x256xbf16, #tpu.memory_space<vmem>>, %arg4: memref<1x2x256xf32, #tpu.memory_space<vmem>>) attributes {dimension_semantics = [#tpu.dimension_semantics<parallel>], iteration_bounds = array<i64: 2>, scalar_prefetch = 0 : i64, scratch_operands = 0 : i64, tpu.core_type = #tpu.core_type<tc>, window_params = [{transform_indices = @transform_0, window_bounds = array<i64: 6, 1, 272, 128>}, {pipeline_mode = #tpu.pipeline_mode<synchronous>, transform_indices = @transform_1, window_bounds = array<i64: 9, 128, 256>}, {transform_indices = @transform_2, window_bounds = array<i64: 256, 256>}, {transform_indices = @transform_3, window_bounds = array<i64: 1, 2, 256>}]} {
    %cst = arith.constant 0.000000e+00 : f32
    %0 = vector.broadcast %cst : f32 to vector<256x256xf32>
    %c0 = arith.constant 0 : index
    %c0_0 = arith.constant 0 : index
    %c0_1 = arith.constant 0 : index
    %c0_2 = arith.constant 0 : index
    %1 = vector.load %arg1[%c0, %c0_0, %c0_1, %c0_2] : memref<6x1x272x128xbf16, #tpu.memory_space<vmem>>, vector<1x1x256x128xbf16>
    %2 = vector.shape_cast %1 : vector<1x1x256x128xbf16> to vector<1x256x128xbf16>
    %3 = vector.shape_cast %2 : vector<1x256x128xbf16> to vector<256x128xbf16>
    %c0_3 = arith.constant 0 : index
    %c0_4 = arith.constant 0 : index
    %c0_5 = arith.constant 0 : index
    %4 = vector.load %arg2[%c0_3, %c0_4, %c0_5] : memref<9x128x256xbf16, #tpu.memory_space<vmem>>, vector<1x128x256xbf16>
    %5 = vector.shape_cast %4 : vector<1x128x256xbf16> to vector<128x256xbf16>
    %cst_6 = arith.constant dense<0.000000e+00> : vector<256x256xf32>
    %6 = tpu.matmul %3, %5, %cst_6 {dimension_numbers = #tpu.dot_dimension_numbers<[1], [0], [0], [1], [0, 0, 1, 1], [], []>} : vector<256x128xbf16>, vector<128x256xbf16>, vector<256x256xf32> -> vector<256x256xf32>
    %7 = arith.addf %0, %6 : vector<256x256xf32>
    %c1 = arith.constant 1 : index
    %c0_7 = arith.constant 0 : index
    %c0_8 = arith.constant 0 : index
    %c0_9 = arith.constant 0 : index
    %8 = vector.load %arg1[%c1, %c0_7, %c0_8, %c0_9] : memref<6x1x272x128xbf16, #tpu.memory_space<vmem>>, vector<1x1x256x128xbf16>
    %9 = vector.shape_cast %8 : vector<1x1x256x128xbf16> to vector<1x256x128xbf16>
    %10 = vector.shape_cast %9 : vector<1x256x128xbf16> to vector<256x128xbf16>
    %c1_10 = arith.constant 1 : index
    %c0_11 = arith.constant 0 : index
    %c0_12 = arith.constant 0 : index
    %11 = vector.load %arg2[%c1_10, %c0_11, %c0_12] : memref<9x128x256xbf16, #tpu.memory_space<vmem>>, vector<1x128x256xbf16>
    %12 = vector.shape_cast %11 : vector<1x128x256xbf16> to vector<128x256xbf16>
    %cst_13 = arith.constant dense<0.000000e+00> : vector<256x256xf32>
    %13 = tpu.matmul %10, %12, %cst_13 {dimension_numbers = #tpu.dot_dimension_numbers<[1], [0], [0], [1], [0, 0, 1, 1], [], []>} : vector<256x128xbf16>, vector<128x256xbf16>, vector<256x256xf32> -> vector<256x256xf32>
    %14 = arith.addf %7, %13 : vector<256x256xf32>
    %c2 = arith.constant 2 : index
    %c0_14 = arith.constant 0 : index
    %c0_15 = arith.constant 0 : index
    %c0_16 = arith.constant 0 : index
    %15 = vector.load %arg1[%c2, %c0_14, %c0_15, %c0_16] : memref<6x1x272x128xbf16, #tpu.memory_space<vmem>>, vector<1x1x256x128xbf16>
    %16 = vector.shape_cast %15 : vector<1x1x256x128xbf16> to vector<1x256x128xbf16>
    %17 = vector.shape_cast %16 : vector<1x256x128xbf16> to vector<256x128xbf16>
    %c2_17 = arith.constant 2 : index
    %c0_18 = arith.constant 0 : index
    %c0_19 = arith.constant 0 : index
    %18 = vector.load %arg2[%c2_17, %c0_18, %c0_19] : memref<9x128x256xbf16, #tpu.memory_space<vmem>>, vector<1x128x256xbf16>
    %19 = vector.shape_cast %18 : vector<1x128x256xbf16> to vector<128x256xbf16>
    %cst_20 = arith.constant dense<0.000000e+00> : vector<256x256xf32>
    %20 = tpu.matmul %17, %19, %cst_20 {dimension_numbers = #tpu.dot_dimension_numbers<[1], [0], [0], [1], [0, 0, 1, 1], [], []>} : vector<256x128xbf16>, vector<128x256xbf16>, vector<256x256xf32> -> vector<256x256xf32>
    %21 = arith.addf %14, %20 : vector<256x256xf32>
    %c3 = arith.constant 3 : index
    %c0_21 = arith.constant 0 : index
    %c0_22 = arith.constant 0 : index
    %c0_23 = arith.constant 0 : index
    %22 = vector.load %arg1[%c3, %c0_21, %c0_22, %c0_23] : memref<6x1x272x128xbf16, #tpu.memory_space<vmem>>, vector<1x1x256x128xbf16>
    %23 = vector.shape_cast %22 : vector<1x1x256x128xbf16> to vector<1x256x128xbf16>
    %24 = vector.shape_cast %23 : vector<1x256x128xbf16> to vector<256x128xbf16>
    %c3_24 = arith.constant 3 : index
    %c0_25 = arith.constant 0 : index
    %c0_26 = arith.constant 0 : index
    %25 = vector.load %arg2[%c3_24, %c0_25, %c0_26] : memref<9x128x256xbf16, #tpu.memory_space<vmem>>, vector<1x128x256xbf16>
    %26 = vector.shape_cast %25 : vector<1x128x256xbf16> to vector<128x256xbf16>
    %cst_27 = arith.constant dense<0.000000e+00> : vector<256x256xf32>
    %27 = tpu.matmul %24, %26, %cst_27 {dimension_numbers = #tpu.dot_dimension_numbers<[1], [0], [0], [1], [0, 0, 1, 1], [], []>} : vector<256x128xbf16>, vector<128x256xbf16>, vector<256x256xf32> -> vector<256x256xf32>
    %28 = arith.addf %21, %27 : vector<256x256xf32>
    %c4 = arith.constant 4 : index
    %c0_28 = arith.constant 0 : index
    %c0_29 = arith.constant 0 : index
    %c0_30 = arith.constant 0 : index
    %29 = vector.load %arg1[%c4, %c0_28, %c0_29, %c0_30] : memref<6x1x272x128xbf16, #tpu.memory_space<vmem>>, vector<1x1x256x128xbf16>
    %30 = vector.shape_cast %29 : vector<1x1x256x128xbf16> to vector<1x256x128xbf16>
    %31 = vector.shape_cast %30 : vector<1x256x128xbf16> to vector<256x128xbf16>
    %c4_31 = arith.constant 4 : index
    %c0_32 = arith.constant 0 : index
    %c0_33 = arith.constant 0 : index
    %32 = vector.load %arg2[%c4_31, %c0_32, %c0_33] : memref<9x128x256xbf16, #tpu.memory_space<vmem>>, vector<1x128x256xbf16>
    %33 = vector.shape_cast %32 : vector<1x128x256xbf16> to vector<128x256xbf16>
    %cst_34 = arith.constant dense<0.000000e+00> : vector<256x256xf32>
    %34 = tpu.matmul %31, %33, %cst_34 {dimension_numbers = #tpu.dot_dimension_numbers<[1], [0], [0], [1], [0, 0, 1, 1], [], []>} : vector<256x128xbf16>, vector<128x256xbf16>, vector<256x256xf32> -> vector<256x256xf32>
    %35 = arith.addf %28, %34 : vector<256x256xf32>
    %c5 = arith.constant 5 : index
    %c0_35 = arith.constant 0 : index
    %c0_36 = arith.constant 0 : index
    %c0_37 = arith.constant 0 : index
    %36 = vector.load %arg1[%c5, %c0_35, %c0_36, %c0_37] : memref<6x1x272x128xbf16, #tpu.memory_space<vmem>>, vector<1x1x256x128xbf16>
    %37 = vector.shape_cast %36 : vector<1x1x256x128xbf16> to vector<1x256x128xbf16>
    %38 = vector.shape_cast %37 : vector<1x256x128xbf16> to vector<256x128xbf16>
    %c5_38 = arith.constant 5 : index
    %c0_39 = arith.constant 0 : index
    %c0_40 = arith.constant 0 : index
    %39 = vector.load %arg2[%c5_38, %c0_39, %c0_40] : memref<9x128x256xbf16, #tpu.memory_space<vmem>>, vector<1x128x256xbf16>
    %40 = vector.shape_cast %39 : vector<1x128x256xbf16> to vector<128x256xbf16>
    %cst_41 = arith.constant dense<0.000000e+00> : vector<256x256xf32>
    %41 = tpu.matmul %38, %40, %cst_41 {dimension_numbers = #tpu.dot_dimension_numbers<[1], [0], [0], [1], [0, 0, 1, 1], [], []>} : vector<256x128xbf16>, vector<128x256xbf16>, vector<256x256xf32> -> vector<256x256xf32>
    %42 = arith.addf %35, %41 : vector<256x256xf32>
    %c0_42 = arith.constant 0 : index
    %c0_43 = arith.constant 0 : index
    %c16 = arith.constant 16 : index
    %c0_44 = arith.constant 0 : index
    %43 = vector.load %arg1[%c0_42, %c0_43, %c16, %c0_44] : memref<6x1x272x128xbf16, #tpu.memory_space<vmem>>, vector<1x1x256x128xbf16>
    %44 = vector.shape_cast %43 : vector<1x1x256x128xbf16> to vector<1x256x128xbf16>
    %45 = vector.shape_cast %44 : vector<1x256x128xbf16> to vector<256x128xbf16>
    %c6 = arith.constant 6 : index
    %c0_45 = arith.constant 0 : index
    %c0_46 = arith.constant 0 : index
    %46 = vector.load %arg2[%c6, %c0_45, %c0_46] : memref<9x128x256xbf16, #tpu.memory_space<vmem>>, vector<1x128x256xbf16>
    %47 = vector.shape_cast %46 : vector<1x128x256xbf16> to vector<128x256xbf16>
    %cst_47 = arith.constant dense<0.000000e+00> : vector<256x256xf32>
    %48 = tpu.matmul %45, %47, %cst_47 {dimension_numbers = #tpu.dot_dimension_numbers<[1], [0], [0], [1], [0, 0, 1, 1], [], []>} : vector<256x128xbf16>, vector<128x256xbf16>, vector<256x256xf32> -> vector<256x256xf32>
    %49 = arith.addf %42, %48 : vector<256x256xf32>
    %c1_48 = arith.constant 1 : index
    %c0_49 = arith.constant 0 : index
    %c16_50 = arith.constant 16 : index
    %c0_51 = arith.constant 0 : index
    %50 = vector.load %arg1[%c1_48, %c0_49, %c16_50, %c0_51] : memref<6x1x272x128xbf16, #tpu.memory_space<vmem>>, vector<1x1x256x128xbf16>
    %51 = vector.shape_cast %50 : vector<1x1x256x128xbf16> to vector<1x256x128xbf16>
    %52 = vector.shape_cast %51 : vector<1x256x128xbf16> to vector<256x128xbf16>
    %c7 = arith.constant 7 : index
    %c0_52 = arith.constant 0 : index
    %c0_53 = arith.constant 0 : index
    %53 = vector.load %arg2[%c7, %c0_52, %c0_53] : memref<9x128x256xbf16, #tpu.memory_space<vmem>>, vector<1x128x256xbf16>
    %54 = vector.shape_cast %53 : vector<1x128x256xbf16> to vector<128x256xbf16>
    %cst_54 = arith.constant dense<0.000000e+00> : vector<256x256xf32>
    %55 = tpu.matmul %52, %54, %cst_54 {dimension_numbers = #tpu.dot_dimension_numbers<[1], [0], [0], [1], [0, 0, 1, 1], [], []>} : vector<256x128xbf16>, vector<128x256xbf16>, vector<256x256xf32> -> vector<256x256xf32>
    %56 = arith.addf %49, %55 : vector<256x256xf32>
    %c2_55 = arith.constant 2 : index
    %c0_56 = arith.constant 0 : index
    %c16_57 = arith.constant 16 : index
    %c0_58 = arith.constant 0 : index
    %57 = vector.load %arg1[%c2_55, %c0_56, %c16_57, %c0_58] : memref<6x1x272x128xbf16, #tpu.memory_space<vmem>>, vector<1x1x256x128xbf16>
    %58 = vector.shape_cast %57 : vector<1x1x256x128xbf16> to vector<1x256x128xbf16>
    %59 = vector.shape_cast %58 : vector<1x256x128xbf16> to vector<256x128xbf16>
    %c8 = arith.constant 8 : index
    %c0_59 = arith.constant 0 : index
    %c0_60 = arith.constant 0 : index
    %60 = vector.load %arg2[%c8, %c0_59, %c0_60] : memref<9x128x256xbf16, #tpu.memory_space<vmem>>, vector<1x128x256xbf16>
    %61 = vector.shape_cast %60 : vector<1x128x256xbf16> to vector<128x256xbf16>
    %cst_61 = arith.constant dense<0.000000e+00> : vector<256x256xf32>
    %62 = tpu.matmul %59, %61, %cst_61 {dimension_numbers = #tpu.dot_dimension_numbers<[1], [0], [0], [1], [0, 0, 1, 1], [], []>} : vector<256x128xbf16>, vector<128x256xbf16>, vector<256x256xf32> -> vector<256x256xf32>
    %63 = arith.addf %56, %62 : vector<256x256xf32>
    %64 = arith.truncf %63 : vector<256x256xf32> to vector<256x256xbf16>
    %c0_62 = arith.constant 0 : index
    %c0_63 = arith.constant 0 : index
    %65 = vector.load %arg3[%c0_62, %c0_63] : memref<256x256xbf16, #tpu.memory_space<vmem>>, vector<256x256xbf16>
    tpu.vector_store %arg3[%c0_62, %c0_63], %64 {strides = array<i32>} : memref<256x256xbf16, #tpu.memory_space<vmem>>, vector<256x256xbf16>,
    %cst_64 = arith.constant dense<0.000000e+00> : vector<256xf32>
    %66 = vector.multi_reduction <add>, %63, %cst_64 [0] : vector<256x256xf32> to vector<256xf32>
    %67 = vector.shape_cast %66 : vector<256xf32> to vector<1x256xf32>
    %cst_65 = arith.constant 3.906250e-03 : f32
    %68 = vector.broadcast %cst_65 : f32 to vector<1x256xf32>
    %69 = arith.mulf %67, %68 : vector<1x256xf32>
    %70 = vector.broadcast %69 : vector<1x256xf32> to vector<256x256xf32>
    %71 = arith.subf %63, %70 : vector<256x256xf32>
    %72 = arith.mulf %71, %71 : vector<256x256xf32>
    %cst_66 = arith.constant dense<0.000000e+00> : vector<256xf32>
    %73 = vector.multi_reduction <add>, %72, %cst_66 [0] : vector<256x256xf32> to vector<256xf32>
    %74 = vector.shape_cast %73 : vector<256xf32> to vector<1x256xf32>
    %75 = tpu.concatenate %67, %74 in 0 : vector<1x256xf32>, vector<1x256xf32> -> vector<2x256xf32>
    %76 = vector.shape_cast %75 : vector<2x256xf32> to vector<1x2x256xf32>
    %c0_67 = arith.constant 0 : index
    %c0_68 = arith.constant 0 : index
    %c0_69 = arith.constant 0 : index
    %77 = vector.load %arg4[%c0_67, %c0_68, %c0_69] : memref<1x2x256xf32, #tpu.memory_space<vmem>>, vector<1x2x256xf32>
    tpu.vector_store %arg4[%c0_67, %c0_68, %c0_69], %76 {strides = array<i32>} : memref<1x2x256xf32, #tpu.memory_space<vmem>>, vector<1x2x256xf32>,
    return
  }
  func.func @transform_0(%arg0: i32) -> (i32, i32, i32, i32) {
    %c0_i32 = arith.constant 0 : i32
    %c0_i32_0 = arith.constant 0 : i32
    %c0_i32_1 = arith.constant 0 : i32
    %c0_i32_2 = arith.constant 0 : i32
    return %c0_i32, %arg0, %c0_i32_0, %c0_i32_1 : i32, i32, i32, i32
  }
  func.func @transform_1(%arg0: i32) -> (i32, i32, i32) {
    %c0_i32 = arith.constant 0 : i32
    %c0_i32_0 = arith.constant 0 : i32
    %c0_i32_1 = arith.constant 0 : i32
    %c0_i32_2 = arith.constant 0 : i32
    return %c0_i32, %c0_i32_0, %c0_i32_1 : i32, i32, i32
  }
  func.func @transform_2(%arg0: i32) -> (i32, i32) {
    %c0_i32 = arith.constant 0 : i32
    %c0_i32_0 = arith.constant 0 : i32
    return %arg0, %c0_i32 : i32, i32
  }
  func.func @transform_3(%arg0: i32) -> (i32, i32, i32) {
    %c0_i32 = arith.constant 0 : i32
    %c0_i32_0 = arith.constant 0 : i32
    %c0_i32_1 = arith.constant 0 : i32
    return %arg0, %c0_i32, %c0_i32_0 : i32, i32, i32
  }
}

module attributes {stable_mosaic.version = 11 : i64} {
  func.func @conv3x3s2_stats_kernel(%arg0: i32, %arg1: memref<6x1x72x256xbf16, #tpu.memory_space<vmem>>, %arg2: memref<9x256x256xbf16, #tpu.memory_space<vmem>>, %arg3: memref<64x256xbf16, #tpu.memory_space<vmem>>, %arg4: memref<1x2x256xf32, #tpu.memory_space<vmem>>) attributes {dimension_semantics = [#tpu.dimension_semantics<parallel>], iteration_bounds = array<i64: 2>, scalar_prefetch = 0 : i64, scratch_operands = 0 : i64, tpu.core_type = #tpu.core_type<tc>, window_params = [{transform_indices = @transform_0, window_bounds = array<i64: 6, 1, 72, 256>}, {pipeline_mode = #tpu.pipeline_mode<synchronous>, transform_indices = @transform_1, window_bounds = array<i64: 9, 256, 256>}, {transform_indices = @transform_2, window_bounds = array<i64: 64, 256>}, {transform_indices = @transform_3, window_bounds = array<i64: 1, 2, 256>}]} {
    %cst = arith.constant 0.000000e+00 : f32
    %0 = vector.broadcast %cst : f32 to vector<64x256xf32>
    %c0 = arith.constant 0 : index
    %c0_0 = arith.constant 0 : index
    %c0_1 = arith.constant 0 : index
    %c0_2 = arith.constant 0 : index
    %1 = vector.load %arg1[%c0, %c0_0, %c0_1, %c0_2] : memref<6x1x72x256xbf16, #tpu.memory_space<vmem>>, vector<1x1x64x256xbf16>
    %2 = vector.shape_cast %1 : vector<1x1x64x256xbf16> to vector<1x64x256xbf16>
    %3 = vector.shape_cast %2 : vector<1x64x256xbf16> to vector<64x256xbf16>
    %c0_3 = arith.constant 0 : index
    %c0_4 = arith.constant 0 : index
    %c0_5 = arith.constant 0 : index
    %4 = vector.load %arg2[%c0_3, %c0_4, %c0_5] : memref<9x256x256xbf16, #tpu.memory_space<vmem>>, vector<1x256x256xbf16>
    %5 = vector.shape_cast %4 : vector<1x256x256xbf16> to vector<256x256xbf16>
    %cst_6 = arith.constant dense<0.000000e+00> : vector<64x256xf32>
    %6 = tpu.matmul %3, %5, %cst_6 {dimension_numbers = #tpu.dot_dimension_numbers<[1], [0], [0], [1], [0, 0, 1, 1], [], []>} : vector<64x256xbf16>, vector<256x256xbf16>, vector<64x256xf32> -> vector<64x256xf32>
    %7 = arith.addf %0, %6 : vector<64x256xf32>
    %c1 = arith.constant 1 : index
    %c0_7 = arith.constant 0 : index
    %c0_8 = arith.constant 0 : index
    %c0_9 = arith.constant 0 : index
    %8 = vector.load %arg1[%c1, %c0_7, %c0_8, %c0_9] : memref<6x1x72x256xbf16, #tpu.memory_space<vmem>>, vector<1x1x64x256xbf16>
    %9 = vector.shape_cast %8 : vector<1x1x64x256xbf16> to vector<1x64x256xbf16>
    %10 = vector.shape_cast %9 : vector<1x64x256xbf16> to vector<64x256xbf16>
    %c1_10 = arith.constant 1 : index
    %c0_11 = arith.constant 0 : index
    %c0_12 = arith.constant 0 : index
    %11 = vector.load %arg2[%c1_10, %c0_11, %c0_12] : memref<9x256x256xbf16, #tpu.memory_space<vmem>>, vector<1x256x256xbf16>
    %12 = vector.shape_cast %11 : vector<1x256x256xbf16> to vector<256x256xbf16>
    %cst_13 = arith.constant dense<0.000000e+00> : vector<64x256xf32>
    %13 = tpu.matmul %10, %12, %cst_13 {dimension_numbers = #tpu.dot_dimension_numbers<[1], [0], [0], [1], [0, 0, 1, 1], [], []>} : vector<64x256xbf16>, vector<256x256xbf16>, vector<64x256xf32> -> vector<64x256xf32>
    %14 = arith.addf %7, %13 : vector<64x256xf32>
    %c2 = arith.constant 2 : index
    %c0_14 = arith.constant 0 : index
    %c0_15 = arith.constant 0 : index
    %c0_16 = arith.constant 0 : index
    %15 = vector.load %arg1[%c2, %c0_14, %c0_15, %c0_16] : memref<6x1x72x256xbf16, #tpu.memory_space<vmem>>, vector<1x1x64x256xbf16>
    %16 = vector.shape_cast %15 : vector<1x1x64x256xbf16> to vector<1x64x256xbf16>
    %17 = vector.shape_cast %16 : vector<1x64x256xbf16> to vector<64x256xbf16>
    %c2_17 = arith.constant 2 : index
    %c0_18 = arith.constant 0 : index
    %c0_19 = arith.constant 0 : index
    %18 = vector.load %arg2[%c2_17, %c0_18, %c0_19] : memref<9x256x256xbf16, #tpu.memory_space<vmem>>, vector<1x256x256xbf16>
    %19 = vector.shape_cast %18 : vector<1x256x256xbf16> to vector<256x256xbf16>
    %cst_20 = arith.constant dense<0.000000e+00> : vector<64x256xf32>
    %20 = tpu.matmul %17, %19, %cst_20 {dimension_numbers = #tpu.dot_dimension_numbers<[1], [0], [0], [1], [0, 0, 1, 1], [], []>} : vector<64x256xbf16>, vector<256x256xbf16>, vector<64x256xf32> -> vector<64x256xf32>
    %21 = arith.addf %14, %20 : vector<64x256xf32>
    %c3 = arith.constant 3 : index
    %c0_21 = arith.constant 0 : index
    %c0_22 = arith.constant 0 : index
    %c0_23 = arith.constant 0 : index
    %22 = vector.load %arg1[%c3, %c0_21, %c0_22, %c0_23] : memref<6x1x72x256xbf16, #tpu.memory_space<vmem>>, vector<1x1x64x256xbf16>
    %23 = vector.shape_cast %22 : vector<1x1x64x256xbf16> to vector<1x64x256xbf16>
    %24 = vector.shape_cast %23 : vector<1x64x256xbf16> to vector<64x256xbf16>
    %c3_24 = arith.constant 3 : index
    %c0_25 = arith.constant 0 : index
    %c0_26 = arith.constant 0 : index
    %25 = vector.load %arg2[%c3_24, %c0_25, %c0_26] : memref<9x256x256xbf16, #tpu.memory_space<vmem>>, vector<1x256x256xbf16>
    %26 = vector.shape_cast %25 : vector<1x256x256xbf16> to vector<256x256xbf16>
    %cst_27 = arith.constant dense<0.000000e+00> : vector<64x256xf32>
    %27 = tpu.matmul %24, %26, %cst_27 {dimension_numbers = #tpu.dot_dimension_numbers<[1], [0], [0], [1], [0, 0, 1, 1], [], []>} : vector<64x256xbf16>, vector<256x256xbf16>, vector<64x256xf32> -> vector<64x256xf32>
    %28 = arith.addf %21, %27 : vector<64x256xf32>
    %c4 = arith.constant 4 : index
    %c0_28 = arith.constant 0 : index
    %c0_29 = arith.constant 0 : index
    %c0_30 = arith.constant 0 : index
    %29 = vector.load %arg1[%c4, %c0_28, %c0_29, %c0_30] : memref<6x1x72x256xbf16, #tpu.memory_space<vmem>>, vector<1x1x64x256xbf16>
    %30 = vector.shape_cast %29 : vector<1x1x64x256xbf16> to vector<1x64x256xbf16>
    %31 = vector.shape_cast %30 : vector<1x64x256xbf16> to vector<64x256xbf16>
    %c4_31 = arith.constant 4 : index
    %c0_32 = arith.constant 0 : index
    %c0_33 = arith.constant 0 : index
    %32 = vector.load %arg2[%c4_31, %c0_32, %c0_33] : memref<9x256x256xbf16, #tpu.memory_space<vmem>>, vector<1x256x256xbf16>
    %33 = vector.shape_cast %32 : vector<1x256x256xbf16> to vector<256x256xbf16>
    %cst_34 = arith.constant dense<0.000000e+00> : vector<64x256xf32>
    %34 = tpu.matmul %31, %33, %cst_34 {dimension_numbers = #tpu.dot_dimension_numbers<[1], [0], [0], [1], [0, 0, 1, 1], [], []>} : vector<64x256xbf16>, vector<256x256xbf16>, vector<64x256xf32> -> vector<64x256xf32>
    %35 = arith.addf %28, %34 : vector<64x256xf32>
    %c5 = arith.constant 5 : index
    %c0_35 = arith.constant 0 : index
    %c0_36 = arith.constant 0 : index
    %c0_37 = arith.constant 0 : index
    %36 = vector.load %arg1[%c5, %c0_35, %c0_36, %c0_37] : memref<6x1x72x256xbf16, #tpu.memory_space<vmem>>, vector<1x1x64x256xbf16>
    %37 = vector.shape_cast %36 : vector<1x1x64x256xbf16> to vector<1x64x256xbf16>
    %38 = vector.shape_cast %37 : vector<1x64x256xbf16> to vector<64x256xbf16>
    %c5_38 = arith.constant 5 : index
    %c0_39 = arith.constant 0 : index
    %c0_40 = arith.constant 0 : index
    %39 = vector.load %arg2[%c5_38, %c0_39, %c0_40] : memref<9x256x256xbf16, #tpu.memory_space<vmem>>, vector<1x256x256xbf16>
    %40 = vector.shape_cast %39 : vector<1x256x256xbf16> to vector<256x256xbf16>
    %cst_41 = arith.constant dense<0.000000e+00> : vector<64x256xf32>
    %41 = tpu.matmul %38, %40, %cst_41 {dimension_numbers = #tpu.dot_dimension_numbers<[1], [0], [0], [1], [0, 0, 1, 1], [], []>} : vector<64x256xbf16>, vector<256x256xbf16>, vector<64x256xf32> -> vector<64x256xf32>
    %42 = arith.addf %35, %41 : vector<64x256xf32>
    %c0_42 = arith.constant 0 : index
    %c0_43 = arith.constant 0 : index
    %c8 = arith.constant 8 : index
    %c0_44 = arith.constant 0 : index
    %43 = vector.load %arg1[%c0_42, %c0_43, %c8, %c0_44] : memref<6x1x72x256xbf16, #tpu.memory_space<vmem>>, vector<1x1x64x256xbf16>
    %44 = vector.shape_cast %43 : vector<1x1x64x256xbf16> to vector<1x64x256xbf16>
    %45 = vector.shape_cast %44 : vector<1x64x256xbf16> to vector<64x256xbf16>
    %c6 = arith.constant 6 : index
    %c0_45 = arith.constant 0 : index
    %c0_46 = arith.constant 0 : index
    %46 = vector.load %arg2[%c6, %c0_45, %c0_46] : memref<9x256x256xbf16, #tpu.memory_space<vmem>>, vector<1x256x256xbf16>
    %47 = vector.shape_cast %46 : vector<1x256x256xbf16> to vector<256x256xbf16>
    %cst_47 = arith.constant dense<0.000000e+00> : vector<64x256xf32>
    %48 = tpu.matmul %45, %47, %cst_47 {dimension_numbers = #tpu.dot_dimension_numbers<[1], [0], [0], [1], [0, 0, 1, 1], [], []>} : vector<64x256xbf16>, vector<256x256xbf16>, vector<64x256xf32> -> vector<64x256xf32>
    %49 = arith.addf %42, %48 : vector<64x256xf32>
    %c1_48 = arith.constant 1 : index
    %c0_49 = arith.constant 0 : index
    %c8_50 = arith.constant 8 : index
    %c0_51 = arith.constant 0 : index
    %50 = vector.load %arg1[%c1_48, %c0_49, %c8_50, %c0_51] : memref<6x1x72x256xbf16, #tpu.memory_space<vmem>>, vector<1x1x64x256xbf16>
    %51 = vector.shape_cast %50 : vector<1x1x64x256xbf16> to vector<1x64x256xbf16>
    %52 = vector.shape_cast %51 : vector<1x64x256xbf16> to vector<64x256xbf16>
    %c7 = arith.constant 7 : index
    %c0_52 = arith.constant 0 : index
    %c0_53 = arith.constant 0 : index
    %53 = vector.load %arg2[%c7, %c0_52, %c0_53] : memref<9x256x256xbf16, #tpu.memory_space<vmem>>, vector<1x256x256xbf16>
    %54 = vector.shape_cast %53 : vector<1x256x256xbf16> to vector<256x256xbf16>
    %cst_54 = arith.constant dense<0.000000e+00> : vector<64x256xf32>
    %55 = tpu.matmul %52, %54, %cst_54 {dimension_numbers = #tpu.dot_dimension_numbers<[1], [0], [0], [1], [0, 0, 1, 1], [], []>} : vector<64x256xbf16>, vector<256x256xbf16>, vector<64x256xf32> -> vector<64x256xf32>
    %56 = arith.addf %49, %55 : vector<64x256xf32>
    %c2_55 = arith.constant 2 : index
    %c0_56 = arith.constant 0 : index
    %c8_57 = arith.constant 8 : index
    %c0_58 = arith.constant 0 : index
    %57 = vector.load %arg1[%c2_55, %c0_56, %c8_57, %c0_58] : memref<6x1x72x256xbf16, #tpu.memory_space<vmem>>, vector<1x1x64x256xbf16>
    %58 = vector.shape_cast %57 : vector<1x1x64x256xbf16> to vector<1x64x256xbf16>
    %59 = vector.shape_cast %58 : vector<1x64x256xbf16> to vector<64x256xbf16>
    %c8_59 = arith.constant 8 : index
    %c0_60 = arith.constant 0 : index
    %c0_61 = arith.constant 0 : index
    %60 = vector.load %arg2[%c8_59, %c0_60, %c0_61] : memref<9x256x256xbf16, #tpu.memory_space<vmem>>, vector<1x256x256xbf16>
    %61 = vector.shape_cast %60 : vector<1x256x256xbf16> to vector<256x256xbf16>
    %cst_62 = arith.constant dense<0.000000e+00> : vector<64x256xf32>
    %62 = tpu.matmul %59, %61, %cst_62 {dimension_numbers = #tpu.dot_dimension_numbers<[1], [0], [0], [1], [0, 0, 1, 1], [], []>} : vector<64x256xbf16>, vector<256x256xbf16>, vector<64x256xf32> -> vector<64x256xf32>
    %63 = arith.addf %56, %62 : vector<64x256xf32>
    %64 = arith.truncf %63 : vector<64x256xf32> to vector<64x256xbf16>
    %c0_63 = arith.constant 0 : index
    %c0_64 = arith.constant 0 : index
    %65 = vector.load %arg3[%c0_63, %c0_64] : memref<64x256xbf16, #tpu.memory_space<vmem>>, vector<64x256xbf16>
    tpu.vector_store %arg3[%c0_63, %c0_64], %64 {strides = array<i32>} : memref<64x256xbf16, #tpu.memory_space<vmem>>, vector<64x256xbf16>,
    %cst_65 = arith.constant dense<0.000000e+00> : vector<256xf32>
    %66 = vector.multi_reduction <add>, %63, %cst_65 [0] : vector<64x256xf32> to vector<256xf32>
    %67 = vector.shape_cast %66 : vector<256xf32> to vector<1x256xf32>
    %cst_66 = arith.constant 1.562500e-02 : f32
    %68 = vector.broadcast %cst_66 : f32 to vector<1x256xf32>
    %69 = arith.mulf %67, %68 : vector<1x256xf32>
    %70 = vector.broadcast %69 : vector<1x256xf32> to vector<64x256xf32>
    %71 = arith.subf %63, %70 : vector<64x256xf32>
    %72 = arith.mulf %71, %71 : vector<64x256xf32>
    %cst_67 = arith.constant dense<0.000000e+00> : vector<256xf32>
    %73 = vector.multi_reduction <add>, %72, %cst_67 [0] : vector<64x256xf32> to vector<256xf32>
    %74 = vector.shape_cast %73 : vector<256xf32> to vector<1x256xf32>
    %75 = tpu.concatenate %67, %74 in 0 : vector<1x256xf32>, vector<1x256xf32> -> vector<2x256xf32>
    %76 = vector.shape_cast %75 : vector<2x256xf32> to vector<1x2x256xf32>
    %c0_68 = arith.constant 0 : index
    %c0_69 = arith.constant 0 : index
    %c0_70 = arith.constant 0 : index
    %77 = vector.load %arg4[%c0_68, %c0_69, %c0_70] : memref<1x2x256xf32, #tpu.memory_space<vmem>>, vector<1x2x256xf32>
    tpu.vector_store %arg4[%c0_68, %c0_69, %c0_70], %76 {strides = array<i32>} : memref<1x2x256xf32, #tpu.memory_space<vmem>>, vector<1x2x256xf32>,
    return
  }
  func.func @transform_0(%arg0: i32) -> (i32, i32, i32, i32) {
    %c0_i32 = arith.constant 0 : i32
    %c0_i32_0 = arith.constant 0 : i32
    %c0_i32_1 = arith.constant 0 : i32
    %c0_i32_2 = arith.constant 0 : i32
    return %c0_i32, %arg0, %c0_i32_0, %c0_i32_1 : i32, i32, i32, i32
  }
  func.func @transform_1(%arg0: i32) -> (i32, i32, i32) {
    %c0_i32 = arith.constant 0 : i32
    %c0_i32_0 = arith.constant 0 : i32
    %c0_i32_1 = arith.constant 0 : i32
    %c0_i32_2 = arith.constant 0 : i32
    return %c0_i32, %c0_i32_0, %c0_i32_1 : i32, i32, i32
  }
  func.func @transform_2(%arg0: i32) -> (i32, i32) {
    %c0_i32 = arith.constant 0 : i32
    %c0_i32_0 = arith.constant 0 : i32
    return %arg0, %c0_i32 : i32, i32
  }
  func.func @transform_3(%arg0: i32) -> (i32, i32, i32) {
    %c0_i32 = arith.constant 0 : i32
    %c0_i32_0 = arith.constant 0 : i32
    %c0_i32_1 = arith.constant 0 : i32
    return %arg0, %c0_i32, %c0_i32_0 : i32, i32, i32
  }
}

module attributes {stable_mosaic.version = 11 : i64} {
  func.func @conv3x3s2_stats_kernel(%arg0: i32, %arg1: memref<6x1x20x256xbf16, #tpu.memory_space<vmem>>, %arg2: memref<9x256x512xbf16, #tpu.memory_space<vmem>>, %arg3: memref<16x512xbf16, #tpu.memory_space<vmem>>, %arg4: memref<1x2x512xf32, #tpu.memory_space<vmem>>) attributes {dimension_semantics = [#tpu.dimension_semantics<parallel>], iteration_bounds = array<i64: 2>, scalar_prefetch = 0 : i64, scratch_operands = 0 : i64, tpu.core_type = #tpu.core_type<tc>, window_params = [{transform_indices = @transform_0, window_bounds = array<i64: 6, 1, 20, 256>}, {pipeline_mode = #tpu.pipeline_mode<synchronous>, transform_indices = @transform_1, window_bounds = array<i64: 9, 256, 512>}, {transform_indices = @transform_2, window_bounds = array<i64: 16, 512>}, {transform_indices = @transform_3, window_bounds = array<i64: 1, 2, 512>}]} {
    %cst = arith.constant 0.000000e+00 : f32
    %0 = vector.broadcast %cst : f32 to vector<16x512xf32>
    %c0 = arith.constant 0 : index
    %c0_0 = arith.constant 0 : index
    %c0_1 = arith.constant 0 : index
    %c0_2 = arith.constant 0 : index
    %1 = vector.load %arg1[%c0, %c0_0, %c0_1, %c0_2] : memref<6x1x20x256xbf16, #tpu.memory_space<vmem>>, vector<1x1x16x256xbf16>
    %2 = vector.shape_cast %1 : vector<1x1x16x256xbf16> to vector<1x16x256xbf16>
    %3 = vector.shape_cast %2 : vector<1x16x256xbf16> to vector<16x256xbf16>
    %c0_3 = arith.constant 0 : index
    %c0_4 = arith.constant 0 : index
    %c0_5 = arith.constant 0 : index
    %4 = vector.load %arg2[%c0_3, %c0_4, %c0_5] : memref<9x256x512xbf16, #tpu.memory_space<vmem>>, vector<1x256x512xbf16>
    %5 = vector.shape_cast %4 : vector<1x256x512xbf16> to vector<256x512xbf16>
    %cst_6 = arith.constant dense<0.000000e+00> : vector<16x512xf32>
    %6 = tpu.matmul %3, %5, %cst_6 {dimension_numbers = #tpu.dot_dimension_numbers<[1], [0], [0], [1], [0, 0, 1, 1], [], []>} : vector<16x256xbf16>, vector<256x512xbf16>, vector<16x512xf32> -> vector<16x512xf32>
    %7 = arith.addf %0, %6 : vector<16x512xf32>
    %c1 = arith.constant 1 : index
    %c0_7 = arith.constant 0 : index
    %c0_8 = arith.constant 0 : index
    %c0_9 = arith.constant 0 : index
    %8 = vector.load %arg1[%c1, %c0_7, %c0_8, %c0_9] : memref<6x1x20x256xbf16, #tpu.memory_space<vmem>>, vector<1x1x16x256xbf16>
    %9 = vector.shape_cast %8 : vector<1x1x16x256xbf16> to vector<1x16x256xbf16>
    %10 = vector.shape_cast %9 : vector<1x16x256xbf16> to vector<16x256xbf16>
    %c1_10 = arith.constant 1 : index
    %c0_11 = arith.constant 0 : index
    %c0_12 = arith.constant 0 : index
    %11 = vector.load %arg2[%c1_10, %c0_11, %c0_12] : memref<9x256x512xbf16, #tpu.memory_space<vmem>>, vector<1x256x512xbf16>
    %12 = vector.shape_cast %11 : vector<1x256x512xbf16> to vector<256x512xbf16>
    %cst_13 = arith.constant dense<0.000000e+00> : vector<16x512xf32>
    %13 = tpu.matmul %10, %12, %cst_13 {dimension_numbers = #tpu.dot_dimension_numbers<[1], [0], [0], [1], [0, 0, 1, 1], [], []>} : vector<16x256xbf16>, vector<256x512xbf16>, vector<16x512xf32> -> vector<16x512xf32>
    %14 = arith.addf %7, %13 : vector<16x512xf32>
    %c2 = arith.constant 2 : index
    %c0_14 = arith.constant 0 : index
    %c0_15 = arith.constant 0 : index
    %c0_16 = arith.constant 0 : index
    %15 = vector.load %arg1[%c2, %c0_14, %c0_15, %c0_16] : memref<6x1x20x256xbf16, #tpu.memory_space<vmem>>, vector<1x1x16x256xbf16>
    %16 = vector.shape_cast %15 : vector<1x1x16x256xbf16> to vector<1x16x256xbf16>
    %17 = vector.shape_cast %16 : vector<1x16x256xbf16> to vector<16x256xbf16>
    %c2_17 = arith.constant 2 : index
    %c0_18 = arith.constant 0 : index
    %c0_19 = arith.constant 0 : index
    %18 = vector.load %arg2[%c2_17, %c0_18, %c0_19] : memref<9x256x512xbf16, #tpu.memory_space<vmem>>, vector<1x256x512xbf16>
    %19 = vector.shape_cast %18 : vector<1x256x512xbf16> to vector<256x512xbf16>
    %cst_20 = arith.constant dense<0.000000e+00> : vector<16x512xf32>
    %20 = tpu.matmul %17, %19, %cst_20 {dimension_numbers = #tpu.dot_dimension_numbers<[1], [0], [0], [1], [0, 0, 1, 1], [], []>} : vector<16x256xbf16>, vector<256x512xbf16>, vector<16x512xf32> -> vector<16x512xf32>
    %21 = arith.addf %14, %20 : vector<16x512xf32>
    %c3 = arith.constant 3 : index
    %c0_21 = arith.constant 0 : index
    %c0_22 = arith.constant 0 : index
    %c0_23 = arith.constant 0 : index
    %22 = vector.load %arg1[%c3, %c0_21, %c0_22, %c0_23] : memref<6x1x20x256xbf16, #tpu.memory_space<vmem>>, vector<1x1x16x256xbf16>
    %23 = vector.shape_cast %22 : vector<1x1x16x256xbf16> to vector<1x16x256xbf16>
    %24 = vector.shape_cast %23 : vector<1x16x256xbf16> to vector<16x256xbf16>
    %c3_24 = arith.constant 3 : index
    %c0_25 = arith.constant 0 : index
    %c0_26 = arith.constant 0 : index
    %25 = vector.load %arg2[%c3_24, %c0_25, %c0_26] : memref<9x256x512xbf16, #tpu.memory_space<vmem>>, vector<1x256x512xbf16>
    %26 = vector.shape_cast %25 : vector<1x256x512xbf16> to vector<256x512xbf16>
    %cst_27 = arith.constant dense<0.000000e+00> : vector<16x512xf32>
    %27 = tpu.matmul %24, %26, %cst_27 {dimension_numbers = #tpu.dot_dimension_numbers<[1], [0], [0], [1], [0, 0, 1, 1], [], []>} : vector<16x256xbf16>, vector<256x512xbf16>, vector<16x512xf32> -> vector<16x512xf32>
    %28 = arith.addf %21, %27 : vector<16x512xf32>
    %c4 = arith.constant 4 : index
    %c0_28 = arith.constant 0 : index
    %c0_29 = arith.constant 0 : index
    %c0_30 = arith.constant 0 : index
    %29 = vector.load %arg1[%c4, %c0_28, %c0_29, %c0_30] : memref<6x1x20x256xbf16, #tpu.memory_space<vmem>>, vector<1x1x16x256xbf16>
    %30 = vector.shape_cast %29 : vector<1x1x16x256xbf16> to vector<1x16x256xbf16>
    %31 = vector.shape_cast %30 : vector<1x16x256xbf16> to vector<16x256xbf16>
    %c4_31 = arith.constant 4 : index
    %c0_32 = arith.constant 0 : index
    %c0_33 = arith.constant 0 : index
    %32 = vector.load %arg2[%c4_31, %c0_32, %c0_33] : memref<9x256x512xbf16, #tpu.memory_space<vmem>>, vector<1x256x512xbf16>
    %33 = vector.shape_cast %32 : vector<1x256x512xbf16> to vector<256x512xbf16>
    %cst_34 = arith.constant dense<0.000000e+00> : vector<16x512xf32>
    %34 = tpu.matmul %31, %33, %cst_34 {dimension_numbers = #tpu.dot_dimension_numbers<[1], [0], [0], [1], [0, 0, 1, 1], [], []>} : vector<16x256xbf16>, vector<256x512xbf16>, vector<16x512xf32> -> vector<16x512xf32>
    %35 = arith.addf %28, %34 : vector<16x512xf32>
    %c5 = arith.constant 5 : index
    %c0_35 = arith.constant 0 : index
    %c0_36 = arith.constant 0 : index
    %c0_37 = arith.constant 0 : index
    %36 = vector.load %arg1[%c5, %c0_35, %c0_36, %c0_37] : memref<6x1x20x256xbf16, #tpu.memory_space<vmem>>, vector<1x1x16x256xbf16>
    %37 = vector.shape_cast %36 : vector<1x1x16x256xbf16> to vector<1x16x256xbf16>
    %38 = vector.shape_cast %37 : vector<1x16x256xbf16> to vector<16x256xbf16>
    %c5_38 = arith.constant 5 : index
    %c0_39 = arith.constant 0 : index
    %c0_40 = arith.constant 0 : index
    %39 = vector.load %arg2[%c5_38, %c0_39, %c0_40] : memref<9x256x512xbf16, #tpu.memory_space<vmem>>, vector<1x256x512xbf16>
    %40 = vector.shape_cast %39 : vector<1x256x512xbf16> to vector<256x512xbf16>
    %cst_41 = arith.constant dense<0.000000e+00> : vector<16x512xf32>
    %41 = tpu.matmul %38, %40, %cst_41 {dimension_numbers = #tpu.dot_dimension_numbers<[1], [0], [0], [1], [0, 0, 1, 1], [], []>} : vector<16x256xbf16>, vector<256x512xbf16>, vector<16x512xf32> -> vector<16x512xf32>
    %42 = arith.addf %35, %41 : vector<16x512xf32>
    %c0_42 = arith.constant 0 : index
    %c0_43 = arith.constant 0 : index
    %c4_44 = arith.constant 4 : index
    %c0_45 = arith.constant 0 : index
    %43 = vector.load %arg1[%c0_42, %c0_43, %c4_44, %c0_45] : memref<6x1x20x256xbf16, #tpu.memory_space<vmem>>, vector<1x1x16x256xbf16>
    %44 = vector.shape_cast %43 : vector<1x1x16x256xbf16> to vector<1x16x256xbf16>
    %45 = vector.shape_cast %44 : vector<1x16x256xbf16> to vector<16x256xbf16>
    %c6 = arith.constant 6 : index
    %c0_46 = arith.constant 0 : index
    %c0_47 = arith.constant 0 : index
    %46 = vector.load %arg2[%c6, %c0_46, %c0_47] : memref<9x256x512xbf16, #tpu.memory_space<vmem>>, vector<1x256x512xbf16>
    %47 = vector.shape_cast %46 : vector<1x256x512xbf16> to vector<256x512xbf16>
    %cst_48 = arith.constant dense<0.000000e+00> : vector<16x512xf32>
    %48 = tpu.matmul %45, %47, %cst_48 {dimension_numbers = #tpu.dot_dimension_numbers<[1], [0], [0], [1], [0, 0, 1, 1], [], []>} : vector<16x256xbf16>, vector<256x512xbf16>, vector<16x512xf32> -> vector<16x512xf32>
    %49 = arith.addf %42, %48 : vector<16x512xf32>
    %c1_49 = arith.constant 1 : index
    %c0_50 = arith.constant 0 : index
    %c4_51 = arith.constant 4 : index
    %c0_52 = arith.constant 0 : index
    %50 = vector.load %arg1[%c1_49, %c0_50, %c4_51, %c0_52] : memref<6x1x20x256xbf16, #tpu.memory_space<vmem>>, vector<1x1x16x256xbf16>
    %51 = vector.shape_cast %50 : vector<1x1x16x256xbf16> to vector<1x16x256xbf16>
    %52 = vector.shape_cast %51 : vector<1x16x256xbf16> to vector<16x256xbf16>
    %c7 = arith.constant 7 : index
    %c0_53 = arith.constant 0 : index
    %c0_54 = arith.constant 0 : index
    %53 = vector.load %arg2[%c7, %c0_53, %c0_54] : memref<9x256x512xbf16, #tpu.memory_space<vmem>>, vector<1x256x512xbf16>
    %54 = vector.shape_cast %53 : vector<1x256x512xbf16> to vector<256x512xbf16>
    %cst_55 = arith.constant dense<0.000000e+00> : vector<16x512xf32>
    %55 = tpu.matmul %52, %54, %cst_55 {dimension_numbers = #tpu.dot_dimension_numbers<[1], [0], [0], [1], [0, 0, 1, 1], [], []>} : vector<16x256xbf16>, vector<256x512xbf16>, vector<16x512xf32> -> vector<16x512xf32>
    %56 = arith.addf %49, %55 : vector<16x512xf32>
    %c2_56 = arith.constant 2 : index
    %c0_57 = arith.constant 0 : index
    %c4_58 = arith.constant 4 : index
    %c0_59 = arith.constant 0 : index
    %57 = vector.load %arg1[%c2_56, %c0_57, %c4_58, %c0_59] : memref<6x1x20x256xbf16, #tpu.memory_space<vmem>>, vector<1x1x16x256xbf16>
    %58 = vector.shape_cast %57 : vector<1x1x16x256xbf16> to vector<1x16x256xbf16>
    %59 = vector.shape_cast %58 : vector<1x16x256xbf16> to vector<16x256xbf16>
    %c8 = arith.constant 8 : index
    %c0_60 = arith.constant 0 : index
    %c0_61 = arith.constant 0 : index
    %60 = vector.load %arg2[%c8, %c0_60, %c0_61] : memref<9x256x512xbf16, #tpu.memory_space<vmem>>, vector<1x256x512xbf16>
    %61 = vector.shape_cast %60 : vector<1x256x512xbf16> to vector<256x512xbf16>
    %cst_62 = arith.constant dense<0.000000e+00> : vector<16x512xf32>
    %62 = tpu.matmul %59, %61, %cst_62 {dimension_numbers = #tpu.dot_dimension_numbers<[1], [0], [0], [1], [0, 0, 1, 1], [], []>} : vector<16x256xbf16>, vector<256x512xbf16>, vector<16x512xf32> -> vector<16x512xf32>
    %63 = arith.addf %56, %62 : vector<16x512xf32>
    %64 = arith.truncf %63 : vector<16x512xf32> to vector<16x512xbf16>
    %c0_63 = arith.constant 0 : index
    %c0_64 = arith.constant 0 : index
    %65 = vector.load %arg3[%c0_63, %c0_64] : memref<16x512xbf16, #tpu.memory_space<vmem>>, vector<16x512xbf16>
    tpu.vector_store %arg3[%c0_63, %c0_64], %64 {strides = array<i32>} : memref<16x512xbf16, #tpu.memory_space<vmem>>, vector<16x512xbf16>,
    %cst_65 = arith.constant dense<0.000000e+00> : vector<512xf32>
    %66 = vector.multi_reduction <add>, %63, %cst_65 [0] : vector<16x512xf32> to vector<512xf32>
    %67 = vector.shape_cast %66 : vector<512xf32> to vector<1x512xf32>
    %cst_66 = arith.constant 6.250000e-02 : f32
    %68 = vector.broadcast %cst_66 : f32 to vector<1x512xf32>
    %69 = arith.mulf %67, %68 : vector<1x512xf32>
    %70 = vector.broadcast %69 : vector<1x512xf32> to vector<16x512xf32>
    %71 = arith.subf %63, %70 : vector<16x512xf32>
    %72 = arith.mulf %71, %71 : vector<16x512xf32>
    %cst_67 = arith.constant dense<0.000000e+00> : vector<512xf32>
    %73 = vector.multi_reduction <add>, %72, %cst_67 [0] : vector<16x512xf32> to vector<512xf32>
    %74 = vector.shape_cast %73 : vector<512xf32> to vector<1x512xf32>
    %75 = tpu.concatenate %67, %74 in 0 : vector<1x512xf32>, vector<1x512xf32> -> vector<2x512xf32>
    %76 = vector.shape_cast %75 : vector<2x512xf32> to vector<1x2x512xf32>
    %c0_68 = arith.constant 0 : index
    %c0_69 = arith.constant 0 : index
    %c0_70 = arith.constant 0 : index
    %77 = vector.load %arg4[%c0_68, %c0_69, %c0_70] : memref<1x2x512xf32, #tpu.memory_space<vmem>>, vector<1x2x512xf32>
    tpu.vector_store %arg4[%c0_68, %c0_69, %c0_70], %76 {strides = array<i32>} : memref<1x2x512xf32, #tpu.memory_space<vmem>>, vector<1x2x512xf32>,
    return
  }
  func.func @transform_0(%arg0: i32) -> (i32, i32, i32, i32) {
    %c0_i32 = arith.constant 0 : i32
    %c0_i32_0 = arith.constant 0 : i32
    %c0_i32_1 = arith.constant 0 : i32
    %c0_i32_2 = arith.constant 0 : i32
    return %c0_i32, %arg0, %c0_i32_0, %c0_i32_1 : i32, i32, i32, i32
  }
  func.func @transform_1(%arg0: i32) -> (i32, i32, i32) {
    %c0_i32 = arith.constant 0 : i32
    %c0_i32_0 = arith.constant 0 : i32
    %c0_i32_1 = arith.constant 0 : i32
    %c0_i32_2 = arith.constant 0 : i32
    return %c0_i32, %c0_i32_0, %c0_i32_1 : i32, i32, i32
  }
  func.func @transform_2(%arg0: i32) -> (i32, i32) {
    %c0_i32 = arith.constant 0 : i32
    %c0_i32_0 = arith.constant 0 : i32
    return %arg0, %c0_i32 : i32, i32
  }
  func.func @transform_3(%arg0: i32) -> (i32, i32, i32) {
    %c0_i32 = arith.constant 0 : i32
    %c0_i32_0 = arith.constant 0 : i32
    %c0_i32_1 = arith.constant 0 : i32
    return %arg0, %c0_i32, %c0_i32_0 : i32, i32, i32
  }
}

module attributes {stable_mosaic.version = 11 : i64} {
  func.func @bn_act_pool_fc_kernel(%arg0: i32, %arg1: memref<32x512xbf16, #tpu.memory_space<vmem>>, %arg2: memref<1x512xf32, #tpu.memory_space<vmem>>, %arg3: memref<1x512xf32, #tpu.memory_space<vmem>>, %arg4: memref<512x128xbf16, #tpu.memory_space<vmem>>, %arg5: memref<1x128xf32, #tpu.memory_space<vmem>>, %arg6: memref<2x128xf32, #tpu.memory_space<vmem>>) attributes {dimension_semantics = [#tpu.dimension_semantics<parallel>], iteration_bounds = array<i64: 1>, scalar_prefetch = 0 : i64, scratch_operands = 0 : i64, tpu.core_type = #tpu.core_type<tc>, window_params = [{transform_indices = @transform_0, window_bounds = array<i64: 32, 512>}, {pipeline_mode = #tpu.pipeline_mode<synchronous>, transform_indices = @transform_1, window_bounds = array<i64: 1, 512>}, {pipeline_mode = #tpu.pipeline_mode<synchronous>, transform_indices = @transform_2, window_bounds = array<i64: 1, 512>}, {pipeline_mode = #tpu.pipeline_mode<synchronous>, transform_indices = @transform_3, window_bounds = array<i64: 512, 128>}, {pipeline_mode = #tpu.pipeline_mode<synchronous>, transform_indices = @transform_4, window_bounds = array<i64: 1, 128>}, {transform_indices = @transform_5, window_bounds = array<i64: 2, 128>}]} {
    %c0 = arith.constant 0 : index
    %c0_0 = arith.constant 0 : index
    %0 = vector.load %arg1[%c0, %c0_0] : memref<32x512xbf16, #tpu.memory_space<vmem>>, vector<32x512xbf16>
    %1 = arith.extf %0 : vector<32x512xbf16> to vector<32x512xf32>
    %c0_1 = arith.constant 0 : index
    %c0_2 = arith.constant 0 : index
    %2 = vector.load %arg2[%c0_1, %c0_2] : memref<1x512xf32, #tpu.memory_space<vmem>>, vector<1x512xf32>
    %3 = vector.broadcast %2 : vector<1x512xf32> to vector<32x512xf32>
    %4 = arith.mulf %1, %3 : vector<32x512xf32>
    %c0_3 = arith.constant 0 : index
    %c0_4 = arith.constant 0 : index
    %5 = vector.load %arg3[%c0_3, %c0_4] : memref<1x512xf32, #tpu.memory_space<vmem>>, vector<1x512xf32>
    %6 = vector.broadcast %5 : vector<1x512xf32> to vector<32x512xf32>
    %7 = arith.addf %4, %6 : vector<32x512xf32>
    %cst = arith.constant 0.000000e+00 : f32
    %8 = vector.broadcast %cst : f32 to vector<32x512xf32>
    %9 = arith.cmpf ogt, %7, %8 : vector<32x512xf32>
    %cst_5 = arith.constant 2.000000e-01 : f32
    %10 = vector.broadcast %cst_5 : f32 to vector<32x512xf32>
    %11 = arith.mulf %10, %7 : vector<32x512xf32>
    %12 = arith.select %9, %7, %11 : vector<32x512xi1>, vector<32x512xf32>
    %13 = vector.shape_cast %12 : vector<32x512xf32> to vector<2x16x512xf32>
    %cst_6 = arith.constant dense<0.000000e+00> : vector<2x512xf32>
    %14 = vector.multi_reduction <add>, %13, %cst_6 [1] : vector<2x16x512xf32> to vector<2x512xf32>
    %cst_7 = arith.constant 1.600000e+01 : f32
    %15 = vector.broadcast %cst_7 : f32 to vector<2x512xf32>
    %16 = arith.divf %14, %15 : vector<2x512xf32>
    %17 = arith.truncf %16 : vector<2x512xf32> to vector<2x512xbf16>
    %c0_8 = arith.constant 0 : index
    %c0_9 = arith.constant 0 : index
    %18 = vector.load %arg4[%c0_8, %c0_9] : memref<512x128xbf16, #tpu.memory_space<vmem>>, vector<512x128xbf16>
    %cst_10 = arith.constant dense<0.000000e+00> : vector<2x128xf32>
    %19 = tpu.matmul %17, %18, %cst_10 {dimension_numbers = #tpu.dot_dimension_numbers<[1], [0], [0], [1], [0, 0, 1, 1], [], []>} : vector<2x512xbf16>, vector<512x128xbf16>, vector<2x128xf32> -> vector<2x128xf32>
    %c0_11 = arith.constant 0 : index
    %c0_12 = arith.constant 0 : index
    %20 = vector.load %arg5[%c0_11, %c0_12] : memref<1x128xf32, #tpu.memory_space<vmem>>, vector<1x128xf32>
    %21 = vector.broadcast %20 : vector<1x128xf32> to vector<2x128xf32>
    %22 = arith.addf %19, %21 : vector<2x128xf32>
    %c0_13 = arith.constant 0 : index
    %c0_14 = arith.constant 0 : index
    %23 = vector.load %arg6[%c0_13, %c0_14] : memref<2x128xf32, #tpu.memory_space<vmem>>, vector<2x128xf32>
    tpu.vector_store %arg6[%c0_13, %c0_14], %22 {strides = array<i32>} : memref<2x128xf32, #tpu.memory_space<vmem>>, vector<2x128xf32>,
    return
  }
  func.func @transform_0(%arg0: i32) -> (i32, i32) {
    %c0_i32 = arith.constant 0 : i32
    %c0_i32_0 = arith.constant 0 : i32
    return %arg0, %c0_i32 : i32, i32
  }
  func.func @transform_1(%arg0: i32) -> (i32, i32) {
    %c0_i32 = arith.constant 0 : i32
    %c0_i32_0 = arith.constant 0 : i32
    %c0_i32_1 = arith.constant 0 : i32
    return %c0_i32, %c0_i32_0 : i32, i32
  }
  func.func @transform_2(%arg0: i32) -> (i32, i32) {
    %c0_i32 = arith.constant 0 : i32
    %c0_i32_0 = arith.constant 0 : i32
    %c0_i32_1 = arith.constant 0 : i32
    return %c0_i32, %c0_i32_0 : i32, i32
  }
  func.func @transform_3(%arg0: i32) -> (i32, i32) {
    %c0_i32 = arith.constant 0 : i32
    %c0_i32_0 = arith.constant 0 : i32
    %c0_i32_1 = arith.constant 0 : i32
    return %c0_i32, %c0_i32_0 : i32, i32
  }
  func.func @transform_4(%arg0: i32) -> (i32, i32) {
    %c0_i32 = arith.constant 0 : i32
    %c0_i32_0 = arith.constant 0 : i32
    %c0_i32_1 = arith.constant 0 : i32
    return %c0_i32, %c0_i32_0 : i32, i32
  }
  func.func @transform_5(%arg0: i32) -> (i32, i32) {
    %c0_i32 = arith.constant 0 : i32
    %c0_i32_0 = arith.constant 0 : i32
    return %arg0, %c0_i32 : i32, i32
  }
}

</mosaic_0001>

<bundles_post_ra>
// kernel: discriminator_forward.5
= control target key start
LH: loop header
LB: loop body
LE: loop exit
PB: predicated region body
PF: predicated region fallthrough
CT: control target
= control target key end

     0   :  { %s5089_s12 = smov 0   ;;  %s5091_s13 = smov 0   ;;  %s6360_s0 = inlined_call_operand.vmem [shape: bf16[6,2,72,256], index: 0, kind: input, shape index: {}]   ;;  %s6361_s1 = inlined_call_operand.vmem [shape: bf16[9,256,256], index: 1, kind: input, shape index: {}]   ;;  %s6362_s2 = inlined_call_operand.vmem [shape: bf16[128,256], index: 2, kind: output, shape index: {0}]   ;;  %s6363_s3 = inlined_call_operand.vmem [shape: f32[2,2,256], index: 3, kind: output, shape index: {1}]  }
   0x1   :  { %s5093_s14 = smov 0  }
   0x2 LB: > { %s5105_s15 = sadd.s32 4294967295, %s5067_s14   ;;  %s5108_s16 = sadd.s32 1, %s5067_s14   ;;  %s5067_s14 = sphi %s5093_s14, %s6366_s14   ;;  %s5063_s13 = sphi %s5091_s13, %s6365_s13   ;;  %s5059_s12 = sphi %s5089_s12, %s6364_s12  }
   0x3   : > { %s18_s17 = ssub.s32 %s5067_s14, %s5108_s16  ;;  %s21_s18 = sadd.s32 1, %s5063_s13 }
   0x4   : > { %p19_p0 = scmp.eq.s32.totalorder %s18_s17, 0  ;;  %p28_p1 = scmp.ne.s32.totalorder %s5063_s13, %s5059_s12 }
   0x5   : > { %p29_p2 = scmp.eq.s32.totalorder %s5067_s14, 0  ;;  %p3633_p4 = scmp.ge.s32.totalorder %s5067_s14, 2 }
   0x6   : > { %s5117_s19 = scalar_select %p19_p0, %s5063_s13, %s21_s18  }
   0x7   : > { %p30_p3 = por %p29_p2, %p28_p1  ;;  %130 = sbr.rel (%p3633_p4) target bundleno = 46 (0x2e), region = 20 }
   0xe   : > { %133 = sbr.rel (!%p30_p3) target bundleno = 46 (0x2e), region = 24  ;;  %s135_s20 = sand.u32 (%p30_p3), 1, %s5063_s13  }
   0xf   : > { %s4495_s21 = smul.u32 (%p30_p3), 72, %s5067_s14 }
  0x10   : > { %s4494_s22 = smul.u32 (%p30_p3), 432, %s135_s20 }
  0x11   : > { %s5125_s25 = scalar_lea.vmem (%p30_p3), %s6360_s0, %s4495_s21 }
  0x12   : > { %v274_v0 = vld [vmem:[%s5125_s25] sm:$0xff] (%p30_p3)  ;;  %v276_v1 = vld [vmem:[%s5125_s25 + $0x8] sm:$0xff] (%p30_p3)  ;;  %v278_v2 = vld [vmem:[%s5125_s25 + $0x10] sm:$0xff] (%p30_p3)  ;;  %s5130_s26 = scalar_lea.vmem (%p30_p3), [#allocation2], %s4494_s22 }
  0x13   : > { %275 = vst [vmem:[%s5130_s26] sm:$0xff] (%p30_p3), %v274_v0  ;;  %277 = vst [vmem:[%s5130_s26 + $0x8] sm:$0xff] (%p30_p3), %v276_v1  ;;  %v280_v3 = vld [vmem:[%s5125_s25 + $0x18] sm:$0xff] (%p30_p3)  ;;  %v282_v4 = vld [vmem:[%s5125_s25 + $0x20] sm:$0xff] (%p30_p3) }
  0x14   : > { %279 = vst [vmem:[%s5130_s26 + $0x10] sm:$0xff] (%p30_p3), %v278_v2  ;;  %v284_v5 = vld [vmem:[%s5125_s25 + $0x28] sm:$0xff] (%p30_p3)  ;;  %281 = vst [vmem:[%s5130_s26 + $0x18] sm:$0xff] (%p30_p3), %v280_v3  ;;  %v286_v6 = vld [vmem:[%s5125_s25 + $0x30] sm:$0xff] (%p30_p3) }
  0x15   : > { %283 = vst [vmem:[%s5130_s26 + $0x20] sm:$0xff] %v282_v4  ;;  %285 = vst [vmem:[%s5130_s26 + $0x28] sm:$0xff] %v284_v5  ;;  %v288_v7 = vld [vmem:[%s5125_s25 + $0x38] sm:$0xff]  ;;  %v290_v8 = vld [vmem:[%s5125_s25 + $0x40] sm:$0xff] }
  0x16   : > { %287 = vst [vmem:[%s5130_s26 + $0x30] sm:$0xff] %v286_v6  ;;  %289 = vst [vmem:[%s5130_s26 + $0x38] sm:$0xff] %v288_v7  ;;  %v292_v9 = vld [vmem:[%s5125_s25 + $0x90] sm:$0xff]  ;;  %v294_v10 = vld [vmem:[%s5125_s25 + $0x98] sm:$0xff] }
  0x17   : > { %291 = vst [vmem:[%s5130_s26 + $0x40] sm:$0xff] %v290_v8  ;;  %v296_v11 = vld [vmem:[%s5125_s25 + $0xa0] sm:$0xff]  ;;  %293 = vst [vmem:[%s5130_s26 + $0x48] sm:$0xff] %v292_v9  ;;  %v298_v12 = vld [vmem:[%s5125_s25 + $0xa8] sm:$0xff] }
  0x18   : > { %295 = vst [vmem:[%s5130_s26 + $0x50] sm:$0xff] %v294_v10  ;;  %297 = vst [vmem:[%s5130_s26 + $0x58] sm:$0xff] %v296_v11  ;;  %v300_v13 = vld [vmem:[%s5125_s25 + $0xb0] sm:$0xff]  ;;  %v302_v14 = vld [vmem:[%s5125_s25 + $0xb8] sm:$0xff] }
  0x19   : > { %299 = vst [vmem:[%s5130_s26 + $0x60] sm:$0xff] %v298_v12  ;;  %301 = vst [vmem:[%s5130_s26 + $0x68] sm:$0xff] %v300_v13  ;;  %v304_v15 = vld [vmem:[%s5125_s25 + $0xc0] sm:$0xff]  ;;  %v306_v16 = vld [vmem:[%s5125_s25 + $0xc8] sm:$0xff] }
  0x1a   : > { %303 = vst [vmem:[%s5130_s26 + $0x70] sm:$0xff] %v302_v14  ;;  %v308_v17 = vld [vmem:[%s5125_s25 + $0xd0] sm:$0xff]  ;;  %305 = vst [vmem:[%s5130_s26 + $0x78] sm:$0xff] %v304_v15  ;;  %v310_v18 = vld [vmem:[%s5125_s25 + $0x120] sm:$0xff] }
  0x1b   : > { %307 = vst [vmem:[%s5130_s26 + $0x80] sm:$0xff] %v306_v16  ;;  %309 = vst [vmem:[%s5130_s26 + $0x88] sm:$0xff] %v308_v17  ;;  %v312_v19 = vld [vmem:[%s5125_s25 + $0x128] sm:$0xff]  ;;  %v314_v20 = vld [vmem:[%s5125_s25 + $0x130] sm:$0xff] }
  0x1c   : > { %311 = vst [vmem:[%s5130_s26 + $0x90] sm:$0xff] %v310_v18  ;;  %313 = vst [vmem:[%s5130_s26 + $0x98] sm:$0xff] %v312_v19  ;;  %v316_v21 = vld [vmem:[%s5125_s25 + $0x138] sm:$0xff]  ;;  %v318_v22 = vld [vmem:[%s5125_s25 + $0x140] sm:$0xff] }
  0x1d   : > { %315 = vst [vmem:[%s5130_s26 + $0xa0] sm:$0xff] %v314_v20  ;;  %v320_v23 = vld [vmem:[%s5125_s25 + $0x148] sm:$0xff]  ;;  %317 = vst [vmem:[%s5130_s26 + $0xa8] sm:$0xff] %v316_v21  ;;  %v322_v24 = vld [vmem:[%s5125_s25 + $0x150] sm:$0xff] }
  0x1e   : > { %319 = vst [vmem:[%s5130_s26 + $0xb0] sm:$0xff] %v318_v22  ;;  %321 = vst [vmem:[%s5130_s26 + $0xb8] sm:$0xff] %v320_v23  ;;  %v324_v25 = vld [vmem:[%s5125_s25 + $0x158] sm:$0xff]  ;;  %v326_v26 = vld [vmem:[%s5125_s25 + $0x160] sm:$0xff] }
  0x1f   : > { %323 = vst [vmem:[%s5130_s26 + $0xc0] sm:$0xff] %v322_v24  ;;  %325 = vst [vmem:[%s5130_s26 + $0xc8] sm:$0xff] %v324_v25  ;;  %v328_v27 = vld [vmem:[%s5125_s25 + $0x1b0] sm:$0xff]  ;;  %v330_v28 = vld [vmem:[%s5125_s25 + $0x1b8] sm:$0xff] }
  0x20   : > { %327 = vst [vmem:[%s5130_s26 + $0xd0] sm:$0xff] %v326_v26  ;;  %v332_v29 = vld [vmem:[%s5125_s25 + $0x1c0] sm:$0xff]  ;;  %329 = vst [vmem:[%s5130_s26 + $0xd8] sm:$0xff] %v328_v27  ;;  %v334_v30 = vld [vmem:[%s5125_s25 + $0x1c8] sm:$0xff] }
  0x21   : > { %331 = vst [vmem:[%s5130_s26 + $0xe0] sm:$0xff] %v330_v28  ;;  %333 = vst [vmem:[%s5130_s26 + $0xe8] sm:$0xff] %v332_v29  ;;  %v336_v31 = vld [vmem:[%s5125_s25 + $0x1d0] sm:$0xff]  ;;  %v338_v32 = vld [vmem:[%s5125_s25 + $0x1d8] sm:$0xff] }
  0x22   : > { %335 = vst [vmem:[%s5130_s26 + $0xf0] sm:$0xff] %v334_v30  ;;  %337 = vst [vmem:[%s5130_s26 + $0xf8] sm:$0xff] %v336_v31  ;;  %v340_v33 = vld [vmem:[%s5125_s25 + $0x1e0] sm:$0xff]  ;;  %v342_v34 = vld [vmem:[%s5125_s25 + $0x1e8] sm:$0xff] }
  0x23   : > { %339 = vst [vmem:[%s5130_s26 + $0x100] sm:$0xff] %v338_v32  ;;  %v344_v35 = vld [vmem:[%s5125_s25 + $0x1f0] sm:$0xff]  ;;  %341 = vst [vmem:[%s5130_s26 + $0x108] sm:$0xff] %v340_v33  ;;  %v346_v36 = vld [vmem:[%s5125_s25 + $0x240] sm:$0xff] }
  0x24   : > { %343 = vst [vmem:[%s5130_s26 + $0x110] sm:$0xff] %v342_v34  ;;  %345 = vst [vmem:[%s5130_s26 + $0x118] sm:$0xff] %v344_v35  ;;  %v348_v37 = vld [vmem:[%s5125_s25 + $0x248] sm:$0xff]  ;;  %v350_v38 = vld [vmem:[%s5125_s25 + $0x250] sm:$0xff] }
  0x25   : > { %347 = vst [vmem:[%s5130_s26 + $0x120] sm:$0xff] %v346_v36  ;;  %349 = vst [vmem:[%s5130_s26 + $0x128] sm:$0xff] %v348_v37  ;;  %v352_v39 = vld [vmem:[%s5125_s25 + $0x258] sm:$0xff]  ;;  %v354_v40 = vld [vmem:[%s5125_s25 + $0x260] sm:$0xff] }
  0x26   : > { %351 = vst [vmem:[%s5130_s26 + $0x130] sm:$0xff] %v350_v38  ;;  %v356_v41 = vld [vmem:[%s5125_s25 + $0x268] sm:$0xff]  ;;  %353 = vst [vmem:[%s5130_s26 + $0x138] sm:$0xff] %v352_v39  ;;  %v358_v42 = vld [vmem:[%s5125_s25 + $0x270] sm:$0xff] }
  0x27   : > { %355 = vst [vmem:[%s5130_s26 + $0x140] sm:$0xff] %v354_v40  ;;  %357 = vst [vmem:[%s5130_s26 + $0x148] sm:$0xff] %v356_v41  ;;  %v360_v43 = vld [vmem:[%s5125_s25 + $0x278] sm:$0xff]  ;;  %v362_v44 = vld [vmem:[%s5125_s25 + $0x280] sm:$0xff] }
  0x28   : > { %359 = vst [vmem:[%s5130_s26 + $0x150] sm:$0xff] %v358_v42  ;;  %361 = vst [vmem:[%s5130_s26 + $0x158] sm:$0xff] %v360_v43  ;;  %v364_v45 = vld [vmem:[%s5125_s25 + $0x2d0] sm:$0xff]  ;;  %v366_v46 = vld [vmem:[%s5125_s25 + $0x2d8] sm:$0xff] }
  0x29   : > { %363 = vst [vmem:[%s5130_s26 + $0x160] sm:$0xff] %v362_v44  ;;  %v368_v47 = vld [vmem:[%s5125_s25 + $0x2e0] sm:$0xff]  ;;  %365 = vst [vmem:[%s5130_s26 + $0x168] sm:$0xff] %v364_v45  ;;  %v370_v48 = vld [vmem:[%s5125_s25 + $0x2e8] sm:$0xff] }
  0x2a   : > { %367 = vst [vmem:[%s5130_s26 + $0x170] sm:$0xff] %v366_v46  ;;  %369 = vst [vmem:[%s5130_s26 + $0x178] sm:$0xff] %v368_v47  ;;  %v372_v49 = vld [vmem:[%s5125_s25 + $0x2f0] sm:$0xff]  ;;  %v374_v50 = vld [vmem:[%s5125_s25 + $0x2f8] sm:$0xff] }
  0x2b   : > { %371 = vst [vmem:[%s5130_s26 + $0x180] sm:$0xff] %v370_v48  ;;  %373 = vst [vmem:[%s5130_s26 + $0x188] sm:$0xff] %v372_v49  ;;  %v376_v51 = vld [vmem:[%s5125_s25 + $0x300] sm:$0xff]  ;;  %v378_v52 = vld [vmem:[%s5125_s25 + $0x308] sm:$0xff] }
  0x2c   : > { %375 = vst [vmem:[%s5130_s26 + $0x190] sm:$0xff] %v374_v50  ;;  %v380_v53 = vld [vmem:[%s5125_s25 + $0x310] sm:$0xff]  ;;  %377 = vst [vmem:[%s5130_s26 + $0x198] sm:$0xff] %v376_v51 }
  0x2d   : > { %379 = vst [vmem:[%s5130_s26 + $0x1a0] sm:$0xff] %v378_v52  ;;  %381 = vst [vmem:[%s5130_s26 + $0x1a8] sm:$0xff] %v380_v53 }
  0x2e PF: > { %p3635_p5 = scmp.ge.s32.totalorder %s5067_s14, 1  ;;  %p386_p6 = scmp.lt.s32.totalorder %s5067_s14, 3 }
  0x30   : > { %p387_p7 = pnand %p3635_p5, %p386_p6 }
  0x31   : > { %v4521_v54 = vld [vmem:[%s6361_s1 + $0x104] ss:$8 sps:$4 sm:$0xff] (!%p387_p7)   ;;  %v4525_v56 = vld [vmem:[%s6361_s1 + $0x100] ss:$8 sps:$4 sm:$0xff] (!%p387_p7)   ;;  %v4527_v58 = vld [vmem:[%s6361_s1 + $0x114] ss:$8 sps:$4 sm:$0xff] (!%p387_p7)  }
  0x32   : > { %390 = sbr.rel (%p387_p7) target bundleno = 656 (0x290), region = 62  ;;  %v4523_v55 = vld [vmem:[%s6361_s1 + $0x404] ss:$8 sps:$4 sm:$0xff] (!%p387_p7)   ;;  %716 = vmatprep.subr.bf16.mxu1 (!%p387_p7), %v4521_v54  ;;  %v4526_v57 = vld [vmem:[%s6361_s1 + $0x400] ss:$8 sps:$4 sm:$0xff] (!%p387_p7)   ;;  %s393_s10 = sand.u32 (!%p387_p7), 1, %s5059_s12  }
  0x33   : > { %1966 = vmatprep.subr.bf16.mxu0 (!%p387_p7), %v4523_v55  ;;  %717 = vmatpush1.bf16.msra.mxu1 (!%p387_p7), %v4525_v56  ;;  %v4529_v59 = vld [vmem:[%s6361_s1 + $0x414] ss:$8 sps:$4 sm:$0xff] (!%p387_p7)   ;;  %v4531_v60 = vld [vmem:[%s6361_s1 + $0x110] ss:$8 sps:$4 sm:$0xff] (!%p387_p7)   ;;  %v4533_v62 = vld [vmem:[%s6361_s1 + $0x124] ss:$8 sps:$4 sm:$0xff] (!%p387_p7)  }
  0x34   : > { %1967 = vmatpush1.bf16.msra.mxu0 (!%p387_p7), %v4526_v57  ;;  %718 = vmatprep.subr.bf16.mxu1 (!%p387_p7), %v4527_v58  ;;  %v4532_v61 = vld [vmem:[%s6361_s1 + $0x410] ss:$8 sps:$4 sm:$0xff] (!%p387_p7)   ;;  %v4535_v63 = vld [vmem:[%s6361_s1 + $0x424] ss:$8 sps:$4 sm:$0xff] (!%p387_p7)   ;;  %v4537_v0 = vld [vmem:[%s6361_s1 + $0x120] ss:$8 sps:$4 sm:$0xff] (!%p387_p7)  }
  0x35   : > { %1968 = vmatprep.subr.bf16.mxu0 (!%p387_p7), %v4529_v59  ;;  %v4538_v1 = vld [vmem:[%s6361_s1 + $0x420] ss:$8 sps:$4 sm:$0xff] (!%p387_p7)   ;;  %v4539_v2 = vld [vmem:[%s6361_s1 + $0x134] ss:$8 sps:$4 sm:$0xff] (!%p387_p7)   ;;  %v4543_v4 = vld [vmem:[%s6361_s1 + $0x130] ss:$8 sps:$4 sm:$0xff] (!%p387_p7)  }
  0x36   : > { %v4541_v3 = vld [vmem:[%s6361_s1 + $0x434] ss:$8 sps:$4 sm:$0xff] (!%p387_p7)   ;;  %v4544_v5 = vld [vmem:[%s6361_s1 + $0x430] ss:$8 sps:$4 sm:$0xff] (!%p387_p7)   ;;  %v4545_v6 = vld [vmem:[%s6361_s1 + $0x144] ss:$8 sps:$4 sm:$0xff] (!%p387_p7)  }
  0x37   : > { %719 = vmatpush1.bf16.msra.mxu1 (!%p387_p7), %v4531_v60  ;;  %v4547_v7 = vld [vmem:[%s6361_s1 + $0x444] ss:$8 sps:$4 sm:$0xff] (!%p387_p7)   ;;  %v4549_v8 = vld [vmem:[%s6361_s1 + $0x140] ss:$8 sps:$4 sm:$0xff] (!%p387_p7)   ;;  %v4551_v10 = vld [vmem:[%s6361_s1 + $0x154] ss:$8 sps:$4 sm:$0xff] (!%p387_p7)  }
  0x38   : > { %1969 = vmatpush1.bf16.msra.mxu0 (!%p387_p7), %v4532_v61  ;;  %720 = vmatprep.subr.bf16.mxu1 (!%p387_p7), %v4533_v62  ;;  %v4550_v9 = vld [vmem:[%s6361_s1 + $0x440] ss:$8 sps:$4 sm:$0xff] (!%p387_p7)   ;;  %v4553_v11 = vld [vmem:[%s6361_s1 + $0x454] ss:$8 sps:$4 sm:$0xff] (!%p387_p7)   ;;  %v4555_v12 = vld [vmem:[%s6361_s1 + $0x150] ss:$8 sps:$4 sm:$0xff] (!%p387_p7)  }
  0x39   : > { %1970 = vmatprep.subr.bf16.mxu0 %v4535_v63  ;;  %v4556_v13 = vld [vmem:[%s6361_s1 + $0x450] ss:$8 sps:$4 sm:$0xff]   ;;  %v4557_v14 = vld [vmem:[%s6361_s1 + $0x164] ss:$8 sps:$4 sm:$0xff]   ;;  %v4561_v16 = vld [vmem:[%s6361_s1 + $0x160] ss:$8 sps:$4 sm:$0xff]  }
  0x3a   : > { %v4559_v15 = vld [vmem:[%s6361_s1 + $0x464] ss:$8 sps:$4 sm:$0xff]   ;;  %v4562_v17 = vld [vmem:[%s6361_s1 + $0x460] ss:$8 sps:$4 sm:$0xff]   ;;  %v4563_v18 = vld [vmem:[%s6361_s1 + $0x174] ss:$8 sps:$4 sm:$0xff]  }
  0x3b   : > { %721 = vmatpush1.bf16.msra.mxu1 %v4537_v0  ;;  %v4565_v19 = vld [vmem:[%s6361_s1 + $0x474] ss:$8 sps:$4 sm:$0xff]   ;;  %v4567_v20 = vld [vmem:[%s6361_s1 + $0x170] ss:$8 sps:$4 sm:$0xff]   ;;  %v4569_v22 = vld [vmem:[%s6361_s1 + $0x184] ss:$8 sps:$4 sm:$0xff]  }
  0x3c   : > { %1971 = vmatpush1.bf16.msra.mxu0 %v4538_v1  ;;  %722 = vmatprep.subr.bf16.mxu1 %v4539_v2  ;;  %v4568_v21 = vld [vmem:[%s6361_s1 + $0x470] ss:$8 sps:$4 sm:$0xff]   ;;  %v4571_v23 = vld [vmem:[%s6361_s1 + $0x484] ss:$8 sps:$4 sm:$0xff]   ;;  %v4573_v24 = vld [vmem:[%s6361_s1 + $0x180] ss:$8 sps:$4 sm:$0xff]  }
  0x3d   : > { %1972 = vmatprep.subr.bf16.mxu0 %v4541_v3  ;;  %v4574_v25 = vld [vmem:[%s6361_s1 + $0x480] ss:$8 sps:$4 sm:$0xff]   ;;  %v4575_v26 = vld [vmem:[%s6361_s1 + $0x194] ss:$8 sps:$4 sm:$0xff]   ;;  %v4579_v28 = vld [vmem:[%s6361_s1 + $0x190] ss:$8 sps:$4 sm:$0xff]  }
  0x3e   : > { %v4577_v27 = vld [vmem:[%s6361_s1 + $0x494] ss:$8 sps:$4 sm:$0xff]   ;;  %v4580_v29 = vld [vmem:[%s6361_s1 + $0x490] ss:$8 sps:$4 sm:$0xff]   ;;  %v4581_v30 = vld [vmem:[%s6361_s1 + $0x1a4] ss:$8 sps:$4 sm:$0xff]  }
  0x3f   : > { %723 = vmatpush1.bf16.msra.mxu1 %v4543_v4  ;;  %s4496_s22 = smul.u32 432, %s393_s10  ;;  %v4583_v31 = vld [vmem:[%s6361_s1 + $0x4a4] ss:$8 sps:$4 sm:$0xff]   ;;  %v4585_v32 = vld [vmem:[%s6361_s1 + $0x1a0] ss:$8 sps:$4 sm:$0xff]   ;;  %p429_p9 = scmp.lt.s32.totalorder %s5105_s15, 1 }
  0x40   : > { %1973 = vmatpush1.bf16.msra.mxu0 %v4544_v5  ;;  %724 = vmatprep.subr.bf16.mxu1 %v4545_v6  ;;  %v4586_v33 = vld [vmem:[%s6361_s1 + $0x4a0] ss:$8 sps:$4 sm:$0xff]   ;;  %v4587_v34 = vld [vmem:[%s6361_s1 + $0x1b4] ss:$8 sps:$4 sm:$0xff]   ;;  %v4591_v36 = vld [vmem:[%s6361_s1 + $0x1b0] ss:$8 sps:$4 sm:$0xff]  }
  0x41   : > { %1974 = vmatprep.subr.bf16.mxu0 %v4547_v7  ;;  %v4589_v35 = vld [vmem:[%s6361_s1 + $0x4b4] ss:$8 sps:$4 sm:$0xff]   ;;  %s5381_s7 = scalar_lea.vmem [#allocation2], %s4496_s22  ;;  %v4592_v37 = vld [vmem:[%s6361_s1 + $0x4b0] ss:$8 sps:$4 sm:$0xff]   ;;  %vm3518_vm0 = vcmask 1040384  }
  0x42   : > { %v4619_v38 = vld [vmem:[%s5381_s7 + $0x4c] ss:$8 sps:$4 sm:$0xff]   ;;  %v4597_v42 = vld [vmem:[%s6361_s1 + $0x1c0] ss:$8 sps:$4 sm:$0xff]   ;;  %v4603_v46 = vld [vmem:[%s6361_s1 + $0x1d0] ss:$8 sps:$4 sm:$0xff]  }
  0x43   : > { %725 = vmatpush1.bf16.msra.mxu1 %v4549_v8  ;;  %v4593_v39 = vld [vmem:[%s6361_s1 + $0x1c4] ss:$8 sps:$4 sm:$0xff]   ;;  %748 = vmatprep.mubr.bf16.mxu1 %v4619_v38  ;;  %v4598_v43 = vld [vmem:[%s6361_s1 + $0x4c0] ss:$8 sps:$4 sm:$0xff]   ;;  %v4599_v44 = vld [vmem:[%s6361_s1 + $0x1d4] ss:$8 sps:$4 sm:$0xff]  }
  0x44   : > { %1975 = vmatpush1.bf16.msra.mxu0 %v4550_v9  ;;  %726 = vmatprep.subr.bf16.mxu1 %v4551_v10  ;;  %v4595_v40 = vld [vmem:[%s6361_s1 + $0x4c4] ss:$8 sps:$4 sm:$0xff]   ;;  %v4601_v45 = vld [vmem:[%s6361_s1 + $0x4d4] ss:$8 sps:$4 sm:$0xff]   ;;  %v4604_v47 = vld [vmem:[%s6361_s1 + $0x4d0] ss:$8 sps:$4 sm:$0xff]  }
  0x45   : > { %1976 = vmatprep.subr.bf16.mxu0 %v4553_v11  ;;  %v4625_v41 = vld [vmem:[%s5381_s7 + $0x124] ss:$8 sps:$4 sm:$0xff]   ;;  %v4609_v50 = vld [vmem:[%s6361_s1 + $0x1e0] ss:$8 sps:$4 sm:$0xff]   ;;  %v4615_v54 = vld [vmem:[%s6361_s1 + $0x1f0] ss:$8 sps:$4 sm:$0xff]  }
  0x46   : > { %1998 = vmatprep.mubr.bf16.mxu0 %v4625_v41  ;;  %v4605_v48 = vld [vmem:[%s6361_s1 + $0x1e4] ss:$8 sps:$4 sm:$0xff]   ;;  %v4610_v51 = vld [vmem:[%s6361_s1 + $0x4e0] ss:$8 sps:$4 sm:$0xff]   ;;  %v4611_v52 = vld [vmem:[%s6361_s1 + $0x1f4] ss:$8 sps:$4 sm:$0xff]  }
  0x47   : > { %727 = vmatpush1.bf16.msra.mxu1 %v4555_v12  ;;  %v4607_v49 = vld [vmem:[%s6361_s1 + $0x4e4] ss:$8 sps:$4 sm:$0xff]   ;;  %v4613_v53 = vld [vmem:[%s6361_s1 + $0x4f4] ss:$8 sps:$4 sm:$0xff]   ;;  %v4616_v55 = vld [vmem:[%s6361_s1 + $0x4f0] ss:$8 sps:$4 sm:$0xff]  }
  0x48   : > { %1977 = vmatpush1.bf16.msra.mxu0 %v4556_v13  ;;  %728 = vmatprep.subr.bf16.mxu1 %v4557_v14  ;;  %v4622_v56 = vld [vmem:[%s6361_s1 + $0x4] ss:$8 sps:$4 sm:$0xff]   ;;  %v4617_v58 = vld [vmem:[%s5381_s7 + $0x48] ss:$8 sps:$4 sm:$0xff]   ;;  %v4631_v62 = vld [vmem:[%s6361_s1 + $0x14] ss:$8 sps:$4 sm:$0xff]  }
  0x49   : > { %1978 = vmatprep.subr.bf16.mxu0 %v4559_v15  ;;  %v4628_v57 = vld [vmem:[%s6361_s1 + $0x504] ss:$8 sps:$4 sm:$0xff]   ;;  %v4620_v59 = vld [vmem:[%s6361_s1] ss:$8 sps:$4 sm:$0xff]   ;;  %v4634_v63 = vld [vmem:[%s6361_s1 + $0x514] ss:$8 sps:$4 sm:$0xff]  }
  0x4a   : > { %v4623_v60 = vld [vmem:[%s5381_s7 + $0x120] ss:$8 sps:$4 sm:$0xff]   ;;  %v4637_v2 = vld [vmem:[%s6361_s1 + $0x24] ss:$8 sps:$4 sm:$0xff]   ;;  %v4643_v6 = vld [vmem:[%s6361_s1 + $0x34] ss:$8 sps:$4 sm:$0xff]  }
  0x4b   : > { %729 = vmatpush1.bf16.msra.mxu1 %v4561_v16  ;;  %v4626_v61 = vld [vmem:[%s6361_s1 + $0x500] ss:$8 sps:$4 sm:$0xff]   ;;  %v4629_v0 = vld [vmem:[%s6361_s1 + $0x10] ss:$8 sps:$4 sm:$0xff]   ;;  %v4640_v3 = vld [vmem:[%s6361_s1 + $0x524] ss:$8 sps:$4 sm:$0xff]  }
  0x4c   : > { %1979 = vmatpush1.bf16.msra.mxu0 %v4562_v17  ;;  %730 = vmatprep.subr.bf16.mxu1 %v4563_v18  ;;  %v4632_v1 = vld [vmem:[%s6361_s1 + $0x510] ss:$8 sps:$4 sm:$0xff]   ;;  %v4635_v4 = vld [vmem:[%s6361_s1 + $0x20] ss:$8 sps:$4 sm:$0xff]   ;;  %v4683_v7 = vld [vmem:[%s5381_s7 + $0x5c] ss:$8 sps:$4 sm:$0xff]  }
  0x4d   : > { %1980 = vmatprep.subr.bf16.mxu0 %v4565_v19  ;;  %v4638_v5 = vld [vmem:[%s6361_s1 + $0x520] ss:$8 sps:$4 sm:$0xff]   ;;  %v4646_v8 = vld [vmem:[%s6361_s1 + $0x534] ss:$8 sps:$4 sm:$0xff]   ;;  %v4641_v9 = vld [vmem:[%s6361_s1 + $0x30] ss:$8 sps:$4 sm:$0xff]  }
  0x4e   : > { %v4644_v10 = vld [vmem:[%s6361_s1 + $0x530] ss:$8 sps:$4 sm:$0xff]   ;;  %v4688_v11 = vld [vmem:[%s5381_s7 + $0x134] ss:$8 sps:$4 sm:$0xff]   ;;  %v4647_v16 = vld [vmem:[%s6361_s1 + $0x40] ss:$8 sps:$4 sm:$0xff]  }
  0x4f   : > { %731 = vmatpush1.bf16.msra.mxu1 %v4567_v20  ;;  %v4649_v12 = vld [vmem:[%s6361_s1 + $0x44] ss:$8 sps:$4 sm:$0xff]   ;;  %v4693_v14 = vld [vmem:[%s5381_s7 + $0x58] ss:$8 sps:$4 sm:$0xff]   ;;  %v4655_v18 = vld [vmem:[%s6361_s1 + $0x54] ss:$8 sps:$4 sm:$0xff]  }
  0x50   : > { %1981 = vmatpush1.bf16.msra.mxu0 %v4568_v21  ;;  %732 = vmatprep.subr.bf16.mxu1 %v4569_v22  ;;  %v4652_v13 = vld [vmem:[%s6361_s1 + $0x544] ss:$8 sps:$4 sm:$0xff]   ;;  %v4694_v15 = vld [vmem:[%s5381_s7 + $0x130] ss:$8 sps:$4 sm:$0xff]   ;;  %v4658_v20 = vld [vmem:[%s6361_s1 + $0x554] ss:$8 sps:$4 sm:$0xff]  }
  0x51   : > { %1982 = vmatprep.subr.bf16.mxu0 %v4571_v23  ;;  %v4650_v17 = vld [vmem:[%s6361_s1 + $0x540] ss:$8 sps:$4 sm:$0xff]   ;;  %v4701_v19 = vld [vmem:[%s5381_s7 + $0x6c] ss:$8 sps:$4 sm:$0xff]   ;;  %v4653_v21 = vld [vmem:[%s6361_s1 + $0x50] ss:$8 sps:$4 sm:$0xff]  }
  0x52   : > { %v4656_v22 = vld [vmem:[%s6361_s1 + $0x550] ss:$8 sps:$4 sm:$0xff]   ;;  %v4706_v23 = vld [vmem:[%s5381_s7 + $0x144] ss:$8 sps:$4 sm:$0xff]   ;;  %v4674_v41 = vld [vmem:[%s6361_s1 + $0x580] ss:$8 sps:$4 sm:$0xff]  }
  0x53   : > { %733 = vmatpush1.bf16.msra.mxu1 %v4573_v24  ;;  %v4661_v24 = vld [vmem:[%s6361_s1 + $0x64] ss:$8 sps:$4 sm:$0xff]   ;;  %v4729_v38 = vld [vmem:[%s5381_s7 + $0x78] ss:$8 sps:$4 sm:$0xff]  }
  0x54   : > { %1983 = vmatpush1.bf16.msra.mxu0 %v4574_v25  ;;  %734 = vmatprep.subr.bf16.mxu1 %v4575_v26  ;;  %v4664_v25 = vld [vmem:[%s6361_s1 + $0x564] ss:$8 sps:$4 sm:$0xff]   ;;  %v4711_v26 = vld [vmem:[%s5381_s7 + $0x68] ss:$8 sps:$4 sm:$0xff]  }
  0x55   : > { %1984 = vmatprep.subr.bf16.mxu0 %v4577_v27  ;;  %v4712_v27 = vld [vmem:[%s5381_s7 + $0x140] ss:$8 sps:$4 sm:$0xff]  }
  0x57   : > { %735 = vmatpush1.bf16.msra.mxu1 %v4579_v28  ;;  %v4659_v28 = vld [vmem:[%s6361_s1 + $0x60] ss:$8 sps:$4 sm:$0xff]  }
  0x58   : > { %1985 = vmatpush1.bf16.msra.mxu0 %v4580_v29  ;;  %736 = vmatprep.subr.bf16.mxu1 %v4581_v30  ;;  %v4662_v29 = vld [vmem:[%s6361_s1 + $0x560] ss:$8 sps:$4 sm:$0xff]   ;;  %v4667_v30 = vld [vmem:[%s6361_s1 + $0x74] ss:$8 sps:$4 sm:$0xff]  }
  0x59   : > { %1986 = vmatprep.subr.bf16.mxu0 %v4583_v31  ;;  %v4719_v31 = vld [vmem:[%s5381_s7 + $0x7c] ss:$8 sps:$4 sm:$0xff]  }
  0x5b   : > { %737 = vmatpush1.bf16.msra.mxu1 %v4585_v32  ;;  %v4670_v32 = vld [vmem:[%s6361_s1 + $0x574] ss:$8 sps:$4 sm:$0xff]  }
  0x5c   : > { %1987 = vmatpush1.bf16.msra.mxu0 %v4586_v33  ;;  %738 = vmatprep.subr.bf16.mxu1 %v4587_v34  ;;  %v4665_v33 = vld [vmem:[%s6361_s1 + $0x70] ss:$8 sps:$4 sm:$0xff]  }
  0x5d   : > { %1988 = vmatprep.subr.bf16.mxu0 %v4589_v35  ;;  %v4668_v34 = vld [vmem:[%s6361_s1 + $0x570] ss:$8 sps:$4 sm:$0xff]   ;;  %v4724_v35 = vld [vmem:[%s5381_s7 + $0x154] ss:$8 sps:$4 sm:$0xff]  }
  0x5f   : > { %739 = vmatpush1.bf16.msra.mxu1 %v4591_v36  ;;  %v4673_v36 = vld [vmem:[%s6361_s1 + $0x84] ss:$8 sps:$4 sm:$0xff]  }
  0x60   : > { %1989 = vmatpush1.bf16.msra.mxu0 %v4592_v37  ;;  %740 = vmatprep.subr.bf16.mxu1 %v4593_v39  ;;  %v4676_v37 = vld [vmem:[%s6361_s1 + $0x584] ss:$8 sps:$4 sm:$0xff]   ;;  %v4730_v39 = vld [vmem:[%s5381_s7 + $0x150] ss:$8 sps:$4 sm:$0xff]  }
  0x61   : > { %1990 = vmatprep.subr.bf16.mxu0 %v4595_v40  ;;  %v4671_v40 = vld [vmem:[%s6361_s1 + $0x80] ss:$8 sps:$4 sm:$0xff]  }
  0x63   : > { %741 = vmatpush1.bf16.msra.mxu1 %v4597_v42  ;;  %v5559_v42 = vld [vmem:[%s5381_s7] sm:$0xff] }
  0x64   : > { %1991 = vmatpush1.bf16.msra.mxu0 %v4598_v43  ;;  %742 = vmatprep.subr.bf16.mxu1 %v4599_v44  ;;  %v5562_v43 = vld [vmem:[%s5381_s7 + $0x8] sm:$0xff] }
  0x65   : > { %1992 = vmatprep.subr.bf16.mxu0 %v4601_v45  ;;  %v4679_v44 = vld [vmem:[%s6361_s1 + $0x94] ss:$8 sps:$4 sm:$0xff]  }
  0x66   : > { %v4682_v45 = vld [vmem:[%s6361_s1 + $0x594] ss:$8 sps:$4 sm:$0xff]  }
  0x67   : > { %743 = vmatpush1.bf16.msra.mxu1 %v4603_v46  ;;  %v3722_v46 = vcombine.high %v5559_v42, %v5562_v43 }
  0x68   : > { %1993 = vmatpush1.bf16.msra.mxu0 %v4604_v47  ;;  %744 = vmatprep.subr.bf16.mxu1 %v4605_v48  ;;  %v4744_v47 = vld [vmem:[%s5381_s7 + $0x16c] ss:$8 sps:$4 sm:$0xff]   ;;  %v4677_v48 = vld [vmem:[%s6361_s1 + $0x90] ss:$8 sps:$4 sm:$0xff]  }
  0x69   : > { %1994 = vmatprep.subr.bf16.mxu0 %v4607_v49  ;;  %v4680_v49 = vld [vmem:[%s6361_s1 + $0x590] ss:$8 sps:$4 sm:$0xff]  }
  0x6b   : > { %745 = vmatpush1.bf16.msra.mxu1 %v4609_v50  ;;  %v4687_v50 = vld [vmem:[%s6361_s1 + $0xa4] ss:$8 sps:$4 sm:$0xff]  }
  0x6c   : > { %1995 = vmatpush1.bf16.msra.mxu0 %v4610_v51  ;;  %746 = vmatprep.subr.bf16.mxu1 %v4611_v52  ;;  %v4692_v51 = vld [vmem:[%s6361_s1 + $0x5a4] ss:$8 sps:$4 sm:$0xff]   ;;  %v4685_v52 = vld [vmem:[%s6361_s1 + $0xa0] ss:$8 sps:$4 sm:$0xff]  }
  0x6d   : > { %1996 = vmatprep.subr.bf16.mxu0 %v4613_v53  ;;  %v4690_v53 = vld [vmem:[%s6361_s1 + $0x5a0] ss:$8 sps:$4 sm:$0xff]  }
  0x6f   : > { %747 = vmatpush1.bf16.msra.mxu1 %v4615_v54  ;;  %v4697_v54 = vld [vmem:[%s6361_s1 + $0xb4] ss:$8 sps:$4 sm:$0xff]  }
  0x70   : > { %1997 = vmatpush1.bf16.msra.mxu0 %v4616_v55  ;;  %989 = vmatprep.subr.bf16.mxu1 %v4622_v56  ;;  %v4700_v55 = vld [vmem:[%s6361_s1 + $0x5b4] ss:$8 sps:$4 sm:$0xff]   ;;  %v4695_v56 = vld [vmem:[%s6361_s1 + $0xb0] ss:$8 sps:$4 sm:$0xff]  }
  0x71   : > { %2297 = vmatprep.subr.bf16.mxu0 %v4628_v57  ;;  %v4698_v57 = vld [vmem:[%s6361_s1 + $0x5b0] ss:$8 sps:$4 sm:$0xff]  }
  0x72   : > { %749 = vmatmul.mubr.bf16.vlgmr.msra.gmra.mrb[0].mxu1 %v4617_v58  ;;  %v4705_v58 = vld [vmem:[%s6361_s1 + $0xc4] ss:$8 sps:$4 sm:$0xff]  }
  0x73   : > { %1999 = vmatmul.mubr.bf16.vlgmr.msra.gmra.mrb[0].mxu0 %v4623_v60  ;;  %990 = vmatpush1.bf16.msra.mxu1 %v4620_v59  ;;  %v4710_v59 = vld [vmem:[%s6361_s1 + $0x5c4] ss:$8 sps:$4 sm:$0xff]   ;;  %v4703_v60 = vld [vmem:[%s6361_s1 + $0xc0] ss:$8 sps:$4 sm:$0xff]  }
  0x74   : > { %2298 = vmatpush1.bf16.msra.mxu0 %v4626_v61  ;;  %991 = vmatprep.subr.bf16.mxu1 %v4631_v62  ;;  %v4708_v61 = vld [vmem:[%s6361_s1 + $0x5c0] ss:$8 sps:$4 sm:$0xff]   ;;  %v4715_v62 = vld [vmem:[%s6361_s1 + $0xd4] ss:$8 sps:$4 sm:$0xff]  }
  0x75   : > { %2299 = vmatprep.subr.bf16.mxu0 %v4634_v63  ;;  %758 = vmatprep.mubr.bf16.mxu1 %v4683_v7  ;;  %v4718_v63 = vld [vmem:[%s6361_s1 + $0x5d4] ss:$8 sps:$4 sm:$0xff]  }
  0x76   : > { %2008 = vmatprep.mubr.bf16.mxu0 %v4688_v11  ;;  %v4736_v7 = vld [vmem:[%s6361_s1 + $0x5f4] ss:$8 sps:$4 sm:$0xff]   ;;  %v4747_v11 = vld [vmem:[%s6361_s1 + $0x604] ss:$8 sps:$4 sm:$0xff]  }
  0x77   : > { %992 = vmatpush1.bf16.msra.mxu1 %v4629_v0  ;;  %v4713_v0 = vld [vmem:[%s6361_s1 + $0xd0] ss:$8 sps:$4 sm:$0xff]  }
  0x78   : > { %2300 = vmatpush1.bf16.msra.mxu0 %v4632_v1  ;;  %993 = vmatprep.subr.bf16.mxu1 %v4637_v2  ;;  %v4716_v1 = vld [vmem:[%s6361_s1 + $0x5d0] ss:$8 sps:$4 sm:$0xff]   ;;  %v4723_v2 = vld [vmem:[%s6361_s1 + $0xe4] ss:$8 sps:$4 sm:$0xff]  }
  0x79   : > { %2301 = vmatprep.subr.bf16.mxu0 %v4640_v3  ;;  %v4728_v3 = vld [vmem:[%s6361_s1 + $0x5e4] ss:$8 sps:$4 sm:$0xff]  }
  0x7a   : > { %759 = vmatmul.mubr.bf16.gmra.mrb[4].mxu1 %v4693_v14  ;;  %v5662_v14 = vld [vmem:[%s5381_s7 + $0x10] sm:$0xff] }
  0x7b   : > { %994 = vmatpush1.bf16.msra.mxu1 %v4635_v4  ;;  %2009 = vmatmul.mubr.bf16.gmra.mrb[4].mxu0 %v4694_v15  ;;  %v4721_v4 = vld [vmem:[%s6361_s1 + $0xe0] ss:$8 sps:$4 sm:$0xff]   ;;  %v3721_v15 = vcombine.low %v5559_v42, %v5562_v43 }
  0x7c   : > { %2302 = vmatpush1.bf16.msra.mxu0 %v4638_v5  ;;  %995 = vmatprep.subr.bf16.mxu1 %v4643_v6  ;;  %v4726_v5 = vld [vmem:[%s6361_s1 + $0x5e0] ss:$8 sps:$4 sm:$0xff]   ;;  %v4733_v6 = vld [vmem:[%s6361_s1 + $0xf4] ss:$8 sps:$4 sm:$0xff]  }
  0x7d   : > { %2303 = vmatprep.subr.bf16.mxu0 %v4646_v8  ;;  %768 = vmatprep.mubr.bf16.mxu1 %v4701_v19  ;;  %v4731_v8 = vld [vmem:[%s6361_s1 + $0xf0] ss:$8 sps:$4 sm:$0xff]   ;;  %v4753_v19 = vld [vmem:[%s6361_s1 + $0x614] ss:$8 sps:$4 sm:$0xff]  }
  0x7e   : > { %2018 = vmatprep.mubr.bf16.mxu0 %v4706_v23  ;;  %v4751_v23 = vld [vmem:[%s6361_s1 + $0x610] ss:$8 sps:$4 sm:$0xff]  }
  0x7f   : > { %996 = vmatpush1.bf16.msra.mxu1 %v4641_v9  ;;  %v4734_v9 = vld [vmem:[%s6361_s1 + $0x5f0] ss:$8 sps:$4 sm:$0xff]  }
  0x80   : > { %2304 = vmatpush1.bf16.msra.mxu0 %v4644_v10  ;;  %997 = vmatprep.subr.bf16.mxu1 %v4649_v12  ;;  %v4741_v10 = vld [vmem:[%s6361_s1 + $0x204] ss:$8 sps:$4 sm:$0xff]   ;;  %v4739_v12 = vld [vmem:[%s6361_s1 + $0x200] ss:$8 sps:$4 sm:$0xff]  }
  0x81   : > { %2305 = vmatprep.subr.bf16.mxu0 %v4652_v13  ;;  %v4742_v13 = vld [vmem:[%s5381_s7 + $0x168] ss:$8 sps:$4 sm:$0xff]  }
  0x82   : > { %769 = vmatmul.mubr.bf16.gmra.mrb[8].mxu1 %v4711_v26  ;;  %v4812_v26 = vld [vmem:[%s5381_s7 + $0x178] ss:$8 sps:$4 sm:$0xff]  }
  0x83   : > { %998 = vmatpush1.bf16.msra.mxu1 %v4647_v16  ;;  %2019 = vmatmul.mubr.bf16.gmra.mrb[8].mxu0 %v4712_v27  ;;  %v5667_v16 = vld [vmem:[%s5381_s7 + $0x18] sm:$0xff]  ;;  %v5695_v27 = vld [vmem:[%s5381_s7 + $0x20] sm:$0xff] }
  0x84   : > { %2306 = vmatpush1.bf16.msra.mxu0 %v4650_v17  ;;  %999 = vmatprep.subr.bf16.mxu1 %v4655_v18  ;;  %v4745_v17 = vld [vmem:[%s6361_s1 + $0x600] ss:$8 sps:$4 sm:$0xff]   ;;  %v4750_v18 = vld [vmem:[%s6361_s1 + $0x214] ss:$8 sps:$4 sm:$0xff]  }
  0x85   : > { %2307 = vmatprep.subr.bf16.mxu0 %v4658_v20  ;;  %778 = vmatprep.mubr.bf16.mxu1 %v4719_v31  ;;  %v3724_v20 = vcombine.high %v5662_v14, %v5667_v16  ;;  %v4757_v31 = vld [vmem:[%s6361_s1 + $0x620] ss:$8 sps:$4 sm:$0xff]  }
  0x86   : > { %2028 = vmatprep.mubr.bf16.mxu0 %v4724_v35  ;;  %v4823_v35 = vld [vmem:[%s5381_s7 + $0x18c] ss:$8 sps:$4 sm:$0xff]  }
  0x87   : > { %1000 = vmatpush1.bf16.msra.mxu1 %v4653_v21  ;;  %v4806_v21 = vld [vmem:[%s5381_s7 + $0x17c] ss:$8 sps:$4 sm:$0xff]  }
  0x88   : > { %2308 = vmatpush1.bf16.msra.mxu0 %v4656_v22  ;;  %1001 = vmatprep.subr.bf16.mxu1 %v4661_v24  ;;  %v4748_v22 = vld [vmem:[%s6361_s1 + $0x210] ss:$8 sps:$4 sm:$0xff]   ;;  %v4756_v24 = vld [vmem:[%s6361_s1 + $0x224] ss:$8 sps:$4 sm:$0xff]  }
  0x89   : > { %2309 = vmatprep.subr.bf16.mxu0 %v4664_v25  ;;  %v4759_v25 = vld [vmem:[%s6361_s1 + $0x624] ss:$8 sps:$4 sm:$0xff]  }
  0x8a   : > { %779 = vmatmul.mubr.bf16.gmra.mrb[12].mxu1 %v4729_v38  ;;  %v4768_v38 = vld [vmem:[%s6361_s1 + $0x244] ss:$8 sps:$4 sm:$0xff]  }
  0x8b   : > { %1002 = vmatpush1.bf16.msra.mxu1 %v4659_v28  ;;  %2029 = vmatmul.mubr.bf16.gmra.mrb[12].mxu0 %v4730_v39  ;;  %v3723_v28 = vcombine.low %v5662_v14, %v5667_v16  ;;  %v4771_v39 = vld [vmem:[%s6361_s1 + $0x644] ss:$8 sps:$4 sm:$0xff]  }
  0x8c   : > { %2310 = vmatpush1.bf16.msra.mxu0 %v4662_v29  ;;  %1003 = vmatprep.subr.bf16.mxu1 %v4667_v30  ;;  %v5700_v29 = vld [vmem:[%s5381_s7 + $0x28] sm:$0xff] }
  0x8d   : > { %2311 = vmatprep.subr.bf16.mxu0 %v4670_v32  ;;  %1021 = vmatprep.mubr.bf16.mxu1 %v3722_v46  ;;  %v4754_v30 = vld [vmem:[%s6361_s1 + $0x220] ss:$8 sps:$4 sm:$0xff]   ;;  %v4762_v32 = vld [vmem:[%s6361_s1 + $0x234] ss:$8 sps:$4 sm:$0xff]   ;;  %v3725_v42 = vcombine.low %v5695_v27, %v5700_v29 }
  0x8e   : > { %2329 = vmatprep.mubr.bf16.mxu0 %v4744_v47  ;;  %v5742_v46 = vld [vmem:[%s5381_s7 + $0x38] sm:$0xff] }
  0x8f   : > { %1004 = vmatpush1.bf16.msra.mxu1 %v4665_v33  ;;  %v4765_v33 = vld [vmem:[%s6361_s1 + $0x634] ss:$8 sps:$4 sm:$0xff]  }
  0x90   : > { %2312 = vmatpush1.bf16.msra.mxu0 %v4668_v34  ;;  %1005 = vmatprep.subr.bf16.mxu1 %v4673_v36  ;;  %v3726_v34 = vcombine.high %v5695_v27, %v5700_v29  ;;  %v4760_v36 = vld [vmem:[%s6361_s1 + $0x230] ss:$8 sps:$4 sm:$0xff]   ;;  %v4774_v47 = vld [vmem:[%s6361_s1 + $0x254] ss:$8 sps:$4 sm:$0xff]  }
  0x91   : > { %2313 = vmatprep.subr.bf16.mxu0 %v4676_v37  ;;  %v4763_v37 = vld [vmem:[%s6361_s1 + $0x630] ss:$8 sps:$4 sm:$0xff]  }
  0x93   : > { %1006 = vmatpush1.bf16.msra.mxu1 %v4671_v40  ;;  %v4766_v40 = vld [vmem:[%s6361_s1 + $0x240] ss:$8 sps:$4 sm:$0xff]  }
  0x94   : > { %2314 = vmatpush1.bf16.msra.mxu0 %v4674_v41  ;;  %1007 = vmatprep.subr.bf16.mxu1 %v4679_v44  ;;  %v4769_v41 = vld [vmem:[%s6361_s1 + $0x640] ss:$8 sps:$4 sm:$0xff]  }
  0x95   : > { %2315 = vmatprep.subr.bf16.mxu0 %v4682_v45  ;;  %v4829_v44 = vld [vmem:[%s5381_s7 + $0x188] ss:$8 sps:$4 sm:$0xff]  }
  0x96   : > { %v5739_v45 = vld [vmem:[%s5381_s7 + $0x30] sm:$0xff] }
  0x97   : > { %1008 = vmatpush1.bf16.msra.mxu1 %v4677_v48  ;;  %v4777_v48 = vld [vmem:[%s6361_s1 + $0x654] ss:$8 sps:$4 sm:$0xff]  }
  0x98   : > { %2316 = vmatpush1.bf16.msra.mxu0 %v4680_v49  ;;  %1009 = vmatprep.subr.bf16.mxu1 %v4687_v50  ;;  %v3728_v49 = vcombine.high %v5739_v45, %v5742_v46  ;;  %v4840_v50 = vld [vmem:[%s5381_s7 + $0x19c] ss:$8 sps:$4 sm:$0xff]  }
  0x99   : > { %2317 = vmatprep.subr.bf16.mxu0 %v4692_v51  ;;  %v4772_v51 = vld [vmem:[%s6361_s1 + $0x250] ss:$8 sps:$4 sm:$0xff]  }
  0x9b   : > { %1010 = vmatpush1.bf16.msra.mxu1 %v4685_v52  ;;  %v4775_v52 = vld [vmem:[%s6361_s1 + $0x650] ss:$8 sps:$4 sm:$0xff]  }
  0x9c   : > { %2318 = vmatpush1.bf16.msra.mxu0 %v4690_v53  ;;  %1011 = vmatprep.subr.bf16.mxu1 %v4697_v54  ;;  %v4780_v53 = vld [vmem:[%s6361_s1 + $0x264] ss:$8 sps:$4 sm:$0xff]  }
  0x9d   : > { %2319 = vmatprep.subr.bf16.mxu0 %v4700_v55  ;;  %v4783_v54 = vld [vmem:[%s6361_s1 + $0x664] ss:$8 sps:$4 sm:$0xff]   ;;  %v4846_v55 = vld [vmem:[%s5381_s7 + $0x198] ss:$8 sps:$4 sm:$0xff]  }
  0x9f   : > { %1012 = vmatpush1.bf16.msra.mxu1 %v4695_v56  ;;  %v5767_v56 = vld [vmem:[%s5381_s7 + $0x90] sm:$0xff] }
  0xa0   : > { %2320 = vmatpush1.bf16.msra.mxu0 %v4698_v57  ;;  %1013 = vmatprep.subr.bf16.mxu1 %v4705_v58  ;;  %v3727_v57 = vcombine.low %v5739_v45, %v5742_v46  ;;  %v5772_v58 = vld [vmem:[%s5381_s7 + $0x98] sm:$0xff] }
  0xa1   : > { %2321 = vmatprep.subr.bf16.mxu0 %v4710_v59  ;;  %v4778_v59 = vld [vmem:[%s6361_s1 + $0x260] ss:$8 sps:$4 sm:$0xff]  }
  0xa3   : > { %1014 = vmatpush1.bf16.msra.mxu1 %v4703_v60  ;;  %v4781_v60 = vld [vmem:[%s6361_s1 + $0x660] ss:$8 sps:$4 sm:$0xff]  }
  0xa4   : > { %2322 = vmatpush1.bf16.msra.mxu0 %v4708_v61  ;;  %1015 = vmatprep.subr.bf16.mxu1 %v4715_v62  ;;  %v4786_v61 = vld [vmem:[%s6361_s1 + $0x274] ss:$8 sps:$4 sm:$0xff]  }
  0xa5   : > { %2323 = vmatprep.subr.bf16.mxu0 %v4718_v63  ;;  %v4789_v62 = vld [vmem:[%s6361_s1 + $0x674] ss:$8 sps:$4 sm:$0xff]   ;;  %v3802_v63 = vcombine.high %v5767_v56, %v5772_v58 }
  0xa7   : > { %1016 = vmatpush1.bf16.msra.mxu1 %v4713_v0  ;;  %v4114_v0 = vcombine.high %v5562_v43, %v5662_v14 }
  0xa8   : > { %2324 = vmatpush1.bf16.msra.mxu0 %v4716_v1  ;;  %1017 = vmatprep.subr.bf16.mxu1 %v4723_v2  ;;  %v4784_v1 = vld [vmem:[%s6361_s1 + $0x270] ss:$8 sps:$4 sm:$0xff]  }
  0xa9   : > { %2325 = vmatprep.subr.bf16.mxu0 %v4728_v3  ;;  %v4787_v2 = vld [vmem:[%s6361_s1 + $0x670] ss:$8 sps:$4 sm:$0xff]   ;;  %v4792_v3 = vld [vmem:[%s6361_s1 + $0x284] ss:$8 sps:$4 sm:$0xff]  }
  0xab   : > { %1018 = vmatpush1.bf16.msra.mxu1 %v4721_v4  ;;  %v4795_v4 = vld [vmem:[%s6361_s1 + $0x684] ss:$8 sps:$4 sm:$0xff]  }
  0xac   : > { %2326 = vmatpush1.bf16.msra.mxu0 %v4726_v5  ;;  %1019 = vmatprep.subr.bf16.mxu1 %v4733_v6  ;;  %v4790_v5 = vld [vmem:[%s6361_s1 + $0x280] ss:$8 sps:$4 sm:$0xff]  }
  0xad   : > { %2327 = vmatprep.subr.bf16.mxu0 %v4736_v7  ;;  %v4793_v6 = vld [vmem:[%s6361_s1 + $0x680] ss:$8 sps:$4 sm:$0xff]   ;;  %v4798_v7 = vld [vmem:[%s6361_s1 + $0x294] ss:$8 sps:$4 sm:$0xff]  }
  0xaf   : > { %1020 = vmatpush1.bf16.msra.mxu1 %v4731_v8  ;;  %v4801_v8 = vld [vmem:[%s6361_s1 + $0x694] ss:$8 sps:$4 sm:$0xff]  }
  0xb0   : > { %2328 = vmatpush1.bf16.msra.mxu0 %v4734_v9  ;;  %1304 = vmatprep.subr.bf16.mxu1 %v4741_v10  ;;  %v4796_v9 = vld [vmem:[%s6361_s1 + $0x290] ss:$8 sps:$4 sm:$0xff]  }
  0xb1   : > { %2627 = vmatprep.subr.bf16.mxu0 %v4747_v11  ;;  %v4799_v10 = vld [vmem:[%s6361_s1 + $0x690] ss:$8 sps:$4 sm:$0xff]   ;;  %v4805_v11 = vld [vmem:[%s6361_s1 + $0x2a4] ss:$8 sps:$4 sm:$0xff]  }
  0xb2   : > { %1022 = vmatmul.mubr.bf16.vlgmr.msra.gmra.mrb[0].mxu1 %v3721_v15  ;;  %v4808_v15 = vld [vmem:[%s6361_s1 + $0x6a0] ss:$8 sps:$4 sm:$0xff]  }
  0xb3   : > { %2330 = vmatmul.mubr.bf16.vlgmr.msra.gmra.mrb[0].mxu0 %v4742_v13  ;;  %1305 = vmatpush1.bf16.msra.mxu1 %v4739_v12  ;;  %v4810_v12 = vld [vmem:[%s6361_s1 + $0x6a4] ss:$8 sps:$4 sm:$0xff]   ;;  %v4803_v13 = vld [vmem:[%s6361_s1 + $0x2a0] ss:$8 sps:$4 sm:$0xff]  }
  0xb4   : > { %2628 = vmatpush1.bf16.msra.mxu0 %v4745_v17  ;;  %1306 = vmatprep.subr.bf16.mxu1 %v4750_v18  ;;  %v4815_v17 = vld [vmem:[%s6361_s1 + $0x2b4] ss:$8 sps:$4 sm:$0xff]  }
  0xb5   : > { %2629 = vmatprep.subr.bf16.mxu0 %v4753_v19  ;;  %1031 = vmatprep.mubr.bf16.mxu1 %v3724_v20  ;;  %v4818_v18 = vld [vmem:[%s6361_s1 + $0x6b4] ss:$8 sps:$4 sm:$0xff]   ;;  %v4813_v19 = vld [vmem:[%s6361_s1 + $0x2b0] ss:$8 sps:$4 sm:$0xff]  }
  0xb6   : > { %2339 = vmatprep.mubr.bf16.mxu0 %v4806_v21  ;;  %v4816_v20 = vld [vmem:[%s6361_s1 + $0x6b0] ss:$8 sps:$4 sm:$0xff]   ;;  %v4822_v21 = vld [vmem:[%s6361_s1 + $0x2c4] ss:$8 sps:$4 sm:$0xff]  }
  0xb7   : > { %1307 = vmatpush1.bf16.msra.mxu1 %v4748_v22  ;;  %v4827_v22 = vld [vmem:[%s6361_s1 + $0x6c4] ss:$8 sps:$4 sm:$0xff]  }
  0xb8   : > { %2630 = vmatpush1.bf16.msra.mxu0 %v4751_v23  ;;  %1308 = vmatprep.subr.bf16.mxu1 %v4756_v24  ;;  %v4820_v23 = vld [vmem:[%s6361_s1 + $0x2c0] ss:$8 sps:$4 sm:$0xff]  }
  0xb9   : > { %2631 = vmatprep.subr.bf16.mxu0 %v4759_v25  ;;  %v4825_v24 = vld [vmem:[%s6361_s1 + $0x6c0] ss:$8 sps:$4 sm:$0xff]   ;;  %v4832_v25 = vld [vmem:[%s6361_s1 + $0x2d4] ss:$8 sps:$4 sm:$0xff]  }
  0xba   : > { %1032 = vmatmul.mubr.bf16.gmra.mrb[4].mxu1 %v3723_v28  ;;  %v4830_v28 = vld [vmem:[%s6361_s1 + $0x2d0] ss:$8 sps:$4 sm:$0xff]  }
  0xbb   : > { %2340 = vmatmul.mubr.bf16.gmra.mrb[4].mxu0 %v4812_v26  ;;  %1309 = vmatpush1.bf16.msra.mxu1 %v4754_v30  ;;  %v4835_v26 = vld [vmem:[%s6361_s1 + $0x6d4] ss:$8 sps:$4 sm:$0xff]   ;;  %v4833_v30 = vld [vmem:[%s6361_s1 + $0x6d0] ss:$8 sps:$4 sm:$0xff]  }
  0xbc   : > { %2632 = vmatpush1.bf16.msra.mxu0 %v4757_v31  ;;  %1310 = vmatprep.subr.bf16.mxu1 %v4762_v32  ;;  %v4839_v31 = vld [vmem:[%s6361_s1 + $0x2e4] ss:$8 sps:$4 sm:$0xff]  }
  0xbd   : > { %2633 = vmatprep.subr.bf16.mxu0 %v4765_v33  ;;  %1041 = vmatprep.mubr.bf16.mxu1 %v3726_v34  ;;  %v4844_v32 = vld [vmem:[%s6361_s1 + $0x6e4] ss:$8 sps:$4 sm:$0xff]   ;;  %v4837_v33 = vld [vmem:[%s6361_s1 + $0x2e0] ss:$8 sps:$4 sm:$0xff]  }
  0xbe   : > { %2349 = vmatprep.mubr.bf16.mxu0 %v4823_v35  ;;  %v4842_v34 = vld [vmem:[%s6361_s1 + $0x6e0] ss:$8 sps:$4 sm:$0xff]   ;;  %v4849_v35 = vld [vmem:[%s6361_s1 + $0x2f4] ss:$8 sps:$4 sm:$0xff]  }
  0xbf   : > { %1311 = vmatpush1.bf16.msra.mxu1 %v4760_v36  ;;  %v4852_v36 = vld [vmem:[%s6361_s1 + $0x6f4] ss:$8 sps:$4 sm:$0xff]  }
  0xc0   : > { %2634 = vmatpush1.bf16.msra.mxu0 %v4763_v37  ;;  %1312 = vmatprep.subr.bf16.mxu1 %v4768_v38  ;;  %v4847_v37 = vld [vmem:[%s6361_s1 + $0x2f0] ss:$8 sps:$4 sm:$0xff]  }
  0xc1   : > { %2635 = vmatprep.subr.bf16.mxu0 %v4771_v39  ;;  %v4850_v38 = vld [vmem:[%s6361_s1 + $0x6f0] ss:$8 sps:$4 sm:$0xff]   ;;  %v4857_v39 = vld [vmem:[%s6361_s1 + $0x304] ss:$8 sps:$4 sm:$0xff]  }
  0xc2   : > { %1042 = vmatmul.mubr.bf16.gmra.mrb[8].mxu1 %v3725_v42  ;;  %v4855_v42 = vld [vmem:[%s6361_s1 + $0x300] ss:$8 sps:$4 sm:$0xff]  }
  0xc3   : > { %2350 = vmatmul.mubr.bf16.gmra.mrb[8].mxu0 %v4829_v44  ;;  %1313 = vmatpush1.bf16.msra.mxu1 %v4766_v40  ;;  %v4862_v40 = vld [vmem:[%s6361_s1 + $0x704] ss:$8 sps:$4 sm:$0xff]  }
  0xc4   : > { %2636 = vmatpush1.bf16.msra.mxu0 %v4769_v41  ;;  %1314 = vmatprep.subr.bf16.mxu1 %v4774_v47  ;;  %v5899_v41 = vld [vmem:[%s5381_s7 + $0xa0] sm:$0xff]  ;;  %v5905_v44 = vld [vmem:[%s5381_s7 + $0xa8] sm:$0xff]  ;;  %v5908_v47 = vld [vmem:[%s5381_s7 + $0xb8] sm:$0xff] }
  0xc5   : > { %2637 = vmatprep.subr.bf16.mxu0 %v4777_v48  ;;  %1051 = vmatprep.mubr.bf16.mxu1 %v3728_v49  ;;  %v3801_v48 = vcombine.low %v5767_v56, %v5772_v58  ;;  %v4113_v49 = vcombine.low %v5562_v43, %v5662_v14  ;;  %v4865_v43 = vld [vmem:[%s6361_s1 + $0x314] ss:$8 sps:$4 sm:$0xff]   ;;  %v3804_v56 = vcombine.high %v5899_v41, %v5905_v44 }
  0xc6   : > { %2359 = vmatprep.mubr.bf16.mxu0 %v4840_v50  ;;  %v5915_v50 = vld [vmem:[%s5381_s7 + $0xc0] sm:$0xff] }
  0xc7   : > { %1315 = vmatpush1.bf16.msra.mxu1 %v4772_v51  ;;  %v4860_v51 = vld [vmem:[%s6361_s1 + $0x700] ss:$8 sps:$4 sm:$0xff]   ;;  %v4868_v14 = vld [vmem:[%s6361_s1 + $0x714] ss:$8 sps:$4 sm:$0xff]  }
  0xc8   : > { %2638 = vmatpush1.bf16.msra.mxu0 %v4775_v52  ;;  %1316 = vmatprep.subr.bf16.mxu1 %v4780_v53  ;;  %v4273_v52 = vcombine.low %v5772_v58, %v5899_v41  ;;  %v4274_v53 = vcombine.high %v5772_v58, %v5899_v41 }
  0xc9   : > { %2639 = vmatprep.subr.bf16.mxu0 %v4783_v54  ;;  %v4277_v54 = vcombine.low %v5908_v47, %v5915_v50 }
  0xca   : > { %1052 = vmatmul.mubr.bf16.gmra.mrb[12].mxu1 %v3727_v57  ;;  %v4116_v57 = vcombine.high %v5667_v16, %v5695_v27 }
  0xcb   : > { %2360 = vmatmul.mubr.bf16.gmra.mrb[12].mxu0 %v4846_v55  ;;  %1317 = vmatpush1.bf16.msra.mxu1 %v4778_v59  ;;  %v4278_v55 = vcombine.high %v5908_v47, %v5915_v50  ;;  %v5939_v59 = vld [vmem:[%s5381_s7 + $0xb0] sm:$0xff] }
  0xcc   : > { %2640 = vmatpush1.bf16.msra.mxu0 %v4781_v60  ;;  %1318 = vmatprep.subr.bf16.mxu1 %v4786_v61  ;;  %v4863_v60 = vld [vmem:[%s6361_s1 + $0x310] ss:$8 sps:$4 sm:$0xff]   ;;  %v4276_v61 = vcombine.high %v5905_v44, %v5939_v59 }
  0xcd   : > { %2641 = vmatprep.subr.bf16.mxu0 %v4789_v62  ;;  %1336 = vmatprep.mubr.bf16.mxu1 %v3802_v63  ;;  %v4866_v62 = vld [vmem:[%s6361_s1 + $0x710] ss:$8 sps:$4 sm:$0xff]   ;;  %v4275_v63 = vcombine.low %v5905_v44, %v5939_v59 }
  0xce   : > { %2659 = vmatprep.mubr.bf16.mxu0 %v4114_v0  ;;  %v4871_v0 = vld [vmem:[%s6361_s1 + $0x324] ss:$8 sps:$4 sm:$0xff]  }
  0xcf   : > { %1319 = vmatpush1.bf16.msra.mxu1 %v4784_v1  ;;  %v4874_v1 = vld [vmem:[%s6361_s1 + $0x724] ss:$8 sps:$4 sm:$0xff]  }
  0xd0   : > { %2642 = vmatpush1.bf16.msra.mxu0 %v4787_v2  ;;  %1320 = vmatprep.subr.bf16.mxu1 %v4792_v3  ;;  %v4869_v2 = vld [vmem:[%s6361_s1 + $0x320] ss:$8 sps:$4 sm:$0xff]   ;;  %v3803_v3 = vcombine.low %v5899_v41, %v5905_v44 }
  0xd1   : > { %2643 = vmatprep.subr.bf16.mxu0 %v4795_v4  ;;  %v4115_v4 = vcombine.low %v5667_v16, %v5695_v27  ;;  %v4118_v16 = vcombine.high %v5700_v29, %v5739_v45  ;;  %v4875_v27 = vld [vmem:[%s6361_s1 + $0x330] ss:$8 sps:$4 sm:$0xff]  }
  0xd3   : > { %1321 = vmatpush1.bf16.msra.mxu1 %v4790_v5  ;;  %v4872_v5 = vld [vmem:[%s6361_s1 + $0x720] ss:$8 sps:$4 sm:$0xff]  }
  0xd4   : > { %2644 = vmatpush1.bf16.msra.mxu0 %v4793_v6  ;;  %1322 = vmatprep.subr.bf16.mxu1 %v4798_v7  ;;  %v4877_v6 = vld [vmem:[%s6361_s1 + $0x334] ss:$8 sps:$4 sm:$0xff]  }
  0xd5   : > { %2645 = vmatprep.subr.bf16.mxu0 %v4801_v8  ;;  %v4880_v7 = vld [vmem:[%s6361_s1 + $0x734] ss:$8 sps:$4 sm:$0xff]   ;;  %v3806_v8 = vcombine.high %v5939_v59, %v5908_v47 }
  0xd7   : > { %1323 = vmatpush1.bf16.msra.mxu1 %v4796_v9  ;;  %v4878_v9 = vld [vmem:[%s6361_s1 + $0x730] ss:$8 sps:$4 sm:$0xff]  }
  0xd8   : > { %2646 = vmatpush1.bf16.msra.mxu0 %v4799_v10  ;;  %1324 = vmatprep.subr.bf16.mxu1 %v4805_v11  ;;  %v4883_v10 = vld [vmem:[%s6361_s1 + $0x344] ss:$8 sps:$4 sm:$0xff]  }
  0xd9   : > { %2647 = vmatprep.subr.bf16.mxu0 %v4810_v12  ;;  %v4886_v11 = vld [vmem:[%s6361_s1 + $0x744] ss:$8 sps:$4 sm:$0xff]   ;;  %v4881_v12 = vld [vmem:[%s6361_s1 + $0x340] ss:$8 sps:$4 sm:$0xff]  }
  0xdb   : > { %1325 = vmatpush1.bf16.msra.mxu1 %v4803_v13  ;;  %v4884_v13 = vld [vmem:[%s6361_s1 + $0x740] ss:$8 sps:$4 sm:$0xff]  }
  0xdc   : > { %2648 = vmatpush1.bf16.msra.mxu0 %v4808_v15  ;;  %1326 = vmatprep.subr.bf16.mxu1 %v4815_v17  ;;  %v5996_v15 = vld [vmem:[%s5381_s7 + $0xc8] sm:$0xff]  ;;  %v3805_v17 = vcombine.low %v5939_v59, %v5908_v47 }
  0xdd   : > { %2649 = vmatprep.subr.bf16.mxu0 %v4818_v18  ;;  %v4117_v18 = vcombine.low %v5700_v29, %v5739_v45  ;;  %v4887_v29 = vld [vmem:[%s6361_s1 + $0x350] ss:$8 sps:$4 sm:$0xff]  }
  0xde   : > { %v4890_v45 = vld [vmem:[%s6361_s1 + $0x750] ss:$8 sps:$4 sm:$0xff]  }
  0xdf   : > { %1327 = vmatpush1.bf16.msra.mxu1 %v4813_v19  ;;  %v2393_v19 = vld [vmem:[%s5381_s7 + $0x40] sm:$0xff] }
  0xe0   : > { %2650 = vmatpush1.bf16.msra.mxu0 %v4816_v20  ;;  %1328 = vmatprep.subr.bf16.mxu1 %v4822_v21  ;;  %v4889_v20 = vld [vmem:[%s6361_s1 + $0x354] ss:$8 sps:$4 sm:$0xff]  }
  0xe1   : > { %2651 = vmatprep.subr.bf16.mxu0 %v4827_v22  ;;  %v4892_v21 = vld [vmem:[%s6361_s1 + $0x754] ss:$8 sps:$4 sm:$0xff]   ;;  %v3808_v22 = vcombine.high %v5915_v50, %v5996_v15 }
  0xe3   : > { %1329 = vmatpush1.bf16.msra.mxu1 %v4820_v23  ;;  %v4120_v23 = vcombine.high %v5742_v46, %v2393_v19 }
  0xe4   : > { %2652 = vmatpush1.bf16.msra.mxu0 %v4825_v24  ;;  %1330 = vmatprep.subr.bf16.mxu1 %v4832_v25  ;;  %v4895_v24 = vld [vmem:[%s6361_s1 + $0x364] ss:$8 sps:$4 sm:$0xff]  }
  0xe5   : > { %2653 = vmatprep.subr.bf16.mxu0 %v4835_v26  ;;  %v4898_v25 = vld [vmem:[%s6361_s1 + $0x764] ss:$8 sps:$4 sm:$0xff]   ;;  %v4893_v26 = vld [vmem:[%s6361_s1 + $0x360] ss:$8 sps:$4 sm:$0xff]  }
  0xe7   : > { %1331 = vmatpush1.bf16.msra.mxu1 %v4830_v28  ;;  %v3807_v28 = vcombine.low %v5915_v50, %v5996_v15 }
  0xe8   : > { %2654 = vmatpush1.bf16.msra.mxu0 %v4833_v30  ;;  %1332 = vmatprep.subr.bf16.mxu1 %v4839_v31  ;;  %v4119_v30 = vcombine.low %v5742_v46, %v2393_v19  ;;  %v4896_v31 = vld [vmem:[%s6361_s1 + $0x760] ss:$8 sps:$4 sm:$0xff]   ;;  %v4899_v46 = vld [vmem:[%s6361_s1 + $0x370] ss:$8 sps:$4 sm:$0xff]   ;;  %v4973_v19 = vld [vmem:[%s6361_s1 + $0x804] ss:$8 sps:$4 sm:$0xff]  }
  0xe9   : > { %2655 = vmatprep.subr.bf16.mxu0 %v4844_v32  ;;  %v4901_v32 = vld [vmem:[%s6361_s1 + $0x374] ss:$8 sps:$4 sm:$0xff]  }
  0xeb   : > { %1333 = vmatpush1.bf16.msra.mxu1 %v4837_v33  ;;  %v4904_v33 = vld [vmem:[%s6361_s1 + $0x774] ss:$8 sps:$4 sm:$0xff]  }
  0xec   : > { %2656 = vmatpush1.bf16.msra.mxu0 %v4842_v34  ;;  %1334 = vmatprep.subr.bf16.mxu1 %v4849_v35  ;;  %v4967_v34 = vld [vmem:[%s5381_s7 + $0xdc] ss:$8 sps:$4 sm:$0xff]  }
  0xed   : > { %2657 = vmatprep.subr.bf16.mxu0 %v4852_v36  ;;  %v4970_v35 = vld [vmem:[%s5381_s7 + $0x54] ss:$8 sps:$4 sm:$0xff]   ;;  %v4902_v36 = vld [vmem:[%s6361_s1 + $0x770] ss:$8 sps:$4 sm:$0xff]  }
  0xef   : > { %1335 = vmatpush1.bf16.msra.mxu1 %v4847_v37  ;;  %v4907_v37 = vld [vmem:[%s6361_s1 + $0x384] ss:$8 sps:$4 sm:$0xff]  }
  0xf0   : > { %2658 = vmatpush1.bf16.msra.mxu0 %v4850_v38  ;;  %1635 = vmatprep.subr.bf16.mxu1 %v4857_v39  ;;  %v4910_v38 = vld [vmem:[%s6361_s1 + $0x784] ss:$8 sps:$4 sm:$0xff]   ;;  %v4905_v39 = vld [vmem:[%s6361_s1 + $0x380] ss:$8 sps:$4 sm:$0xff]  }
  0xf1   : > { %2957 = vmatprep.subr.bf16.mxu0 %v4862_v40  ;;  %v4908_v40 = vld [vmem:[%s6361_s1 + $0x780] ss:$8 sps:$4 sm:$0xff]  }
  0xf2   : > { %1337 = vmatmul.mubr.bf16.vlgmr.msra.gmra.mrb[0].mxu1 %v3801_v48  ;;  %v4916_v48 = vld [vmem:[%s6361_s1 + $0x794] ss:$8 sps:$4 sm:$0xff]  }
  0xf3   : > { %2660 = vmatmul.mubr.bf16.vlgmr.msra.gmra.mrb[0].mxu0 %v4113_v49  ;;  %1636 = vmatpush1.bf16.msra.mxu1 %v4855_v42  ;;  %v4913_v42 = vld [vmem:[%s6361_s1 + $0x394] ss:$8 sps:$4 sm:$0xff]   ;;  %v4911_v49 = vld [vmem:[%s6361_s1 + $0x390] ss:$8 sps:$4 sm:$0xff]  }
  0xf4   : > { %2958 = vmatpush1.bf16.msra.mxu0 %v4860_v51  ;;  %1637 = vmatprep.subr.bf16.mxu1 %v4865_v43  ;;  %v4914_v51 = vld [vmem:[%s6361_s1 + $0x790] ss:$8 sps:$4 sm:$0xff]   ;;  %v4922_v43 = vld [vmem:[%s6361_s1 + $0x3a4] ss:$8 sps:$4 sm:$0xff]  }
  0xf5   : > { %2959 = vmatprep.subr.bf16.mxu0 %v4868_v14  ;;  %1346 = vmatprep.mubr.bf16.mxu1 %v3804_v56  ;;  %v4926_v14 = vld [vmem:[%s6361_s1 + $0x7a4] ss:$8 sps:$4 sm:$0xff]   ;;  %v4920_v56 = vld [vmem:[%s6361_s1 + $0x3a0] ss:$8 sps:$4 sm:$0xff]  }
  0xf6   : > { %2669 = vmatprep.mubr.bf16.mxu0 %v4116_v57  ;;  %v4924_v57 = vld [vmem:[%s6361_s1 + $0x7a0] ss:$8 sps:$4 sm:$0xff]  }
  0xf7   : > { %1638 = vmatpush1.bf16.msra.mxu1 %v4863_v60  ;;  %v4929_v60 = vld [vmem:[%s6361_s1 + $0x3b4] ss:$8 sps:$4 sm:$0xff]  }
  0xf8   : > { %2960 = vmatpush1.bf16.msra.mxu0 %v4866_v62  ;;  %1639 = vmatprep.subr.bf16.mxu1 %v4871_v0  ;;  %v4932_v62 = vld [vmem:[%s6361_s1 + $0x7b4] ss:$8 sps:$4 sm:$0xff]   ;;  %v4927_v0 = vld [vmem:[%s6361_s1 + $0x3b0] ss:$8 sps:$4 sm:$0xff]  }
  0xf9   : > { %2961 = vmatprep.subr.bf16.mxu0 %v4874_v1  ;;  %v4930_v1 = vld [vmem:[%s6361_s1 + $0x7b0] ss:$8 sps:$4 sm:$0xff]  }
  0xfa   : > { %1347 = vmatmul.mubr.bf16.gmra.mrb[4].mxu1 %v3803_v3  ;;  %v4942_v3 = vld [vmem:[%s6361_s1 + $0x7c4] ss:$8 sps:$4 sm:$0xff]  }
  0xfb   : > { %2670 = vmatmul.mubr.bf16.gmra.mrb[4].mxu0 %v4115_v4  ;;  %1640 = vmatpush1.bf16.msra.mxu1 %v4869_v2  ;;  %v4938_v2 = vld [vmem:[%s6361_s1 + $0x3c4] ss:$8 sps:$4 sm:$0xff]   ;;  %v4936_v4 = vld [vmem:[%s6361_s1 + $0x3c0] ss:$8 sps:$4 sm:$0xff]  }
  0xfc   : > { %2962 = vmatpush1.bf16.msra.mxu0 %v4872_v5  ;;  %1641 = vmatprep.subr.bf16.mxu1 %v4877_v6  ;;  %v4940_v5 = vld [vmem:[%s6361_s1 + $0x7c0] ss:$8 sps:$4 sm:$0xff]   ;;  %v4945_v6 = vld [vmem:[%s6361_s1 + $0x3d4] ss:$8 sps:$4 sm:$0xff]  }
  0xfd   : > { %2963 = vmatprep.subr.bf16.mxu0 %v4880_v7  ;;  %1356 = vmatprep.mubr.bf16.mxu1 %v3806_v8  ;;  %v4948_v7 = vld [vmem:[%s6361_s1 + $0x7d4] ss:$8 sps:$4 sm:$0xff]   ;;  %v4943_v8 = vld [vmem:[%s6361_s1 + $0x3d0] ss:$8 sps:$4 sm:$0xff]  }
  0xfe   : > { %2679 = vmatprep.mubr.bf16.mxu0 %v4118_v16  ;;  %v4946_v16 = vld [vmem:[%s6361_s1 + $0x7d0] ss:$8 sps:$4 sm:$0xff]  }
  0xff   : > { %1642 = vmatpush1.bf16.msra.mxu1 %v4875_v27  ;;  %v4954_v27 = vld [vmem:[%s6361_s1 + $0x3e4] ss:$8 sps:$4 sm:$0xff]  }
 0x100   : > { %2964 = vmatpush1.bf16.msra.mxu0 %v4878_v9  ;;  %1643 = vmatprep.subr.bf16.mxu1 %v4883_v10  ;;  %v4958_v9 = vld [vmem:[%s6361_s1 + $0x7e4] ss:$8 sps:$4 sm:$0xff]   ;;  %v4952_v10 = vld [vmem:[%s6361_s1 + $0x3e0] ss:$8 sps:$4 sm:$0xff]  }
 0x101   : > { %2965 = vmatprep.subr.bf16.mxu0 %v4886_v11  ;;  %v4956_v11 = vld [vmem:[%s6361_s1 + $0x7e0] ss:$8 sps:$4 sm:$0xff]  }
 0x102   : > { %1357 = vmatmul.mubr.bf16.gmra.mrb[8].mxu1 %v3805_v17  ;;  %v4959_v17 = vld [vmem:[%s6361_s1 + $0x3f0] ss:$8 sps:$4 sm:$0xff]  }
 0x103   : > { %2680 = vmatmul.mubr.bf16.gmra.mrb[8].mxu0 %v4117_v18  ;;  %1644 = vmatpush1.bf16.msra.mxu1 %v4881_v12  ;;  %v4961_v12 = vld [vmem:[%s6361_s1 + $0x3f4] ss:$8 sps:$4 sm:$0xff]   ;;  %v4962_v18 = vld [vmem:[%s6361_s1 + $0x7f0] ss:$8 sps:$4 sm:$0xff]  }
 0x104   : > { %2966 = vmatpush1.bf16.msra.mxu0 %v4884_v13  ;;  %1645 = vmatprep.subr.bf16.mxu1 %v4889_v20  ;;  %v4964_v13 = vld [vmem:[%s6361_s1 + $0x7f4] ss:$8 sps:$4 sm:$0xff]   ;;  %v4965_v20 = vld [vmem:[%s5381_s7 + $0xd8] ss:$8 sps:$4 sm:$0xff]  }
 0x105   : > { %2967 = vmatprep.subr.bf16.mxu0 %v4892_v21  ;;  %1366 = vmatprep.mubr.bf16.mxu1 %v3808_v22  ;;  %v4968_v21 = vld [vmem:[%s5381_s7 + $0x50] ss:$8 sps:$4 sm:$0xff]  }
 0x106   : > { %2689 = vmatprep.mubr.bf16.mxu0 %v4120_v23  ;;  %v4971_v22 = vld [vmem:[%s6361_s1 + $0x800] ss:$8 sps:$4 sm:$0xff]   ;;  %v4976_v23 = vld [vmem:[%s6361_s1 + $0x814] ss:$8 sps:$4 sm:$0xff]  }
 0x107   : > { %1646 = vmatpush1.bf16.msra.mxu1 %v4887_v29  ;;  %v4977_v29 = vld [vmem:[%s5381_s7 + $0xec] ss:$8 sps:$4 sm:$0xff]  }
 0x108   : > { %2968 = vmatpush1.bf16.msra.mxu0 %v4890_v45  ;;  %1647 = vmatprep.subr.bf16.mxu1 %v4895_v24  ;;  %v4979_v45 = vld [vmem:[%s5381_s7 + $0x64] ss:$8 sps:$4 sm:$0xff]   ;;  %v4974_v24 = vld [vmem:[%s6361_s1 + $0x810] ss:$8 sps:$4 sm:$0xff]  }
 0x109   : > { %2969 = vmatprep.subr.bf16.mxu0 %v4898_v25  ;;  %v4985_v25 = vld [vmem:[%s6361_s1 + $0x824] ss:$8 sps:$4 sm:$0xff]  }
 0x10a   : > { %1367 = vmatmul.mubr.bf16.gmra.mrb[12].mxu1 %v3807_v28  ;;  %v4982_v28 = vld [vmem:[%s5381_s7 + $0x60] ss:$8 sps:$4 sm:$0xff]  }
 0x10b   : > { %2690 = vmatmul.mubr.bf16.gmra.mrb[12].mxu0 %v4119_v30  ;;  %1648 = vmatpush1.bf16.msra.mxu1 %v4893_v26  ;;  %v4981_v26 = vld [vmem:[%s5381_s7 + $0xe8] ss:$8 sps:$4 sm:$0xff]  }
 0x10c   : > { %2970 = vmatpush1.bf16.msra.mxu0 %v4896_v31  ;;  %1649 = vmatprep.subr.bf16.mxu1 %v4901_v32  ;;  %v4983_v30 = vld [vmem:[%s6361_s1 + $0x820] ss:$8 sps:$4 sm:$0xff]   ;;  %v4988_v31 = vld [vmem:[%s6361_s1 + $0x834] ss:$8 sps:$4 sm:$0xff]  }
 0x10d   : > { %2971 = vmatprep.subr.bf16.mxu0 %v4904_v33  ;;  %1667 = vmatprep.mubr.bf16.mxu1 %v4967_v34  ;;  %v4989_v32 = vld [vmem:[%s5381_s7 + $0xfc] ss:$8 sps:$4 sm:$0xff]   ;;  %v4986_v34 = vld [vmem:[%s6361_s1 + $0x830] ss:$8 sps:$4 sm:$0xff]  }
 0x10e   : > { %2989 = vmatprep.mubr.bf16.mxu0 %v4970_v35  ;;  %v4991_v33 = vld [vmem:[%s5381_s7 + $0x74] ss:$8 sps:$4 sm:$0xff]  }
 0x10f   : > { %1650 = vmatpush1.bf16.msra.mxu1 %v4899_v46  ;;  %v4997_v35 = vld [vmem:[%s6361_s1 + $0x844] ss:$8 sps:$4 sm:$0xff]   ;;  %v4993_v46 = vld [vmem:[%s5381_s7 + $0xf8] ss:$8 sps:$4 sm:$0xff]  }
 0x110   : > { %2972 = vmatpush1.bf16.msra.mxu0 %v4902_v36  ;;  %1651 = vmatprep.subr.bf16.mxu1 %v4907_v37  ;;  %v4994_v36 = vld [vmem:[%s5381_s7 + $0x70] ss:$8 sps:$4 sm:$0xff]  }
 0x111   : > { %2973 = vmatprep.subr.bf16.mxu0 %v4910_v38  ;;  %v4995_v37 = vld [vmem:[%s6361_s1 + $0x840] ss:$8 sps:$4 sm:$0xff]   ;;  %v5000_v38 = vld [vmem:[%s6361_s1 + $0x854] ss:$8 sps:$4 sm:$0xff]  }
 0x113   : > { %1652 = vmatpush1.bf16.msra.mxu1 %v4905_v39  ;;  %v5001_v39 = vld [vmem:[%s5381_s7 + $0x10c] ss:$8 sps:$4 sm:$0xff]  }
 0x114   : > { %2974 = vmatpush1.bf16.msra.mxu0 %v4908_v40  ;;  %1653 = vmatprep.subr.bf16.mxu1 %v4913_v42  ;;  %v5003_v40 = vld [vmem:[%s5381_s7 + $0x84] ss:$8 sps:$4 sm:$0xff]   ;;  %v4998_v42 = vld [vmem:[%s6361_s1 + $0x850] ss:$8 sps:$4 sm:$0xff]  }
 0x115   : > { %2975 = vmatprep.subr.bf16.mxu0 %v4916_v48  ;;  %v5009_v48 = vld [vmem:[%s6361_s1 + $0x864] ss:$8 sps:$4 sm:$0xff]  }
 0x117   : > { %1654 = vmatpush1.bf16.msra.mxu1 %v4911_v49  ;;  %v5005_v49 = vld [vmem:[%s5381_s7 + $0x108] ss:$8 sps:$4 sm:$0xff]  }
 0x118   : > { %2976 = vmatpush1.bf16.msra.mxu0 %v4914_v51  ;;  %1655 = vmatprep.subr.bf16.mxu1 %v4922_v43  ;;  %v5006_v51 = vld [vmem:[%s5381_s7 + $0x80] ss:$8 sps:$4 sm:$0xff]  }
 0x119   : > { %2977 = vmatprep.subr.bf16.mxu0 %v4926_v14  ;;  %v5007_v43 = vld [vmem:[%s6361_s1 + $0x860] ss:$8 sps:$4 sm:$0xff]   ;;  %v5012_v14 = vld [vmem:[%s6361_s1 + $0x874] ss:$8 sps:$4 sm:$0xff]  }
 0x11b   : > { %1656 = vmatpush1.bf16.msra.mxu1 %v4920_v56  ;;  %v5010_v56 = vld [vmem:[%s6361_s1 + $0x870] ss:$8 sps:$4 sm:$0xff]  }
 0x11c   : > { %2978 = vmatpush1.bf16.msra.mxu0 %v4924_v57  ;;  %1657 = vmatprep.subr.bf16.mxu1 %v4929_v60  ;;  %v5015_v57 = vld [vmem:[%s6361_s1 + $0x884] ss:$8 sps:$4 sm:$0xff]   ;;  %v5013_v60 = vld [vmem:[%s6361_s1 + $0x880] ss:$8 sps:$4 sm:$0xff]  }
 0x11d   : > { %2979 = vmatprep.subr.bf16.mxu0 %v4932_v62  ;;  %v5018_v62 = vld [vmem:[%s6361_s1 + $0x894] ss:$8 sps:$4 sm:$0xff]  }
 0x11f   : > { %1658 = vmatpush1.bf16.msra.mxu1 %v4927_v0  ;;  %v5019_v0 = vld [vmem:[%s6361_s1 + $0x8a0] ss:$8 sps:$4 sm:$0xff]  }
 0x120   : > { %2980 = vmatpush1.bf16.msra.mxu0 %v4930_v1  ;;  %1659 = vmatprep.subr.bf16.mxu1 %v4938_v2  ;;  %v5024_v1 = vld [vmem:[%s6361_s1 + $0x8b4] ss:$8 sps:$4 sm:$0xff]   ;;  %v5022_v2 = vld [vmem:[%s6361_s1 + $0x8b0] ss:$8 sps:$4 sm:$0xff]  }
 0x121   : > { %2981 = vmatprep.subr.bf16.mxu0 %v4942_v3  ;;  %v5027_v3 = vld [vmem:[%s6361_s1 + $0x8c4] ss:$8 sps:$4 sm:$0xff]  }
 0x123   : > { %1660 = vmatpush1.bf16.msra.mxu1 %v4936_v4  ;;  %v5025_v4 = vld [vmem:[%s6361_s1 + $0x8c0] ss:$8 sps:$4 sm:$0xff]  }
 0x124   : > { %2982 = vmatpush1.bf16.msra.mxu0 %v4940_v5  ;;  %1661 = vmatprep.subr.bf16.mxu1 %v4945_v6  ;;  %v5030_v5 = vld [vmem:[%s6361_s1 + $0x8d4] ss:$8 sps:$4 sm:$0xff]   ;;  %v5028_v6 = vld [vmem:[%s6361_s1 + $0x8d0] ss:$8 sps:$4 sm:$0xff]  }
 0x125   : > { %2983 = vmatprep.subr.bf16.mxu0 %v4948_v7  ;;  %v5033_v7 = vld [vmem:[%s6361_s1 + $0x8e4] ss:$8 sps:$4 sm:$0xff]  }
 0x127   : > { %1662 = vmatpush1.bf16.msra.mxu1 %v4943_v8  ;;  %v5031_v8 = vld [vmem:[%s6361_s1 + $0x8e0] ss:$8 sps:$4 sm:$0xff]  }
 0x128   : > { %2984 = vmatpush1.bf16.msra.mxu0 %v4946_v16  ;;  %1663 = vmatprep.subr.bf16.mxu1 %v4954_v27  ;;  %v5036_v16 = vld [vmem:[%s6361_s1 + $0x8f4] ss:$8 sps:$4 sm:$0xff]   ;;  %v5034_v27 = vld [vmem:[%s6361_s1 + $0x8f0] ss:$8 sps:$4 sm:$0xff]  }
 0x129   : > { %2985 = vmatprep.subr.bf16.mxu0 %v4958_v9  ;;  %v4240_v9 = vld [vmem:[%s5381_s7 + $0xd0] sm:$0xff]  ;;  %s3636_s7 = sshll.u32 %s5105_s15, 3  ;;  %s6370_s15 = smov (!%p429_p9, %s5105_s15), 1 }
 0x12a   : > { %p423_p8 = scmp.lt.s32.totalorder %s3636_s7, 15  ;;  %s4325_s10 = sshll.u32 %s6370_s15, 2 }
 0x12b   : > { %1664 = vmatpush1.bf16.msra.mxu1 %v4952_v10  ;;  %v4280_v10 = vcombine.high %v5996_v15, %v4240_v9  ;;  %s433_s17 = scalar_lea.vmem %s6363_s3, %s4325_s10 }
 0x12c   : > { %2986 = vmatpush1.bf16.msra.mxu0 %v4956_v11  ;;  %1665 = vmatprep.subr.bf16.mxu1 %v4961_v12  ;;  %v4279_v11 = vcombine.low %v5996_v15, %v4240_v9  ;;  %s6368_s7 = smov (!%p423_p8, %s3636_s7), 15 }
 0x12d   : > { %2987 = vmatprep.subr.bf16.mxu0 %v4964_v13  ;;  %s4324_s5 = sshll.u32 %s6368_s7, 3 }
 0x12e   : > { %s6292_s9 = scalar_lea.vmem %s6362_s2, %s4324_s5 }
 0x12f   : > { %1666 = vmatpush1.bf16.msra.mxu1 %v4959_v17 }
 0x130   : > { %2988 = vmatpush1.bf16.msra.mxu0 %v4962_v18  ;;  %4334 = vmatprep.subr.bf16.mxu1 %v4973_v19 }
 0x131   : > { %3287 = vmatprep.subr.bf16.mxu0 %v4973_v19 }
 0x132   : > { %1668 = vmatmul.mubr.bf16.vlgmr.msra.gmra.mrb[0].mxu1 %v4965_v20 }
 0x133   : > { %2990 = vmatmul.mubr.bf16.vlgmr.msra.gmra.mrb[0].mxu0 %v4968_v21  ;;  %4350 = vmatpush1.bf16.msra.mxu1 %v4971_v22 }
 0x134   : > { %3288 = vmatpush1.bf16.msra.mxu0 %v4971_v22  ;;  %4335 = vmatprep.subr.bf16.mxu1 %v4976_v23 }
 0x135   : > { %3289 = vmatprep.subr.bf16.mxu0 %v4976_v23  ;;  %1677 = vmatprep.mubr.bf16.mxu1 %v4977_v29 }
 0x136   : > { %2999 = vmatprep.mubr.bf16.mxu0 %v4979_v45 }
 0x137   : > { %4351 = vmatpush1.bf16.msra.mxu1 %v4974_v24 }
 0x138   : > { %3290 = vmatpush1.bf16.msra.mxu0 %v4974_v24  ;;  %4336 = vmatprep.subr.bf16.mxu1 %v4985_v25 }
 0x139   : > { %3291 = vmatprep.subr.bf16.mxu0 %v4985_v25 }
 0x13a   : > { %1678 = vmatmul.mubr.bf16.gmra.mrb[4].mxu1 %v4981_v26 }
 0x13b   : > { %3000 = vmatmul.mubr.bf16.gmra.mrb[4].mxu0 %v4982_v28  ;;  %4352 = vmatpush1.bf16.msra.mxu1 %v4983_v30 }
 0x13c   : > { %3292 = vmatpush1.bf16.msra.mxu0 %v4983_v30  ;;  %4337 = vmatprep.subr.bf16.mxu1 %v4988_v31 }
 0x13d   : > { %3293 = vmatprep.subr.bf16.mxu0 %v4988_v31  ;;  %1687 = vmatprep.mubr.bf16.mxu1 %v4989_v32 }
 0x13e   : > { %3009 = vmatprep.mubr.bf16.mxu0 %v4991_v33 }
 0x13f   : > { %4353 = vmatpush1.bf16.msra.mxu1 %v4986_v34 }
 0x140   : > { %3294 = vmatpush1.bf16.msra.mxu0 %v4986_v34  ;;  %4338 = vmatprep.subr.bf16.mxu1 %v4997_v35 }
 0x141   : > { %3295 = vmatprep.subr.bf16.mxu0 %v4997_v35 }
 0x142   : > { %1688 = vmatmul.mubr.bf16.gmra.mrb[8].mxu1 %v4993_v46 }
 0x143   : > { %3010 = vmatmul.mubr.bf16.gmra.mrb[8].mxu0 %v4994_v36  ;;  %4354 = vmatpush1.bf16.msra.mxu1 %v4995_v37 }
 0x144   : > { %3296 = vmatpush1.bf16.msra.mxu0 %v4995_v37  ;;  %4339 = vmatprep.subr.bf16.mxu1 %v5000_v38 }
 0x145   : > { %3297 = vmatprep.subr.bf16.mxu0 %v5000_v38  ;;  %1697 = vmatprep.mubr.bf16.mxu1 %v5001_v39 }
 0x146   : > { %3019 = vmatprep.mubr.bf16.mxu0 %v5003_v40 }
 0x147   : > { %4355 = vmatpush1.bf16.msra.mxu1 %v4998_v42 }
 0x148   : > { %3298 = vmatpush1.bf16.msra.mxu0 %v4998_v42  ;;  %4340 = vmatprep.subr.bf16.mxu1 %v5009_v48 }
 0x149   : > { %3299 = vmatprep.subr.bf16.mxu0 %v5009_v48 }
 0x14a   : > { %1698 = vmatmul.mubr.bf16.gmra.mrb[12].mxu1 %v5005_v49 }
 0x14b   : > { %3020 = vmatmul.mubr.bf16.gmra.mrb[12].mxu0 %v5006_v51  ;;  %4356 = vmatpush1.bf16.msra.mxu1 %v5007_v43 }
 0x14c   : > { %3300 = vmatpush1.bf16.msra.mxu0 %v5007_v43  ;;  %4341 = vmatprep.subr.bf16.mxu1 %v5012_v14 }
 0x14d   : > { %3301 = vmatprep.subr.bf16.mxu0 %v5012_v14  ;;  %3319 = vmatprep.mubr.bf16.mxu0 %v4274_v53  ;;  %v5016_v53 = vld [vmem:[%s6361_s1 + $0x890] ss:$8 sps:$4 sm:$0xff]  }
 0x14e   : > { %3339 = vmatprep.mubr.bf16.mxu1 %v4278_v55  ;;  %v5021_v55 = vld [vmem:[%s6361_s1 + $0x8a4] ss:$8 sps:$4 sm:$0xff]  }
 0x14f   : > { %4357 = vmatpush1.bf16.msra.mxu1 %v5010_v56 }
 0x150   : > { %3302 = vmatpush1.bf16.msra.mxu0 %v5010_v56  ;;  %4342 = vmatprep.subr.bf16.mxu1 %v5015_v57 }
 0x151   : > { %3303 = vmatprep.subr.bf16.mxu0 %v5015_v57 }
 0x153   : > { %4358 = vmatpush1.bf16.msra.mxu1 %v5013_v60 }
 0x154   : > { %3304 = vmatpush1.bf16.msra.mxu0 %v5013_v60  ;;  %4343 = vmatprep.subr.bf16.mxu1 %v5018_v62 }
 0x155   : > { %3305 = vmatprep.subr.bf16.mxu0 %v5018_v62 }
 0x157   : > { %4359 = vmatpush1.bf16.msra.mxu1 %v5016_v53 }
 0x158   : > { %3306 = vmatpush1.bf16.msra.mxu0 %v5016_v53  ;;  %4344 = vmatprep.subr.bf16.mxu1 %v5021_v55 }
 0x159   : > { %3307 = vmatprep.subr.bf16.mxu0 %v5021_v55 }
 0x15b   : > { %4360 = vmatpush1.bf16.msra.mxu1 %v5019_v0 }
 0x15c   : > { %3308 = vmatpush1.bf16.msra.mxu0 %v5019_v0  ;;  %4345 = vmatprep.subr.bf16.mxu1 %v5024_v1 }
 0x15d   : > { %3309 = vmatprep.subr.bf16.mxu0 %v5024_v1 }
 0x15f   : > { %4361 = vmatpush1.bf16.msra.mxu1 %v5022_v2 }
 0x160   : > { %3310 = vmatpush1.bf16.msra.mxu0 %v5022_v2  ;;  %4346 = vmatprep.subr.bf16.mxu1 %v5027_v3 }
 0x161   : > { %3311 = vmatprep.subr.bf16.mxu0 %v5027_v3 }
 0x163   : > { %4362 = vmatpush1.bf16.msra.mxu1 %v5025_v4 }
 0x164   : > { %3312 = vmatpush1.bf16.msra.mxu0 %v5025_v4  ;;  %4347 = vmatprep.subr.bf16.mxu1 %v5030_v5 }
 0x165   : > { %3313 = vmatprep.subr.bf16.mxu0 %v5030_v5 }
 0x167   : > { %4363 = vmatpush1.bf16.msra.mxu1 %v5028_v6 }
 0x168   : > { %3314 = vmatpush1.bf16.msra.mxu0 %v5028_v6  ;;  %4348 = vmatprep.subr.bf16.mxu1 %v5033_v7 }
 0x169   : > { %3315 = vmatprep.subr.bf16.mxu0 %v5033_v7 }
 0x16b   : > { %4364 = vmatpush1.bf16.msra.mxu1 %v5031_v8 }
 0x16c   : > { %3316 = vmatpush1.bf16.msra.mxu0 %v5031_v8  ;;  %4349 = vmatprep.subr.bf16.mxu1 %v5036_v16 }
 0x16d   : > { %3317 = vmatprep.subr.bf16.mxu0 %v5036_v16 }
 0x16f   : > { %4365 = vmatpush1.bf16.msra.mxu1 %v5034_v27 }
 0x170   : > { %3318 = vmatpush1.bf16.msra.mxu0 %v5034_v27 }
 0x172   : > { %3340 = vmatmul.mubr.bf16.vlgmr.msra.gmra.mrb[16].mxu1 %v4277_v54 }
 0x173   : > { %3320 = vmatmul.mubr.bf16.vlgmr.msra.gmra.mrb[0].mxu0 %v4273_v52  ;;  %3349 = vmatprep.mubr.bf16.mxu1 %v4280_v10 }
 0x174   : > { %3329 = vmatprep.mubr.bf16.mxu0 %v4276_v61 }
 0x17a   : > { %3350 = vmatmul.mubr.bf16.gmra.mrb[20].mxu1 %v4279_v11 }
 0x17b   : > { %3330 = vmatmul.mubr.bf16.gmra.mrb[4].mxu0 %v4275_v63 }
 0x205   : > { %v1669_v12 = vpop.f32.mrb[0].mxu1 }
 0x206   : > { %v1671_v13 = vpop.f32.mrb[1].mxu1 }
 0x207   : > { %v1673_v58 = vpop.f32.mrb[2].mxu1 }
 0x208   : > { %v1675_v41 = vpop.f32.mrb[3].mxu1 }
 0x20d   : > { %v1679_v52 = vpop.f32.mrb[4].mxu1 }
 0x20e   : > { %v6274_v17 = vpop.f32.mrb[5].mxu1 }
 0x20f   : > { %v6276_v47 = vpop.f32.mrb[6].mxu1 }
 0x210   : > { %v6278_v50 = vpop.f32.mrb[7].mxu1 }
 0x215   : > { %v1689_v54 = vpop.f32.mrb[8].mxu1 }
 0x216   : > { %v3011_v61 = vpop.f32.mrb[8].mxu0  ;;  %v1691_v15 = vpop.f32.mrb[9].mxu1 }
 0x217   : > { %v4374_v18 = vadd.f32 %v3011_v61, %v1689_v54  ;;  %v3013_v19 = vpop.f32.mrb[9].mxu0  ;;  %v1693_v44 = vpop.f32.mrb[10].mxu1 }
 0x218   : > { %v4376_v20 = vadd.f32 %v3013_v19, %v1691_v15  ;;  %v3015_v59 = vpop.f32.mrb[10].mxu0  ;;  %v1695_v21 = vpop.f32.mrb[11].mxu1 }
 0x219   : > { %v4378_v63 = vadd.f32 %v3015_v59, %v1693_v44  ;;  %v3017_v22 = vpop.f32.mrb[11].mxu0 }
 0x21a   : > { %v4380_v23 = vadd.f32 %v3017_v22, %v1695_v21 }
 0x21d   : > { %v1699_v29 = vpop.f32.mrb[12].mxu1 }
 0x21e   : > { %v3021_v45 = vpop.f32.mrb[12].mxu0  ;;  %v1701_v25 = vpop.f32.mrb[13].mxu1 }
 0x21f   : > { %v4382_v24 = vadd.f32 %v3021_v45, %v1699_v29  ;;  %v3023_v26 = vpop.f32.mrb[13].mxu0  ;;  %v1703_v30 = vpop.f32.mrb[14].mxu1 }
 0x220   : > { %v4384_v28 = vadd.f32 %v3023_v26, %v1701_v25  ;;  %v3025_v31 = vpop.f32.mrb[14].mxu0  ;;  %v1705_v33 = vpop.f32.mrb[15].mxu1 }
 0x221   : > { %v4386_v32 = vadd.f32 %v3025_v31, %v1703_v30  ;;  %v3027_v34 = vpop.f32.mrb[15].mxu0 }
 0x222   : > { %v4388_v35 = vadd.f32 %v3027_v34, %v1705_v33 }
 0x245   : > { %v3341_v36 = vpop.f32.mrb[16].mxu1 }
 0x246   : > { %v3321_v46 = vpop.f32.mrb[0].mxu0  ;;  %v6283_v38 = vadd.f32 %v4374_v18, %v3341_v36  ;;  %v3343_v40 = vpop.f32.mrb[17].mxu1 }
 0x247   : > { %v6281_v37 = vadd.f32 %v3321_v46, %v1669_v12  ;;  %v3323_v39 = vpop.f32.mrb[1].mxu0  ;;  %v6287_v48 = vadd.f32 %v4376_v20, %v3343_v40  ;;  %v3345_v51 = vpop.f32.mrb[18].mxu1 }
 0x248   : > { %v6285_v42 = vadd.f32 %v3323_v39, %v1671_v13  ;;  %v3325_v49 = vpop.f32.mrb[2].mxu0  ;;  %v6296_v14 = vadd.f32 %v4378_v63, %v3345_v51  ;;  %v3347_v57 = vpop.f32.mrb[19].mxu1 }
 0x249   : > { %v6294_v43 = vadd.f32 %v3325_v49, %v1673_v58  ;;  %v3327_v56 = vpop.f32.mrb[3].mxu0  ;;  %v4330_v62 = vpack.c.bf16 %v6287_v48, %v6283_v38  ;;  %v6304_v55 = vadd.f32 %v4380_v23, %v3347_v57 }
 0x24a   : > { %v4326_v60 = vpack.c.bf16 %v6285_v42, %v6281_v37  ;;  %v6302_v53 = vadd.f32 %v3327_v56, %v1675_v41 }
 0x24b   : > { %v3432_v0 = vadd.f32 %v6294_v43, %v6281_v37  ;;  %3428 = vst [vmem:[%s6292_s9 + $0x20] sm:$0xff] %v4330_v62  ;;  %v4331_v3 = vpack.c.bf16 %v6304_v55, %v6296_v14 }
 0x24c   : > { %3424 = vst [vmem:[%s6292_s9] sm:$0xff] %v4326_v60  ;;  %v4327_v1 = vpack.c.bf16 %v6302_v53, %v6294_v43  ;;  %v3445_v2 = vadd.f32 %v6302_v53, %v6285_v42 }
 0x24d   : > { %3429 = vst [vmem:[%s6292_s9 + $0x28] sm:$0xff] %v4331_v3  ;;  %v3351_v5 = vpop.f32.mrb[20].mxu1 }
 0x24e   : > { %3425 = vst [vmem:[%s6292_s9 + $0x8] sm:$0xff] %v4327_v1  ;;  %v3331_v4 = vpop.f32.mrb[4].mxu0  ;;  %v4383_v7 = vadd.f32 %v4382_v24, %v3351_v5  ;;  %v3353_v16 = vpop.f32.mrb[21].mxu1 }
 0x24f   : > { %v4370_v6 = vadd.f32 %v3331_v4, %v1679_v52  ;;  %v3333_v8 = vpop.f32.mrb[5].mxu0  ;;  %v4385_v9 = vadd.f32 %v4384_v28, %v3353_v16  ;;  %v3355_v11 = vpop.f32.mrb[22].mxu1 }
 0x250   : > { %v4371_v27 = vadd.f32 %v3333_v8, %v6274_v17  ;;  %v3335_v10 = vpop.f32.mrb[6].mxu0  ;;  %v4387_v58 = vadd.f32 %v4386_v32, %v3355_v11  ;;  %v3357_v54 = vpop.f32.mrb[23].mxu1 }
 0x251   : > { %v3433_v12 = vadd.f32 %v4370_v6, %v3432_v0  ;;  %v4372_v13 = vadd.f32 %v3335_v10, %v6276_v47  ;;  %v3337_v41 = vpop.f32.mrb[7].mxu0  ;;  %v4332_v18 = vpack.c.bf16 %v4385_v9, %v4383_v7  ;;  %v4389_v20 = vadd.f32 %v4388_v35, %v3357_v54 }
 0x252   : > { %v4328_v61 = vpack.c.bf16 %v4371_v27, %v4370_v6  ;;  %v3446_v52 = vadd.f32 %v4371_v27, %v3445_v2  ;;  %v4373_v15 = vadd.f32 %v3337_v41, %v6278_v50 }
 0x253   : > { %v3434_v19 = vadd.f32 %v4372_v13, %v3433_v12  ;;  %3430 = vst [vmem:[%s6292_s9 + $0x30] sm:$0xff] %v4332_v18  ;;  %v4333_v63 = vpack.c.bf16 %v4389_v20, %v4387_v58 }
 0x254   : > { %3426 = vst [vmem:[%s6292_s9 + $0x10] sm:$0xff] %v4328_v61  ;;  %v4329_v17 = vpack.c.bf16 %v4373_v15, %v4372_v13  ;;  %v3447_v44 = vadd.f32 %v4373_v15, %v3446_v52 }
 0x255   : > { %v3435_v59 = vadd.f32 %v6283_v38, %v3434_v19  ;;  %3431 = vst [vmem:[%s6292_s9 + $0x38] sm:$0xff] %v4333_v63 }
 0x256   : > { %3427 = vst [vmem:[%s6292_s9 + $0x18] sm:$0xff] %v4329_v17  ;;  %v3448_v47 = vadd.f32 %v6287_v48, %v3447_v44 }
 0x257   : > { %v3436_v21 = vadd.f32 %v6296_v14, %v3435_v59 }
 0x258   : > { %v3449_v22 = vadd.f32 %v6304_v55, %v3448_v47 }
 0x259   : > { %v3437_v23 = vadd.f32 %v4383_v7, %v3436_v21 }
 0x25a   : > { %v3450_v29 = vadd.f32 %v4385_v9, %v3449_v22 }
 0x25b   : > { %v3438_v50 = vadd.f32 %v4387_v58, %v3437_v23 }
 0x25c   : > { %v3451_v45 = vadd.f32 %v4389_v20, %v3450_v29 }
 0x25d   : > { %v3439_v24 = vrot.slane %v3438_v50, 4 }
 0x25e   : > { %v3452_v25 = vrot.slane %v3451_v45, 4 }
 0x25f   : > { %v3440_v26 = vadd.f32 %v3439_v24, %v3438_v50 }
 0x260   : > { %v3453_v28 = vadd.f32 %v3452_v25, %v3451_v45 }
 0x261   : > { %v3441_v30 = vrot.slane %v3440_v26, 2 }
 0x262   : > { %v3454_v31 = vrot.slane %v3453_v28, 2 }
 0x263   : > { %v3442_v32 = vadd.f32 %v3441_v30, %v3440_v26 }
 0x264   : > { %v3455_v33 = vadd.f32 %v3454_v31, %v3453_v28 }
 0x265   : > { %v3443_v34 = vrot.slane %v3442_v32, 1 }
 0x266   : > { %v3456_v35 = vrot.slane %v3455_v33, 1 }
 0x267   : > { %v6329_v46 = vadd.f32 %v3443_v34, %v3442_v32 }
 0x268   : > { %v6331_v36 = vadd.f32 %v3456_v35, %v3455_v33 }
 0x269   : > { %v3458_v39 = vmul.f32 0.015625, %v6329_v46 }
 0x26a   : > { %v3459_v40 = vmul.f32 0.015625, %v6331_v36 }
 0x26b   : > { %v3460_v49 = vsub.f32 %v6281_v37, %v3458_v39  ;;  %v3462_v51 = vsub.f32 %v6294_v43, %v3458_v39  ;;  %v3464_v56 = vsub.f32 %v4370_v6, %v3458_v39  ;;  %v3466_v57 = vsub.f32 %v4372_v13, %v3458_v39 }
 0x26c   : > { %v3468_v60 = vsub.f32 %v6283_v38, %v3458_v39  ;;  %v3470_v62 = vsub.f32 %v6296_v14, %v3458_v39  ;;  %v3472_v0 = vsub.f32 %v4383_v7, %v3458_v39  ;;  %v3474_v1 = vsub.f32 %v4387_v58, %v3458_v39 }
 0x26d   : > { %v3476_v2 = vmul.f32 %v3460_v49, %v3460_v49  ;;  %v3478_v3 = vmul.f32 %v3462_v51, %v3462_v51  ;;  %v3480_v4 = vmul.f32 %v3464_v56, %v3464_v56  ;;  %v3482_v5 = vmul.f32 %v3466_v57, %v3466_v57 }
 0x26e   : > { %v3461_v16 = vsub.f32 %v6285_v42, %v3459_v40  ;;  %v3463_v10 = vsub.f32 %v6302_v53, %v3459_v40  ;;  %v3465_v37 = vsub.f32 %v4371_v27, %v3459_v40  ;;  %v3467_v11 = vsub.f32 %v4373_v15, %v3459_v40 }
 0x26f   : > { %v3492_v8 = vadd.f32 %v3478_v3, %v3476_v2  ;;  %v3469_v43 = vsub.f32 %v6287_v48, %v3459_v40  ;;  %v3471_v6 = vsub.f32 %v6304_v55, %v3459_v40  ;;  %v3473_v38 = vsub.f32 %v4385_v9, %v3459_v40 }
 0x270   : > { %v3475_v14 = vsub.f32 %v4389_v20, %v3459_v40  ;;  %v3477_v7 = vmul.f32 %v3461_v16, %v3461_v16  ;;  %v3479_v13 = vmul.f32 %v3463_v10, %v3463_v10  ;;  %v3484_v58 = vmul.f32 %v3468_v60, %v3468_v60 }
 0x271   : > { %v3493_v12 = vadd.f32 %v3492_v8, %v3480_v4  ;;  %v3481_v54 = vmul.f32 %v3465_v37, %v3465_v37  ;;  %v3486_v52 = vmul.f32 %v3470_v62, %v3470_v62  ;;  %v3483_v42 = vmul.f32 %v3467_v11, %v3467_v11 }
 0x272   : > { %v3505_v61 = vadd.f32 %v3479_v13, %v3477_v7  ;;  %v3488_v53 = vmul.f32 %v3472_v0, %v3472_v0  ;;  %v3485_v15 = vmul.f32 %v3469_v43, %v3469_v43  ;;  %v3490_v17 = vmul.f32 %v3474_v1, %v3474_v1 }
 0x273   : > { %v3494_v41 = vadd.f32 %v3493_v12, %v3482_v5  ;;  %v3487_v9 = vmul.f32 %v3471_v6, %v3471_v6  ;;  %v3489_v59 = vmul.f32 %v3473_v38, %v3473_v38  ;;  %v3491_v21 = vmul.f32 %v3475_v14, %v3475_v14 }
 0x274   : > { %v3506_v19 = vadd.f32 %v3505_v61, %v3481_v54 }
 0x275   : > { %v3495_v18 = vadd.f32 %v3494_v41, %v3484_v58 }
 0x276   : > { %v3507_v48 = vadd.f32 %v3506_v19, %v3483_v42 }
 0x277   : > { %v3496_v27 = vadd.f32 %v3495_v18, %v3486_v52 }
 0x278   : > { %v3508_v44 = vadd.f32 %v3507_v48, %v3485_v15 }
 0x279   : > { %v3497_v55 = vadd.f32 %v3496_v27, %v3488_v53 }
 0x27a   : > { %v3509_v63 = vadd.f32 %v3508_v44, %v3487_v9 }
 0x27b   : > { %v3498_v20 = vadd.f32 %v3497_v55, %v3490_v17 }
 0x27c   : > { %v3510_v22 = vadd.f32 %v3509_v63, %v3489_v59 }
 0x27d   : > { %v3499_v47 = vrot.slane %v3498_v20, 4 }
 0x27e   : > { %v3511_v29 = vadd.f32 %v3510_v22, %v3491_v21 }
 0x27f   : > { %v3500_v23 = vadd.f32 %v3499_v47, %v3498_v20 }
 0x280   : > { %v3512_v45 = vrot.slane %v3511_v29, 4 }
 0x281   : > { %v3501_v50 = vrot.slane %v3500_v23, 2 }
 0x282   : > { %v3513_v25 = vadd.f32 %v3512_v45, %v3511_v29 }
 0x283   : > { %v3502_v24 = vadd.f32 %v3501_v50, %v3500_v23 }
 0x284   : > { %v3514_v28 = vrot.slane %v3513_v25, 2 }
 0x285   : > { %v3503_v26 = vrot.slane %v3502_v24, 1 }
 0x286   : > { %v3515_v31 = vadd.f32 %v3514_v28, %v3513_v25 }
 0x287   : > { %v3504_v30 = vadd.f32 %v3503_v26, %v3502_v24 }
 0x288   : > { %v3516_v33 = vrot.slane %v3515_v31, 1 }
 0x289   : > { %v3519_v32 = vsel %vm3518_vm0, %v6329_v46, %v3504_v30 }
 0x28a   : > { %v3517_v34 = vadd.f32 %v3516_v33, %v3515_v31 }
 0x28c   : > { %v3520_v35 = vsel %vm3518_vm0, %v6331_v36, %v3517_v34 }
 0x28d   : > { %v3523_v39 = vcombine.low %v3519_v32, %v3520_v35 }
 0x28f   : > { %4321 = vst.sshfl [vmem:[%s433_s17] sm:$0x33 pattern:$0x76325410] %v3523_v39 }
 0x290 PF: > { %p11_p10 = scmp.ge.s32.totalorder %s5108_s16, 4   ;;  %s6364_s12 = smov %s5063_s13 }
 0x291   : > { %s6365_s13 = smov %s5117_s19  ;;  %s6366_s14 = smov %s5108_s16 }
 0x292   :  { %13 = sbr.rel (!%p11_p10) target bundleno = 2 (0x2), region = 126 }

// kernel: discriminator_forward.7
= control target key start
LH: loop header
LB: loop body
LE: loop exit
PB: predicated region body
PF: predicated region fallthrough
CT: control target
= control target key end

     0   :  { %v48_v24 = vlaneseq  ;;  %s1018_s0 = inlined_call_operand.vmem [shape: bf16[32,512], index: 0, kind: input, shape index: {}]   ;;  %s1019_s1 = inlined_call_operand.vmem [shape: f32[1,512], index: 1, kind: input, shape index: {}]   ;;  %s1020_s2 = inlined_call_operand.vmem [shape: f32[1,512], index: 2, kind: input, shape index: {}]   ;;  %s1021_s3 = inlined_call_operand.vmem [shape: bf16[512,128], index: 3, kind: input, shape index: {}]   ;;  %s1022_s4 = inlined_call_operand.vmem [shape: f32[1,128], index: 4, kind: input, shape index: {}]   ;;  %s1023_s5 = inlined_call_operand.hbm [shape: f32[2,128], index: 5, kind: output, shape index: {}]  }
   0x1   :  { %v708_v0 = vld [vmem:[%s1021_s3 + $0x40] sm:$0xff]   ;;  %v712_v4 = vld [vmem:[%s1021_s3 + $0x48] sm:$0xff]   ;;  %v716_v8 = vld [vmem:[%s1021_s3 + $0x50] sm:$0xff]  }
   0x2   :  { %v709_v1 = vld [vmem:[%s1021_s3 + $0xc0] sm:$0xff]   ;;  %663 = vmatprep.subr.bf16.mxu0 %v708_v0  ;;  %v713_v5 = vld [vmem:[%s1021_s3 + $0xc8] sm:$0xff]   ;;  %v717_v9 = vld [vmem:[%s1021_s3 + $0xd0] sm:$0xff]   ;;  %v879_v29 = vshrl.u32 %v48_v24, 7 }
   0x3   :  { %v710_v2 = vld [vmem:[%s1021_s3] sm:$0xff]   ;;  %685 = vmatprep.subr.bf16.mxu1 %v709_v1  ;;  %v714_v6 = vld [vmem:[%s1021_s3 + $0x8] sm:$0xff]   ;;  %v718_v10 = vld [vmem:[%s1021_s3 + $0x10] sm:$0xff]  }
   0x4   :  { %v711_v3 = vld [vmem:[%s1021_s3 + $0x80] sm:$0xff]   ;;  %664 = vmatpush3.bf16.msra.mxu0 %v710_v2  ;;  %v715_v7 = vld [vmem:[%s1021_s3 + $0x88] sm:$0xff]   ;;  %v719_v11 = vld [vmem:[%s1021_s3 + $0x90] sm:$0xff]   ;;  %v54_v34 = vsub.s32 1, %v879_v29  ;;  %v62_v38 = vsub.s32 3, %v879_v29  ;;  %v50_v39 = vsub.s32 0, %v879_v29 }
   0x5   :  { %686 = vmatpush3.bf16.msra.mxu1 %v711_v3  ;;  %665 = vmatprep.subr.bf16.mxu0 %v712_v4  ;;  %v720_v12 = vld [vmem:[%s1021_s3 + $0x58] sm:$0xff]   ;;  %v724_v16 = vld [vmem:[%s1021_s3 + $0x60] sm:$0xff]   ;;  %v728_v20 = vld [vmem:[%s1021_s3 + $0x68] sm:$0xff]   ;;  %v58_v40 = vsub.s32 2, %v879_v29 }
   0x6   :  { %687 = vmatprep.subr.bf16.mxu1 %v713_v5  ;;  %v721_v13 = vld [vmem:[%s1021_s3 + $0xd8] sm:$0xff]   ;;  %v725_v17 = vld [vmem:[%s1021_s3 + $0xe0] sm:$0xff]   ;;  %v729_v21 = vld [vmem:[%s1021_s3 + $0xe8] sm:$0xff]  }
   0x7   :  { %v722_v14 = vld [vmem:[%s1021_s3 + $0x18] sm:$0xff]   ;;  %v726_v18 = vld [vmem:[%s1021_s3 + $0x20] sm:$0xff]   ;;  %v730_v22 = vld [vmem:[%s1021_s3 + $0x28] sm:$0xff]  }
   0x8   :  { %666 = vmatpush3.bf16.msra.mxu0 %v714_v6  ;;  %v723_v15 = vld [vmem:[%s1021_s3 + $0x98] sm:$0xff]   ;;  %v727_v19 = vld [vmem:[%s1021_s3 + $0xa0] sm:$0xff]   ;;  %v731_v23 = vld [vmem:[%s1021_s3 + $0xa8] sm:$0xff]  }
   0x9   :  { %688 = vmatpush3.bf16.msra.mxu1 %v715_v7  ;;  %667 = vmatprep.subr.bf16.mxu0 %v716_v8  ;;  %v732_v25 = vld [vmem:[%s1021_s3 + $0x70] sm:$0xff]   ;;  %v736_v30 = vld [vmem:[%s1021_s3 + $0x78] sm:$0xff]   ;;  %v897_v35 = vld [vmem:[%s1018_s0] sm:$0xff] }
   0xa   :  { %689 = vmatprep.subr.bf16.mxu1 %v717_v9  ;;  %v733_v26 = vld [vmem:[%s1021_s3 + $0xf0] sm:$0xff]   ;;  %v737_v31 = vld [vmem:[%s1021_s3 + $0xf8] sm:$0xff]   ;;  %v907_v37 = vld [vmem:[%s1018_s0 + $0x20] sm:$0xff]  ;;  %v30_v42 = vunpack.c.l.bf16 %v897_v35  ;;  %v31_v43 = vunpack.c.h.bf16 %v897_v35 }
   0xb   :  { %v734_v27 = vld [vmem:[%s1021_s3 + $0x30] sm:$0xff]   ;;  %v738_v32 = vld [vmem:[%s1021_s3 + $0x38] sm:$0xff]   ;;  %v924_v46 = vld [vmem:[%s1019_s1] sm:$0xf]  ;;  %v38_v48 = vunpack.c.l.bf16 %v907_v37  ;;  %v39_v49 = vunpack.c.h.bf16 %v907_v37 }
   0xc   :  { %668 = vmatpush3.bf16.msra.mxu0 %v718_v10  ;;  %v735_v28 = vld [vmem:[%s1021_s3 + $0xb0] sm:$0xff]   ;;  %v739_v33 = vld [vmem:[%s1021_s3 + $0xb8] sm:$0xff]   ;;  %v929_v47 = vld [vmem:[%s1020_s2] sm:$0xf]  ;;  %v55_v55 = vrot.slane %v924_v46, %v54_v34 }
   0xd   :  { %690 = vmatpush3.bf16.msra.mxu1 %v719_v11  ;;  %669 = vmatprep.subr.bf16.mxu0 %v720_v12  ;;  %v902_v36 = vld [vmem:[%s1018_s0 + $0x10] sm:$0xff]  ;;  %v938_v52 = vld [vmem:[%s1018_s0 + $0x8] sm:$0xff]  ;;  %v943_v53 = vld [vmem:[%s1018_s0 + $0x18] sm:$0xff]  ;;  %v93_v56 = vrot.slane %v929_v47, %v54_v34 }
   0xe   :  { %691 = vmatprep.subr.bf16.mxu1 %v721_v13  ;;  %v915_v41 = vld [vmem:[%s1018_s0 + $0x30] sm:$0xff]  ;;  %v34_v44 = vunpack.c.l.bf16 %v902_v36  ;;  %v35_v45 = vunpack.c.h.bf16 %v902_v36  ;;  %v948_v54 = vld [vmem:[%s1018_s0 + $0x28] sm:$0xff]  ;;  %v955_v57 = vld [vmem:[%s1018_s0 + $0x38] sm:$0xff]  ;;  %v32_v58 = vunpack.c.l.bf16 %v938_v52  ;;  %v33_v59 = vunpack.c.h.bf16 %v938_v52 }
   0xf   :  { %v42_v50 = vunpack.c.l.bf16 %v915_v41  ;;  %v43_v51 = vunpack.c.h.bf16 %v915_v41 }
  0x10   :  { %670 = vmatpush3.bf16.msra.mxu0 %v722_v14 }
  0x11   :  { %692 = vmatpush3.bf16.msra.mxu1 %v723_v15  ;;  %671 = vmatprep.subr.bf16.mxu0 %v724_v16 }
  0x12   :  { %693 = vmatprep.subr.bf16.mxu1 %v725_v17 }
  0x14   :  { %672 = vmatpush3.bf16.msra.mxu0 %v726_v18 }
  0x15   :  { %694 = vmatpush3.bf16.msra.mxu1 %v727_v19  ;;  %673 = vmatprep.subr.bf16.mxu0 %v728_v20 }
  0x16   :  { %695 = vmatprep.subr.bf16.mxu1 %v729_v21 }
  0x18   :  { %674 = vmatpush3.bf16.msra.mxu0 %v730_v22 }
  0x19   :  { %696 = vmatpush3.bf16.msra.mxu1 %v731_v23  ;;  %675 = vmatprep.subr.bf16.mxu0 %v732_v25 }
  0x1a   :  { %697 = vmatprep.subr.bf16.mxu1 %v733_v26 }
  0x1c   :  { %676 = vmatpush3.bf16.msra.mxu0 %v734_v27 }
  0x1d   :  { %698 = vmatpush3.bf16.msra.mxu1 %v735_v28  ;;  %677 = vmatprep.subr.bf16.mxu0 %v736_v30 }
  0x1e   :  { %699 = vmatprep.subr.bf16.mxu1 %v737_v31 }
  0x20   :  { %678 = vmatpush3.bf16.msra.mxu0 %v738_v32 }
  0x21   :  { %700 = vmatpush3.bf16.msra.mxu1 %v739_v33 }
  0x22   :  { %10 = vsyncpa [#allocation3], 0  ;;  %v36_v60 = vunpack.c.l.bf16 %v943_v53  ;;  %v37_v61 = vunpack.c.h.bf16 %v943_v53  ;;  %v40_v62 = vunpack.c.l.bf16 %v948_v54  ;;  %v41_v63 = vunpack.c.h.bf16 %v948_v54  ;;  %s764_s25 = smov [#allocation2]  }
  0x23   :  { %v69_v0 = vmul.f32 %v55_v55, %v31_v43  ;;  %v73_v1 = vmul.f32 %v55_v55, %v35_v45  ;;  %v77_v2 = vmul.f32 %v55_v55, %v39_v49  ;;  %v81_v3 = vmul.f32 %v55_v55, %v43_v51  ;;  %s622_s26 = sshll.u32 %s764_s25, 4  ;;  %s623_s26 = int_to_ptr.vmem [resolvable:$true] %s622_s26 }
  0x24   :  { %v44_v4 = vunpack.c.l.bf16 %v955_v57  ;;  %v45_v5 = vunpack.c.h.bf16 %v955_v57  ;;  %v63_v6 = vrot.slane %v924_v46, %v62_v38  ;;  %v101_v7 = vrot.slane %v929_v47, %v62_v38  ;;  %s740_s27 = scalar_lea.vmem %s623_s26, 32  ;;  %p745_p1 = scmp.lt.s32.totalorder %s623_s26, %s623_s26 }
  0x25   :  { %v107_v8 = vadd.f32 %v93_v56, %v69_v0  ;;  %v111_v9 = vadd.f32 %v93_v56, %v73_v1  ;;  %v115_v10 = vadd.f32 %v93_v56, %v77_v2  ;;  %v119_v11 = vadd.f32 %v93_v56, %v81_v3  ;;  %p741_p0 = scmp.ne.s32.totalorder %s623_s26, %s740_s27  ;;  %p746_p2 = scmp.lt.s32.totalorder %s740_s27, %s740_s27 }
  0x26   :  { %v71_v12 = vmul.f32 %v63_v6, %v33_v59  ;;  %v75_v13 = vmul.f32 %v63_v6, %v37_v61  ;;  %v79_v14 = vmul.f32 %v63_v6, %v41_v63  ;;  %v83_v15 = vmul.f32 %v63_v6, %v45_v5 }
  0x27   :  { %vm123_vm0 = vcmp.gt.f32.partialorder %v107_v8, 0.0  ;;  %vm127_vm1 = vcmp.gt.f32.partialorder %v111_v9, 0.0  ;;  %vm131_vm2 = vcmp.gt.f32.partialorder %v115_v10, 0.0  ;;  %vm135_vm3 = vcmp.gt.f32.partialorder %v119_v11, 0.0  ;;  %p747_p3 = por %p746_p2, %p745_p1 }
  0x28   :  { %v139_v16 = vmul.f32 0.2, %v107_v8  ;;  %v143_v17 = vmul.f32 0.2, %v111_v9  ;;  %v147_v18 = vmul.f32 0.2, %v115_v10  ;;  %v109_v19 = vadd.f32 %v101_v7, %v71_v12 }
  0x29   :  { %v151_v20 = vmul.f32 0.2, %v119_v11  ;;  %v113_v21 = vadd.f32 %v101_v7, %v75_v13  ;;  %v117_v22 = vadd.f32 %v101_v7, %v79_v14  ;;  %v121_v23 = vadd.f32 %v101_v7, %v83_v15  ;;  %p748_p4 = pnand %p747_p3, %p741_p0 }
  0x2a   :  { %v155_v24 = vsel %vm123_vm0, %v107_v8, %v139_v16  ;;  %v159_v25 = vsel %vm127_vm1, %v111_v9, %v143_v17  ;;  %v163_v26 = vsel %vm131_vm2, %v115_v10, %v147_v18  ;;  %vm125_vm4 = vcmp.gt.f32.partialorder %v109_v19, 0.0 }
  0x2b   :  { %v167_v27 = vsel %vm135_vm3, %v119_v11, %v151_v20  ;;  %v177_v28 = vadd.f32 %v159_v25, %v155_v24  ;;  %vm129_vm5 = vcmp.gt.f32.partialorder %v113_v21, 0.0  ;;  %vm133_vm6 = vcmp.gt.f32.partialorder %v117_v22, 0.0 }
  0x2c   :  { %v205_v30 = vadd.f32 %v167_v27, %v163_v26  ;;  %vm137_vm7 = vcmp.gt.f32.partialorder %v121_v23, 0.0  ;;  %v141_v31 = vmul.f32 0.2, %v109_v19  ;;  %v145_v32 = vmul.f32 0.2, %v113_v21 }
  0x2d   :  { %v178_v33 = vrot.slane %v177_v28, 4  ;;  %v149_v34 = vmul.f32 0.2, %v117_v22  ;;  %v153_v38 = vmul.f32 0.2, %v121_v23  ;;  %v51_v43 = vrot.slane %v924_v46, %v50_v39 }
  0x2e   :  { %v206_v45 = vrot.slane %v205_v30, 4  ;;  %v157_v49 = vsel %vm125_vm4, %v109_v19, %v141_v31  ;;  %v161_v51 = vsel %vm129_vm5, %v113_v21, %v145_v32  ;;  %v89_v55 = vrot.slane %v929_v47, %v50_v39 }
  0x2f   :  { %v179_v56 = vadd.f32 %v178_v33, %v177_v28  ;;  %v165_v59 = vsel %vm133_vm6, %v117_v22, %v149_v34  ;;  %v169_v61 = vsel %vm137_vm7, %v121_v23, %v153_v38  ;;  %v191_v63 = vadd.f32 %v161_v51, %v157_v49 }
  0x30   :  { %v207_v0 = vadd.f32 %v206_v45, %v205_v30  ;;  %v219_v1 = vadd.f32 %v169_v61, %v165_v59  ;;  %v68_v2 = vmul.f32 %v51_v43, %v30_v42  ;;  %v72_v3 = vmul.f32 %v51_v43, %v34_v44 }
  0x31   :  { %v180_v5 = vrot.slane %v179_v56, 2  ;;  %v192_v6 = vrot.slane %v191_v63, 4  ;;  %v76_v7 = vmul.f32 %v51_v43, %v38_v48  ;;  %v80_v39 = vmul.f32 %v51_v43, %v42_v50 }
  0x32   :  { %v208_v8 = vrot.slane %v207_v0, 2  ;;  %v220_v9 = vrot.slane %v219_v1, 4  ;;  %v106_v10 = vadd.f32 %v89_v55, %v68_v2  ;;  %v110_v11 = vadd.f32 %v89_v55, %v72_v3 }
  0x33   :  { %v181_v12 = vadd.f32 %v180_v5, %v179_v56  ;;  %v193_v13 = vadd.f32 %v192_v6, %v191_v63  ;;  %v114_v14 = vadd.f32 %v89_v55, %v76_v7  ;;  %v118_v35 = vadd.f32 %v89_v55, %v80_v39 }
  0x34   :  { %v209_v42 = vadd.f32 %v208_v8, %v207_v0  ;;  %v221_v15 = vadd.f32 %v220_v9, %v219_v1  ;;  %vm122_vm8 = vcmp.gt.f32.partialorder %v106_v10, 0.0  ;;  %vm126_vm9 = vcmp.gt.f32.partialorder %v110_v11, 0.0 }
  0x35   :  { %v182_v36 = vrot.slane %v181_v12, 1  ;;  %vm330_vm10 = vcmask 1041409   ;;  %v194_v44 = vrot.slane %v193_v13, 2  ;;  %vm130_vm11 = vcmp.gt.f32.partialorder %v114_v14, 0.0 }
  0x36   :  { %vm134_vm12 = vcmp.gt.f32.partialorder %v118_v35, 0.0  ;;  %v210_v37 = vrot.slane %v209_v42, 1  ;;  %v222_v41 = vrot.slane %v221_v15, 2  ;;  %v138_v48 = vmul.f32 0.2, %v106_v10 }
  0x37   :  { %v142_v50 = vmul.f32 0.2, %v110_v11  ;;  %v183_v16 = vadd.f32 %v182_v36, %v181_v12  ;;  %v195_v17 = vadd.f32 %v194_v44, %v193_v13  ;;  %v146_v18 = vmul.f32 0.2, %v114_v14 }
  0x38   :  { %v150_v19 = vmul.f32 0.2, %v118_v35  ;;  %v211_v20 = vadd.f32 %v210_v37, %v209_v42  ;;  %v223_v21 = vadd.f32 %v222_v41, %v221_v15  ;;  %v154_v22 = vsel %vm122_vm8, %v106_v10, %v138_v48 }
  0x39   :  { %v158_v23 = vsel %vm126_vm9, %v110_v11, %v142_v50  ;;  %v228_v24 = vmul.f32 0.0625, %v183_v16  ;;  %v196_v25 = vrot.slane %v195_v17, 1  ;;  %v162_v26 = vsel %vm130_vm11, %v114_v14, %v146_v18 }
  0x3a   :  { %v166_v27 = vsel %vm134_vm12, %v118_v35, %v150_v19  ;;  %v232_v28 = vmul.f32 0.0625, %v211_v20  ;;  %v224_v30 = vrot.slane %v223_v21, 1  ;;  %v170_v31 = vadd.f32 %v158_v23, %v154_v22 }
  0x3b   :  { %v198_v32 = vadd.f32 %v166_v27, %v162_v26  ;;  %v236_v33 = vpack.c.bf16 %v228_v24, %v228_v24  ;;  %v197_v34 = vadd.f32 %v196_v25, %v195_v17  ;;  %v59_v38 = vrot.slane %v924_v46, %v58_v40 }
  0x3c   :  { %v97_v43 = vrot.slane %v929_v47, %v58_v40  ;;  %v240_v45 = vpack.c.bf16 %v232_v28, %v232_v28  ;;  %v225_v49 = vadd.f32 %v224_v30, %v223_v21  ;;  %v171_v51 = vrot.slane %v170_v31, 4 }
  0x3d   :  { %v199_v55 = vrot.slane %v198_v32, 4  ;;  %v323_v56 = vunpack.c.l.b16 %v236_v33  ;;  %v230_v59 = vmul.f32 0.0625, %v197_v34  ;;  %v70_v61 = vmul.f32 %v59_v38, %v32_v58 }
  0x3e   :  { %v74_v63 = vmul.f32 %v59_v38, %v36_v60  ;;  %v327_v0 = vunpack.c.l.b16 %v240_v45  ;;  %v234_v1 = vmul.f32 0.0625, %v225_v49  ;;  %v172_v2 = vadd.f32 %v171_v51, %v170_v31 }
  0x3f   :  { %v200_v46 = vadd.f32 %v199_v55, %v198_v32  ;;  %v238_v3 = vpack.c.bf16 %v230_v59, %v230_v59  ;;  %v78_v29 = vmul.f32 %v59_v38, %v40_v62  ;;  %v82_v40 = vmul.f32 %v59_v38, %v44_v4 }
  0x40   :  { %v108_v47 = vadd.f32 %v97_v43, %v70_v61  ;;  %v332_v5 = vsel %vm330_vm10, %v327_v0, %v323_v56  ;;  %v242_v6 = vpack.c.bf16 %v234_v1, %v234_v1  ;;  %v173_v52 = vrot.slane %v172_v2, 2 }
  0x41   :  { %v201_v58 = vrot.slane %v200_v46, 2  ;;  %v336_v7 = vpack.c.b16 %v332_v5, %v332_v5  ;;  %v325_v53 = vunpack.c.l.b16 %v238_v3  ;;  %v112_v60 = vadd.f32 %v97_v43, %v74_v63 }
  0x42   :  { %v116_v39 = vadd.f32 %v97_v43, %v78_v29  ;;  %v329_v8 = vunpack.c.l.b16 %v242_v6  ;;  %v174_v9 = vadd.f32 %v173_v52, %v172_v2  ;;  %v120_v11 = vadd.f32 %v97_v43, %v82_v40  ;;  %v630_v29 = vld [vmem:[%s1022_s4] ss:$0 sm:$0xff] }
  0x43   :  { %v202_v10 = vadd.f32 %v201_v58, %v200_v46  ;;  %567 = vmatprep.mubr.bf16.mxu0 %v336_v7  ;;  %vm124_vm13 = vcmp.gt.f32.partialorder %v108_v47, 0.0  ;;  %vm128_vm14 = vcmp.gt.f32.partialorder %v112_v60, 0.0  ;;  %v140_v54 = vmul.f32 0.2, %v108_v47 }
  0x44   :  { %vm132_vm15 = vcmp.gt.f32.partialorder %v116_v39, 0.0  ;;  %v334_v57 = vsel %vm330_vm10, %v329_v8, %v325_v53  ;;  %v175_v62 = vrot.slane %v174_v9, 1  ;;  %vm136_vm0 = vcmp.gt.f32.partialorder %v120_v11, 0.0 }
  0x45   :  { %v203_v4 = vrot.slane %v202_v10, 1  ;;  %v338_v12 = vpack.c.b16 %v334_v57, %v334_v57  ;;  %v144_v13 = vmul.f32 0.2, %v112_v60  ;;  %v148_v14 = vmul.f32 0.2, %v116_v39 }
  0x46   :  { %v152_v35 = vmul.f32 0.2, %v120_v11  ;;  %v176_v42 = vadd.f32 %v175_v62, %v174_v9  ;;  %v156_v36 = vsel %vm124_vm13, %v108_v47, %v140_v54 }
  0x47   :  { %v204_v15 = vadd.f32 %v203_v4, %v202_v10  ;;  %607 = vmatprep.mubr.bf16.mxu1 %v338_v12  ;;  %v160_v44 = vsel %vm128_vm14, %v112_v60, %v144_v13  ;;  %v164_v37 = vsel %vm132_vm15, %v116_v39, %v148_v14 }
  0x48   :  { %v168_v41 = vsel %vm136_vm0, %v120_v11, %v152_v35  ;;  %v227_v48 = vmul.f32 0.0625, %v176_v42  ;;  %v184_v16 = vadd.f32 %v160_v44, %v156_v36 }
  0x49   :  { %v231_v50 = vmul.f32 0.0625, %v204_v15  ;;  %v212_v17 = vadd.f32 %v168_v41, %v164_v37 }
  0x4a   :  { %v235_v18 = vpack.c.bf16 %v227_v48, %v227_v48  ;;  %v185_v20 = vrot.slane %v184_v16, 4 }
  0x4b   :  { %v239_v19 = vpack.c.bf16 %v231_v50, %v231_v50  ;;  %v213_v21 = vrot.slane %v212_v17, 4 }
  0x4c   :  { %v322_v22 = vunpack.c.l.b16 %v235_v18  ;;  %v186_v24 = vadd.f32 %v185_v20, %v184_v16 }
  0x4d   :  { %v326_v23 = vunpack.c.l.b16 %v239_v19  ;;  %v214_v25 = vadd.f32 %v213_v21, %v212_v17 }
  0x4e   :  { %v187_v27 = vrot.slane %v186_v24, 2 }
  0x4f   :  { %v331_v26 = vsel %vm330_vm10, %v326_v23, %v322_v22  ;;  %v215_v28 = vrot.slane %v214_v25, 2 }
  0x50   :  { %v335_v30 = vpack.c.b16 %v331_v26, %v331_v26  ;;  %v188_v31 = vadd.f32 %v187_v27, %v186_v24 }
  0x51   :  { %v216_v32 = vadd.f32 %v215_v28, %v214_v25 }
  0x52   :  { %568 = vmatmul.mubr.bf16.vlgmr.msra.gmra.mrb[0].mxu0 %v335_v30  ;;  %v189_v33 = vrot.slane %v188_v31, 1 }
  0x53   :  { %v217_v34 = vrot.slane %v216_v32, 1 }
  0x54   :  { %v190_v38 = vadd.f32 %v189_v33, %v188_v31 }
  0x55   :  { %v218_v43 = vadd.f32 %v217_v34, %v216_v32 }
  0x56   :  { %v229_v45 = vmul.f32 0.0625, %v190_v38 }
  0x57   :  { %v233_v49 = vmul.f32 0.0625, %v218_v43 }
  0x58   :  { %v237_v51 = vpack.c.bf16 %v229_v45, %v229_v45 }
  0x59   :  { %v241_v55 = vpack.c.bf16 %v233_v49, %v233_v49 }
  0x5a   :  { %v324_v56 = vunpack.c.l.b16 %v237_v51 }
  0x5b   :  { %v328_v59 = vunpack.c.l.b16 %v241_v55 }
  0x5d   :  { %v333_v61 = vsel %vm330_vm10, %v328_v59, %v324_v56 }
  0x5e   :  { %v337_v63 = vpack.c.b16 %v333_v61, %v333_v61 }
  0x60   :  { %608 = vmatmul.mubr.bf16.vlgmr.msra.gmra.mrb[0].mxu1 %v337_v63 }
 0x125   :  { %v679_v0 = vpop.f32.mrb[0].mxu0 }
 0x126   :  { %v680_v1 = vpop.f32.mrb[1].mxu0 }
 0x127   :  { %v681_v2 = vadd.f32 %v680_v1, %v679_v0  ;;  %v682_v46 = vpop.f32.mrb[2].mxu0 }
 0x128   :  { %v683_v3 = vpop.f32.mrb[3].mxu0 }
 0x129   :  { %v570_v47 = vadd.f32 %v681_v2, %v630_v29 }
 0x133   :  { %v701_v40 = vpop.f32.mrb[0].mxu1 }
 0x134   :  { %v702_v5 = vpop.f32.mrb[1].mxu1 }
 0x135   :  { %v703_v6 = vadd.f32 %v702_v5, %v701_v40  ;;  %v704_v52 = vpop.f32.mrb[2].mxu1 }
 0x136   :  { %v705_v58 = vpop.f32.mrb[3].mxu1 }
 0x137   :  { %v610_v7 = vadd.f32 %v703_v6, %v570_v47 }
 0x139   :  { %615 = vst [vmem:[#allocation2] sm:$0x3] %v610_v7 }
 0x13a   :  { %751 = shalt.err (!%p748_p4)
}
 0x13b   :  { %s752_s29 = scalar_lea.hbm %s1023_s5, 32 }
 0x13c   :  { %p753_p5 = scmp.ne.s32.totalorder %s1023_s5, %s752_s29  ;;  %p756_p6 = scmp.lt.u32.totalorder %s752_s29, %s1023_s5 }
 0x13e   :  { %p758_p7 = pnand %p756_p6, %p753_p5 }
 0x140   :  { %761 = shalt.err (!%p758_p7)
}
 0x141   :  { %625 = dma.vmem_to_hbm [thread:$0]  %s623_s26, 32, %s1023_s5, [#allocation3]  }
 0x142   :  { %762 = dma.done.wait [#allocation3], 32  }
 0x143   :  { %763 = vsyncadd [#allocation3], 4294967264 }
 0x144   :  { %629 = vsyncpa [#allocation3], 1 }

// kernel: discriminator_forward.4
= control target key start
LH: loop header
LB: loop body
LE: loop exit
PB: predicated region body
PF: predicated region fallthrough
CT: control target
= control target key end

     0   :  { %s7567_s12 = smov 0   ;;  %s7569_s13 = smov 0   ;;  %s9090_s0 = inlined_call_operand.vmem [shape: bf16[6,2,272,128], index: 0, kind: input, shape index: {}]   ;;  %s9091_s1 = inlined_call_operand.vmem [shape: bf16[9,128,256], index: 1, kind: input, shape index: {}]   ;;  %s9092_s2 = inlined_call_operand.vmem [shape: bf16[512,256], index: 2, kind: output, shape index: {0}]   ;;  %s9093_s3 = inlined_call_operand.vmem [shape: f32[2,2,256], index: 3, kind: output, shape index: {1}]  }
   0x1   :  { %s7571_s14 = smov 0  }
   0x2 LB: > { %s7583_s15 = sadd.s32 4294967295, %s7544_s14   ;;  %s7586_s16 = sadd.s32 1, %s7544_s14   ;;  %s7544_s14 = sphi %s7571_s14, %s9147_s14   ;;  %s7540_s13 = sphi %s7569_s13, %s9146_s13   ;;  %s7536_s12 = sphi %s7567_s12, %s9145_s12  }
   0x3   : > { %s18_s17 = ssub.s32 %s7544_s14, %s7586_s16  ;;  %s21_s18 = sadd.s32 1, %s7540_s13 }
   0x4   : > { %p19_p0 = scmp.eq.s32.totalorder %s18_s17, 0  ;;  %p28_p1 = scmp.ne.s32.totalorder %s7540_s13, %s7536_s12 }
   0x5   : > { %p29_p2 = scmp.eq.s32.totalorder %s7544_s14, 0  ;;  %p5873_p4 = scmp.ge.s32.totalorder %s7544_s14, 2 }
   0x6   : > { %s7595_s19 = scalar_select %p19_p0, %s7540_s13, %s21_s18  }
   0x7   : > { %p30_p3 = por %p29_p2, %p28_p1  ;;  %130 = sbr.rel (%p5873_p4) target bundleno = 70 (0x46), region = 20 }
   0xe   : > { %133 = sbr.rel (!%p30_p3) target bundleno = 70 (0x46), region = 24  ;;  %s135_s20 = sand.u32 (%p30_p3), 1, %s7540_s13  }
   0xf   : > { %s7119_s21 = smul.u32 (%p30_p3), 136, %s7544_s14 }
  0x10   : > { %s7118_s22 = smul.u32 (%p30_p3), 816, %s135_s20 }
  0x11   : > { %s7603_s25 = scalar_lea.vmem (%p30_p3), %s9090_s0, %s7119_s21 }
  0x12   : > { %v156_v0 = vld [vmem:[%s7603_s25] sm:$0xff] (%p30_p3)   ;;  %v160_v1 = vld [vmem:[%s7603_s25 + $0x8] sm:$0xff] (%p30_p3)   ;;  %v164_v2 = vld [vmem:[%s7603_s25 + $0x10] sm:$0xff] (%p30_p3)   ;;  %s7608_s26 = scalar_lea.vmem (%p30_p3), [#allocation2], %s7118_s22 }
  0x13   : > { %157 = vst [vmem:[%s7608_s26] sm:$0xff] (%p30_p3), %v156_v0   ;;  %161 = vst [vmem:[%s7608_s26 + $0x8] sm:$0xff] (%p30_p3), %v160_v1   ;;  %v168_v3 = vld [vmem:[%s7603_s25 + $0x18] sm:$0xff] (%p30_p3)   ;;  %v172_v4 = vld [vmem:[%s7603_s25 + $0x20] sm:$0xff] (%p30_p3)  }
  0x14   : > { %165 = vst [vmem:[%s7608_s26 + $0x10] sm:$0xff] (%p30_p3), %v164_v2   ;;  %v176_v5 = vld [vmem:[%s7603_s25 + $0x28] sm:$0xff] (%p30_p3)   ;;  %169 = vst [vmem:[%s7608_s26 + $0x18] sm:$0xff] (%p30_p3), %v168_v3   ;;  %v180_v6 = vld [vmem:[%s7603_s25 + $0x30] sm:$0xff] (%p30_p3)  }
  0x15   : > { %173 = vst [vmem:[%s7608_s26 + $0x20] sm:$0xff] %v172_v4   ;;  %177 = vst [vmem:[%s7608_s26 + $0x28] sm:$0xff] %v176_v5   ;;  %v184_v7 = vld [vmem:[%s7603_s25 + $0x38] sm:$0xff]   ;;  %v188_v8 = vld [vmem:[%s7603_s25 + $0x40] sm:$0xff]  }
  0x16   : > { %181 = vst [vmem:[%s7608_s26 + $0x30] sm:$0xff] %v180_v6   ;;  %185 = vst [vmem:[%s7608_s26 + $0x38] sm:$0xff] %v184_v7   ;;  %v192_v9 = vld [vmem:[%s7603_s25 + $0x48] sm:$0xff]   ;;  %v196_v10 = vld [vmem:[%s7603_s25 + $0x50] sm:$0xff]  }
  0x17   : > { %189 = vst [vmem:[%s7608_s26 + $0x40] sm:$0xff] %v188_v8   ;;  %v200_v11 = vld [vmem:[%s7603_s25 + $0x58] sm:$0xff]   ;;  %193 = vst [vmem:[%s7608_s26 + $0x48] sm:$0xff] %v192_v9   ;;  %v204_v12 = vld [vmem:[%s7603_s25 + $0x60] sm:$0xff]  }
  0x18   : > { %197 = vst [vmem:[%s7608_s26 + $0x50] sm:$0xff] %v196_v10   ;;  %201 = vst [vmem:[%s7608_s26 + $0x58] sm:$0xff] %v200_v11   ;;  %v208_v13 = vld [vmem:[%s7603_s25 + $0x68] sm:$0xff]   ;;  %v212_v14 = vld [vmem:[%s7603_s25 + $0x70] sm:$0xff]  }
  0x19   : > { %205 = vst [vmem:[%s7608_s26 + $0x60] sm:$0xff] %v204_v12   ;;  %209 = vst [vmem:[%s7608_s26 + $0x68] sm:$0xff] %v208_v13   ;;  %v216_v15 = vld [vmem:[%s7603_s25 + $0x78] sm:$0xff]   ;;  %v220_v16 = vld [vmem:[%s7603_s25 + $0x80] sm:$0xff]  }
  0x1a   : > { %213 = vst [vmem:[%s7608_s26 + $0x70] sm:$0xff] %v212_v14   ;;  %v224_v17 = vld [vmem:[%s7603_s25 + $0x110] sm:$0xff]   ;;  %217 = vst [vmem:[%s7608_s26 + $0x78] sm:$0xff] %v216_v15   ;;  %v228_v18 = vld [vmem:[%s7603_s25 + $0x118] sm:$0xff]  }
  0x1b   : > { %221 = vst [vmem:[%s7608_s26 + $0x80] sm:$0xff] %v220_v16   ;;  %225 = vst [vmem:[%s7608_s26 + $0x88] sm:$0xff] %v224_v17   ;;  %v232_v19 = vld [vmem:[%s7603_s25 + $0x120] sm:$0xff]   ;;  %v236_v20 = vld [vmem:[%s7603_s25 + $0x128] sm:$0xff]  }
  0x1c   : > { %229 = vst [vmem:[%s7608_s26 + $0x90] sm:$0xff] %v228_v18   ;;  %233 = vst [vmem:[%s7608_s26 + $0x98] sm:$0xff] %v232_v19   ;;  %v240_v21 = vld [vmem:[%s7603_s25 + $0x130] sm:$0xff]   ;;  %v244_v22 = vld [vmem:[%s7603_s25 + $0x138] sm:$0xff]  }
  0x1d   : > { %237 = vst [vmem:[%s7608_s26 + $0xa0] sm:$0xff] %v236_v20   ;;  %v248_v23 = vld [vmem:[%s7603_s25 + $0x140] sm:$0xff]   ;;  %241 = vst [vmem:[%s7608_s26 + $0xa8] sm:$0xff] %v240_v21   ;;  %v252_v24 = vld [vmem:[%s7603_s25 + $0x148] sm:$0xff]  }
  0x1e   : > { %245 = vst [vmem:[%s7608_s26 + $0xb0] sm:$0xff] %v244_v22   ;;  %249 = vst [vmem:[%s7608_s26 + $0xb8] sm:$0xff] %v248_v23   ;;  %v256_v25 = vld [vmem:[%s7603_s25 + $0x150] sm:$0xff]   ;;  %v260_v26 = vld [vmem:[%s7603_s25 + $0x158] sm:$0xff]  }
  0x1f   : > { %253 = vst [vmem:[%s7608_s26 + $0xc0] sm:$0xff] %v252_v24   ;;  %257 = vst [vmem:[%s7608_s26 + $0xc8] sm:$0xff] %v256_v25   ;;  %v264_v27 = vld [vmem:[%s7603_s25 + $0x160] sm:$0xff]   ;;  %v268_v28 = vld [vmem:[%s7603_s25 + $0x168] sm:$0xff]  }
  0x20   : > { %261 = vst [vmem:[%s7608_s26 + $0xd0] sm:$0xff] %v260_v26   ;;  %v272_v29 = vld [vmem:[%s7603_s25 + $0x170] sm:$0xff]   ;;  %265 = vst [vmem:[%s7608_s26 + $0xd8] sm:$0xff] %v264_v27   ;;  %v276_v30 = vld [vmem:[%s7603_s25 + $0x178] sm:$0xff]  }
  0x21   : > { %269 = vst [vmem:[%s7608_s26 + $0xe0] sm:$0xff] %v268_v28   ;;  %273 = vst [vmem:[%s7608_s26 + $0xe8] sm:$0xff] %v272_v29   ;;  %v280_v31 = vld [vmem:[%s7603_s25 + $0x180] sm:$0xff]   ;;  %v284_v32 = vld [vmem:[%s7603_s25 + $0x188] sm:$0xff]  }
  0x22   : > { %277 = vst [vmem:[%s7608_s26 + $0xf0] sm:$0xff] %v276_v30   ;;  %281 = vst [vmem:[%s7608_s26 + $0xf8] sm:$0xff] %v280_v31   ;;  %v288_v33 = vld [vmem:[%s7603_s25 + $0x190] sm:$0xff]   ;;  %v292_v34 = vld [vmem:[%s7603_s25 + $0x220] sm:$0xff]  }
  0x23   : > { %285 = vst [vmem:[%s7608_s26 + $0x100] sm:$0xff] %v284_v32   ;;  %v296_v35 = vld [vmem:[%s7603_s25 + $0x228] sm:$0xff]   ;;  %289 = vst [vmem:[%s7608_s26 + $0x108] sm:$0xff] %v288_v33   ;;  %v300_v36 = vld [vmem:[%s7603_s25 + $0x230] sm:$0xff]  }
  0x24   : > { %293 = vst [vmem:[%s7608_s26 + $0x110] sm:$0xff] %v292_v34   ;;  %297 = vst [vmem:[%s7608_s26 + $0x118] sm:$0xff] %v296_v35   ;;  %v304_v37 = vld [vmem:[%s7603_s25 + $0x238] sm:$0xff]   ;;  %v308_v38 = vld [vmem:[%s7603_s25 + $0x240] sm:$0xff]  }
  0x25   : > { %301 = vst [vmem:[%s7608_s26 + $0x120] sm:$0xff] %v300_v36   ;;  %305 = vst [vmem:[%s7608_s26 + $0x128] sm:$0xff] %v304_v37   ;;  %v312_v39 = vld [vmem:[%s7603_s25 + $0x248] sm:$0xff]   ;;  %v316_v40 = vld [vmem:[%s7603_s25 + $0x250] sm:$0xff]  }
  0x26   : > { %309 = vst [vmem:[%s7608_s26 + $0x130] sm:$0xff] %v308_v38   ;;  %v320_v41 = vld [vmem:[%s7603_s25 + $0x258] sm:$0xff]   ;;  %313 = vst [vmem:[%s7608_s26 + $0x138] sm:$0xff] %v312_v39   ;;  %v324_v42 = vld [vmem:[%s7603_s25 + $0x260] sm:$0xff]  }
  0x27   : > { %317 = vst [vmem:[%s7608_s26 + $0x140] sm:$0xff] %v316_v40   ;;  %321 = vst [vmem:[%s7608_s26 + $0x148] sm:$0xff] %v320_v41   ;;  %v328_v43 = vld [vmem:[%s7603_s25 + $0x268] sm:$0xff]   ;;  %v332_v44 = vld [vmem:[%s7603_s25 + $0x270] sm:$0xff]  }
  0x28   : > { %325 = vst [vmem:[%s7608_s26 + $0x150] sm:$0xff] %v324_v42   ;;  %329 = vst [vmem:[%s7608_s26 + $0x158] sm:$0xff] %v328_v43   ;;  %v336_v45 = vld [vmem:[%s7603_s25 + $0x278] sm:$0xff]   ;;  %v340_v46 = vld [vmem:[%s7603_s25 + $0x280] sm:$0xff]  }
  0x29   : > { %333 = vst [vmem:[%s7608_s26 + $0x160] sm:$0xff] %v332_v44   ;;  %v344_v47 = vld [vmem:[%s7603_s25 + $0x288] sm:$0xff]   ;;  %337 = vst [vmem:[%s7608_s26 + $0x168] sm:$0xff] %v336_v45   ;;  %v348_v48 = vld [vmem:[%s7603_s25 + $0x290] sm:$0xff]  }
  0x2a   : > { %341 = vst [vmem:[%s7608_s26 + $0x170] sm:$0xff] %v340_v46   ;;  %345 = vst [vmem:[%s7608_s26 + $0x178] sm:$0xff] %v344_v47   ;;  %v352_v49 = vld [vmem:[%s7603_s25 + $0x298] sm:$0xff]   ;;  %v356_v50 = vld [vmem:[%s7603_s25 + $0x2a0] sm:$0xff]  }
  0x2b   : > { %349 = vst [vmem:[%s7608_s26 + $0x180] sm:$0xff] %v348_v48   ;;  %353 = vst [vmem:[%s7608_s26 + $0x188] sm:$0xff] %v352_v49   ;;  %v360_v51 = vld [vmem:[%s7603_s25 + $0x330] sm:$0xff]   ;;  %v364_v52 = vld [vmem:[%s7603_s25 + $0x338] sm:$0xff]  }
  0x2c   : > { %357 = vst [vmem:[%s7608_s26 + $0x190] sm:$0xff] %v356_v50   ;;  %v368_v53 = vld [vmem:[%s7603_s25 + $0x340] sm:$0xff]   ;;  %361 = vst [vmem:[%s7608_s26 + $0x198] sm:$0xff] %v360_v51   ;;  %v372_v54 = vld [vmem:[%s7603_s25 + $0x348] sm:$0xff]  }
  0x2d   : > { %365 = vst [vmem:[%s7608_s26 + $0x1a0] sm:$0xff] %v364_v52   ;;  %369 = vst [vmem:[%s7608_s26 + $0x1a8] sm:$0xff] %v368_v53   ;;  %v376_v55 = vld [vmem:[%s7603_s25 + $0x350] sm:$0xff]   ;;  %v380_v56 = vld [vmem:[%s7603_s25 + $0x358] sm:$0xff]  }
  0x2e   : > { %373 = vst [vmem:[%s7608_s26 + $0x1b0] sm:$0xff] %v372_v54   ;;  %377 = vst [vmem:[%s7608_s26 + $0x1b8] sm:$0xff] %v376_v55   ;;  %v384_v57 = vld [vmem:[%s7603_s25 + $0x360] sm:$0xff]   ;;  %v388_v58 = vld [vmem:[%s7603_s25 + $0x368] sm:$0xff]  }
  0x2f   : > { %381 = vst [vmem:[%s7608_s26 + $0x1c0] sm:$0xff] %v380_v56   ;;  %v392_v59 = vld [vmem:[%s7603_s25 + $0x370] sm:$0xff]   ;;  %385 = vst [vmem:[%s7608_s26 + $0x1c8] sm:$0xff] %v384_v57   ;;  %v396_v60 = vld [vmem:[%s7603_s25 + $0x378] sm:$0xff]  }
  0x30   : > { %389 = vst [vmem:[%s7608_s26 + $0x1d0] sm:$0xff] %v388_v58   ;;  %393 = vst [vmem:[%s7608_s26 + $0x1d8] sm:$0xff] %v392_v59   ;;  %v400_v61 = vld [vmem:[%s7603_s25 + $0x380] sm:$0xff]   ;;  %v404_v62 = vld [vmem:[%s7603_s25 + $0x388] sm:$0xff]  }
  0x31   : > { %397 = vst [vmem:[%s7608_s26 + $0x1e0] sm:$0xff] %v396_v60   ;;  %401 = vst [vmem:[%s7608_s26 + $0x1e8] sm:$0xff] %v400_v61   ;;  %v408_v63 = vld [vmem:[%s7603_s25 + $0x390] sm:$0xff]   ;;  %v412_v0 = vld [vmem:[%s7603_s25 + $0x398] sm:$0xff]  }
  0x32   : > { %405 = vst [vmem:[%s7608_s26 + $0x1f0] sm:$0xff] %v404_v62   ;;  %v416_v1 = vld [vmem:[%s7603_s25 + $0x3a0] sm:$0xff]   ;;  %409 = vst [vmem:[%s7608_s26 + $0x1f8] sm:$0xff] %v408_v63   ;;  %v420_v2 = vld [vmem:[%s7603_s25 + $0x3a8] sm:$0xff]  }
  0x33   : > { %413 = vst [vmem:[%s7608_s26 + $0x200] sm:$0xff] %v412_v0   ;;  %417 = vst [vmem:[%s7608_s26 + $0x208] sm:$0xff] %v416_v1   ;;  %v424_v3 = vld [vmem:[%s7603_s25 + $0x3b0] sm:$0xff]   ;;  %v428_v4 = vld [vmem:[%s7603_s25 + $0x440] sm:$0xff]  }
  0x34   : > { %421 = vst [vmem:[%s7608_s26 + $0x210] sm:$0xff] %v420_v2   ;;  %425 = vst [vmem:[%s7608_s26 + $0x218] sm:$0xff] %v424_v3   ;;  %v432_v5 = vld [vmem:[%s7603_s25 + $0x448] sm:$0xff]   ;;  %v436_v6 = vld [vmem:[%s7603_s25 + $0x450] sm:$0xff]  }
  0x35   : > { %429 = vst [vmem:[%s7608_s26 + $0x220] sm:$0xff] %v428_v4   ;;  %v440_v7 = vld [vmem:[%s7603_s25 + $0x458] sm:$0xff]   ;;  %433 = vst [vmem:[%s7608_s26 + $0x228] sm:$0xff] %v432_v5   ;;  %v444_v8 = vld [vmem:[%s7603_s25 + $0x460] sm:$0xff]  }
  0x36   : > { %437 = vst [vmem:[%s7608_s26 + $0x230] sm:$0xff] %v436_v6   ;;  %441 = vst [vmem:[%s7608_s26 + $0x238] sm:$0xff] %v440_v7   ;;  %v448_v9 = vld [vmem:[%s7603_s25 + $0x468] sm:$0xff]   ;;  %v452_v10 = vld [vmem:[%s7603_s25 + $0x470] sm:$0xff]  }
  0x37   : > { %445 = vst [vmem:[%s7608_s26 + $0x240] sm:$0xff] %v444_v8   ;;  %449 = vst [vmem:[%s7608_s26 + $0x248] sm:$0xff] %v448_v9   ;;  %v456_v11 = vld [vmem:[%s7603_s25 + $0x478] sm:$0xff]   ;;  %v460_v12 = vld [vmem:[%s7603_s25 + $0x480] sm:$0xff]  }
  0x38   : > { %453 = vst [vmem:[%s7608_s26 + $0x250] sm:$0xff] %v452_v10   ;;  %v464_v13 = vld [vmem:[%s7603_s25 + $0x488] sm:$0xff]   ;;  %457 = vst [vmem:[%s7608_s26 + $0x258] sm:$0xff] %v456_v11   ;;  %v468_v14 = vld [vmem:[%s7603_s25 + $0x490] sm:$0xff]  }
  0x39   : > { %461 = vst [vmem:[%s7608_s26 + $0x260] sm:$0xff] %v460_v12   ;;  %465 = vst [vmem:[%s7608_s26 + $0x268] sm:$0xff] %v464_v13   ;;  %v472_v15 = vld [vmem:[%s7603_s25 + $0x498] sm:$0xff]   ;;  %v476_v16 = vld [vmem:[%s7603_s25 + $0x4a0] sm:$0xff]  }
  0x3a   : > { %469 = vst [vmem:[%s7608_s26 + $0x270] sm:$0xff] %v468_v14   ;;  %473 = vst [vmem:[%s7608_s26 + $0x278] sm:$0xff] %v472_v15   ;;  %v480_v17 = vld [vmem:[%s7603_s25 + $0x4a8] sm:$0xff]   ;;  %v484_v18 = vld [vmem:[%s7603_s25 + $0x4b0] sm:$0xff]  }
  0x3b   : > { %477 = vst [vmem:[%s7608_s26 + $0x280] sm:$0xff] %v476_v16   ;;  %v488_v19 = vld [vmem:[%s7603_s25 + $0x4b8] sm:$0xff]   ;;  %481 = vst [vmem:[%s7608_s26 + $0x288] sm:$0xff] %v480_v17   ;;  %v492_v20 = vld [vmem:[%s7603_s25 + $0x4c0] sm:$0xff]  }
  0x3c   : > { %485 = vst [vmem:[%s7608_s26 + $0x290] sm:$0xff] %v484_v18   ;;  %489 = vst [vmem:[%s7608_s26 + $0x298] sm:$0xff] %v488_v19   ;;  %v496_v21 = vld [vmem:[%s7603_s25 + $0x550] sm:$0xff]   ;;  %v500_v22 = vld [vmem:[%s7603_s25 + $0x558] sm:$0xff]  }
  0x3d   : > { %493 = vst [vmem:[%s7608_s26 + $0x2a0] sm:$0xff] %v492_v20   ;;  %497 = vst [vmem:[%s7608_s26 + $0x2a8] sm:$0xff] %v496_v21   ;;  %v504_v23 = vld [vmem:[%s7603_s25 + $0x560] sm:$0xff]   ;;  %v508_v24 = vld [vmem:[%s7603_s25 + $0x568] sm:$0xff]  }
  0x3e   : > { %501 = vst [vmem:[%s7608_s26 + $0x2b0] sm:$0xff] %v500_v22   ;;  %v512_v25 = vld [vmem:[%s7603_s25 + $0x570] sm:$0xff]   ;;  %505 = vst [vmem:[%s7608_s26 + $0x2b8] sm:$0xff] %v504_v23   ;;  %v516_v26 = vld [vmem:[%s7603_s25 + $0x578] sm:$0xff]  }
  0x3f   : > { %509 = vst [vmem:[%s7608_s26 + $0x2c0] sm:$0xff] %v508_v24   ;;  %513 = vst [vmem:[%s7608_s26 + $0x2c8] sm:$0xff] %v512_v25   ;;  %v520_v27 = vld [vmem:[%s7603_s25 + $0x580] sm:$0xff]   ;;  %v524_v28 = vld [vmem:[%s7603_s25 + $0x588] sm:$0xff]  }
  0x40   : > { %517 = vst [vmem:[%s7608_s26 + $0x2d0] sm:$0xff] %v516_v26   ;;  %521 = vst [vmem:[%s7608_s26 + $0x2d8] sm:$0xff] %v520_v27   ;;  %v528_v29 = vld [vmem:[%s7603_s25 + $0x590] sm:$0xff]   ;;  %v532_v30 = vld [vmem:[%s7603_s25 + $0x598] sm:$0xff]  }
  0x41   : > { %525 = vst [vmem:[%s7608_s26 + $0x2e0] sm:$0xff] %v524_v28   ;;  %v536_v31 = vld [vmem:[%s7603_s25 + $0x5a0] sm:$0xff]   ;;  %529 = vst [vmem:[%s7608_s26 + $0x2e8] sm:$0xff] %v528_v29   ;;  %v540_v32 = vld [vmem:[%s7603_s25 + $0x5a8] sm:$0xff]  }
  0x42   : > { %533 = vst [vmem:[%s7608_s26 + $0x2f0] sm:$0xff] %v532_v30   ;;  %537 = vst [vmem:[%s7608_s26 + $0x2f8] sm:$0xff] %v536_v31   ;;  %v544_v33 = vld [vmem:[%s7603_s25 + $0x5b0] sm:$0xff]   ;;  %v548_v34 = vld [vmem:[%s7603_s25 + $0x5b8] sm:$0xff]  }
  0x43   : > { %541 = vst [vmem:[%s7608_s26 + $0x300] sm:$0xff] %v540_v32   ;;  %545 = vst [vmem:[%s7608_s26 + $0x308] sm:$0xff] %v544_v33   ;;  %v552_v35 = vld [vmem:[%s7603_s25 + $0x5c0] sm:$0xff]   ;;  %v556_v36 = vld [vmem:[%s7603_s25 + $0x5c8] sm:$0xff]  }
  0x44   : > { %549 = vst [vmem:[%s7608_s26 + $0x310] sm:$0xff] %v548_v34   ;;  %v560_v37 = vld [vmem:[%s7603_s25 + $0x5d0] sm:$0xff]   ;;  %553 = vst [vmem:[%s7608_s26 + $0x318] sm:$0xff] %v552_v35  }
  0x45   : > { %557 = vst [vmem:[%s7608_s26 + $0x320] sm:$0xff] %v556_v36   ;;  %561 = vst [vmem:[%s7608_s26 + $0x328] sm:$0xff] %v560_v37  }
  0x46 PF: > { %p5875_p5 = scmp.ge.s32.totalorder %s7544_s14, 1  ;;  %p993_p6 = scmp.lt.s32.totalorder %s7544_s14, 3 }
  0x48   : > { %p994_p7 = pnand %p5875_p5, %p993_p6 }
  0x4a   : > { %997 = sbr.rel (%p994_p7) target bundleno = 1005 (0x3ed), region = 65 }
  0x51   : > { %v7146_v38 = vld [vmem:[%s9091_s1 + $0x84] ss:$8 sps:$4 sm:$0xff]   ;;  %v7546_v40 = vmov 0   ;;  %v7150_v41 = vld [vmem:[%s9091_s1 + $0x80] ss:$8 sps:$4 sm:$0xff]   ;;  %s1000_s18 = sand.u32 1, %s7536_s12  }
  0x52   : > { %v7148_v39 = vld [vmem:[%s9091_s1 + $0x204] ss:$8 sps:$4 sm:$0xff]   ;;  %1348 = vmatprep.mubr.bf16.mxu1 %v7546_v40  ;;  %3102 = vmatprep.mubr.bf16.mxu0 %v7546_v40  ;;  %v7151_v42 = vld [vmem:[%s9091_s1 + $0x200] ss:$8 sps:$4 sm:$0xff]   ;;  %v7152_v43 = vld [vmem:[%s9091_s1 + $0x94] ss:$8 sps:$4 sm:$0xff]  }
  0x53   : > { %1316 = vmatprep.subr.bf16.mxu1 %v7146_v38  ;;  %3070 = vmatprep.subr.bf16.mxu0 %v7148_v39  ;;  %v7154_v44 = vld [vmem:[%s9091_s1 + $0x214] ss:$8 sps:$4 sm:$0xff]   ;;  %v7156_v45 = vld [vmem:[%s9091_s1 + $0x90] ss:$8 sps:$4 sm:$0xff]   ;;  %v7158_v47 = vld [vmem:[%s9091_s1 + $0xa4] ss:$8 sps:$4 sm:$0xff]  }
  0x54   : > { %1317 = vmatpush1.bf16.msra.mxu1 %v7150_v41  ;;  %3071 = vmatpush1.bf16.msra.mxu0 %v7151_v42  ;;  %v7157_v46 = vld [vmem:[%s9091_s1 + $0x210] ss:$8 sps:$4 sm:$0xff]   ;;  %v7160_v48 = vld [vmem:[%s9091_s1 + $0x224] ss:$8 sps:$4 sm:$0xff]   ;;  %v7162_v49 = vld [vmem:[%s9091_s1 + $0xa0] ss:$8 sps:$4 sm:$0xff]  }
  0x55   : > { %1318 = vmatprep.subr.bf16.mxu1 %v7152_v43  ;;  %3072 = vmatprep.subr.bf16.mxu0 %v7154_v44  ;;  %v7163_v50 = vld [vmem:[%s9091_s1 + $0x220] ss:$8 sps:$4 sm:$0xff]   ;;  %v7164_v51 = vld [vmem:[%s9091_s1 + $0xb4] ss:$8 sps:$4 sm:$0xff]   ;;  %v7168_v53 = vld [vmem:[%s9091_s1 + $0xb0] ss:$8 sps:$4 sm:$0xff]  }
  0x56   : > { %v7166_v52 = vld [vmem:[%s9091_s1 + $0x234] ss:$8 sps:$4 sm:$0xff]   ;;  %v7169_v54 = vld [vmem:[%s9091_s1 + $0x230] ss:$8 sps:$4 sm:$0xff]   ;;  %v7170_v55 = vld [vmem:[%s9091_s1 + $0xc4] ss:$8 sps:$4 sm:$0xff]  }
  0x57   : > { %v7172_v56 = vld [vmem:[%s9091_s1 + $0x244] ss:$8 sps:$4 sm:$0xff]   ;;  %v7174_v57 = vld [vmem:[%s9091_s1 + $0xc0] ss:$8 sps:$4 sm:$0xff]   ;;  %v7176_v59 = vld [vmem:[%s9091_s1 + $0xd4] ss:$8 sps:$4 sm:$0xff]  }
  0x58   : > { %1319 = vmatpush1.bf16.msra.mxu1 %v7156_v45  ;;  %3073 = vmatpush1.bf16.msra.mxu0 %v7157_v46  ;;  %v7175_v58 = vld [vmem:[%s9091_s1 + $0x240] ss:$8 sps:$4 sm:$0xff]   ;;  %s7120_s26 = smul.u32 816, %s1000_s18  ;;  %v7178_v60 = vld [vmem:[%s9091_s1 + $0x254] ss:$8 sps:$4 sm:$0xff]   ;;  %p1036_p9 = scmp.lt.s32.totalorder %s7583_s15, 1 }
  0x59   : > { %1320 = vmatprep.subr.bf16.mxu1 %v7158_v47  ;;  %3074 = vmatprep.subr.bf16.mxu0 %v7160_v48  ;;  %v7180_v61 = vld [vmem:[%s9091_s1 + $0xd0] ss:$8 sps:$4 sm:$0xff]   ;;  %v7182_v63 = vld [vmem:[%s9091_s1 + $0xe4] ss:$8 sps:$4 sm:$0xff]   ;;  %v7186_v1 = vld [vmem:[%s9091_s1 + $0xe0] ss:$8 sps:$4 sm:$0xff]  }
  0x5a   : > { %v7181_v62 = vld [vmem:[%s9091_s1 + $0x250] ss:$8 sps:$4 sm:$0xff]   ;;  %v7184_v0 = vld [vmem:[%s9091_s1 + $0x264] ss:$8 sps:$4 sm:$0xff]   ;;  %s7894_s9 = scalar_lea.vmem [#allocation2], %s7120_s26  ;;  %vm5758_vm0 = vcmask 1040384  }
  0x5b   : > { %v7187_v2 = vld [vmem:[%s9091_s1 + $0x260] ss:$8 sps:$4 sm:$0xff]   ;;  %v7188_v3 = vld [vmem:[%s9091_s1 + $0xf4] ss:$8 sps:$4 sm:$0xff]   ;;  %v7192_v5 = vld [vmem:[%s9091_s1 + $0xf0] ss:$8 sps:$4 sm:$0xff]  }
  0x5c   : > { %1321 = vmatpush1.bf16.msra.mxu1 %v7162_v49  ;;  %3075 = vmatpush1.bf16.msra.mxu0 %v7163_v50  ;;  %v7190_v4 = vld [vmem:[%s9091_s1 + $0x274] ss:$8 sps:$4 sm:$0xff]   ;;  %v7193_v6 = vld [vmem:[%s9091_s1 + $0x270] ss:$8 sps:$4 sm:$0xff]   ;;  %v7197_v7 = vld [vmem:[%s9091_s1 + $0x4] ss:$8 sps:$4 sm:$0xff]  }
  0x5d   : > { %1322 = vmatprep.subr.bf16.mxu1 %v7164_v51  ;;  %3076 = vmatprep.subr.bf16.mxu0 %v7166_v52  ;;  %v7201_v8 = vld [vmem:[%s9091_s1 + $0x284] ss:$8 sps:$4 sm:$0xff]   ;;  %v7195_v10 = vld [vmem:[%s9091_s1] ss:$8 sps:$4 sm:$0xff]   ;;  %v7206_v13 = vld [vmem:[%s9091_s1 + $0x294] ss:$8 sps:$4 sm:$0xff]  }
  0x5e   : > { %v7194_v9 = vld [vmem:[%s7894_s9 + $0x88] sm:$0xff]   ;;  %v7198_v11 = vld [vmem:[%s7894_s9 + $0x220] sm:$0xff]   ;;  %v7202_v18 = vld [vmem:[%s7894_s9 + $0x90] sm:$0xff]  }
  0x5f   : > { %v7199_v12 = vld [vmem:[%s9091_s1 + $0x280] ss:$8 sps:$4 sm:$0xff]   ;;  %v7210_v14 = vld [vmem:[%s9091_s1 + $0x14] ss:$8 sps:$4 sm:$0xff]   ;;  %v7204_v15 = vld [vmem:[%s9091_s1 + $0x290] ss:$8 sps:$4 sm:$0xff]  }
  0x60   : > { %1323 = vmatpush1.bf16.msra.mxu1 %v7168_v53  ;;  %3077 = vmatpush1.bf16.msra.mxu0 %v7169_v54  ;;  %v7208_v16 = vld [vmem:[%s9091_s1 + $0x10] ss:$8 sps:$4 sm:$0xff]   ;;  %v7214_v17 = vld [vmem:[%s9091_s1 + $0x2a4] ss:$8 sps:$4 sm:$0xff]   ;;  %v7212_v21 = vld [vmem:[%s9091_s1 + $0x2a0] ss:$8 sps:$4 sm:$0xff]  }
  0x61   : > { %1324 = vmatprep.subr.bf16.mxu1 %v7170_v55  ;;  %3078 = vmatprep.subr.bf16.mxu0 %v7172_v56  ;;  %v7203_v19 = vld [vmem:[%s7894_s9 + $0x228] sm:$0xff]   ;;  %v7207_v24 = vld [vmem:[%s7894_s9 + $0x98] sm:$0xff]   ;;  %v7211_v25 = vld [vmem:[%s7894_s9 + $0x230] sm:$0xff]  }
  0x62   : > { %v7223_v20 = vld [vmem:[%s9091_s1 + $0x24] ss:$8 sps:$4 sm:$0xff]   ;;  %v7221_v22 = vld [vmem:[%s9091_s1 + $0x20] ss:$8 sps:$4 sm:$0xff]   ;;  %v7219_v23 = vld [vmem:[%s9091_s1 + $0x2b4] ss:$8 sps:$4 sm:$0xff]  }
  0x63   : > { %v7217_v26 = vld [vmem:[%s9091_s1 + $0x2b0] ss:$8 sps:$4 sm:$0xff]   ;;  %v7227_v27 = vld [vmem:[%s9091_s1 + $0x2c4] ss:$8 sps:$4 sm:$0xff]   ;;  %v7236_v29 = vld [vmem:[%s9091_s1 + $0x34] ss:$8 sps:$4 sm:$0xff]  }
  0x64   : > { %1325 = vmatpush1.bf16.msra.mxu1 %v7174_v57  ;;  %3079 = vmatpush1.bf16.msra.mxu0 %v7175_v58  ;;  %v7234_v28 = vld [vmem:[%s9091_s1 + $0x30] ss:$8 sps:$4 sm:$0xff]   ;;  %v7225_v30 = vld [vmem:[%s9091_s1 + $0x2c0] ss:$8 sps:$4 sm:$0xff]   ;;  %v7232_v31 = vld [vmem:[%s9091_s1 + $0x2d4] ss:$8 sps:$4 sm:$0xff]  }
  0x65   : > { %1326 = vmatprep.subr.bf16.mxu1 %v7176_v59  ;;  %3080 = vmatprep.subr.bf16.mxu0 %v7178_v60  ;;  %v7215_v32 = vld [vmem:[%s7894_s9 + $0xa0] sm:$0xff]   ;;  %v7216_v33 = vld [vmem:[%s7894_s9 + $0x238] sm:$0xff]   ;;  %v7220_v43 = vld [vmem:[%s7894_s9 + $0xa8] sm:$0xff]  }
  0x66   : > { %v7230_v34 = vld [vmem:[%s9091_s1 + $0x2d0] ss:$8 sps:$4 sm:$0xff]   ;;  %v7240_v35 = vld [vmem:[%s9091_s1 + $0x2e4] ss:$8 sps:$4 sm:$0xff]   ;;  %v7247_v36 = vld [vmem:[%s9091_s1 + $0x40] ss:$8 sps:$4 sm:$0xff]  }
  0x67   : > { %v7249_v37 = vld [vmem:[%s9091_s1 + $0x44] ss:$8 sps:$4 sm:$0xff]   ;;  %v7238_v38 = vld [vmem:[%s9091_s1 + $0x2e0] ss:$8 sps:$4 sm:$0xff]   ;;  %v7245_v39 = vld [vmem:[%s9091_s1 + $0x2f4] ss:$8 sps:$4 sm:$0xff]  }
  0x68   : > { %1327 = vmatpush1.bf16.msra.mxu1 %v7180_v61  ;;  %3081 = vmatpush1.bf16.msra.mxu0 %v7181_v62  ;;  %v7243_v41 = vld [vmem:[%s9091_s1 + $0x2f0] ss:$8 sps:$4 sm:$0xff]   ;;  %v7253_v42 = vld [vmem:[%s9091_s1 + $0x304] ss:$8 sps:$4 sm:$0xff]   ;;  %v7259_v45 = vld [vmem:[%s9091_s1 + $0x54] ss:$8 sps:$4 sm:$0xff]  }
  0x69   : > { %1328 = vmatprep.subr.bf16.mxu1 %v7182_v63  ;;  %3082 = vmatprep.subr.bf16.mxu0 %v7184_v0  ;;  %v7257_v44 = vld [vmem:[%s9091_s1 + $0x50] ss:$8 sps:$4 sm:$0xff]   ;;  %v7267_v47 = vld [vmem:[%s9091_s1 + $0x60] ss:$8 sps:$4 sm:$0xff]   ;;  %v7269_v48 = vld [vmem:[%s9091_s1 + $0x64] ss:$8 sps:$4 sm:$0xff]  }
  0x6a   : > { %v7224_v46 = vld [vmem:[%s7894_s9 + $0x240] sm:$0xff]   ;;  %v7228_v49 = vld [vmem:[%s7894_s9 + $0xb0] sm:$0xff]   ;;  %v7229_v50 = vld [vmem:[%s7894_s9 + $0x248] sm:$0xff]  }
  0x6b   : > { %v7277_v51 = vld [vmem:[%s9091_s1 + $0x70] ss:$8 sps:$4 sm:$0xff]   ;;  %v7279_v52 = vld [vmem:[%s9091_s1 + $0x74] ss:$8 sps:$4 sm:$0xff]   ;;  %v7289_v55 = vld [vmem:[%s9091_s1 + $0x104] ss:$8 sps:$4 sm:$0xff]  }
  0x6c   : > { %1329 = vmatpush1.bf16.msra.mxu1 %v7186_v1  ;;  %3083 = vmatpush1.bf16.msra.mxu0 %v7187_v2  ;;  %v7233_v53 = vld [vmem:[%s7894_s9 + $0xb8] sm:$0xff]   ;;  %v7237_v54 = vld [vmem:[%s7894_s9 + $0x250] sm:$0xff]   ;;  %v7241_v56 = vld [vmem:[%s7894_s9 + $0xc0] sm:$0xff]  }
  0x6d   : > { %1330 = vmatprep.subr.bf16.mxu1 %v7188_v3  ;;  %3084 = vmatprep.subr.bf16.mxu0 %v7190_v4  ;;  %v7242_v57 = vld [vmem:[%s7894_s9 + $0x258] sm:$0xff]   ;;  %v7246_v58 = vld [vmem:[%s7894_s9 + $0xc8] sm:$0xff]   ;;  %v7254_v0 = vld [vmem:[%s7894_s9 + $0xd0] sm:$0xff]  }
  0x6e   : > { %v7250_v59 = vld [vmem:[%s7894_s9 + $0x2a8] sm:$0xff]   ;;  %v7255_v1 = vld [vmem:[%s7894_s9 + $0x2b0] sm:$0xff]   ;;  %v7256_v4 = vld [vmem:[%s7894_s9 + $0xd8] sm:$0xff]  }
  0x6f   : > { %v7251_v60 = vld [vmem:[%s9091_s1 + $0x300] ss:$8 sps:$4 sm:$0xff]   ;;  %v7263_v61 = vld [vmem:[%s9091_s1 + $0x314] ss:$8 sps:$4 sm:$0xff]   ;;  %v7261_v62 = vld [vmem:[%s9091_s1 + $0x310] ss:$8 sps:$4 sm:$0xff]  }
  0x70   : > { %1331 = vmatpush1.bf16.msra.mxu1 %v7192_v5  ;;  %3085 = vmatpush1.bf16.msra.mxu0 %v7193_v6  ;;  %v7273_v63 = vld [vmem:[%s9091_s1 + $0x324] ss:$8 sps:$4 sm:$0xff]   ;;  %v7271_v2 = vld [vmem:[%s9091_s1 + $0x320] ss:$8 sps:$4 sm:$0xff]   ;;  %v7283_v3 = vld [vmem:[%s9091_s1 + $0x334] ss:$8 sps:$4 sm:$0xff]  }
  0x71   : > { %1685 = vmatprep.subr.bf16.mxu1 %v7197_v7  ;;  %3553 = vmatprep.subr.bf16.mxu0 %v7201_v8  ;;  %v7281_v5 = vld [vmem:[%s9091_s1 + $0x330] ss:$8 sps:$4 sm:$0xff]   ;;  %v7293_v6 = vld [vmem:[%s9091_s1 + $0x344] ss:$8 sps:$4 sm:$0xff]   ;;  %v7291_v8 = vld [vmem:[%s9091_s1 + $0x340] ss:$8 sps:$4 sm:$0xff]  }
  0x72   : > { %v7260_v7 = vld [vmem:[%s7894_s9 + $0x2b8] sm:$0xff]  }
  0x73   : > { %1349 = vmatmul.mubr.bf16.vlgmr.msra.gmra.mrb[0].mxu1 %v7194_v9  ;;  %3103 = vmatmul.mubr.bf16.vlgmr.msra.gmra.mrb[0].mxu0 %v7198_v11  ;;  %v7303_v9 = vld [vmem:[%s9091_s1 + $0x354] ss:$8 sps:$4 sm:$0xff]  }
  0x74   : > { %1686 = vmatpush1.bf16.msra.mxu1 %v7195_v10  ;;  %3554 = vmatpush1.bf16.msra.mxu0 %v7199_v12  ;;  %v7264_v10 = vld [vmem:[%s7894_s9 + $0xe0] sm:$0xff]  }
  0x75   : > { %1358 = vmatprep.mubr.bf16.mxu1 %v7546_v40  ;;  %3112 = vmatprep.mubr.bf16.mxu0 %v7546_v40  ;;  %v7265_v11 = vld [vmem:[%s7894_s9 + $0x2c0] sm:$0xff]  }
  0x76   : > { %3555 = vmatprep.subr.bf16.mxu0 %v7206_v13  ;;  %1687 = vmatprep.subr.bf16.mxu1 %v7210_v14  ;;  %v7301_v12 = vld [vmem:[%s9091_s1 + $0x350] ss:$8 sps:$4 sm:$0xff]   ;;  %v7313_v13 = vld [vmem:[%s9091_s1 + $0x364] ss:$8 sps:$4 sm:$0xff]   ;;  %v7311_v14 = vld [vmem:[%s9091_s1 + $0x360] ss:$8 sps:$4 sm:$0xff]  }
  0x78   : > { %3556 = vmatpush1.bf16.msra.mxu0 %v7204_v15  ;;  %1688 = vmatpush1.bf16.msra.mxu1 %v7208_v16  ;;  %v7323_v15 = vld [vmem:[%s9091_s1 + $0x374] ss:$8 sps:$4 sm:$0xff]   ;;  %v7321_v16 = vld [vmem:[%s9091_s1 + $0x370] ss:$8 sps:$4 sm:$0xff]  }
  0x79   : > { %3557 = vmatprep.subr.bf16.mxu0 %v7214_v17  ;;  %1689 = vmatprep.subr.bf16.mxu1 %v7223_v20  ;;  %v7333_v17 = vld [vmem:[%s9091_s1 + $0x384] ss:$8 sps:$4 sm:$0xff]  }
  0x7a   : > { %v7274_v20 = vld [vmem:[%s7894_s9 + $0xf0] sm:$0xff]  }
  0x7b   : > { %1359 = vmatmul.mubr.bf16.gmra.mrb[4].mxu1 %v7202_v18  ;;  %3113 = vmatmul.mubr.bf16.gmra.mrb[4].mxu0 %v7203_v19  ;;  %v7266_v18 = vld [vmem:[%s7894_s9 + $0xe8] sm:$0xff]  }
  0x7c   : > { %1368 = vmatprep.mubr.bf16.mxu1 %v7546_v40  ;;  %3122 = vmatprep.mubr.bf16.mxu0 %v7546_v40  ;;  %v7270_v19 = vld [vmem:[%s7894_s9 + $0x2c8] sm:$0xff]  }
  0x7d   : > { %3558 = vmatpush1.bf16.msra.mxu0 %v7212_v21  ;;  %1690 = vmatpush1.bf16.msra.mxu1 %v7221_v22  ;;  %v7275_v21 = vld [vmem:[%s7894_s9 + $0x2d0] sm:$0xff]   ;;  %v7276_v22 = vld [vmem:[%s7894_s9 + $0xf8] sm:$0xff]  }
  0x7e   : > { %3559 = vmatprep.subr.bf16.mxu0 %v7219_v23  ;;  %1691 = vmatprep.subr.bf16.mxu1 %v7236_v29  ;;  %v7280_v23 = vld [vmem:[%s7894_s9 + $0x2d8] sm:$0xff]  }
  0x7f   : > { %v7299_v29 = vld [vmem:[%s9091_s1 + $0x114] ss:$8 sps:$4 sm:$0xff]  }
  0x81   : > { %3560 = vmatpush1.bf16.msra.mxu0 %v7217_v26  ;;  %1692 = vmatpush1.bf16.msra.mxu1 %v7234_v28  ;;  %v7286_v26 = vld [vmem:[%s7894_s9] sm:$0xff]  }
  0x82   : > { %3561 = vmatprep.subr.bf16.mxu0 %v7227_v27  ;;  %1693 = vmatprep.subr.bf16.mxu1 %v7249_v37  ;;  %v7290_v27 = vld [vmem:[%s7894_s9 + $0x2e8] sm:$0xff]  }
  0x83   : > { %1369 = vmatmul.mubr.bf16.gmra.mrb[8].mxu1 %v7207_v24  ;;  %3123 = vmatmul.mubr.bf16.gmra.mrb[8].mxu0 %v7211_v25  ;;  %v7284_v24 = vld [vmem:[%s7894_s9 + $0x100] sm:$0xff]  }
  0x84   : > { %1378 = vmatprep.mubr.bf16.mxu1 %v7546_v40  ;;  %3132 = vmatprep.mubr.bf16.mxu0 %v7546_v40  ;;  %v7285_v25 = vld [vmem:[%s7894_s9 + $0x2e0] sm:$0xff]  }
  0x85   : > { %3562 = vmatpush1.bf16.msra.mxu0 %v7225_v30  ;;  %1694 = vmatpush1.bf16.msra.mxu1 %v7247_v36  ;;  %v7287_v28 = vld [vmem:[%s9091_s1 + $0x100] ss:$8 sps:$4 sm:$0xff]   ;;  %v7297_v30 = vld [vmem:[%s9091_s1 + $0x110] ss:$8 sps:$4 sm:$0xff]   ;;  %v7329_v37 = vld [vmem:[%s9091_s1 + $0x144] ss:$8 sps:$4 sm:$0xff]  }
  0x86   : > { %3563 = vmatprep.subr.bf16.mxu0 %v7232_v31  ;;  %1695 = vmatprep.subr.bf16.mxu1 %v7259_v45  ;;  %v7294_v31 = vld [vmem:[%s7894_s9 + $0x8] sm:$0xff]   ;;  %v7304_v45 = vld [vmem:[%s7894_s9 + $0x18] sm:$0xff]  }
  0x87   : > { %v7317_v36 = vld [vmem:[%s9091_s1 + $0x130] ss:$8 sps:$4 sm:$0xff]  }
  0x89   : > { %3564 = vmatpush1.bf16.msra.mxu0 %v7230_v34  ;;  %1696 = vmatpush1.bf16.msra.mxu1 %v7257_v44  ;;  %v7307_v34 = vld [vmem:[%s9091_s1 + $0x120] ss:$8 sps:$4 sm:$0xff]   ;;  %v7349_v44 = vld [vmem:[%s9091_s1 + $0x164] ss:$8 sps:$4 sm:$0xff]  }
  0x8a   : > { %3565 = vmatprep.subr.bf16.mxu0 %v7240_v35  ;;  %1697 = vmatprep.subr.bf16.mxu1 %v7269_v48  ;;  %v7319_v35 = vld [vmem:[%s9091_s1 + $0x134] ss:$8 sps:$4 sm:$0xff]  }
  0x8b   : > { %1379 = vmatmul.mubr.bf16.gmra.mrb[12].mxu1 %v7215_v32  ;;  %3133 = vmatmul.mubr.bf16.gmra.mrb[12].mxu0 %v7216_v33  ;;  %v7295_v32 = vld [vmem:[%s7894_s9 + $0x2f0] sm:$0xff]  }
  0x8c   : > { %1388 = vmatprep.mubr.bf16.mxu1 %v7546_v40  ;;  %3142 = vmatprep.mubr.bf16.mxu0 %v7546_v40  ;;  %v7309_v33 = vld [vmem:[%s9091_s1 + $0x124] ss:$8 sps:$4 sm:$0xff]   ;;  %v7359_v48 = vld [vmem:[%s9091_s1 + $0x174] ss:$8 sps:$4 sm:$0xff]  }
  0x8d   : > { %3566 = vmatpush1.bf16.msra.mxu0 %v7238_v38  ;;  %1698 = vmatpush1.bf16.msra.mxu1 %v7267_v47  ;;  %v7296_v38 = vld [vmem:[%s7894_s9 + $0x10] sm:$0xff]  }
  0x8e   : > { %3567 = vmatprep.subr.bf16.mxu0 %v7245_v39  ;;  %1699 = vmatprep.subr.bf16.mxu1 %v7279_v52  ;;  %v7300_v39 = vld [vmem:[%s7894_s9 + $0x2f8] sm:$0xff]   ;;  %v7310_v52 = vld [vmem:[%s7894_s9 + $0x308] sm:$0xff]  }
  0x8f   : > { %v7347_v47 = vld [vmem:[%s9091_s1 + $0x160] ss:$8 sps:$4 sm:$0xff]  }
  0x91   : > { %3568 = vmatpush1.bf16.msra.mxu0 %v7243_v41  ;;  %1700 = vmatpush1.bf16.msra.mxu1 %v7277_v51  ;;  %v7327_v41 = vld [vmem:[%s9091_s1 + $0x140] ss:$8 sps:$4 sm:$0xff]  }
  0x92   : > { %4035 = vmatprep.subr.bf16.mxu0 %v7253_v42  ;;  %2104 = vmatprep.subr.bf16.mxu1 %v7289_v55  ;;  %v7339_v42 = vld [vmem:[%s9091_s1 + $0x154] ss:$8 sps:$4 sm:$0xff]  }
  0x93   : > { %1389 = vmatmul.mubr.bf16.gmra.mrb[16].mxu1 %v7220_v43  ;;  %3143 = vmatmul.mubr.bf16.gmra.mrb[16].mxu0 %v7224_v46  ;;  %v7337_v43 = vld [vmem:[%s9091_s1 + $0x150] ss:$8 sps:$4 sm:$0xff]  }
  0x94   : > { %1398 = vmatprep.mubr.bf16.mxu1 %v7546_v40  ;;  %3152 = vmatprep.mubr.bf16.mxu0 %v7546_v40  ;;  %v7305_v46 = vld [vmem:[%s7894_s9 + $0x300] sm:$0xff]   ;;  %v7316_v55 = vld [vmem:[%s7894_s9 + $0x30] sm:$0xff]  }
  0x95   : > { %v7306_v51 = vld [vmem:[%s7894_s9 + $0x20] sm:$0xff]  }
  0x9b   : > { %1399 = vmatmul.mubr.bf16.gmra.mrb[20].mxu1 %v7228_v49  ;;  %3153 = vmatmul.mubr.bf16.gmra.mrb[20].mxu0 %v7229_v50  ;;  %v7357_v49 = vld [vmem:[%s9091_s1 + $0x170] ss:$8 sps:$4 sm:$0xff]   ;;  %v7369_v50 = vld [vmem:[%s9091_s1 + $0x184] ss:$8 sps:$4 sm:$0xff]  }
  0x9c   : > { %1408 = vmatprep.mubr.bf16.mxu1 %v7546_v40  ;;  %3162 = vmatprep.mubr.bf16.mxu0 %v7546_v40 }
  0xa3   : > { %1409 = vmatmul.mubr.bf16.gmra.mrb[24].mxu1 %v7233_v53  ;;  %3163 = vmatmul.mubr.bf16.gmra.mrb[24].mxu0 %v7237_v54  ;;  %v7314_v53 = vld [vmem:[%s7894_s9 + $0x28] sm:$0xff]   ;;  %v7315_v54 = vld [vmem:[%s7894_s9 + $0x310] sm:$0xff]  }
  0xa4   : > { %1418 = vmatprep.mubr.bf16.mxu1 %v7546_v40  ;;  %3172 = vmatprep.mubr.bf16.mxu0 %v7546_v40 }
  0xab   : > { %1419 = vmatmul.mubr.bf16.gmra.mrb[28].mxu1 %v7241_v56  ;;  %3173 = vmatmul.mubr.bf16.gmra.mrb[28].mxu0 %v7242_v57  ;;  %v7320_v56 = vld [vmem:[%s7894_s9 + $0x318] sm:$0xff]  }
  0xac   : > { %1428 = vmatprep.mubr.bf16.mxu1 %v7546_v40  ;;  %3585 = vmatprep.mubr.bf16.mxu0 %v7546_v40  ;;  %v7324_v57 = vld [vmem:[%s7894_s9 + $0x38] sm:$0xff]  }
  0xb3   : > { %1429 = vmatmul.mubr.bf16.gmra.mrb[32].mxu1 %v7246_v58  ;;  %3586 = vmatmul.mubr.bf16.vlgmr.msra.gmra.mrb[0].mxu0 %v7250_v59  ;;  %v7325_v58 = vld [vmem:[%s7894_s9 + $0x320] sm:$0xff]  }
  0xb4   : > { %4036 = vmatpush1.bf16.msra.mxu0 %v7251_v60  ;;  %1438 = vmatprep.mubr.bf16.mxu1 %v7546_v40  ;;  %v7326_v59 = vld [vmem:[%s7894_s9 + $0x40] sm:$0xff]   ;;  %v7330_v60 = vld [vmem:[%s7894_s9 + $0x8] sm:$0xff]  }
  0xb5   : > { %3595 = vmatprep.mubr.bf16.mxu0 %v7546_v40  ;;  %4037 = vmatprep.subr.bf16.mxu0 %v7263_v61  ;;  %v7331_v61 = vld [vmem:[%s9091_s1 + $0x380] ss:$8 sps:$4 sm:$0xff]  }
  0xb8   : > { %4038 = vmatpush1.bf16.msra.mxu0 %v7261_v62  ;;  %v7343_v62 = vld [vmem:[%s9091_s1 + $0x394] ss:$8 sps:$4 sm:$0xff]  }
  0xb9   : > { %4039 = vmatprep.subr.bf16.mxu0 %v7273_v63  ;;  %v7341_v63 = vld [vmem:[%s9091_s1 + $0x390] ss:$8 sps:$4 sm:$0xff]  }
  0xbb   : > { %1439 = vmatmul.mubr.bf16.gmra.mrb[36].mxu1 %v7254_v0  ;;  %3596 = vmatmul.mubr.bf16.gmra.mrb[4].mxu0 %v7255_v1  ;;  %v7353_v0 = vld [vmem:[%s9091_s1 + $0x3a4] ss:$8 sps:$4 sm:$0xff]  }
  0xbc   : > { %1448 = vmatprep.mubr.bf16.mxu1 %v7546_v40  ;;  %3605 = vmatprep.mubr.bf16.mxu0 %v7546_v40  ;;  %v7334_v1 = vld [vmem:[%s7894_s9 + $0x48] sm:$0xff]  }
  0xbd   : > { %4040 = vmatpush1.bf16.msra.mxu0 %v7271_v2  ;;  %v7335_v2 = vld [vmem:[%s7894_s9 + $0x10] sm:$0xff]  }
  0xbe   : > { %4041 = vmatprep.subr.bf16.mxu0 %v7283_v3  ;;  %v7351_v3 = vld [vmem:[%s9091_s1 + $0x3a0] ss:$8 sps:$4 sm:$0xff]  }
  0xc1   : > { %4042 = vmatpush1.bf16.msra.mxu0 %v7281_v5  ;;  %v7361_v5 = vld [vmem:[%s9091_s1 + $0x3b0] ss:$8 sps:$4 sm:$0xff]  }
  0xc2   : > { %4043 = vmatprep.subr.bf16.mxu0 %v7293_v6  ;;  %v7373_v6 = vld [vmem:[%s9091_s1 + $0x3c4] ss:$8 sps:$4 sm:$0xff]  }
  0xc3   : > { %1449 = vmatmul.mubr.bf16.gmra.mrb[40].mxu1 %v7256_v4  ;;  %3606 = vmatmul.mubr.bf16.gmra.mrb[8].mxu0 %v7260_v7  ;;  %v7363_v4 = vld [vmem:[%s9091_s1 + $0x3b4] ss:$8 sps:$4 sm:$0xff]  }
  0xc4   : > { %1458 = vmatprep.mubr.bf16.mxu1 %v7546_v40  ;;  %3615 = vmatprep.mubr.bf16.mxu0 %v7546_v40  ;;  %v7336_v7 = vld [vmem:[%s7894_s9 + $0x50] sm:$0xff]  }
  0xc5   : > { %4044 = vmatpush1.bf16.msra.mxu0 %v7291_v8  ;;  %v7340_v8 = vld [vmem:[%s7894_s9 + $0x18] sm:$0xff]  }
  0xc6   : > { %4045 = vmatprep.subr.bf16.mxu0 %v7303_v9  ;;  %v7371_v9 = vld [vmem:[%s9091_s1 + $0x3c0] ss:$8 sps:$4 sm:$0xff]  }
  0xc9   : > { %4046 = vmatpush1.bf16.msra.mxu0 %v7301_v12  ;;  %v7393_v12 = vld [vmem:[%s9091_s1 + $0x3e4] ss:$8 sps:$4 sm:$0xff]  }
  0xca   : > { %4047 = vmatprep.subr.bf16.mxu0 %v7313_v13  ;;  %v7344_v13 = vld [vmem:[%s7894_s9 + $0x58] sm:$0xff]  }
  0xcb   : > { %1459 = vmatmul.mubr.bf16.gmra.mrb[44].mxu1 %v7264_v10  ;;  %3616 = vmatmul.mubr.bf16.gmra.mrb[12].mxu0 %v7265_v11  ;;  %v7383_v10 = vld [vmem:[%s9091_s1 + $0x3d4] ss:$8 sps:$4 sm:$0xff]   ;;  %v7381_v11 = vld [vmem:[%s9091_s1 + $0x3d0] ss:$8 sps:$4 sm:$0xff]  }
  0xcc   : > { %1468 = vmatprep.mubr.bf16.mxu1 %v7546_v40  ;;  %3625 = vmatprep.mubr.bf16.mxu0 %v7546_v40 }
  0xcd   : > { %4048 = vmatpush1.bf16.msra.mxu0 %v7311_v14  ;;  %v7345_v14 = vld [vmem:[%s7894_s9 + $0x20] sm:$0xff]  }
  0xce   : > { %4049 = vmatprep.subr.bf16.mxu0 %v7323_v15  ;;  %v7391_v15 = vld [vmem:[%s9091_s1 + $0x3e0] ss:$8 sps:$4 sm:$0xff]  }
  0xd1   : > { %4050 = vmatpush1.bf16.msra.mxu0 %v7321_v16  ;;  %v7403_v16 = vld [vmem:[%s9091_s1 + $0x3f4] ss:$8 sps:$4 sm:$0xff]  }
  0xd2   : > { %4517 = vmatprep.subr.bf16.mxu0 %v7333_v17  ;;  %v7401_v17 = vld [vmem:[%s9091_s1 + $0x3f0] ss:$8 sps:$4 sm:$0xff]  }
  0xd3   : > { %1469 = vmatmul.mubr.bf16.gmra.mrb[48].mxu1 %v7266_v18  ;;  %3626 = vmatmul.mubr.bf16.gmra.mrb[16].mxu0 %v7270_v19  ;;  %v7413_v18 = vld [vmem:[%s9091_s1 + $0x404] ss:$8 sps:$4 sm:$0xff]  }
  0xd4   : > { %1478 = vmatprep.mubr.bf16.mxu1 %v7546_v40  ;;  %3635 = vmatprep.mubr.bf16.mxu0 %v7546_v40  ;;  %v7346_v19 = vld [vmem:[%s7894_s9 + $0x60] sm:$0xff]  }
  0xdb   : > { %1479 = vmatmul.mubr.bf16.gmra.mrb[52].mxu1 %v7274_v20  ;;  %3636 = vmatmul.mubr.bf16.gmra.mrb[20].mxu0 %v7275_v21  ;;  %v7350_v20 = vld [vmem:[%s7894_s9 + $0x28] sm:$0xff]  }
  0xdc   : > { %1488 = vmatprep.mubr.bf16.mxu1 %v7546_v40  ;;  %3645 = vmatprep.mubr.bf16.mxu0 %v7546_v40  ;;  %v7354_v21 = vld [vmem:[%s7894_s9 + $0x68] sm:$0xff]  }
  0xe3   : > { %1489 = vmatmul.mubr.bf16.gmra.mrb[56].mxu1 %v7276_v22  ;;  %3646 = vmatmul.mubr.bf16.gmra.mrb[24].mxu0 %v7280_v23  ;;  %v7355_v22 = vld [vmem:[%s7894_s9 + $0x30] sm:$0xff]  }
  0xe4   : > { %1498 = vmatprep.mubr.bf16.mxu1 %v7546_v40  ;;  %3655 = vmatprep.mubr.bf16.mxu0 %v7546_v40  ;;  %v7356_v23 = vld [vmem:[%s7894_s9 + $0x70] sm:$0xff]  }
  0xeb   : > { %1499 = vmatmul.mubr.bf16.gmra.mrb[60].mxu1 %v7284_v24  ;;  %3656 = vmatmul.mubr.bf16.gmra.mrb[28].mxu0 %v7285_v25  ;;  %v7360_v24 = vld [vmem:[%s7894_s9 + $0x38] sm:$0xff]  }
  0xec   : > { %1717 = vmatprep.mubr.bf16.mxu1 %v7546_v40  ;;  %3665 = vmatprep.mubr.bf16.mxu0 %v7546_v40  ;;  %v7364_v25 = vld [vmem:[%s7894_s9 + $0x78] sm:$0xff]  }
  0xf3   : > { %1718 = vmatmul.mubr.bf16.vlgmr.msra.gmra.mrb[0].mxu1 %v7286_v26  ;;  %3666 = vmatmul.mubr.bf16.gmra.mrb[32].mxu0 %v7290_v27  ;;  %v7365_v26 = vld [vmem:[%s7894_s9 + $0x40] sm:$0xff]   ;;  %v7366_v27 = vld [vmem:[%s7894_s9 + $0x110] sm:$0xff]  }
  0xf4   : > { %2105 = vmatpush1.bf16.msra.mxu1 %v7287_v28  ;;  %1727 = vmatprep.mubr.bf16.mxu1 %v7546_v40  ;;  %v7370_v28 = vld [vmem:[%s7894_s9 + $0x48] sm:$0xff]  }
  0xf5   : > { %3675 = vmatprep.mubr.bf16.mxu0 %v7546_v40  ;;  %2106 = vmatprep.subr.bf16.mxu1 %v7299_v29  ;;  %v7367_v29 = vld [vmem:[%s9091_s1 + $0x180] ss:$8 sps:$4 sm:$0xff]  }
  0xf8   : > { %2107 = vmatpush1.bf16.msra.mxu1 %v7297_v30  ;;  %v7379_v30 = vld [vmem:[%s9091_s1 + $0x194] ss:$8 sps:$4 sm:$0xff]  }
  0xf9   : > { %2108 = vmatprep.subr.bf16.mxu1 %v7309_v33  ;;  %v7374_v33 = vld [vmem:[%s7894_s9 + $0x118] sm:$0xff]  }
  0xfb   : > { %1728 = vmatmul.mubr.bf16.gmra.mrb[4].mxu1 %v7294_v31  ;;  %3676 = vmatmul.mubr.bf16.gmra.mrb[36].mxu0 %v7295_v32  ;;  %v7377_v31 = vld [vmem:[%s9091_s1 + $0x190] ss:$8 sps:$4 sm:$0xff]   ;;  %v7389_v32 = vld [vmem:[%s9091_s1 + $0x1a4] ss:$8 sps:$4 sm:$0xff]  }
  0xfc   : > { %1737 = vmatprep.mubr.bf16.mxu1 %v7546_v40  ;;  %3685 = vmatprep.mubr.bf16.mxu0 %v7546_v40 }
  0xfd   : > { %2109 = vmatpush1.bf16.msra.mxu1 %v7307_v34  ;;  %v7375_v34 = vld [vmem:[%s7894_s9 + $0x50] sm:$0xff]  }
  0xfe   : > { %2110 = vmatprep.subr.bf16.mxu1 %v7319_v35  ;;  %v7387_v35 = vld [vmem:[%s9091_s1 + $0x1a0] ss:$8 sps:$4 sm:$0xff]  }
 0x101   : > { %2111 = vmatpush1.bf16.msra.mxu1 %v7317_v36  ;;  %v7399_v36 = vld [vmem:[%s9091_s1 + $0x1b4] ss:$8 sps:$4 sm:$0xff]  }
 0x102   : > { %2112 = vmatprep.subr.bf16.mxu1 %v7329_v37  ;;  %v7397_v37 = vld [vmem:[%s9091_s1 + $0x1b0] ss:$8 sps:$4 sm:$0xff]  }
 0x103   : > { %1738 = vmatmul.mubr.bf16.gmra.mrb[8].mxu1 %v7296_v38  ;;  %3686 = vmatmul.mubr.bf16.gmra.mrb[40].mxu0 %v7300_v39  ;;  %v7409_v38 = vld [vmem:[%s9091_s1 + $0x1c4] ss:$8 sps:$4 sm:$0xff]  }
 0x104   : > { %1747 = vmatprep.mubr.bf16.mxu1 %v7546_v40  ;;  %3695 = vmatprep.mubr.bf16.mxu0 %v7546_v40  ;;  %v7376_v39 = vld [vmem:[%s7894_s9 + $0x120] sm:$0xff]  }
 0x105   : > { %2113 = vmatpush1.bf16.msra.mxu1 %v7327_v41  ;;  %v7380_v41 = vld [vmem:[%s7894_s9 + $0x58] sm:$0xff]  }
 0x106   : > { %2114 = vmatprep.subr.bf16.mxu1 %v7339_v42  ;;  %v7407_v42 = vld [vmem:[%s9091_s1 + $0x1c0] ss:$8 sps:$4 sm:$0xff]  }
 0x109   : > { %2115 = vmatpush1.bf16.msra.mxu1 %v7337_v43  ;;  %v7419_v43 = vld [vmem:[%s9091_s1 + $0x1d4] ss:$8 sps:$4 sm:$0xff]  }
 0x10a   : > { %2116 = vmatprep.subr.bf16.mxu1 %v7349_v44  ;;  %v7417_v44 = vld [vmem:[%s9091_s1 + $0x1d0] ss:$8 sps:$4 sm:$0xff]  }
 0x10b   : > { %1748 = vmatmul.mubr.bf16.gmra.mrb[12].mxu1 %v7304_v45  ;;  %3696 = vmatmul.mubr.bf16.gmra.mrb[44].mxu0 %v7305_v46  ;;  %v7429_v45 = vld [vmem:[%s9091_s1 + $0x1e4] ss:$8 sps:$4 sm:$0xff]  }
 0x10c   : > { %1757 = vmatprep.mubr.bf16.mxu1 %v7546_v40  ;;  %3705 = vmatprep.mubr.bf16.mxu0 %v7546_v40  ;;  %v7384_v46 = vld [vmem:[%s7894_s9 + $0x128] sm:$0xff]  }
 0x10d   : > { %2117 = vmatpush1.bf16.msra.mxu1 %v7347_v47  ;;  %v7385_v47 = vld [vmem:[%s7894_s9 + $0x60] sm:$0xff]  }
 0x10e   : > { %2118 = vmatprep.subr.bf16.mxu1 %v7359_v48  ;;  %v7427_v48 = vld [vmem:[%s9091_s1 + $0x1e0] ss:$8 sps:$4 sm:$0xff]  }
 0x111   : > { %2119 = vmatpush1.bf16.msra.mxu1 %v7357_v49  ;;  %v7439_v49 = vld [vmem:[%s9091_s1 + $0x1f4] ss:$8 sps:$4 sm:$0xff]  }
 0x112   : > { %2587 = vmatprep.subr.bf16.mxu1 %v7369_v50  ;;  %v7437_v50 = vld [vmem:[%s9091_s1 + $0x1f0] ss:$8 sps:$4 sm:$0xff]  }
 0x113   : > { %1758 = vmatmul.mubr.bf16.gmra.mrb[16].mxu1 %v7306_v51  ;;  %3706 = vmatmul.mubr.bf16.gmra.mrb[48].mxu0 %v7310_v52  ;;  %v7386_v51 = vld [vmem:[%s7894_s9 + $0x130] sm:$0xff]   ;;  %v7390_v52 = vld [vmem:[%s7894_s9 + $0x68] sm:$0xff]  }
 0x114   : > { %1767 = vmatprep.mubr.bf16.mxu1 %v7546_v40  ;;  %3715 = vmatprep.mubr.bf16.mxu0 %v7546_v40 }
 0x11b   : > { %1768 = vmatmul.mubr.bf16.gmra.mrb[20].mxu1 %v7314_v53  ;;  %3716 = vmatmul.mubr.bf16.gmra.mrb[52].mxu0 %v7315_v54  ;;  %v7506_v53 = vld [vmem:[%s9091_s1 + $0x204] ss:$8 sps:$4 sm:$0xff]  }
 0x11c   : > { %1777 = vmatprep.mubr.bf16.mxu1 %v7546_v40  ;;  %3725 = vmatprep.mubr.bf16.mxu0 %v7546_v40  ;;  %v7394_v54 = vld [vmem:[%s7894_s9 + $0x138] sm:$0xff]  }
 0x123   : > { %1778 = vmatmul.mubr.bf16.gmra.mrb[24].mxu1 %v7316_v55  ;;  %3726 = vmatmul.mubr.bf16.gmra.mrb[56].mxu0 %v7320_v56  ;;  %v7395_v55 = vld [vmem:[%s7894_s9 + $0x70] sm:$0xff]   ;;  %v7396_v56 = vld [vmem:[%s7894_s9 + $0x140] sm:$0xff]  }
 0x124   : > { %1787 = vmatprep.mubr.bf16.mxu1 %v7546_v40  ;;  %3735 = vmatprep.mubr.bf16.mxu0 %v7546_v40 }
 0x12b   : > { %1788 = vmatmul.mubr.bf16.gmra.mrb[28].mxu1 %v7324_v57  ;;  %3736 = vmatmul.mubr.bf16.gmra.mrb[60].mxu0 %v7325_v58  ;;  %v7400_v57 = vld [vmem:[%s7894_s9 + $0x78] sm:$0xff]   ;;  %v7404_v58 = vld [vmem:[%s7894_s9 + $0x148] sm:$0xff]  }
 0x12c   : > { %1797 = vmatprep.mubr.bf16.mxu1 %v7546_v40  ;;  %4067 = vmatprep.mubr.bf16.mxu0 %v7546_v40 }
 0x133   : > { %1798 = vmatmul.mubr.bf16.gmra.mrb[32].mxu1 %v7326_v59  ;;  %4068 = vmatmul.mubr.bf16.vlgmr.msra.gmra.mrb[0].mxu0 %v7330_v60  ;;  %v7405_v59 = vld [vmem:[%s7894_s9 + $0x80] sm:$0xff]   ;;  %v7406_v60 = vld [vmem:[%s7894_s9 + $0x150] sm:$0xff]  }
 0x134   : > { %4518 = vmatpush1.bf16.msra.mxu0 %v7331_v61  ;;  %1807 = vmatprep.mubr.bf16.mxu1 %v7546_v40  ;;  %v7410_v61 = vld [vmem:[%s7894_s9 + $0x90] sm:$0xff]  }
 0x135   : > { %4077 = vmatprep.mubr.bf16.mxu0 %v7546_v40  ;;  %4519 = vmatprep.subr.bf16.mxu0 %v7343_v62  ;;  %v7411_v62 = vld [vmem:[%s9091_s1 + $0x400] ss:$8 sps:$4 sm:$0xff]  }
 0x138   : > { %4520 = vmatpush1.bf16.msra.mxu0 %v7341_v63  ;;  %v7423_v63 = vld [vmem:[%s9091_s1 + $0x414] ss:$8 sps:$4 sm:$0xff]  }
 0x139   : > { %4521 = vmatprep.subr.bf16.mxu0 %v7353_v0  ;;  %v7421_v0 = vld [vmem:[%s9091_s1 + $0x410] ss:$8 sps:$4 sm:$0xff]  }
 0x13b   : > { %1808 = vmatmul.mubr.bf16.gmra.mrb[36].mxu1 %v7334_v1  ;;  %4078 = vmatmul.mubr.bf16.gmra.mrb[4].mxu0 %v7335_v2  ;;  %v7433_v1 = vld [vmem:[%s9091_s1 + $0x424] ss:$8 sps:$4 sm:$0xff]  }
 0x13c   : > { %1817 = vmatprep.mubr.bf16.mxu1 %v7546_v40  ;;  %4087 = vmatprep.mubr.bf16.mxu0 %v7546_v40  ;;  %v7414_v2 = vld [vmem:[%s7894_s9 + $0x158] sm:$0xff]  }
 0x13d   : > { %4522 = vmatpush1.bf16.msra.mxu0 %v7351_v3  ;;  %v7415_v3 = vld [vmem:[%s7894_s9 + $0x98] sm:$0xff]  }
 0x13e   : > { %4523 = vmatprep.subr.bf16.mxu0 %v7363_v4  ;;  %v7431_v4 = vld [vmem:[%s9091_s1 + $0x420] ss:$8 sps:$4 sm:$0xff]  }
 0x141   : > { %4524 = vmatpush1.bf16.msra.mxu0 %v7361_v5  ;;  %v7443_v5 = vld [vmem:[%s9091_s1 + $0x434] ss:$8 sps:$4 sm:$0xff]  }
 0x142   : > { %4525 = vmatprep.subr.bf16.mxu0 %v7373_v6  ;;  %v7441_v6 = vld [vmem:[%s9091_s1 + $0x430] ss:$8 sps:$4 sm:$0xff]  }
 0x143   : > { %1818 = vmatmul.mubr.bf16.gmra.mrb[40].mxu1 %v7336_v7  ;;  %4088 = vmatmul.mubr.bf16.gmra.mrb[8].mxu0 %v7340_v8  ;;  %v7450_v7 = vld [vmem:[%s9091_s1 + $0x444] ss:$8 sps:$4 sm:$0xff]  }
 0x144   : > { %1827 = vmatprep.mubr.bf16.mxu1 %v7546_v40  ;;  %4097 = vmatprep.mubr.bf16.mxu0 %v7546_v40  ;;  %v7416_v8 = vld [vmem:[%s7894_s9 + $0x160] sm:$0xff]  }
 0x145   : > { %4526 = vmatpush1.bf16.msra.mxu0 %v7371_v9  ;;  %v7420_v9 = vld [vmem:[%s7894_s9 + $0xa0] sm:$0xff]  }
 0x146   : > { %4527 = vmatprep.subr.bf16.mxu0 %v7383_v10  ;;  %v7448_v10 = vld [vmem:[%s9091_s1 + $0x440] ss:$8 sps:$4 sm:$0xff]  }
 0x149   : > { %4528 = vmatpush1.bf16.msra.mxu0 %v7381_v11  ;;  %v7457_v11 = vld [vmem:[%s9091_s1 + $0x454] ss:$8 sps:$4 sm:$0xff]  }
 0x14a   : > { %4529 = vmatprep.subr.bf16.mxu0 %v7393_v12  ;;  %v7455_v12 = vld [vmem:[%s9091_s1 + $0x450] ss:$8 sps:$4 sm:$0xff]  }
 0x14b   : > { %1828 = vmatmul.mubr.bf16.gmra.mrb[44].mxu1 %v7344_v13  ;;  %4098 = vmatmul.mubr.bf16.gmra.mrb[12].mxu0 %v7345_v14  ;;  %v7464_v13 = vld [vmem:[%s9091_s1 + $0x464] ss:$8 sps:$4 sm:$0xff]  }
 0x14c   : > { %1837 = vmatprep.mubr.bf16.mxu1 %v7546_v40  ;;  %4107 = vmatprep.mubr.bf16.mxu0 %v7546_v40  ;;  %v7424_v14 = vld [vmem:[%s7894_s9 + $0x168] sm:$0xff]  }
 0x14d   : > { %4530 = vmatpush1.bf16.msra.mxu0 %v7391_v15  ;;  %v7425_v15 = vld [vmem:[%s7894_s9 + $0xa8] sm:$0xff]  }
 0x14e   : > { %4531 = vmatprep.subr.bf16.mxu0 %v7403_v16  ;;  %v7462_v16 = vld [vmem:[%s9091_s1 + $0x460] ss:$8 sps:$4 sm:$0xff]  }
 0x151   : > { %4532 = vmatpush1.bf16.msra.mxu0 %v7401_v17  ;;  %v7471_v17 = vld [vmem:[%s9091_s1 + $0x474] ss:$8 sps:$4 sm:$0xff]  }
 0x152   : > { %4999 = vmatprep.subr.bf16.mxu0 %v7413_v18  ;;  %v7469_v18 = vld [vmem:[%s9091_s1 + $0x470] ss:$8 sps:$4 sm:$0xff]  }
 0x153   : > { %1838 = vmatmul.mubr.bf16.gmra.mrb[48].mxu1 %v7346_v19  ;;  %4108 = vmatmul.mubr.bf16.gmra.mrb[16].mxu0 %v7350_v20  ;;  %v7426_v19 = vld [vmem:[%s7894_s9 + $0x170] sm:$0xff]  }
 0x154   : > { %1847 = vmatprep.mubr.bf16.mxu1 %v7546_v40  ;;  %4117 = vmatprep.mubr.bf16.mxu0 %v7546_v40  ;;  %v7430_v20 = vld [vmem:[%s7894_s9 + $0xb0] sm:$0xff]  }
 0x15b   : > { %1848 = vmatmul.mubr.bf16.gmra.mrb[52].mxu1 %v7354_v21  ;;  %4118 = vmatmul.mubr.bf16.gmra.mrb[20].mxu0 %v7355_v22  ;;  %v7434_v21 = vld [vmem:[%s7894_s9 + $0x178] sm:$0xff]  }
 0x15c   : > { %1857 = vmatprep.mubr.bf16.mxu1 %v7546_v40  ;;  %4127 = vmatprep.mubr.bf16.mxu0 %v7546_v40  ;;  %v7435_v22 = vld [vmem:[%s7894_s9 + $0xb8] sm:$0xff]  }
 0x163   : > { %1858 = vmatmul.mubr.bf16.gmra.mrb[56].mxu1 %v7356_v23  ;;  %4128 = vmatmul.mubr.bf16.gmra.mrb[24].mxu0 %v7360_v24  ;;  %v7436_v23 = vld [vmem:[%s7894_s9 + $0x180] sm:$0xff]  }
 0x164   : > { %1867 = vmatprep.mubr.bf16.mxu1 %v7546_v40  ;;  %4137 = vmatprep.mubr.bf16.mxu0 %v7546_v40  ;;  %v7440_v24 = vld [vmem:[%s7894_s9 + $0xc0] sm:$0xff]  }
 0x16b   : > { %1868 = vmatmul.mubr.bf16.gmra.mrb[60].mxu1 %v7364_v25  ;;  %4138 = vmatmul.mubr.bf16.gmra.mrb[28].mxu0 %v7365_v26  ;;  %v7444_v25 = vld [vmem:[%s7894_s9 + $0x188] sm:$0xff]  }
 0x16c   : > { %2136 = vmatprep.mubr.bf16.mxu1 %v7546_v40  ;;  %4147 = vmatprep.mubr.bf16.mxu0 %v7546_v40  ;;  %v7445_v26 = vld [vmem:[%s7894_s9 + $0xc8] sm:$0xff]  }
 0x173   : > { %2137 = vmatmul.mubr.bf16.vlgmr.msra.gmra.mrb[0].mxu1 %v7366_v27  ;;  %4148 = vmatmul.mubr.bf16.gmra.mrb[32].mxu0 %v7370_v28  ;;  %v7446_v27 = vld [vmem:[%s7894_s9 + $0x198] sm:$0xff]   ;;  %v7447_v28 = vld [vmem:[%s7894_s9 + $0xd0] sm:$0xff]  }
 0x174   : > { %2588 = vmatpush1.bf16.msra.mxu1 %v7367_v29  ;;  %2146 = vmatprep.mubr.bf16.mxu1 %v7546_v40  ;;  %v7507_v29 = vld [vmem:[%s9091_s1 + $0x200] ss:$8 sps:$4 sm:$0xff]  }
 0x175   : > { %4157 = vmatprep.mubr.bf16.mxu0 %v7546_v40  ;;  %2589 = vmatprep.subr.bf16.mxu1 %v7379_v30  ;;  %v7508_v30 = vld [vmem:[%s9091_s1 + $0x214] ss:$8 sps:$4 sm:$0xff]  }
 0x178   : > { %2590 = vmatpush1.bf16.msra.mxu1 %v7377_v31  ;;  %v7451_v31 = vld [vmem:[%s7894_s9 + $0x1a0] sm:$0xff]  }
 0x179   : > { %2591 = vmatprep.subr.bf16.mxu1 %v7389_v32  ;;  %v7452_v32 = vld [vmem:[%s7894_s9 + $0xd8] sm:$0xff]  }
 0x17b   : > { %2147 = vmatmul.mubr.bf16.gmra.mrb[4].mxu1 %v7374_v33  ;;  %4158 = vmatmul.mubr.bf16.gmra.mrb[36].mxu0 %v7375_v34  ;;  %v7509_v33 = vld [vmem:[%s9091_s1 + $0x210] ss:$8 sps:$4 sm:$0xff]   ;;  %v7510_v34 = vld [vmem:[%s9091_s1 + $0x224] ss:$8 sps:$4 sm:$0xff]  }
 0x17c   : > { %2156 = vmatprep.mubr.bf16.mxu1 %v7546_v40  ;;  %4167 = vmatprep.mubr.bf16.mxu0 %v7546_v40 }
 0x17d   : > { %2592 = vmatpush1.bf16.msra.mxu1 %v7387_v35  ;;  %v7511_v35 = vld [vmem:[%s9091_s1 + $0x220] ss:$8 sps:$4 sm:$0xff]  }
 0x17e   : > { %2593 = vmatprep.subr.bf16.mxu1 %v7399_v36  ;;  %v7512_v36 = vld [vmem:[%s9091_s1 + $0x234] ss:$8 sps:$4 sm:$0xff]  }
 0x181   : > { %2594 = vmatpush1.bf16.msra.mxu1 %v7397_v37  ;;  %v7453_v37 = vld [vmem:[%s7894_s9 + $0x1a8] sm:$0xff]  }
 0x182   : > { %2595 = vmatprep.subr.bf16.mxu1 %v7409_v38  ;;  %v7454_v38 = vld [vmem:[%s7894_s9 + $0xe0] sm:$0xff]  }
 0x183   : > { %2157 = vmatmul.mubr.bf16.gmra.mrb[8].mxu1 %v7376_v39  ;;  %4168 = vmatmul.mubr.bf16.gmra.mrb[40].mxu0 %v7380_v41  ;;  %v7513_v39 = vld [vmem:[%s9091_s1 + $0x230] ss:$8 sps:$4 sm:$0xff]   ;;  %v7514_v41 = vld [vmem:[%s9091_s1 + $0x244] ss:$8 sps:$4 sm:$0xff]  }
 0x184   : > { %2166 = vmatprep.mubr.bf16.mxu1 %v7546_v40  ;;  %4177 = vmatprep.mubr.bf16.mxu0 %v7546_v40 }
 0x185   : > { %2596 = vmatpush1.bf16.msra.mxu1 %v7407_v42  ;;  %v7515_v42 = vld [vmem:[%s9091_s1 + $0x240] ss:$8 sps:$4 sm:$0xff]  }
 0x186   : > { %2597 = vmatprep.subr.bf16.mxu1 %v7419_v43  ;;  %v7516_v43 = vld [vmem:[%s9091_s1 + $0x254] ss:$8 sps:$4 sm:$0xff]  }
 0x189   : > { %2598 = vmatpush1.bf16.msra.mxu1 %v7417_v44  ;;  %v7458_v44 = vld [vmem:[%s7894_s9 + $0x1b0] sm:$0xff]  }
 0x18a   : > { %2599 = vmatprep.subr.bf16.mxu1 %v7429_v45  ;;  %v7459_v45 = vld [vmem:[%s7894_s9 + $0xe8] sm:$0xff]  }
 0x18b   : > { %2167 = vmatmul.mubr.bf16.gmra.mrb[12].mxu1 %v7384_v46  ;;  %4178 = vmatmul.mubr.bf16.gmra.mrb[44].mxu0 %v7385_v47  ;;  %v7517_v46 = vld [vmem:[%s9091_s1 + $0x250] ss:$8 sps:$4 sm:$0xff]   ;;  %v7518_v47 = vld [vmem:[%s9091_s1 + $0x264] ss:$8 sps:$4 sm:$0xff]  }
 0x18c   : > { %2176 = vmatprep.mubr.bf16.mxu1 %v7546_v40  ;;  %4187 = vmatprep.mubr.bf16.mxu0 %v7546_v40 }
 0x18d   : > { %2600 = vmatpush1.bf16.msra.mxu1 %v7427_v48  ;;  %v7519_v48 = vld [vmem:[%s9091_s1 + $0x260] ss:$8 sps:$4 sm:$0xff]  }
 0x18e   : > { %2601 = vmatprep.subr.bf16.mxu1 %v7439_v49  ;;  %v7520_v49 = vld [vmem:[%s9091_s1 + $0x274] ss:$8 sps:$4 sm:$0xff]  }
 0x191   : > { %2602 = vmatpush1.bf16.msra.mxu1 %v7437_v50  ;;  %v7460_v50 = vld [vmem:[%s7894_s9 + $0x1b8] sm:$0xff]  }
 0x192   : > { %6590 = vmatprep.subr.bf16.mxu1 %v7506_v53  ;;  %v7465_v53 = vld [vmem:[%s7894_s9 + $0x1c0] sm:$0xff]  }
 0x193   : > { %2177 = vmatmul.mubr.bf16.gmra.mrb[16].mxu1 %v7386_v51  ;;  %4188 = vmatmul.mubr.bf16.gmra.mrb[48].mxu0 %v7390_v52  ;;  %v7461_v51 = vld [vmem:[%s7894_s9 + $0xf0] sm:$0xff]  }
 0x194   : > { %2186 = vmatprep.mubr.bf16.mxu1 %v7546_v40  ;;  %4197 = vmatprep.mubr.bf16.mxu0 %v7546_v40  ;;  %v7521_v52 = vld [vmem:[%s9091_s1 + $0x270] ss:$8 sps:$4 sm:$0xff]  }
 0x19b   : > { %2187 = vmatmul.mubr.bf16.gmra.mrb[20].mxu1 %v7394_v54  ;;  %4198 = vmatmul.mubr.bf16.gmra.mrb[52].mxu0 %v7395_v55  ;;  %v7466_v54 = vld [vmem:[%s7894_s9 + $0xf8] sm:$0xff]   ;;  %v7467_v55 = vld [vmem:[%s7894_s9 + $0x1c8] sm:$0xff]  }
 0x19c   : > { %2196 = vmatprep.mubr.bf16.mxu1 %v7546_v40  ;;  %4207 = vmatprep.mubr.bf16.mxu0 %v7546_v40 }
 0x1a3   : > { %2197 = vmatmul.mubr.bf16.gmra.mrb[24].mxu1 %v7396_v56  ;;  %4208 = vmatmul.mubr.bf16.gmra.mrb[56].mxu0 %v7400_v57  ;;  %v7468_v56 = vld [vmem:[%s7894_s9 + $0x100] sm:$0xff]   ;;  %v7472_v57 = vld [vmem:[%s7894_s9 + $0x1d0] sm:$0xff]  }
 0x1a4   : > { %2206 = vmatprep.mubr.bf16.mxu1 %v7546_v40  ;;  %4217 = vmatprep.mubr.bf16.mxu0 %v7546_v40 }
 0x1ab   : > { %2207 = vmatmul.mubr.bf16.gmra.mrb[28].mxu1 %v7404_v58  ;;  %4218 = vmatmul.mubr.bf16.gmra.mrb[60].mxu0 %v7405_v59  ;;  %v7473_v58 = vld [vmem:[%s7894_s9 + $0x108] sm:$0xff]   ;;  %v7474_v59 = vld [vmem:[%s7894_s9 + $0x1d8] sm:$0xff]  }
 0x1ac   : > { %2216 = vmatprep.mubr.bf16.mxu1 %v7546_v40  ;;  %4549 = vmatprep.mubr.bf16.mxu0 %v7546_v40 }
 0x1b3   : > { %2217 = vmatmul.mubr.bf16.gmra.mrb[32].mxu1 %v7406_v60  ;;  %4550 = vmatmul.mubr.bf16.vlgmr.msra.gmra.mrb[0].mxu0 %v7410_v61  ;;  %v7475_v60 = vld [vmem:[%s7894_s9 + $0x118] sm:$0xff]   ;;  %v7476_v61 = vld [vmem:[%s7894_s9 + $0x1e0] sm:$0xff]  }
 0x1b4   : > { %5000 = vmatpush1.bf16.msra.mxu0 %v7411_v62  ;;  %2226 = vmatprep.mubr.bf16.mxu1 %v7546_v40  ;;  %v7477_v62 = vld [vmem:[%s7894_s9 + $0x120] sm:$0xff]  }
 0x1b5   : > { %4559 = vmatprep.mubr.bf16.mxu0 %v7546_v40  ;;  %5001 = vmatprep.subr.bf16.mxu0 %v7423_v63  ;;  %v7478_v63 = vld [vmem:[%s7894_s9 + $0x1e8] sm:$0xff]  }
 0x1b8   : > { %5002 = vmatpush1.bf16.msra.mxu0 %v7421_v0  ;;  %v7479_v0 = vld [vmem:[%s7894_s9 + $0x128] sm:$0xff]  }
 0x1b9   : > { %5003 = vmatprep.subr.bf16.mxu0 %v7433_v1  ;;  %v7480_v1 = vld [vmem:[%s7894_s9 + $0x1f0] sm:$0xff]  }
 0x1bb   : > { %2227 = vmatmul.mubr.bf16.gmra.mrb[36].mxu1 %v7414_v2  ;;  %4560 = vmatmul.mubr.bf16.gmra.mrb[4].mxu0 %v7415_v3  ;;  %v7481_v2 = vld [vmem:[%s7894_s9 + $0x130] sm:$0xff]   ;;  %v7482_v3 = vld [vmem:[%s7894_s9 + $0x1f8] sm:$0xff]  }
 0x1bc   : > { %2236 = vmatprep.mubr.bf16.mxu1 %v7546_v40  ;;  %4569 = vmatprep.mubr.bf16.mxu0 %v7546_v40 }
 0x1bd   : > { %5004 = vmatpush1.bf16.msra.mxu0 %v7431_v4  ;;  %v7483_v4 = vld [vmem:[%s7894_s9 + $0x138] sm:$0xff]  }
 0x1be   : > { %5005 = vmatprep.subr.bf16.mxu0 %v7443_v5  ;;  %v7484_v5 = vld [vmem:[%s7894_s9 + $0x200] sm:$0xff]  }
 0x1c1   : > { %5006 = vmatpush1.bf16.msra.mxu0 %v7441_v6  ;;  %v7485_v6 = vld [vmem:[%s7894_s9 + $0x140] sm:$0xff]  }
 0x1c2   : > { %5007 = vmatprep.subr.bf16.mxu0 %v7450_v7  ;;  %v7486_v7 = vld [vmem:[%s7894_s9 + $0x208] sm:$0xff]  }
 0x1c3   : > { %2237 = vmatmul.mubr.bf16.gmra.mrb[40].mxu1 %v7416_v8  ;;  %4570 = vmatmul.mubr.bf16.gmra.mrb[8].mxu0 %v7420_v9  ;;  %v7487_v8 = vld [vmem:[%s7894_s9 + $0x148] sm:$0xff]   ;;  %v7488_v9 = vld [vmem:[%s7894_s9 + $0x210] sm:$0xff]  }
 0x1c4   : > { %2246 = vmatprep.mubr.bf16.mxu1 %v7546_v40  ;;  %4579 = vmatprep.mubr.bf16.mxu0 %v7546_v40 }
 0x1c5   : > { %5008 = vmatpush1.bf16.msra.mxu0 %v7448_v10  ;;  %v7489_v10 = vld [vmem:[%s7894_s9 + $0x150] sm:$0xff]  }
 0x1c6   : > { %5009 = vmatprep.subr.bf16.mxu0 %v7457_v11  ;;  %v7490_v11 = vld [vmem:[%s7894_s9 + $0x260] sm:$0xff]  }
 0x1c9   : > { %5010 = vmatpush1.bf16.msra.mxu0 %v7455_v12  ;;  %v7491_v12 = vld [vmem:[%s7894_s9 + $0x158] sm:$0xff]  }
 0x1ca   : > { %5011 = vmatprep.subr.bf16.mxu0 %v7464_v13  ;;  %v7492_v13 = vld [vmem:[%s7894_s9 + $0x268] sm:$0xff]  }
 0x1cb   : > { %2247 = vmatmul.mubr.bf16.gmra.mrb[44].mxu1 %v7424_v14  ;;  %4580 = vmatmul.mubr.bf16.gmra.mrb[12].mxu0 %v7425_v15  ;;  %v7493_v14 = vld [vmem:[%s7894_s9 + $0x160] sm:$0xff]   ;;  %v7494_v15 = vld [vmem:[%s7894_s9 + $0x270] sm:$0xff]  }
 0x1cc   : > { %2256 = vmatprep.mubr.bf16.mxu1 %v7546_v40  ;;  %4589 = vmatprep.mubr.bf16.mxu0 %v7546_v40 }
 0x1cd   : > { %5012 = vmatpush1.bf16.msra.mxu0 %v7462_v16  ;;  %v7495_v16 = vld [vmem:[%s7894_s9 + $0x168] sm:$0xff]  }
 0x1ce   : > { %5013 = vmatprep.subr.bf16.mxu0 %v7471_v17  ;;  %v7496_v17 = vld [vmem:[%s7894_s9 + $0x278] sm:$0xff]  }
 0x1d1   : > { %5014 = vmatpush1.bf16.msra.mxu0 %v7469_v18  ;;  %v7497_v18 = vld [vmem:[%s7894_s9 + $0x170] sm:$0xff]  }
 0x1d3   : > { %2257 = vmatmul.mubr.bf16.gmra.mrb[48].mxu1 %v7426_v19  ;;  %4590 = vmatmul.mubr.bf16.gmra.mrb[16].mxu0 %v7430_v20  ;;  %v7498_v19 = vld [vmem:[%s7894_s9 + $0x280] sm:$0xff]   ;;  %v7499_v20 = vld [vmem:[%s7894_s9 + $0x178] sm:$0xff]  }
 0x1d4   : > { %2266 = vmatprep.mubr.bf16.mxu1 %v7546_v40  ;;  %4599 = vmatprep.mubr.bf16.mxu0 %v7546_v40 }
 0x1db   : > { %2267 = vmatmul.mubr.bf16.gmra.mrb[52].mxu1 %v7434_v21  ;;  %4600 = vmatmul.mubr.bf16.gmra.mrb[20].mxu0 %v7435_v22  ;;  %v7500_v21 = vld [vmem:[%s7894_s9 + $0x288] sm:$0xff]   ;;  %v7501_v22 = vld [vmem:[%s7894_s9 + $0x180] sm:$0xff]  }
 0x1dc   : > { %2276 = vmatprep.mubr.bf16.mxu1 %v7546_v40  ;;  %4609 = vmatprep.mubr.bf16.mxu0 %v7546_v40 }
 0x1e3   : > { %2277 = vmatmul.mubr.bf16.gmra.mrb[56].mxu1 %v7436_v23  ;;  %4610 = vmatmul.mubr.bf16.gmra.mrb[24].mxu0 %v7440_v24  ;;  %v7502_v23 = vld [vmem:[%s7894_s9 + $0x290] sm:$0xff]   ;;  %v7503_v24 = vld [vmem:[%s7894_s9 + $0x188] sm:$0xff]  }
 0x1e4   : > { %2286 = vmatprep.mubr.bf16.mxu1 %v7546_v40  ;;  %4619 = vmatprep.mubr.bf16.mxu0 %v7546_v40 }
 0x1eb   : > { %2287 = vmatmul.mubr.bf16.gmra.mrb[60].mxu1 %v7444_v25  ;;  %4620 = vmatmul.mubr.bf16.gmra.mrb[28].mxu0 %v7445_v26  ;;  %v7504_v25 = vld [vmem:[%s7894_s9 + $0x298] sm:$0xff]   ;;  %v7505_v26 = vld [vmem:[%s7894_s9 + $0x190] sm:$0xff]   ;;  %s5876_s9 = sshll.u32 %s7583_s15, 5  ;;  %s9151_s15 = smov (!%p1036_p9, %s7583_s15), 1 }
 0x1ec   : > { %2619 = vmatprep.mubr.bf16.mxu1 %v7546_v40  ;;  %4629 = vmatprep.mubr.bf16.mxu0 %v7546_v40  ;;  %p1030_p8 = scmp.lt.s32.totalorder %s5876_s9, 63  ;;  %s6557_s23 = sshll.u32 %s9151_s15, 2 }
 0x1ed   : > { %s1040_s26 = scalar_lea.vmem %s9093_s3, %s6557_s23 }
 0x1ee   : > { %s9149_s9 = smov (!%p1030_p8, %s5876_s9), 63 }
 0x1ef   : > { %s6556_s18 = sshll.u32 %s9149_s9, 3 }
 0x1f0   : > { %s8630_s22 = scalar_lea.vmem %s9092_s2, %s6556_s18 }
 0x1f3   : > { %2620 = vmatmul.mubr.bf16.vlgmr.msra.gmra.mrb[0].mxu1 %v7446_v27  ;;  %4630 = vmatmul.mubr.bf16.gmra.mrb[32].mxu0 %v7447_v28 }
 0x1f4   : > { %6598 = vmatpush1.bf16.msra.mxu1 %v7507_v29  ;;  %2629 = vmatprep.mubr.bf16.mxu1 %v7546_v40 }
 0x1f5   : > { %4639 = vmatprep.mubr.bf16.mxu0 %v7546_v40  ;;  %6591 = vmatprep.subr.bf16.mxu1 %v7508_v30 }
 0x1f8   : > { %6599 = vmatpush1.bf16.msra.mxu1 %v7509_v33 }
 0x1f9   : > { %6592 = vmatprep.subr.bf16.mxu1 %v7510_v34 }
 0x1fb   : > { %2630 = vmatmul.mubr.bf16.gmra.mrb[4].mxu1 %v7451_v31  ;;  %4640 = vmatmul.mubr.bf16.gmra.mrb[36].mxu0 %v7452_v32 }
 0x1fc   : > { %2639 = vmatprep.mubr.bf16.mxu1 %v7546_v40  ;;  %4649 = vmatprep.mubr.bf16.mxu0 %v7546_v40 }
 0x1fd   : > { %6600 = vmatpush1.bf16.msra.mxu1 %v7511_v35 }
 0x1fe   : > { %6593 = vmatprep.subr.bf16.mxu1 %v7512_v36 }
 0x201   : > { %6601 = vmatpush1.bf16.msra.mxu1 %v7513_v39 }
 0x202   : > { %6594 = vmatprep.subr.bf16.mxu1 %v7514_v41 }
 0x203   : > { %2640 = vmatmul.mubr.bf16.gmra.mrb[8].mxu1 %v7453_v37  ;;  %4650 = vmatmul.mubr.bf16.gmra.mrb[40].mxu0 %v7454_v38 }
 0x204   : > { %2649 = vmatprep.mubr.bf16.mxu1 %v7546_v40  ;;  %4659 = vmatprep.mubr.bf16.mxu0 %v7546_v40 }
 0x205   : > { %6602 = vmatpush1.bf16.msra.mxu1 %v7515_v42 }
 0x206   : > { %6595 = vmatprep.subr.bf16.mxu1 %v7516_v43 }
 0x209   : > { %6603 = vmatpush1.bf16.msra.mxu1 %v7517_v46 }
 0x20a   : > { %6596 = vmatprep.subr.bf16.mxu1 %v7518_v47 }
 0x20b   : > { %2650 = vmatmul.mubr.bf16.gmra.mrb[12].mxu1 %v7458_v44  ;;  %4660 = vmatmul.mubr.bf16.gmra.mrb[44].mxu0 %v7459_v45 }
 0x20c   : > { %2659 = vmatprep.mubr.bf16.mxu1 %v7546_v40  ;;  %4669 = vmatprep.mubr.bf16.mxu0 %v7546_v40 }
 0x20d   : > { %6604 = vmatpush1.bf16.msra.mxu1 %v7519_v48 }
 0x20e   : > { %6597 = vmatprep.subr.bf16.mxu1 %v7520_v49 }
 0x211   : > { %6605 = vmatpush1.bf16.msra.mxu1 %v7521_v52 }
 0x213   : > { %2660 = vmatmul.mubr.bf16.gmra.mrb[16].mxu1 %v7460_v50  ;;  %4670 = vmatmul.mubr.bf16.gmra.mrb[48].mxu0 %v7461_v51 }
 0x214   : > { %2669 = vmatprep.mubr.bf16.mxu1 %v7546_v40  ;;  %4679 = vmatprep.mubr.bf16.mxu0 %v7546_v40 }
 0x21b   : > { %2670 = vmatmul.mubr.bf16.gmra.mrb[20].mxu1 %v7465_v53  ;;  %4680 = vmatmul.mubr.bf16.gmra.mrb[52].mxu0 %v7466_v54 }
 0x21c   : > { %2679 = vmatprep.mubr.bf16.mxu1 %v7546_v40  ;;  %4689 = vmatprep.mubr.bf16.mxu0 %v7546_v40 }
 0x223   : > { %2680 = vmatmul.mubr.bf16.gmra.mrb[24].mxu1 %v7467_v55  ;;  %4690 = vmatmul.mubr.bf16.gmra.mrb[56].mxu0 %v7468_v56 }
 0x224   : > { %2689 = vmatprep.mubr.bf16.mxu1 %v7546_v40  ;;  %4699 = vmatprep.mubr.bf16.mxu0 %v7546_v40 }
 0x22b   : > { %2690 = vmatmul.mubr.bf16.gmra.mrb[28].mxu1 %v7472_v57  ;;  %4700 = vmatmul.mubr.bf16.gmra.mrb[60].mxu0 %v7473_v58 }
 0x22c   : > { %2699 = vmatprep.mubr.bf16.mxu1 %v7546_v40  ;;  %5031 = vmatprep.mubr.bf16.mxu0 %v7546_v40 }
 0x233   : > { %2700 = vmatmul.mubr.bf16.gmra.mrb[32].mxu1 %v7474_v59  ;;  %5032 = vmatmul.mubr.bf16.vlgmr.msra.gmra.mrb[0].mxu0 %v7475_v60 }
 0x234   : > { %2709 = vmatprep.mubr.bf16.mxu1 %v7546_v40  ;;  %5041 = vmatprep.mubr.bf16.mxu0 %v7546_v40 }
 0x23b   : > { %2710 = vmatmul.mubr.bf16.gmra.mrb[36].mxu1 %v7476_v61  ;;  %5042 = vmatmul.mubr.bf16.gmra.mrb[4].mxu0 %v7477_v62 }
 0x23c   : > { %2719 = vmatprep.mubr.bf16.mxu1 %v7546_v40  ;;  %5051 = vmatprep.mubr.bf16.mxu0 %v7546_v40 }
 0x243   : > { %2720 = vmatmul.mubr.bf16.gmra.mrb[40].mxu1 %v7478_v63  ;;  %5052 = vmatmul.mubr.bf16.gmra.mrb[8].mxu0 %v7479_v0 }
 0x244   : > { %2729 = vmatprep.mubr.bf16.mxu1 %v7546_v40  ;;  %5061 = vmatprep.mubr.bf16.mxu0 %v7546_v40 }
 0x24b   : > { %2730 = vmatmul.mubr.bf16.gmra.mrb[44].mxu1 %v7480_v1  ;;  %5062 = vmatmul.mubr.bf16.gmra.mrb[12].mxu0 %v7481_v2 }
 0x24c   : > { %2739 = vmatprep.mubr.bf16.mxu1 %v7546_v40  ;;  %5071 = vmatprep.mubr.bf16.mxu0 %v7546_v40 }
 0x253   : > { %2740 = vmatmul.mubr.bf16.gmra.mrb[48].mxu1 %v7482_v3  ;;  %5072 = vmatmul.mubr.bf16.gmra.mrb[16].mxu0 %v7483_v4 }
 0x254   : > { %2749 = vmatprep.mubr.bf16.mxu1 %v7546_v40  ;;  %5081 = vmatprep.mubr.bf16.mxu0 %v7546_v40 }
 0x25b   : > { %2750 = vmatmul.mubr.bf16.gmra.mrb[52].mxu1 %v7484_v5  ;;  %5082 = vmatmul.mubr.bf16.gmra.mrb[20].mxu0 %v7485_v6 }
 0x25c   : > { %2759 = vmatprep.mubr.bf16.mxu1 %v7546_v40  ;;  %5091 = vmatprep.mubr.bf16.mxu0 %v7546_v40 }
 0x263   : > { %2760 = vmatmul.mubr.bf16.gmra.mrb[56].mxu1 %v7486_v7  ;;  %5092 = vmatmul.mubr.bf16.gmra.mrb[24].mxu0 %v7487_v8 }
 0x264   : > { %2769 = vmatprep.mubr.bf16.mxu1 %v7546_v40  ;;  %5101 = vmatprep.mubr.bf16.mxu0 %v7546_v40 }
 0x26b   : > { %2770 = vmatmul.mubr.bf16.gmra.mrb[60].mxu1 %v7488_v9  ;;  %5102 = vmatmul.mubr.bf16.gmra.mrb[28].mxu0 %v7489_v10 }
 0x26c   : > { %3182 = vmatprep.mubr.bf16.mxu1 %v7546_v40  ;;  %5111 = vmatprep.mubr.bf16.mxu0 %v7546_v40 }
 0x273   : > { %3183 = vmatmul.mubr.bf16.vlgmr.msra.gmra.mrb[32].mxu1 %v7490_v11  ;;  %5112 = vmatmul.mubr.bf16.gmra.mrb[32].mxu0 %v7491_v12 }
 0x274   : > { %3192 = vmatprep.mubr.bf16.mxu1 %v7546_v40  ;;  %5121 = vmatprep.mubr.bf16.mxu0 %v7546_v40 }
 0x27b   : > { %3193 = vmatmul.mubr.bf16.gmra.mrb[36].mxu1 %v7492_v13  ;;  %5122 = vmatmul.mubr.bf16.gmra.mrb[36].mxu0 %v7493_v14 }
 0x27c   : > { %3202 = vmatprep.mubr.bf16.mxu1 %v7546_v40  ;;  %5131 = vmatprep.mubr.bf16.mxu0 %v7546_v40 }
 0x283   : > { %3203 = vmatmul.mubr.bf16.gmra.mrb[40].mxu1 %v7494_v15  ;;  %5132 = vmatmul.mubr.bf16.gmra.mrb[40].mxu0 %v7495_v16 }
 0x284   : > { %3212 = vmatprep.mubr.bf16.mxu1 %v7546_v40  ;;  %5141 = vmatprep.mubr.bf16.mxu0 %v7546_v40 }
 0x28b   : > { %3213 = vmatmul.mubr.bf16.gmra.mrb[44].mxu1 %v7496_v17  ;;  %5142 = vmatmul.mubr.bf16.gmra.mrb[44].mxu0 %v7497_v18 }
 0x28c   : > { %3222 = vmatprep.mubr.bf16.mxu1 %v7546_v40  ;;  %5151 = vmatprep.mubr.bf16.mxu0 %v7546_v40 }
 0x293   : > { %3223 = vmatmul.mubr.bf16.gmra.mrb[48].mxu1 %v7498_v19  ;;  %5152 = vmatmul.mubr.bf16.gmra.mrb[48].mxu0 %v7499_v20 }
 0x294   : > { %3232 = vmatprep.mubr.bf16.mxu1 %v7546_v40  ;;  %5161 = vmatprep.mubr.bf16.mxu0 %v7546_v40 }
 0x29b   : > { %3233 = vmatmul.mubr.bf16.gmra.mrb[52].mxu1 %v7500_v21  ;;  %5162 = vmatmul.mubr.bf16.gmra.mrb[52].mxu0 %v7501_v22 }
 0x29c   : > { %3242 = vmatprep.mubr.bf16.mxu1 %v7546_v40  ;;  %5171 = vmatprep.mubr.bf16.mxu0 %v7546_v40 }
 0x2a3   : > { %3243 = vmatmul.mubr.bf16.gmra.mrb[56].mxu1 %v7502_v23  ;;  %5172 = vmatmul.mubr.bf16.gmra.mrb[56].mxu0 %v7503_v24 }
 0x2a4   : > { %3252 = vmatprep.mubr.bf16.mxu1 %v7546_v40  ;;  %5181 = vmatprep.mubr.bf16.mxu0 %v7546_v40 }
 0x2ab   : > { %3253 = vmatmul.mubr.bf16.gmra.mrb[60].mxu1 %v7504_v25  ;;  %5182 = vmatmul.mubr.bf16.gmra.mrb[60].mxu0 %v7505_v26 }
 0x2c6   : > { %v2621_v27 = vpop.f32.mrb[0].mxu1 }
 0x2c7   : > { %v2623_v28 = vpop.f32.mrb[1].mxu1 }
 0x2c8   : > { %v2625_v29 = vpop.f32.mrb[2].mxu1 }
 0x2c9   : > { %v2627_v30 = vpop.f32.mrb[3].mxu1 }
 0x2ce   : > { %v2631_v31 = vpop.f32.mrb[4].mxu1 }
 0x2cf   : > { %v2633_v32 = vpop.f32.mrb[5].mxu1 }
 0x2d0   : > { %v2635_v33 = vpop.f32.mrb[6].mxu1 }
 0x2d1   : > { %v2637_v34 = vpop.f32.mrb[7].mxu1 }
 0x2d6   : > { %v2641_v35 = vpop.f32.mrb[8].mxu1 }
 0x2d7   : > { %v2643_v36 = vpop.f32.mrb[9].mxu1 }
 0x2d8   : > { %v2645_v37 = vpop.f32.mrb[10].mxu1 }
 0x2d9   : > { %v2647_v38 = vpop.f32.mrb[11].mxu1 }
 0x2de   : > { %v2651_v39 = vpop.f32.mrb[12].mxu1 }
 0x2df   : > { %v8584_v41 = vpop.f32.mrb[13].mxu1 }
 0x2e0   : > { %v8586_v40 = vpop.f32.mrb[14].mxu1 }
 0x2e1   : > { %v8588_v42 = vpop.f32.mrb[15].mxu1 }
 0x2e6   : > { %v8590_v43 = vpop.f32.mrb[16].mxu1 }
 0x2e7   : > { %v8592_v44 = vpop.f32.mrb[17].mxu1 }
 0x2e8   : > { %v8594_v45 = vpop.f32.mrb[18].mxu1 }
 0x2e9   : > { %v8596_v46 = vpop.f32.mrb[19].mxu1 }
 0x2ee   : > { %v8598_v47 = vpop.f32.mrb[20].mxu1 }
 0x2ef   : > { %v8600_v48 = vpop.f32.mrb[21].mxu1 }
 0x2f0   : > { %v8602_v49 = vpop.f32.mrb[22].mxu1 }
 0x2f1   : > { %v8604_v50 = vpop.f32.mrb[23].mxu1 }
 0x2f6   : > { %v8606_v51 = vpop.f32.mrb[24].mxu1 }
 0x2f7   : > { %v8608_v52 = vpop.f32.mrb[25].mxu1 }
 0x2f8   : > { %v8610_v53 = vpop.f32.mrb[26].mxu1 }
 0x2f9   : > { %v8612_v54 = vpop.f32.mrb[27].mxu1 }
 0x2fe   : > { %v8615_v55 = vpop.f32.mrb[28].mxu1 }
 0x2ff   : > { %v8617_v56 = vpop.f32.mrb[29].mxu1 }
 0x300   : > { %v8619_v57 = vpop.f32.mrb[30].mxu1 }
 0x301   : > { %v8621_v58 = vpop.f32.mrb[31].mxu1 }
 0x306   : > { %v5033_v59 = vpop.f32.mrb[0].mxu0 }
 0x307   : > { %v8623_v60 = vadd.f32 %v5033_v59, %v2621_v27  ;;  %v5035_v61 = vpop.f32.mrb[1].mxu0 }
 0x308   : > { %v8625_v62 = vadd.f32 %v5035_v61, %v2623_v28  ;;  %v5037_v63 = vpop.f32.mrb[2].mxu0 }
 0x309   : > { %v8632_v0 = vadd.f32 %v5037_v63, %v2625_v29  ;;  %v5039_v1 = vpop.f32.mrb[3].mxu0 }
 0x30a   : > { %v6558_v2 = vpack.c.bf16 %v8625_v62, %v8623_v60  ;;  %v8636_v3 = vadd.f32 %v5039_v1, %v2627_v30 }
 0x30b   : > { %v5480_v30 = vadd.f32 %v8632_v0, %v8623_v60 }
 0x30c   : > { %5448 = vst [vmem:[%s8630_s22] sm:$0xff] %v6558_v2  ;;  %v6559_v4 = vpack.c.bf16 %v8636_v3, %v8632_v0 }
 0x30e   : > { %5449 = vst [vmem:[%s8630_s22 + $0x8] sm:$0xff] %v6559_v4  ;;  %v5043_v5 = vpop.f32.mrb[4].mxu0 }
 0x30f   : > { %v8642_v6 = vadd.f32 %v5043_v5, %v2631_v31  ;;  %v5045_v7 = vpop.f32.mrb[5].mxu0 }
 0x310   : > { %v8644_v8 = vadd.f32 %v5045_v7, %v2633_v32  ;;  %v5047_v9 = vpop.f32.mrb[6].mxu0 }
 0x311   : > { %v8646_v10 = vadd.f32 %v5047_v9, %v2635_v33  ;;  %v5049_v11 = vpop.f32.mrb[7].mxu0 }
 0x312   : > { %v6560_v12 = vpack.c.bf16 %v8644_v8, %v8642_v6  ;;  %v8650_v13 = vadd.f32 %v5049_v11, %v2637_v34 }
 0x314   : > { %5450 = vst [vmem:[%s8630_s22 + $0x10] sm:$0xff] %v6560_v12  ;;  %v6561_v14 = vpack.c.bf16 %v8650_v13, %v8646_v10 }
 0x316   : > { %5451 = vst [vmem:[%s8630_s22 + $0x18] sm:$0xff] %v6561_v14  ;;  %v5053_v15 = vpop.f32.mrb[8].mxu0 }
 0x317   : > { %v8656_v16 = vadd.f32 %v5053_v15, %v2641_v35  ;;  %v5055_v17 = vpop.f32.mrb[9].mxu0  ;;  %v5481_v35 = vadd.f32 %v8642_v6, %v5480_v30 }
 0x318   : > { %v8658_v18 = vadd.f32 %v5055_v17, %v2643_v36  ;;  %v5057_v19 = vpop.f32.mrb[10].mxu0 }
 0x319   : > { %v8660_v20 = vadd.f32 %v5057_v19, %v2645_v37  ;;  %v5059_v21 = vpop.f32.mrb[11].mxu0  ;;  %v5517_v37 = vadd.f32 %v8636_v3, %v8625_v62 }
 0x31a   : > { %v6562_v22 = vpack.c.bf16 %v8658_v18, %v8656_v16  ;;  %v8664_v23 = vadd.f32 %v5059_v21, %v2647_v38 }
 0x31c   : > { %5452 = vst [vmem:[%s8630_s22 + $0x20] sm:$0xff] %v6562_v22  ;;  %v6563_v24 = vpack.c.bf16 %v8664_v23, %v8660_v20 }
 0x31e   : > { %5453 = vst [vmem:[%s8630_s22 + $0x28] sm:$0xff] %v6563_v24  ;;  %v5063_v25 = vpop.f32.mrb[12].mxu0 }
 0x31f   : > { %v8670_v26 = vadd.f32 %v5063_v25, %v2651_v39  ;;  %v5065_v27 = vpop.f32.mrb[13].mxu0  ;;  %v5482_v39 = vadd.f32 %v8646_v10, %v5481_v35 }
 0x320   : > { %v8673_v28 = vadd.f32 %v5065_v27, %v8584_v41  ;;  %v5067_v29 = vpop.f32.mrb[14].mxu0 }
 0x321   : > { %v8678_v31 = vadd.f32 %v5067_v29, %v8586_v40  ;;  %v5069_v32 = vpop.f32.mrb[15].mxu0  ;;  %v5483_v63 = vadd.f32 %v8656_v16, %v5482_v39 }
 0x322   : > { %v6564_v33 = vpack.c.bf16 %v8673_v28, %v8670_v26  ;;  %v8683_v34 = vadd.f32 %v5069_v32, %v8588_v42  ;;  %v5518_v42 = vadd.f32 %v8644_v8, %v5517_v37 }
 0x323   : > { %v5484_v7 = vadd.f32 %v8660_v20, %v5483_v63 }
 0x324   : > { %5454 = vst [vmem:[%s8630_s22 + $0x30] sm:$0xff] %v6564_v33  ;;  %v6565_v36 = vpack.c.bf16 %v8683_v34, %v8678_v31 }
 0x325   : > { %v5485_v11 = vadd.f32 %v8670_v26, %v5484_v7 }
 0x326   : > { %5455 = vst [vmem:[%s8630_s22 + $0x38] sm:$0xff] %v6565_v36  ;;  %v5073_v38 = vpop.f32.mrb[16].mxu0 }
 0x327   : > { %v8694_v41 = vadd.f32 %v5073_v38, %v8590_v43  ;;  %v5075_v40 = vpop.f32.mrb[17].mxu0  ;;  %v5519_v43 = vadd.f32 %v8650_v13, %v5518_v42 }
 0x328   : > { %v8698_v59 = vadd.f32 %v5075_v40, %v8592_v44  ;;  %v5077_v61 = vpop.f32.mrb[18].mxu0 }
 0x329   : > { %v8702_v1 = vadd.f32 %v5077_v61, %v8594_v45  ;;  %v5079_v2 = vpop.f32.mrb[19].mxu0  ;;  %v5520_v9 = vadd.f32 %v8658_v18, %v5519_v43 }
 0x32a   : > { %v6566_v4 = vpack.c.bf16 %v8698_v59, %v8694_v41  ;;  %v8707_v5 = vadd.f32 %v5079_v2, %v8596_v46 }
 0x32b   : > { %v5521_v21 = vadd.f32 %v8664_v23, %v5520_v9 }
 0x32c   : > { %5456 = vst [vmem:[%s8630_s22 + $0x40] sm:$0xff] %v6566_v4  ;;  %v6567_v44 = vpack.c.bf16 %v8707_v5, %v8702_v1 }
 0x32d   : > { %v5522_v25 = vadd.f32 %v8673_v28, %v5521_v21 }
 0x32e   : > { %5457 = vst [vmem:[%s8630_s22 + $0x48] sm:$0xff] %v6567_v44  ;;  %v5083_v45 = vpop.f32.mrb[20].mxu0 }
 0x32f   : > { %v8718_v12 = vadd.f32 %v5083_v45, %v8598_v47  ;;  %v5085_v46 = vpop.f32.mrb[21].mxu0  ;;  %v5486_v47 = vadd.f32 %v8678_v31, %v5485_v11 }
 0x330   : > { %v8721_v14 = vadd.f32 %v5085_v46, %v8600_v48  ;;  %v5087_v15 = vpop.f32.mrb[22].mxu0 }
 0x331   : > { %v8724_v17 = vadd.f32 %v5087_v15, %v8602_v49  ;;  %v5089_v19 = vpop.f32.mrb[23].mxu0  ;;  %v5487_v49 = vadd.f32 %v8694_v41, %v5486_v47 }
 0x332   : > { %v6568_v22 = vpack.c.bf16 %v8721_v14, %v8718_v12  ;;  %v8730_v24 = vadd.f32 %v5089_v19, %v8604_v50  ;;  %v5523_v50 = vadd.f32 %v8683_v34, %v5522_v25 }
 0x333   : > { %v5488_v35 = vadd.f32 %v8702_v1, %v5487_v49 }
 0x334   : > { %5458 = vst [vmem:[%s8630_s22 + $0x50] sm:$0xff] %v6568_v22  ;;  %v6569_v48 = vpack.c.bf16 %v8730_v24, %v8724_v17  ;;  %v5524_v38 = vadd.f32 %v8698_v59, %v5523_v50 }
 0x335   : > { %v5489_v40 = vadd.f32 %v8718_v12, %v5488_v35 }
 0x336   : > { %5459 = vst [vmem:[%s8630_s22 + $0x58] sm:$0xff] %v6569_v48  ;;  %v5093_v27 = vpop.f32.mrb[24].mxu0  ;;  %v5525_v42 = vadd.f32 %v8707_v5, %v5524_v38 }
 0x337   : > { %v8740_v29 = vadd.f32 %v5093_v27, %v8606_v51  ;;  %v5095_v30 = vpop.f32.mrb[25].mxu0  ;;  %v5490_v61 = vadd.f32 %v8724_v17, %v5489_v40 }
 0x338   : > { %v8744_v32 = vadd.f32 %v5095_v30, %v8608_v52  ;;  %v5097_v33 = vpop.f32.mrb[26].mxu0 }
 0x339   : > { %v8748_v36 = vadd.f32 %v5097_v33, %v8610_v53  ;;  %v5099_v37 = vpop.f32.mrb[27].mxu0  ;;  %v5491_v44 = vadd.f32 %v8740_v29, %v5490_v61 }
 0x33a   : > { %v6570_v39 = vpack.c.bf16 %v8744_v32, %v8740_v29  ;;  %v8754_v51 = vadd.f32 %v5099_v37, %v8612_v54  ;;  %v5526_v54 = vadd.f32 %v8721_v14, %v5525_v42 }
 0x33b   : > { %v5492_v46 = vadd.f32 %v8748_v36, %v5491_v44 }
 0x33c   : > { %5460 = vst [vmem:[%s8630_s22 + $0x60] sm:$0xff] %v6570_v39  ;;  %v6571_v52 = vpack.c.bf16 %v8754_v51, %v8748_v36 }
 0x33e   : > { %5461 = vst [vmem:[%s8630_s22 + $0x68] sm:$0xff] %v6571_v52  ;;  %v5103_v53 = vpop.f32.mrb[28].mxu0 }
 0x33f   : > { %v8764_v63 = vadd.f32 %v5103_v53, %v8615_v55  ;;  %v5105_v2 = vpop.f32.mrb[29].mxu0  ;;  %v5527_v55 = vadd.f32 %v8730_v24, %v5526_v54 }
 0x340   : > { %v8768_v4 = vadd.f32 %v5105_v2, %v8617_v56  ;;  %v5107_v43 = vpop.f32.mrb[30].mxu0 }
 0x341   : > { %v8772_v7 = vadd.f32 %v5107_v43, %v8619_v57  ;;  %v5109_v9 = vpop.f32.mrb[31].mxu0  ;;  %v5528_v15 = vadd.f32 %v8744_v32, %v5527_v55  ;;  %v5493_v21 = vadd.f32 %v8764_v63, %v5492_v46 }
 0x342   : > { %v6572_v45 = vpack.c.bf16 %v8768_v4, %v8764_v63  ;;  %v8777_v11 = vadd.f32 %v5109_v9, %v8621_v58 }
 0x343   : > { %v5529_v33 = vadd.f32 %v8754_v51, %v5528_v15  ;;  %v5494_v38 = vadd.f32 %v8772_v7, %v5493_v21 }
 0x344   : > { %5462 = vst [vmem:[%s8630_s22 + $0x70] sm:$0xff] %v6572_v45  ;;  %v6573_v56 = vpack.c.bf16 %v8777_v11, %v8772_v7 }
 0x345   : > { %v5530_v39 = vadd.f32 %v8768_v4, %v5529_v33 }
 0x346   : > { %5463 = vst [vmem:[%s8630_s22 + $0x78] sm:$0xff] %v6573_v56  ;;  %v3184_v57 = vpop.f32.mrb[32].mxu1  ;;  %v5113_v19 = vpop.f32.mrb[32].mxu0 }
 0x347   : > { %v8787_v22 = vadd.f32 %v5113_v19, %v3184_v57  ;;  %v3186_v58 = vpop.f32.mrb[33].mxu1  ;;  %v5115_v47 = vpop.f32.mrb[33].mxu0  ;;  %v5531_v43 = vadd.f32 %v8777_v11, %v5530_v39 }
 0x348   : > { %v8789_v25 = vadd.f32 %v5115_v47, %v3186_v58  ;;  %v3188_v48 = vpop.f32.mrb[34].mxu1  ;;  %v5117_v49 = vpop.f32.mrb[34].mxu0 }
 0x349   : > { %v8791_v27 = vadd.f32 %v5117_v49, %v3188_v48  ;;  %v3190_v30 = vpop.f32.mrb[35].mxu1  ;;  %v5119_v50 = vpop.f32.mrb[35].mxu0  ;;  %v5495_v52 = vadd.f32 %v8787_v22, %v5494_v38 }
 0x34a   : > { %v6574_v35 = vpack.c.bf16 %v8789_v25, %v8787_v22  ;;  %v8796_v37 = vadd.f32 %v5119_v50, %v3190_v30  ;;  %v5532_v57 = vadd.f32 %v8789_v25, %v5531_v43 }
 0x34b   : > { %v5496_v55 = vadd.f32 %v8791_v27, %v5495_v52 }
 0x34c   : > { %5464 = vst [vmem:[%s8630_s22 + $0x80] sm:$0xff] %v6574_v35  ;;  %v6575_v40 = vpack.c.bf16 %v8796_v37, %v8791_v27  ;;  %v5533_v48 = vadd.f32 %v8796_v37, %v5532_v57 }
 0x34e   : > { %5465 = vst [vmem:[%s8630_s22 + $0x88] sm:$0xff] %v6575_v40  ;;  %v3194_v42 = vpop.f32.mrb[36].mxu1  ;;  %v5123_v53 = vpop.f32.mrb[36].mxu0 }
 0x34f   : > { %v8805_v61 = vadd.f32 %v5123_v53, %v3194_v42  ;;  %v3196_v2 = vpop.f32.mrb[37].mxu1  ;;  %v5125_v54 = vpop.f32.mrb[37].mxu0 }
 0x350   : > { %v8808_v44 = vadd.f32 %v5125_v54, %v3196_v2  ;;  %v3198_v9 = vpop.f32.mrb[38].mxu1  ;;  %v5127_v45 = vpop.f32.mrb[38].mxu0 }
 0x351   : > { %v8811_v56 = vadd.f32 %v5127_v45, %v3198_v9  ;;  %v3200_v46 = vpop.f32.mrb[39].mxu1  ;;  %v5129_v15 = vpop.f32.mrb[39].mxu0  ;;  %v5497_v58 = vadd.f32 %v8805_v61, %v5496_v55 }
 0x352   : > { %9111 = vst [vmem:[#allocation3_spill] sm:$0xff] %v8808_v44  ;;  %v6576_v19 = vpack.c.bf16 %v8808_v44, %v8805_v61  ;;  %v8816_v21 = vadd.f32 %v5129_v15, %v3200_v46  ;;  %v5534_v39 = vadd.f32 %v8808_v44, %v5533_v48 }
 0x353   : > { %v5498_v50 = vadd.f32 %v8811_v56, %v5497_v58 }
 0x354   : > { %9112 = vst [vmem:[#allocation4_spill] sm:$0xff] %v8816_v21  ;;  %5466 = vst [vmem:[%s8630_s22 + $0x90] sm:$0xff] %v6576_v19  ;;  %v6577_v47 = vpack.c.bf16 %v8816_v21, %v8811_v56  ;;  %v5535_v46 = vadd.f32 %v8816_v21, %v5534_v39 }
 0x356   : > { %5467 = vst [vmem:[%s8630_s22 + $0x98] sm:$0xff] %v6577_v47  ;;  %v3204_v49 = vpop.f32.mrb[40].mxu1  ;;  %v5133_v30 = vpop.f32.mrb[40].mxu0 }
 0x357   : > { %v8825_v33 = vadd.f32 %v5133_v30, %v3204_v49  ;;  %v3206_v35 = vpop.f32.mrb[41].mxu1  ;;  %v5135_v38 = vpop.f32.mrb[41].mxu0 }
 0x358   : > { %v8828_v40 = vadd.f32 %v5135_v38, %v3206_v35  ;;  %v3208_v52 = vpop.f32.mrb[42].mxu1  ;;  %v5137_v42 = vpop.f32.mrb[42].mxu0 }
 0x359   : > { %v5499_v53 = vadd.f32 %v8825_v33, %v5498_v50  ;;  %v8831_v2 = vadd.f32 %v5137_v42, %v3208_v52  ;;  %v3210_v54 = vpop.f32.mrb[43].mxu1  ;;  %v5139_v43 = vpop.f32.mrb[43].mxu0 }
 0x35a   : > { %9113 = vst [vmem:[#allocation5_spill] sm:$0xff] %v8828_v40  ;;  %v6578_v9 = vpack.c.bf16 %v8828_v40, %v8825_v33  ;;  %v8835_v45 = vadd.f32 %v5139_v43, %v3210_v54  ;;  %v5536_v57 = vadd.f32 %v8828_v40, %v5535_v46 }
 0x35b   : > { %v5500_v55 = vadd.f32 %v8831_v2, %v5499_v53 }
 0x35c   : > { %9114 = vst [vmem:[#allocation6_spill] sm:$0xff] %v8835_v45  ;;  %5468 = vst [vmem:[%s8630_s22 + $0xa0] sm:$0xff] %v6578_v9  ;;  %v6579_v15 = vpack.c.bf16 %v8835_v45, %v8831_v2  ;;  %v5537_v53 = vadd.f32 %v8835_v45, %v5536_v57 }
 0x35e   : > { %5469 = vst [vmem:[%s8630_s22 + $0xa8] sm:$0xff] %v6579_v15  ;;  %v3214_v19 = vpop.f32.mrb[44].mxu1  ;;  %v5143_v58 = vpop.f32.mrb[44].mxu0 }
 0x35f   : > { %v8844_v47 = vadd.f32 %v5143_v58, %v3214_v19  ;;  %v3216_v48 = vpop.f32.mrb[45].mxu1  ;;  %v5145_v49 = vpop.f32.mrb[45].mxu0 }
 0x360   : > { %v8846_v30 = vadd.f32 %v5145_v49, %v3216_v48  ;;  %v3218_v50 = vpop.f32.mrb[46].mxu1  ;;  %v5147_v35 = vpop.f32.mrb[46].mxu0 }
 0x361   : > { %v5501_v38 = vadd.f32 %v8844_v47, %v5500_v55  ;;  %v8849_v39 = vadd.f32 %v5147_v35, %v3218_v50  ;;  %v3220_v52 = vpop.f32.mrb[47].mxu1  ;;  %v5149_v42 = vpop.f32.mrb[47].mxu0 }
 0x362   : > { %9115 = vst [vmem:[#allocation7_spill] sm:$0xff] %v8846_v30  ;;  %v6580_v54 = vpack.c.bf16 %v8846_v30, %v8844_v47  ;;  %v8854_v43 = vadd.f32 %v5149_v42, %v3220_v52  ;;  %v5538_v46 = vadd.f32 %v8846_v30, %v5537_v53 }
 0x363   : > { %v5502_v9 = vadd.f32 %v8849_v39, %v5501_v38 }
 0x364   : > { %9116 = vst [vmem:[#allocation8_spill] sm:$0xff] %v8854_v43  ;;  %5470 = vst [vmem:[%s8630_s22 + $0xb0] sm:$0xff] %v6580_v54  ;;  %v6581_v15 = vpack.c.bf16 %v8854_v43, %v8849_v39  ;;  %v5539_v49 = vadd.f32 %v8854_v43, %v5538_v46 }
 0x366   : > { %5471 = vst [vmem:[%s8630_s22 + $0xb8] sm:$0xff] %v6581_v15  ;;  %v3224_v55 = vpop.f32.mrb[48].mxu1  ;;  %v5153_v19 = vpop.f32.mrb[48].mxu0 }
 0x367   : > { %v8862_v58 = vadd.f32 %v5153_v19, %v3224_v55  ;;  %v3226_v57 = vpop.f32.mrb[49].mxu1  ;;  %v5155_v48 = vpop.f32.mrb[49].mxu0 }
 0x368   : > { %v8865_v50 = vadd.f32 %v5155_v48, %v3226_v57  ;;  %v3228_v35 = vpop.f32.mrb[50].mxu1  ;;  %v5157_v38 = vpop.f32.mrb[50].mxu0 }
 0x369   : > { %v5503_v52 = vadd.f32 %v8862_v58, %v5502_v9  ;;  %v8868_v42 = vadd.f32 %v5157_v38, %v3228_v35  ;;  %v3230_v53 = vpop.f32.mrb[51].mxu1  ;;  %v5159_v54 = vpop.f32.mrb[51].mxu0 }
 0x36a   : > { %9117 = vst [vmem:[#allocation9_spill] sm:$0xff] %v8865_v50  ;;  %v6582_v15 = vpack.c.bf16 %v8865_v50, %v8862_v58  ;;  %v5540_v55 = vadd.f32 %v8865_v50, %v5539_v49  ;;  %v8873_v19 = vadd.f32 %v5159_v54, %v3230_v53 }
 0x36b   : > { %v5504_v30 = vadd.f32 %v8868_v42, %v5503_v52 }
 0x36c   : > { %9118 = vst [vmem:[#allocation10_spill] sm:$0xff] %v8873_v19  ;;  %5472 = vst [vmem:[%s8630_s22 + $0xc0] sm:$0xff] %v6582_v15  ;;  %v6583_v46 = vpack.c.bf16 %v8873_v19, %v8868_v42  ;;  %v5541_v57 = vadd.f32 %v8873_v19, %v5540_v55 }
 0x36e   : > { %5473 = vst [vmem:[%s8630_s22 + $0xc8] sm:$0xff] %v6583_v46  ;;  %v3234_v9 = vpop.f32.mrb[52].mxu1  ;;  %v5163_v48 = vpop.f32.mrb[52].mxu0 }
 0x36f   : > { %v8881_v35 = vadd.f32 %v5163_v48, %v3234_v9  ;;  %v3236_v38 = vpop.f32.mrb[53].mxu1  ;;  %v5165_v43 = vpop.f32.mrb[53].mxu0 }
 0x370   : > { %v8883_v49 = vadd.f32 %v5165_v43, %v3236_v38  ;;  %v3238_v53 = vpop.f32.mrb[54].mxu1  ;;  %v5167_v54 = vpop.f32.mrb[54].mxu0 }
 0x371   : > { %v5505_v52 = vadd.f32 %v8881_v35, %v5504_v30  ;;  %v8886_v15 = vadd.f32 %v5167_v54, %v3238_v53  ;;  %v3240_v50 = vpop.f32.mrb[55].mxu1  ;;  %v5169_v45 = vpop.f32.mrb[55].mxu0 }
 0x372   : > { %9119 = vst [vmem:[#allocation11_spill] sm:$0xff] %v8883_v49  ;;  %v6584_v55 = vpack.c.bf16 %v8883_v49, %v8881_v35  ;;  %v5542_v46 = vadd.f32 %v8883_v49, %v5541_v57  ;;  %v8891_v9 = vadd.f32 %v5169_v45, %v3240_v50 }
 0x373   : > { %9120 = vst [vmem:[#allocation12_spill] sm:$0xff] %v8886_v15  ;;  %v5506_v48 = vadd.f32 %v8886_v15, %v5505_v52 }
 0x374   : > { %9121 = vst [vmem:[#allocation13_spill] sm:$0xff] %v8891_v9  ;;  %5474 = vst [vmem:[%s8630_s22 + $0xd0] sm:$0xff] %v6584_v55  ;;  %v6585_v43 = vpack.c.bf16 %v8891_v9, %v8886_v15  ;;  %v5543_v38 = vadd.f32 %v8891_v9, %v5542_v46 }
 0x376   : > { %5475 = vst [vmem:[%s8630_s22 + $0xd8] sm:$0xff] %v6585_v43  ;;  %v3244_v30 = vpop.f32.mrb[56].mxu1  ;;  %v5173_v53 = vpop.f32.mrb[56].mxu0 }
 0x377   : > { %v8899_v54 = vadd.f32 %v5173_v53, %v3244_v30  ;;  %v3246_v19 = vpop.f32.mrb[57].mxu1  ;;  %v5175_v40 = vpop.f32.mrb[57].mxu0 }
 0x378   : > { %v8901_v57 = vadd.f32 %v5175_v40, %v3246_v19  ;;  %v3248_v45 = vpop.f32.mrb[58].mxu1  ;;  %v5177_v50 = vpop.f32.mrb[58].mxu0 }
 0x379   : > { %9122 = vst [vmem:[#allocation14_spill] sm:$0xff] %v8899_v54  ;;  %v5507_v52 = vadd.f32 %v8899_v54, %v5506_v48  ;;  %v8904_v55 = vadd.f32 %v5177_v50, %v3248_v45  ;;  %v3250_v49 = vpop.f32.mrb[59].mxu1  ;;  %v5179_v21 = vpop.f32.mrb[59].mxu0 }
 0x37a   : > { %9123 = vst [vmem:[#allocation15_spill] sm:$0xff] %v8901_v57  ;;  %v6586_v46 = vpack.c.bf16 %v8901_v57, %v8899_v54  ;;  %v5544_v43 = vadd.f32 %v8901_v57, %v5543_v38  ;;  %v8909_v30 = vadd.f32 %v5179_v21, %v3250_v49 }
 0x37b   : > { %9124 = vst [vmem:[#allocation16_spill] sm:$0xff] %v8904_v55  ;;  %v5508_v53 = vadd.f32 %v8904_v55, %v5507_v52 }
 0x37c   : > { %9125 = vst [vmem:[#allocation17_spill] sm:$0xff] %v8909_v30  ;;  %5476 = vst [vmem:[%s8630_s22 + $0xe0] sm:$0xff] %v6586_v46  ;;  %v6587_v40 = vpack.c.bf16 %v8909_v30, %v8904_v55  ;;  %v5545_v19 = vadd.f32 %v8909_v30, %v5544_v43 }
 0x37e   : > { %5477 = vst [vmem:[%s8630_s22 + $0xe8] sm:$0xff] %v6587_v40  ;;  %v3254_v48 = vpop.f32.mrb[60].mxu1  ;;  %v5183_v45 = vpop.f32.mrb[60].mxu0 }
 0x37f   : > { %v8917_v50 = vadd.f32 %v5183_v45, %v3254_v48  ;;  %v3256_v9 = vpop.f32.mrb[61].mxu1  ;;  %v5185_v54 = vpop.f32.mrb[61].mxu0 }
 0x380   : > { %v8919_v38 = vadd.f32 %v5185_v54, %v3256_v9  ;;  %v3258_v21 = vpop.f32.mrb[62].mxu1  ;;  %v5187_v49 = vpop.f32.mrb[62].mxu0 }
 0x381   : > { %9126 = vst [vmem:[#allocation18_spill] sm:$0xff] %v8917_v50  ;;  %v5509_v52 = vadd.f32 %v8917_v50, %v5508_v53  ;;  %v8922_v46 = vadd.f32 %v5187_v49, %v3258_v21  ;;  %v3260_v57 = vpop.f32.mrb[63].mxu1  ;;  %v5189_v55 = vpop.f32.mrb[63].mxu0 }
 0x382   : > { %v6588_v43 = vpack.c.bf16 %v8919_v38, %v8917_v50  ;;  %v5546_v40 = vadd.f32 %v8919_v38, %v5545_v19  ;;  %v8927_v48 = vadd.f32 %v5189_v55, %v3260_v57 }
 0x383   : > { %v5510_v45 = vadd.f32 %v8922_v46, %v5509_v52 }
 0x384   : > { %5478 = vst [vmem:[%s8630_s22 + $0xf0] sm:$0xff] %v6588_v43  ;;  %v6589_v9 = vpack.c.bf16 %v8927_v48, %v8922_v46  ;;  %v5547_v54 = vadd.f32 %v8927_v48, %v5546_v40 }
 0x385   : > { %v5511_v53 = vrot.slane %v5510_v45, 4 }
 0x386   : > { %5479 = vst [vmem:[%s8630_s22 + $0xf8] sm:$0xff] %v6589_v9  ;;  %v5548_v15 = vrot.slane %v5547_v54, 4 }
 0x387   : > { %v5512_v21 = vadd.f32 %v5511_v53, %v5510_v45 }
 0x388   : > { %v5549_v19 = vadd.f32 %v5548_v15, %v5547_v54 }
 0x389   : > { %v5513_v49 = vrot.slane %v5512_v21, 2 }
 0x38a   : > { %v5550_v55 = vrot.slane %v5549_v19, 2 }
 0x38b   : > { %v5514_v30 = vadd.f32 %v5513_v49, %v5512_v21 }
 0x38c   : > { %v5551_v40 = vadd.f32 %v5550_v55, %v5549_v19 }
 0x38d   : > { %v5515_v44 = vrot.slane %v5514_v30, 1 }
 0x38e   : > { %v5552_v15 = vrot.slane %v5551_v40, 1 }
 0x38f   : > { %v8935_v50 = vadd.f32 %v5515_v44, %v5514_v30 }
 0x390   : > { %v8952_v19 = vadd.f32 %v5552_v15, %v5551_v40 }
 0x391   : > { %9127 = vst [vmem:[#allocation19_spill] sm:$0xff] %v8935_v50  ;;  %v8938_v57 = vmul.f32 0.00390625, %v8935_v50 }
 0x393   : > { %v5556_v52 = vsub.f32 %v8623_v60, %v8938_v57  ;;  %v5558_v43 = vsub.f32 %v8632_v0, %v8938_v57  ;;  %v5560_v45 = vsub.f32 %v8642_v6, %v8938_v57  ;;  %v5562_v44 = vsub.f32 %v8646_v10, %v8938_v57 }
 0x394   : > { %v5564_v30 = vsub.f32 %v8656_v16, %v8938_v57  ;;  %v5566_v60 = vsub.f32 %v8660_v20, %v8938_v57  ;;  %v5568_v6 = vsub.f32 %v8670_v26, %v8938_v57  ;;  %v5570_v10 = vsub.f32 %v8678_v31, %v8938_v57 }
 0x395   : > { %v5620_v9 = vmul.f32 %v5556_v52, %v5556_v52  ;;  %v5622_v53 = vmul.f32 %v5558_v43, %v5558_v43  ;;  %v5624_v54 = vmul.f32 %v5560_v45, %v5560_v45  ;;  %v5626_v49 = vmul.f32 %v5562_v44, %v5562_v44 }
 0x396   : > { %v5628_v55 = vmul.f32 %v5564_v30, %v5564_v30  ;;  %v5630_v43 = vmul.f32 %v5566_v60, %v5566_v60  ;;  %v8959_v16 = vmul.f32 0.00390625, %v8952_v19  ;;  %v5572_v20 = vsub.f32 %v8694_v41, %v8938_v57 }
 0x397   : > { %v5684_v21 = vadd.f32 %v5622_v53, %v5620_v9  ;;  %v5632_v45 = vmul.f32 %v5568_v6, %v5568_v6  ;;  %v5574_v40 = vsub.f32 %v8702_v1, %v8938_v57  ;;  %v5634_v53 = vmul.f32 %v5570_v10, %v5570_v10 }
 0x398   : > { %v5557_v44 = vsub.f32 %v8625_v62, %v8959_v16  ;;  %v5559_v31 = vsub.f32 %v8636_v3, %v8959_v16  ;;  %v5576_v15 = vsub.f32 %v8718_v12, %v8938_v57  ;;  %v5636_v30 = vmul.f32 %v5572_v20, %v5572_v20 }
 0x399   : > { %v5685_v0 = vadd.f32 %v5684_v21, %v5624_v54  ;;  %v5578_v41 = vsub.f32 %v8724_v17, %v8938_v57  ;;  %v5561_v1 = vsub.f32 %v8644_v8, %v8959_v16  ;;  %v5580_v62 = vsub.f32 %v8740_v29, %v8938_v57 }
 0x39a   : > { %v5621_v60 = vmul.f32 %v5557_v44, %v5557_v44  ;;  %v5563_v12 = vsub.f32 %v8650_v13, %v8959_v16  ;;  %v5582_v6 = vsub.f32 %v8748_v36, %v8938_v57  ;;  %v5586_v36 = vsub.f32 %v8772_v7, %v8938_v57 }
 0x39b   : > { %v5686_v52 = vadd.f32 %v5685_v0, %v5626_v49  ;;  %v5623_v49 = vmul.f32 %v5559_v31, %v5559_v31  ;;  %v5640_v0 = vmul.f32 %v5576_v15, %v5576_v15  ;;  %v5625_v10 = vmul.f32 %v5561_v1, %v5561_v1 }
 0x39c   : > { %v5644_v20 = vmul.f32 %v5580_v62, %v5580_v62  ;;  %v5590_v7 = vsub.f32 %v8791_v27, %v8938_v57  ;;  %v5594_v27 = vsub.f32 %v8811_v56, %v8938_v57  ;;  %v5598_v56 = vsub.f32 %v8831_v2, %v8938_v57 }
 0x39d   : > { %v5687_v50 = vadd.f32 %v5686_v52, %v5628_v55  ;;  %v5642_v55 = vmul.f32 %v5578_v41, %v5578_v41  ;;  %v5565_v52 = vsub.f32 %v8658_v18, %v8959_v16  ;;  %v5721_v8 = vadd.f32 %v5623_v49, %v5621_v60 }
 0x39e   : > { %v5569_v18 = vsub.f32 %v8673_v28, %v8959_v16  ;;  %v5650_v41 = vmul.f32 %v5586_v36, %v5586_v36  ;;  %v5573_v28 = vsub.f32 %v8698_v59, %v8959_v16  ;;  %v5577_v59 = vsub.f32 %v8721_v14, %v8959_v16 }
 0x39f   : > { %v5688_v9 = vadd.f32 %v5687_v50, %v5630_v43  ;;  %v5638_v50 = vmul.f32 %v5574_v40, %v5574_v40  ;;  %v5584_v43 = vsub.f32 %v8764_v63, %v8938_v57  ;;  %v5722_v13 = vadd.f32 %v5721_v8, %v5625_v10 }
 0x3a0   : > { %v5646_v40 = vmul.f32 %v5582_v6, %v5582_v6  ;;  %v5588_v63 = vsub.f32 %v8787_v22, %v8938_v57  ;;  %v5592_v22 = vsub.f32 %v8805_v61, %v8938_v57  ;;  %v5637_v6 = vmul.f32 %v5573_v28, %v5573_v28 }
 0x3a1   : > { %v5689_v26 = vadd.f32 %v5688_v9, %v5632_v45  ;;  %v5567_v45 = vsub.f32 %v8664_v23, %v8959_v16  ;;  %v5627_v9 = vmul.f32 %v5563_v12, %v5563_v12  ;;  %v5648_v31 = vmul.f32 %v5584_v43, %v5584_v43 }
 0x3a2   : > { %v5571_v23 = vsub.f32 %v8683_v34, %v8959_v16  ;;  %v5652_v60 = vmul.f32 %v5588_v63, %v5588_v63  ;;  %v5575_v34 = vsub.f32 %v8707_v5, %v8959_v16  ;;  %v5596_v61 = vsub.f32 %v8825_v33, %v8938_v57 }
 0x3a3   : > { %v5690_v54 = vadd.f32 %v5689_v26, %v5634_v53  ;;  %v5629_v26 = vmul.f32 %v5565_v52, %v5565_v52  ;;  %v5723_v44 = vadd.f32 %v5722_v13, %v5627_v9  ;;  %v5579_v5 = vsub.f32 %v8730_v24, %v8959_v16 }
 0x3a4   : > { %v5635_v62 = vmul.f32 %v5571_v23, %v5571_v23  ;;  %v5639_v10 = vmul.f32 %v5575_v34, %v5575_v34  ;;  %v5658_v43 = vmul.f32 %v5594_v27, %v5594_v27  ;;  %v5581_v14 = vsub.f32 %v8744_v32, %v8959_v16  ;;  %v9129_v34 = vld [vmem:[#allocation3_spill] sm:$0xff]  ;;  %v9130_v27 = vld [vmem:[#allocation14_spill] sm:$0xff] }
 0x3a5   : > { %v5691_v21 = vadd.f32 %v5690_v54, %v5636_v30  ;;  %v5631_v30 = vmul.f32 %v5567_v45, %v5567_v45  ;;  %v5724_v54 = vadd.f32 %v5723_v44, %v5629_v26  ;;  %v5600_v33 = vsub.f32 %v8844_v47, %v8938_v57 }
 0x3a6   : > { %v5660_v9 = vmul.f32 %v5596_v61, %v5596_v61  ;;  %v5583_v24 = vsub.f32 %v8754_v51, %v8959_v16  ;;  %v5643_v36 = vmul.f32 %v5579_v5, %v5579_v5  ;;  %v5602_v2 = vsub.f32 %v8849_v39, %v8938_v57  ;;  %v9132_v61 = vld [vmem:[#allocation16_spill] sm:$0xff] }
 0x3a7   : > { %v5692_v3 = vadd.f32 %v5691_v21, %v5638_v50  ;;  %v5633_v21 = vmul.f32 %v5569_v18, %v5569_v18  ;;  %v5725_v1 = vadd.f32 %v5724_v54, %v5631_v30  ;;  %v5585_v32 = vsub.f32 %v8768_v4, %v8959_v16 }
 0x3a8   : > { %v5645_v26 = vmul.f32 %v5581_v14, %v5581_v14  ;;  %v5604_v47 = vsub.f32 %v8862_v58, %v8938_v57  ;;  %v5664_v63 = vmul.f32 %v5600_v33, %v5600_v33  ;;  %v5587_v51 = vsub.f32 %v8777_v11, %v8959_v16  ;;  %v9135_v33 = vld [vmem:[#allocation6_spill] sm:$0xff] }
 0x3a9   : > { %v5693_v17 = vadd.f32 %v5692_v3, %v5640_v0  ;;  %v5726_v0 = vadd.f32 %v5725_v1, %v5633_v21  ;;  %v5654_v3 = vmul.f32 %v5590_v7, %v5590_v7  ;;  %v5606_v39 = vsub.f32 %v8868_v42, %v8938_v57 }
 0x3aa   : > { %v5666_v30 = vmul.f32 %v5602_v2, %v5602_v2  ;;  %v5589_v4 = vsub.f32 %v8789_v25, %v8959_v16  ;;  %v5649_v7 = vmul.f32 %v5585_v32, %v5585_v32  ;;  %v5608_v58 = vsub.f32 %v8881_v35, %v8938_v57 }
 0x3ab   : > { %v5694_v29 = vadd.f32 %v5693_v17, %v5642_v55  ;;  %v5727_v55 = vadd.f32 %v5726_v0, %v5635_v62  ;;  %v5656_v17 = vmul.f32 %v5592_v22, %v5592_v22  ;;  %v5591_v11 = vsub.f32 %v8796_v37, %v8959_v16  ;;  %v9128_v22 = vld [vmem:[#allocation12_spill] sm:$0xff] }
 0x3ac   : > { %v5651_v21 = vmul.f32 %v5587_v51, %v5587_v51  ;;  %v5610_v42 = vsub.f32 %v9128_v22, %v8938_v57  ;;  %v5593_v25 = vsub.f32 %v9129_v34, %v8959_v16  ;;  %v5653_v62 = vmul.f32 %v5589_v4, %v5589_v4  ;;  %v9141_v22 = vld [vmem:[#allocation13_spill] sm:$0xff] }
 0x3ad   : > { %v5695_v53 = vadd.f32 %v5694_v29, %v5644_v20  ;;  %v5728_v8 = vadd.f32 %v5727_v55, %v5637_v6  ;;  %v5641_v29 = vmul.f32 %v5577_v59, %v5577_v59  ;;  %v5612_v35 = vsub.f32 %v9130_v27, %v8938_v57  ;;  %v9131_v59 = vld [vmem:[#allocation4_spill] sm:$0xff] }
 0x3ae   : > { %v5595_v37 = vsub.f32 %v9131_v59, %v8959_v16  ;;  %v5655_v6 = vmul.f32 %v5591_v11, %v5591_v11 }
 0x3af   : > { %v5696_v15 = vadd.f32 %v5695_v53, %v5646_v40  ;;  %v5729_v45 = vadd.f32 %v5728_v8, %v5639_v10  ;;  %v5662_v53 = vmul.f32 %v5598_v56, %v5598_v56  ;;  %v9133_v10 = vld [vmem:[#allocation5_spill] sm:$0xff]  ;;  %v5657_v56 = vmul.f32 %v5593_v25, %v5593_v25  ;;  %v9142_v25 = vld [vmem:[#allocation15_spill] sm:$0xff] }
 0x3b0   : > { %v5597_v8 = vsub.f32 %v9133_v10, %v8959_v16 }
 0x3b1   : > { %v5697_v50 = vadd.f32 %v5696_v15, %v5648_v31  ;;  %v5730_v40 = vadd.f32 %v5729_v45, %v5641_v29  ;;  %v5647_v15 = vmul.f32 %v5583_v24, %v5583_v24  ;;  %v5676_v29 = vmul.f32 %v5612_v35, %v5612_v35  ;;  %v9143_v35 = vld [vmem:[#allocation17_spill] sm:$0xff] }
 0x3b2   : > { %v5661_v32 = vmul.f32 %v5597_v8, %v5597_v8 }
 0x3b3   : > { %v5698_v49 = vadd.f32 %v5697_v50, %v5650_v41  ;;  %v5731_v44 = vadd.f32 %v5730_v40, %v5643_v36  ;;  %v5668_v50 = vmul.f32 %v5604_v47, %v5604_v47  ;;  %v5618_v36 = vsub.f32 %v8922_v46, %v8938_v57 }
 0x3b5   : > { %v5699_v12 = vadd.f32 %v5698_v49, %v5652_v60  ;;  %v5732_v23 = vadd.f32 %v5731_v44, %v5645_v26  ;;  %v5670_v60 = vmul.f32 %v5606_v39, %v5606_v39 }
 0x3b7   : > { %v5700_v52 = vadd.f32 %v5699_v12, %v5654_v3  ;;  %v5733_v41 = vadd.f32 %v5732_v23, %v5647_v15  ;;  %v5672_v3 = vmul.f32 %v5608_v58, %v5608_v58  ;;  %v5682_v23 = vmul.f32 %v5618_v36, %v5618_v36 }
 0x3b9   : > { %v5701_v20 = vadd.f32 %v5700_v52, %v5656_v17  ;;  %v5734_v1 = vadd.f32 %v5733_v41, %v5649_v7  ;;  %v5614_v17 = vsub.f32 %v9132_v61, %v8938_v57  ;;  %v5674_v52 = vmul.f32 %v5610_v42, %v5610_v42  ;;  %v9139_v7 = vld [vmem:[#allocation10_spill] sm:$0xff] }
 0x3ba   : > { %v5607_v41 = vsub.f32 %v9139_v7, %v8959_v16  ;;  %v5611_v42 = vsub.f32 %v9141_v22, %v8959_v16 }
 0x3bb   : > { %v5702_v13 = vadd.f32 %v5701_v20, %v5658_v43  ;;  %v5735_v0 = vadd.f32 %v5734_v1, %v5651_v21  ;;  %v9134_v20 = vld [vmem:[#allocation18_spill] sm:$0xff]  ;;  %v5678_v40 = vmul.f32 %v5614_v17, %v5614_v17  ;;  %v5619_v17 = vsub.f32 %v8927_v48, %v8959_v16  ;;  %v9144_v48 = vld [vmem:[#allocation19_spill] sm:$0xff] }
 0x3bc   : > { %v5616_v14 = vsub.f32 %v9134_v20, %v8938_v57 }
 0x3bd   : > { %v5703_v18 = vadd.f32 %v5702_v13, %v5660_v9  ;;  %v5736_v55 = vadd.f32 %v5735_v0, %v5653_v62  ;;  %v5599_v9 = vsub.f32 %v9135_v33, %v8959_v16  ;;  %v5659_v13 = vmul.f32 %v5595_v37, %v5595_v37 }
 0x3be   : > { %v5680_v44 = vmul.f32 %v5616_v14, %v5616_v14  ;;  %v5613_v62 = vsub.f32 %v9142_v25, %v8959_v16 }
 0x3bf   : > { %v5704_v31 = vadd.f32 %v5703_v18, %v5662_v53  ;;  %v5737_v43 = vadd.f32 %v5736_v55, %v5655_v6  ;;  %v9136_v53 = vld [vmem:[#allocation7_spill] sm:$0xff]  ;;  %v5663_v51 = vmul.f32 %v5599_v9, %v5599_v9  ;;  %v5617_v6 = vsub.f32 %v8919_v38, %v8959_v16 }
 0x3c0   : > { %v5601_v18 = vsub.f32 %v9136_v53, %v8959_v16  ;;  %v5677_v55 = vmul.f32 %v5613_v62, %v5613_v62 }
 0x3c1   : > { %v5705_v54 = vadd.f32 %v5704_v31, %v5664_v63  ;;  %v5738_v24 = vadd.f32 %v5737_v43, %v5657_v56  ;;  %v9137_v63 = vld [vmem:[#allocation8_spill] sm:$0xff]  ;;  %v5681_v8 = vmul.f32 %v5617_v6, %v5617_v6  ;;  %v5683_v43 = vmul.f32 %v5619_v17, %v5619_v17 }
 0x3c2   : > { %v5603_v31 = vsub.f32 %v9137_v63, %v8959_v16  ;;  %v5665_v46 = vmul.f32 %v5601_v18, %v5601_v18 }
 0x3c3   : > { %v5706_v28 = vadd.f32 %v5705_v54, %v5666_v30  ;;  %v5739_v26 = vadd.f32 %v5738_v24, %v5659_v13  ;;  %v9138_v30 = vld [vmem:[#allocation9_spill] sm:$0xff] }
 0x3c4   : > { %v5605_v54 = vsub.f32 %v9138_v30, %v8959_v16  ;;  %v5667_v58 = vmul.f32 %v5603_v31, %v5603_v31 }
 0x3c5   : > { %v5707_v49 = vadd.f32 %v5706_v28, %v5668_v50  ;;  %v5740_v15 = vadd.f32 %v5739_v26, %v5661_v32  ;;  %v9140_v28 = vld [vmem:[#allocation11_spill] sm:$0xff] }
 0x3c6   : > { %v5609_v11 = vsub.f32 %v9140_v28, %v8959_v16  ;;  %v5669_v21 = vmul.f32 %v5605_v54, %v5605_v54 }
 0x3c7   : > { %v5708_v12 = vadd.f32 %v5707_v49, %v5670_v60  ;;  %v5741_v57 = vadd.f32 %v5740_v15, %v5663_v51  ;;  %v5671_v60 = vmul.f32 %v5607_v41, %v5607_v41 }
 0x3c8   : > { %v5673_v0 = vmul.f32 %v5609_v11, %v5609_v11 }
 0x3c9   : > { %v5709_v5 = vadd.f32 %v5708_v12, %v5672_v3  ;;  %v5742_v50 = vadd.f32 %v5741_v57, %v5665_v46  ;;  %v5615_v3 = vsub.f32 %v9143_v35, %v8959_v16  ;;  %v5675_v12 = vmul.f32 %v5611_v42, %v5611_v42 }
 0x3cb   : > { %v5710_v45 = vadd.f32 %v5709_v5, %v5674_v52  ;;  %v5743_v1 = vadd.f32 %v5742_v50, %v5667_v58  ;;  %v5679_v52 = vmul.f32 %v5615_v3, %v5615_v3 }
 0x3cd   : > { %v5711_v2 = vadd.f32 %v5710_v45, %v5676_v29  ;;  %v5744_v49 = vadd.f32 %v5743_v1, %v5669_v21 }
 0x3cf   : > { %v5712_v47 = vadd.f32 %v5711_v2, %v5678_v40  ;;  %v5745_v27 = vadd.f32 %v5744_v49, %v5671_v60 }
 0x3d1   : > { %v5713_v39 = vadd.f32 %v5712_v47, %v5680_v44  ;;  %v5746_v59 = vadd.f32 %v5745_v27, %v5673_v0 }
 0x3d3   : > { %v5714_v4 = vadd.f32 %v5713_v39, %v5682_v23  ;;  %v5747_v61 = vadd.f32 %v5746_v59, %v5675_v12 }
 0x3d5   : > { %v5715_v34 = vrot.slane %v5714_v4, 4  ;;  %v5748_v5 = vadd.f32 %v5747_v61, %v5677_v55 }
 0x3d7   : > { %v5716_v37 = vadd.f32 %v5715_v34, %v5714_v4  ;;  %v5749_v56 = vadd.f32 %v5748_v5, %v5679_v52 }
 0x3d9   : > { %v5717_v10 = vrot.slane %v5716_v37, 2  ;;  %v5750_v20 = vadd.f32 %v5749_v56, %v5681_v8 }
 0x3db   : > { %v5718_v14 = vadd.f32 %v5717_v10, %v5716_v37  ;;  %v5751_v29 = vadd.f32 %v5750_v20, %v5683_v43 }
 0x3dd   : > { %v5752_v45 = vrot.slane %v5751_v29, 4  ;;  %v5719_v33 = vrot.slane %v5718_v14, 1 }
 0x3df   : > { %v5753_v9 = vadd.f32 %v5752_v45, %v5751_v29  ;;  %v5720_v13 = vadd.f32 %v5719_v33, %v5718_v14 }
 0x3e1   : > { %v5754_v38 = vrot.slane %v5753_v9, 2  ;;  %v5759_v16 = vsel %vm5758_vm0, %v9144_v48, %v5720_v13 }
 0x3e3   : > { %v5755_v24 = vadd.f32 %v5754_v38, %v5753_v9 }
 0x3e5   : > { %v5756_v36 = vrot.slane %v5755_v24, 1 }
 0x3e7   : > { %v5757_v40 = vadd.f32 %v5756_v36, %v5755_v24 }
 0x3e9   : > { %v5760_v2 = vsel %vm5758_vm0, %v8952_v19, %v5757_v40 }
 0x3ea   : > { %v5763_v53 = vcombine.low %v5759_v16, %v5760_v2 }
 0x3ec   : > { %6553 = vst.sshfl [vmem:[%s1040_s26] sm:$0x33 pattern:$0x76325410] %v5763_v53 }
 0x3ed PF: > { %p11_p10 = scmp.ge.s32.totalorder %s7586_s16, 4   ;;  %s9145_s12 = smov %s7540_s13 }
 0x3ee   : > { %s9146_s13 = smov %s7595_s19  ;;  %s9147_s14 = smov %s7586_s16 }
 0x3ef   :  { %13 = sbr.rel (!%p11_p10) target bundleno = 2 (0x2), region = 129 }

// kernel: discriminator_forward.6
= control target key start
LH: loop header
LB: loop body
LE: loop exit
PB: predicated region body
PF: predicated region fallthrough
CT: control target
= control target key end

     0   :  { %s7148_s12 = smov 0   ;;  %s7150_s13 = smov 0   ;;  %s9021_s0 = inlined_call_operand.vmem [shape: bf16[6,2,20,256], index: 0, kind: input, shape index: {}]   ;;  %s9022_s1 = inlined_call_operand.vmem [shape: bf16[9,256,512], index: 1, kind: input, shape index: {}]   ;;  %s9023_s2 = inlined_call_operand.vmem [shape: bf16[32,512], index: 2, kind: output, shape index: {0}]   ;;  %s9024_s3 = inlined_call_operand.vmem [shape: f32[2,2,512], index: 3, kind: output, shape index: {1}]  }
   0x1   :  { %s7152_s14 = smov 0  }
   0x2 LB: > { %s7164_s15 = sadd.s32 4294967295, %s7125_s14   ;;  %s7167_s16 = sadd.s32 1, %s7125_s14   ;;  %s7125_s14 = sphi %s7152_s14, %s9027_s14   ;;  %s7121_s13 = sphi %s7150_s13, %s9026_s13   ;;  %s7117_s12 = sphi %s7148_s12, %s9025_s12  }
   0x3   : > { %s18_s17 = ssub.s32 %s7125_s14, %s7167_s16  ;;  %s21_s18 = sadd.s32 1, %s7121_s13 }
   0x4   : > { %p19_p0 = scmp.eq.s32.totalorder %s18_s17, 0  ;;  %p28_p1 = scmp.ne.s32.totalorder %s7121_s13, %s7117_s12 }
   0x5   : > { %p29_p2 = scmp.eq.s32.totalorder %s7125_s14, 0  ;;  %p4966_p4 = scmp.ge.s32.totalorder %s7125_s14, 2 }
   0x6   : > { %s7176_s19 = scalar_select %p19_p0, %s7121_s13, %s21_s18  }
   0x7   : > { %p30_p3 = por %p29_p2, %p28_p1  ;;  %130 = sbr.rel (%p4966_p4) target bundleno = 28 (0x1c), region = 20 }
   0xe   : > { %133 = sbr.rel (!%p30_p3) target bundleno = 28 (0x1c), region = 24  ;;  %s135_s20 = sand.u32 (%p30_p3), 1, %s7121_s13  }
   0xf   : > { %s6179_s21 = smul.u32 (%p30_p3), 24, %s7125_s14 }
  0x10   : > { %s6178_s22 = smul.u32 (%p30_p3), 144, %s135_s20 }
  0x11   : > { %s7184_s25 = scalar_lea.vmem (%p30_p3), %s9021_s0, %s6179_s21 }
  0x12   : > { %v202_v0 = vld [vmem:[%s7184_s25] sm:$0xff] (%p30_p3)  ;;  %v204_v1 = vld [vmem:[%s7184_s25 + $0x8] sm:$0xff] (%p30_p3)  ;;  %v206_v2 = vld [vmem:[%s7184_s25 + $0x10] sm:$0xff] (%p30_p3)  ;;  %s7189_s26 = scalar_lea.vmem (%p30_p3), [#allocation2], %s6178_s22 }
  0x13   : > { %203 = vst [vmem:[%s7189_s26] sm:$0xff] (%p30_p3), %v202_v0  ;;  %205 = vst [vmem:[%s7189_s26 + $0x8] sm:$0xff] (%p30_p3), %v204_v1  ;;  %v208_v3 = vld [vmem:[%s7184_s25 + $0x30] sm:$0xff] (%p30_p3)  ;;  %v210_v4 = vld [vmem:[%s7184_s25 + $0x38] sm:$0xff] (%p30_p3) }
  0x14   : > { %207 = vst [vmem:[%s7189_s26 + $0x10] sm:$0xff] (%p30_p3), %v206_v2  ;;  %v212_v5 = vld [vmem:[%s7184_s25 + $0x40] sm:$0xff] (%p30_p3)  ;;  %209 = vst [vmem:[%s7189_s26 + $0x18] sm:$0xff] (%p30_p3), %v208_v3  ;;  %v216_v7 = vld [vmem:[%s7184_s25 + $0x68] sm:$0xff] (%p30_p3) }
  0x15   : > { %211 = vst [vmem:[%s7189_s26 + $0x20] sm:$0xff] %v210_v4  ;;  %213 = vst [vmem:[%s7189_s26 + $0x28] sm:$0xff] %v212_v5  ;;  %v214_v6 = vld [vmem:[%s7184_s25 + $0x60] sm:$0xff]  ;;  %v218_v8 = vld [vmem:[%s7184_s25 + $0x70] sm:$0xff] }
  0x16   : > { %215 = vst [vmem:[%s7189_s26 + $0x30] sm:$0xff] %v214_v6  ;;  %217 = vst [vmem:[%s7189_s26 + $0x38] sm:$0xff] %v216_v7  ;;  %v220_v9 = vld [vmem:[%s7184_s25 + $0x90] sm:$0xff]  ;;  %v222_v10 = vld [vmem:[%s7184_s25 + $0x98] sm:$0xff] }
  0x17   : > { %219 = vst [vmem:[%s7189_s26 + $0x40] sm:$0xff] %v218_v8  ;;  %v224_v11 = vld [vmem:[%s7184_s25 + $0xa0] sm:$0xff]  ;;  %221 = vst [vmem:[%s7189_s26 + $0x48] sm:$0xff] %v220_v9  ;;  %v228_v13 = vld [vmem:[%s7184_s25 + $0xc8] sm:$0xff] }
  0x18   : > { %223 = vst [vmem:[%s7189_s26 + $0x50] sm:$0xff] %v222_v10  ;;  %225 = vst [vmem:[%s7189_s26 + $0x58] sm:$0xff] %v224_v11  ;;  %v226_v12 = vld [vmem:[%s7184_s25 + $0xc0] sm:$0xff]  ;;  %v230_v14 = vld [vmem:[%s7184_s25 + $0xd0] sm:$0xff] }
  0x19   : > { %227 = vst [vmem:[%s7189_s26 + $0x60] sm:$0xff] %v226_v12  ;;  %229 = vst [vmem:[%s7189_s26 + $0x68] sm:$0xff] %v228_v13  ;;  %v232_v15 = vld [vmem:[%s7184_s25 + $0xf0] sm:$0xff]  ;;  %v234_v16 = vld [vmem:[%s7184_s25 + $0xf8] sm:$0xff] }
  0x1a   : > { %231 = vst [vmem:[%s7189_s26 + $0x70] sm:$0xff] %v230_v14  ;;  %v236_v17 = vld [vmem:[%s7184_s25 + $0x100] sm:$0xff]  ;;  %233 = vst [vmem:[%s7189_s26 + $0x78] sm:$0xff] %v232_v15 }
  0x1b   : > { %235 = vst [vmem:[%s7189_s26 + $0x80] sm:$0xff] %v234_v16  ;;  %237 = vst [vmem:[%s7189_s26 + $0x88] sm:$0xff] %v236_v17 }
  0x1c PF: > { %p4968_p5 = scmp.ge.s32.totalorder %s7125_s14, 1  ;;  %p242_p6 = scmp.lt.s32.totalorder %s7125_s14, 3 }
  0x1e   : > { %p243_p7 = pnand %p4968_p5, %p242_p6 }
  0x1f   : > { %v6206_v18 = vld [vmem:[%s9022_s1 + $0x204] ss:$16 sps:$4 sm:$0xff] (!%p243_p7)   ;;  %v6208_v19 = vld [vmem:[%s9022_s1 + $0x20c] ss:$16 sps:$4 sm:$0xff] (!%p243_p7)   ;;  %v6210_v20 = vld [vmem:[%s9022_s1 + $0x200] ss:$16 sps:$4 sm:$0xff] (!%p243_p7)  }
  0x20   : > { %246 = sbr.rel (%p243_p7) target bundleno = 866 (0x362), region = 62  ;;  %754 = vmatprep.subr.bf16.mxu0 (!%p243_p7), %v6206_v18  ;;  %v6211_v21 = vld [vmem:[%s9022_s1 + $0x208] ss:$16 sps:$4 sm:$0xff] (!%p243_p7)   ;;  %797 = vmatprep.subr.bf16.mxu1 (!%p243_p7), %v6208_v19  ;;  %v6212_v22 = vld [vmem:[%s9022_s1 + $0x224] ss:$16 sps:$4 sm:$0xff] (!%p243_p7)   ;;  %s249_s10 = sand.u32 (!%p243_p7), 1, %s7117_s12  }
  0x21   : > { %755 = vmatpush1.bf16.msra.mxu0 (!%p243_p7), %v6210_v20  ;;  %798 = vmatpush1.bf16.msra.mxu1 (!%p243_p7), %v6211_v21  ;;  %v6214_v23 = vld [vmem:[%s9022_s1 + $0x22c] ss:$16 sps:$4 sm:$0xff] (!%p243_p7)   ;;  %v6216_v24 = vld [vmem:[%s9022_s1 + $0x220] ss:$16 sps:$4 sm:$0xff] (!%p243_p7)   ;;  %v6217_v25 = vld [vmem:[%s9022_s1 + $0x228] ss:$16 sps:$4 sm:$0xff] (!%p243_p7)  }
  0x22   : > { %756 = vmatprep.subr.bf16.mxu0 (!%p243_p7), %v6212_v22  ;;  %799 = vmatprep.subr.bf16.mxu1 (!%p243_p7), %v6214_v23  ;;  %v6218_v26 = vld [vmem:[%s9022_s1 + $0x244] ss:$16 sps:$4 sm:$0xff] (!%p243_p7)   ;;  %v6220_v27 = vld [vmem:[%s9022_s1 + $0x24c] ss:$16 sps:$4 sm:$0xff] (!%p243_p7)   ;;  %v6222_v28 = vld [vmem:[%s9022_s1 + $0x240] ss:$16 sps:$4 sm:$0xff] (!%p243_p7)  }
  0x23   : > { %v6223_v29 = vld [vmem:[%s9022_s1 + $0x248] ss:$16 sps:$4 sm:$0xff] (!%p243_p7)   ;;  %v6224_v30 = vld [vmem:[%s9022_s1 + $0x264] ss:$16 sps:$4 sm:$0xff] (!%p243_p7)   ;;  %v6226_v31 = vld [vmem:[%s9022_s1 + $0x26c] ss:$16 sps:$4 sm:$0xff] (!%p243_p7)  }
  0x24   : > { %v6228_v32 = vld [vmem:[%s9022_s1 + $0x260] ss:$16 sps:$4 sm:$0xff] (!%p243_p7)   ;;  %v6229_v33 = vld [vmem:[%s9022_s1 + $0x268] ss:$16 sps:$4 sm:$0xff] (!%p243_p7)   ;;  %v6230_v34 = vld [vmem:[%s9022_s1 + $0x284] ss:$16 sps:$4 sm:$0xff] (!%p243_p7)  }
  0x25   : > { %757 = vmatpush1.bf16.msra.mxu0 (!%p243_p7), %v6216_v24  ;;  %800 = vmatpush1.bf16.msra.mxu1 (!%p243_p7), %v6217_v25  ;;  %v6232_v35 = vld [vmem:[%s9022_s1 + $0x28c] ss:$16 sps:$4 sm:$0xff] (!%p243_p7)   ;;  %v6234_v36 = vld [vmem:[%s9022_s1 + $0x280] ss:$16 sps:$4 sm:$0xff] (!%p243_p7)   ;;  %v6235_v37 = vld [vmem:[%s9022_s1 + $0x288] ss:$16 sps:$4 sm:$0xff] (!%p243_p7)  }
  0x26   : > { %758 = vmatprep.subr.bf16.mxu0 (!%p243_p7), %v6218_v26  ;;  %801 = vmatprep.subr.bf16.mxu1 (!%p243_p7), %v6220_v27  ;;  %v6236_v38 = vld [vmem:[%s9022_s1 + $0x2a4] ss:$16 sps:$4 sm:$0xff] (!%p243_p7)   ;;  %v6238_v39 = vld [vmem:[%s9022_s1 + $0x2ac] ss:$16 sps:$4 sm:$0xff] (!%p243_p7)   ;;  %v6240_v40 = vld [vmem:[%s9022_s1 + $0x2a0] ss:$16 sps:$4 sm:$0xff] (!%p243_p7)  }
  0x27   : > { %v6241_v41 = vld [vmem:[%s9022_s1 + $0x2a8] ss:$16 sps:$4 sm:$0xff]   ;;  %v6242_v42 = vld [vmem:[%s9022_s1 + $0x2c4] ss:$16 sps:$4 sm:$0xff]   ;;  %v6244_v43 = vld [vmem:[%s9022_s1 + $0x2cc] ss:$16 sps:$4 sm:$0xff]  }
  0x28   : > { %v6246_v44 = vld [vmem:[%s9022_s1 + $0x2c0] ss:$16 sps:$4 sm:$0xff]   ;;  %v6247_v45 = vld [vmem:[%s9022_s1 + $0x2c8] ss:$16 sps:$4 sm:$0xff]   ;;  %v6248_v46 = vld [vmem:[%s9022_s1 + $0x2e4] ss:$16 sps:$4 sm:$0xff]  }
  0x29   : > { %759 = vmatpush1.bf16.msra.mxu0 %v6222_v28  ;;  %802 = vmatpush1.bf16.msra.mxu1 %v6223_v29  ;;  %v6250_v47 = vld [vmem:[%s9022_s1 + $0x2ec] ss:$16 sps:$4 sm:$0xff]   ;;  %v6252_v48 = vld [vmem:[%s9022_s1 + $0x2e0] ss:$16 sps:$4 sm:$0xff]   ;;  %v6253_v49 = vld [vmem:[%s9022_s1 + $0x2e8] ss:$16 sps:$4 sm:$0xff]  }
  0x2a   : > { %760 = vmatprep.subr.bf16.mxu0 %v6224_v30  ;;  %803 = vmatprep.subr.bf16.mxu1 %v6226_v31  ;;  %v6254_v50 = vld [vmem:[%s9022_s1 + $0x304] ss:$16 sps:$4 sm:$0xff]   ;;  %v6256_v51 = vld [vmem:[%s9022_s1 + $0x30c] ss:$16 sps:$4 sm:$0xff]   ;;  %v6258_v52 = vld [vmem:[%s9022_s1 + $0x300] ss:$16 sps:$4 sm:$0xff]  }
  0x2b   : > { %v6259_v53 = vld [vmem:[%s9022_s1 + $0x308] ss:$16 sps:$4 sm:$0xff]   ;;  %v6260_v54 = vld [vmem:[%s9022_s1 + $0x324] ss:$16 sps:$4 sm:$0xff]   ;;  %v6262_v55 = vld [vmem:[%s9022_s1 + $0x32c] ss:$16 sps:$4 sm:$0xff]  }
  0x2c   : > { %v6264_v56 = vld [vmem:[%s9022_s1 + $0x320] ss:$16 sps:$4 sm:$0xff]   ;;  %v6265_v57 = vld [vmem:[%s9022_s1 + $0x328] ss:$16 sps:$4 sm:$0xff]   ;;  %v6266_v58 = vld [vmem:[%s9022_s1 + $0x344] ss:$16 sps:$4 sm:$0xff]  }
  0x2d   : > { %761 = vmatpush1.bf16.msra.mxu0 %v6228_v32  ;;  %804 = vmatpush1.bf16.msra.mxu1 %v6229_v33  ;;  %s6180_s22 = smul.u32 144, %s249_s10  ;;  %v6268_v59 = vld [vmem:[%s9022_s1 + $0x34c] ss:$16 sps:$4 sm:$0xff]   ;;  %v6270_v60 = vld [vmem:[%s9022_s1 + $0x340] ss:$16 sps:$4 sm:$0xff]   ;;  %vm3305_vm0 = vcmask 1045504  }
  0x2e   : > { %762 = vmatprep.subr.bf16.mxu0 %v6230_v34  ;;  %805 = vmatprep.subr.bf16.mxu1 %v6232_v35  ;;  %v6271_v61 = vld [vmem:[%s9022_s1 + $0x348] ss:$16 sps:$4 sm:$0xff]   ;;  %v6272_v62 = vld [vmem:[%s9022_s1 + $0x364] ss:$16 sps:$4 sm:$0xff]   ;;  %v6274_v63 = vld [vmem:[%s9022_s1 + $0x36c] ss:$16 sps:$4 sm:$0xff]  }
  0x2f   : > { %v6276_v0 = vld [vmem:[%s9022_s1 + $0x360] ss:$16 sps:$4 sm:$0xff]   ;;  %s7368_s7 = scalar_lea.vmem [#allocation2], %s6180_s22  ;;  %v6277_v1 = vld [vmem:[%s9022_s1 + $0x368] ss:$16 sps:$4 sm:$0xff]   ;;  %s4969_s9 = sshll.u32 %s7164_s15, 1 }
  0x30   : > { %v6304_v2 = vld [vmem:[%s7368_s7 + $0x1c] ss:$8 sps:$4 sm:$0xff]   ;;  %v6282_v5 = vld [vmem:[%s9022_s1 + $0x380] ss:$16 sps:$4 sm:$0xff]   ;;  %v6283_v6 = vld [vmem:[%s9022_s1 + $0x388] ss:$16 sps:$4 sm:$0xff]  }
  0x31   : > { %763 = vmatpush1.bf16.msra.mxu0 %v6234_v36  ;;  %806 = vmatpush1.bf16.msra.mxu1 %v6235_v37  ;;  %v6278_v3 = vld [vmem:[%s9022_s1 + $0x384] ss:$16 sps:$4 sm:$0xff]   ;;  %v6280_v4 = vld [vmem:[%s9022_s1 + $0x38c] ss:$16 sps:$4 sm:$0xff]   ;;  %v6288_v9 = vld [vmem:[%s9022_s1 + $0x3a0] ss:$16 sps:$4 sm:$0xff]  }
  0x32   : > { %764 = vmatprep.subr.bf16.mxu0 %v6236_v38  ;;  %807 = vmatprep.subr.bf16.mxu1 %v6238_v39  ;;  %v6284_v7 = vld [vmem:[%s9022_s1 + $0x3a4] ss:$16 sps:$4 sm:$0xff]   ;;  %v6286_v8 = vld [vmem:[%s9022_s1 + $0x3ac] ss:$16 sps:$4 sm:$0xff]   ;;  %v6289_v10 = vld [vmem:[%s9022_s1 + $0x3a8] ss:$16 sps:$4 sm:$0xff]  }
  0x33   : > { %786 = vmatprep.mubr.bf16.mxu0 %v6304_v2  ;;  %829 = vmatprep.mubr.bf16.mxu1 %v6304_v2  ;;  %v6290_v11 = vld [vmem:[%s9022_s1 + $0x3c4] ss:$16 sps:$4 sm:$0xff]   ;;  %v6292_v12 = vld [vmem:[%s9022_s1 + $0x3cc] ss:$16 sps:$4 sm:$0xff]   ;;  %v6294_v13 = vld [vmem:[%s9022_s1 + $0x3c0] ss:$16 sps:$4 sm:$0xff]  }
  0x34   : > { %v6295_v14 = vld [vmem:[%s9022_s1 + $0x3c8] ss:$16 sps:$4 sm:$0xff]   ;;  %v6296_v15 = vld [vmem:[%s9022_s1 + $0x3e4] ss:$16 sps:$4 sm:$0xff]   ;;  %v6298_v16 = vld [vmem:[%s9022_s1 + $0x3ec] ss:$16 sps:$4 sm:$0xff]  }
  0x35   : > { %765 = vmatpush1.bf16.msra.mxu0 %v6240_v40  ;;  %808 = vmatpush1.bf16.msra.mxu1 %v6241_v41  ;;  %v6300_v17 = vld [vmem:[%s9022_s1 + $0x3e0] ss:$16 sps:$4 sm:$0xff]   ;;  %v6301_v18 = vld [vmem:[%s9022_s1 + $0x3e8] ss:$16 sps:$4 sm:$0xff]   ;;  %v6307_v19 = vld [vmem:[%s9022_s1 + $0x4] ss:$16 sps:$4 sm:$0xff]  }
  0x36   : > { %766 = vmatprep.subr.bf16.mxu0 %v6242_v42  ;;  %809 = vmatprep.subr.bf16.mxu1 %v6244_v43  ;;  %v6310_v20 = vld [vmem:[%s9022_s1 + $0xc] ss:$16 sps:$4 sm:$0xff]   ;;  %v6302_v21 = vld [vmem:[%s7368_s7 + $0x18] ss:$8 sps:$4 sm:$0xff]   ;;  %v6313_v24 = vld [vmem:[%s9022_s1 + $0x24] ss:$16 sps:$4 sm:$0xff]  }
  0x37   : > { %v6305_v22 = vld [vmem:[%s9022_s1] ss:$16 sps:$4 sm:$0xff]   ;;  %v6308_v23 = vld [vmem:[%s9022_s1 + $0x8] ss:$16 sps:$4 sm:$0xff]   ;;  %v6316_v25 = vld [vmem:[%s9022_s1 + $0x2c] ss:$16 sps:$4 sm:$0xff]  }
  0x38   : > { %v6311_v26 = vld [vmem:[%s9022_s1 + $0x20] ss:$16 sps:$4 sm:$0xff]   ;;  %v6314_v27 = vld [vmem:[%s9022_s1 + $0x28] ss:$16 sps:$4 sm:$0xff]   ;;  %v6319_v28 = vld [vmem:[%s9022_s1 + $0x44] ss:$16 sps:$4 sm:$0xff]  }
  0x39   : > { %767 = vmatpush1.bf16.msra.mxu0 %v6246_v44  ;;  %810 = vmatpush1.bf16.msra.mxu1 %v6247_v45  ;;  %v6322_v29 = vld [vmem:[%s9022_s1 + $0x4c] ss:$16 sps:$4 sm:$0xff]   ;;  %v6317_v30 = vld [vmem:[%s9022_s1 + $0x40] ss:$16 sps:$4 sm:$0xff]   ;;  %v6320_v31 = vld [vmem:[%s9022_s1 + $0x48] ss:$16 sps:$4 sm:$0xff]  }
  0x3a   : > { %768 = vmatprep.subr.bf16.mxu0 %v6248_v46  ;;  %811 = vmatprep.subr.bf16.mxu1 %v6250_v47  ;;  %v6325_v32 = vld [vmem:[%s9022_s1 + $0x64] ss:$16 sps:$4 sm:$0xff]   ;;  %v6328_v33 = vld [vmem:[%s9022_s1 + $0x6c] ss:$16 sps:$4 sm:$0xff]   ;;  %v6323_v34 = vld [vmem:[%s9022_s1 + $0x60] ss:$16 sps:$4 sm:$0xff]  }
  0x3b   : > { %v6326_v35 = vld [vmem:[%s9022_s1 + $0x68] ss:$16 sps:$4 sm:$0xff]   ;;  %v6331_v36 = vld [vmem:[%s9022_s1 + $0x84] ss:$16 sps:$4 sm:$0xff]   ;;  %v6334_v37 = vld [vmem:[%s9022_s1 + $0x8c] ss:$16 sps:$4 sm:$0xff]  }
  0x3c   : > { %v6329_v38 = vld [vmem:[%s9022_s1 + $0x80] ss:$16 sps:$4 sm:$0xff]   ;;  %v6332_v39 = vld [vmem:[%s9022_s1 + $0x88] ss:$16 sps:$4 sm:$0xff]   ;;  %v6337_v40 = vld [vmem:[%s9022_s1 + $0xa4] ss:$16 sps:$4 sm:$0xff]  }
  0x3d   : > { %769 = vmatpush1.bf16.msra.mxu0 %v6252_v48  ;;  %812 = vmatpush1.bf16.msra.mxu1 %v6253_v49  ;;  %v6340_v41 = vld [vmem:[%s9022_s1 + $0xac] ss:$16 sps:$4 sm:$0xff]   ;;  %v6335_v42 = vld [vmem:[%s9022_s1 + $0xa0] ss:$16 sps:$4 sm:$0xff]   ;;  %v6338_v43 = vld [vmem:[%s9022_s1 + $0xa8] ss:$16 sps:$4 sm:$0xff]  }
  0x3e   : > { %770 = vmatprep.subr.bf16.mxu0 %v6254_v50  ;;  %813 = vmatprep.subr.bf16.mxu1 %v6256_v51  ;;  %v6343_v44 = vld [vmem:[%s9022_s1 + $0xc4] ss:$16 sps:$4 sm:$0xff]   ;;  %v6346_v45 = vld [vmem:[%s9022_s1 + $0xcc] ss:$16 sps:$4 sm:$0xff]   ;;  %v6341_v46 = vld [vmem:[%s9022_s1 + $0xc0] ss:$16 sps:$4 sm:$0xff]  }
  0x3f   : > { %v6344_v47 = vld [vmem:[%s9022_s1 + $0xc8] ss:$16 sps:$4 sm:$0xff]   ;;  %v6403_v48 = vld [vmem:[%s7368_s7 + $0x4] ss:$8 sps:$4 sm:$0xff]   ;;  %v6347_v51 = vld [vmem:[%s9022_s1 + $0xe0] ss:$16 sps:$4 sm:$0xff]  }
  0x40   : > { %v6349_v49 = vld [vmem:[%s9022_s1 + $0xe4] ss:$16 sps:$4 sm:$0xff]   ;;  %v6352_v50 = vld [vmem:[%s9022_s1 + $0xec] ss:$16 sps:$4 sm:$0xff]   ;;  %p279_p8 = scmp.lt.s32.totalorder %s4969_s9, 3  ;;  %p285_p9 = scmp.lt.s32.totalorder %s7164_s15, 1 }
  0x41   : > { %771 = vmatpush1.bf16.msra.mxu0 %v6258_v52  ;;  %814 = vmatpush1.bf16.msra.mxu1 %v6259_v53  ;;  %v6350_v52 = vld [vmem:[%s9022_s1 + $0xe8] ss:$16 sps:$4 sm:$0xff]   ;;  %v6355_v53 = vld [vmem:[%s9022_s1 + $0x104] ss:$16 sps:$4 sm:$0xff]   ;;  %v6376_v2 = vld [vmem:[%s9022_s1 + $0x16c] ss:$16 sps:$4 sm:$0xff]  }
  0x42   : > { %772 = vmatprep.subr.bf16.mxu0 %v6260_v54  ;;  %815 = vmatprep.subr.bf16.mxu1 %v6262_v55  ;;  %v6358_v54 = vld [vmem:[%s9022_s1 + $0x10c] ss:$16 sps:$4 sm:$0xff]   ;;  %v6353_v55 = vld [vmem:[%s9022_s1 + $0x100] ss:$16 sps:$4 sm:$0xff]   ;;  %s9029_s9 = smov (!%p279_p8, %s4969_s9), 3  ;;  %vm4838_vm1 = vcmask 1040384  }
  0x43   : > { %s6108_s10 = sshll.u32 %s9029_s9, 4  ;;  %s9031_s15 = smov (!%p285_p9, %s7164_s15), 1 }
  0x44   : > { %s283_s17 = scalar_lea.vmem %s9023_s2, %s6108_s10  ;;  %s6109_s18 = sshll.u32 %s9031_s15, 3 }
  0x45   : > { %773 = vmatpush1.bf16.msra.mxu0 %v6264_v56  ;;  %816 = vmatpush1.bf16.msra.mxu1 %v6265_v57  ;;  %v6356_v56 = vld [vmem:[%s9022_s1 + $0x108] ss:$16 sps:$4 sm:$0xff]   ;;  %v6361_v57 = vld [vmem:[%s9022_s1 + $0x124] ss:$16 sps:$4 sm:$0xff]   ;;  %s289_s22 = scalar_lea.vmem %s9024_s3, %s6109_s18 }
  0x46   : > { %774 = vmatprep.subr.bf16.mxu0 %v6266_v58  ;;  %817 = vmatprep.subr.bf16.mxu1 %v6268_v59  ;;  %v6364_v58 = vld [vmem:[%s9022_s1 + $0x12c] ss:$16 sps:$4 sm:$0xff]   ;;  %v6359_v59 = vld [vmem:[%s9022_s1 + $0x120] ss:$16 sps:$4 sm:$0xff]  }
  0x49   : > { %775 = vmatpush1.bf16.msra.mxu0 %v6270_v60  ;;  %818 = vmatpush1.bf16.msra.mxu1 %v6271_v61  ;;  %v6362_v60 = vld [vmem:[%s9022_s1 + $0x128] ss:$16 sps:$4 sm:$0xff]   ;;  %v6367_v61 = vld [vmem:[%s9022_s1 + $0x144] ss:$16 sps:$4 sm:$0xff]  }
  0x4a   : > { %776 = vmatprep.subr.bf16.mxu0 %v6272_v62  ;;  %819 = vmatprep.subr.bf16.mxu1 %v6274_v63  ;;  %v6370_v62 = vld [vmem:[%s9022_s1 + $0x14c] ss:$16 sps:$4 sm:$0xff]   ;;  %v6365_v63 = vld [vmem:[%s9022_s1 + $0x140] ss:$16 sps:$4 sm:$0xff]  }
  0x4d   : > { %777 = vmatpush1.bf16.msra.mxu0 %v6276_v0  ;;  %820 = vmatpush1.bf16.msra.mxu1 %v6277_v1  ;;  %v6368_v0 = vld [vmem:[%s9022_s1 + $0x148] ss:$16 sps:$4 sm:$0xff]   ;;  %v6373_v1 = vld [vmem:[%s9022_s1 + $0x164] ss:$16 sps:$4 sm:$0xff]  }
  0x4e   : > { %778 = vmatprep.subr.bf16.mxu0 %v6278_v3  ;;  %821 = vmatprep.subr.bf16.mxu1 %v6280_v4  ;;  %v6371_v3 = vld [vmem:[%s9022_s1 + $0x160] ss:$16 sps:$4 sm:$0xff]   ;;  %v6374_v4 = vld [vmem:[%s9022_s1 + $0x168] ss:$16 sps:$4 sm:$0xff]  }
  0x51   : > { %779 = vmatpush1.bf16.msra.mxu0 %v6282_v5  ;;  %822 = vmatpush1.bf16.msra.mxu1 %v6283_v6  ;;  %v6379_v5 = vld [vmem:[%s9022_s1 + $0x184] ss:$16 sps:$4 sm:$0xff]   ;;  %v6382_v6 = vld [vmem:[%s9022_s1 + $0x18c] ss:$16 sps:$4 sm:$0xff]  }
  0x52   : > { %780 = vmatprep.subr.bf16.mxu0 %v6284_v7  ;;  %823 = vmatprep.subr.bf16.mxu1 %v6286_v8  ;;  %v6377_v7 = vld [vmem:[%s9022_s1 + $0x180] ss:$16 sps:$4 sm:$0xff]   ;;  %v6380_v8 = vld [vmem:[%s9022_s1 + $0x188] ss:$16 sps:$4 sm:$0xff]  }
  0x55   : > { %781 = vmatpush1.bf16.msra.mxu0 %v6288_v9  ;;  %824 = vmatpush1.bf16.msra.mxu1 %v6289_v10  ;;  %v6385_v9 = vld [vmem:[%s9022_s1 + $0x1a4] ss:$16 sps:$4 sm:$0xff]   ;;  %v6388_v10 = vld [vmem:[%s9022_s1 + $0x1ac] ss:$16 sps:$4 sm:$0xff]  }
  0x56   : > { %782 = vmatprep.subr.bf16.mxu0 %v6290_v11  ;;  %825 = vmatprep.subr.bf16.mxu1 %v6292_v12  ;;  %v6383_v11 = vld [vmem:[%s9022_s1 + $0x1a0] ss:$16 sps:$4 sm:$0xff]   ;;  %v6386_v12 = vld [vmem:[%s9022_s1 + $0x1a8] ss:$16 sps:$4 sm:$0xff]  }
  0x59   : > { %783 = vmatpush1.bf16.msra.mxu0 %v6294_v13  ;;  %826 = vmatpush1.bf16.msra.mxu1 %v6295_v14  ;;  %v6391_v13 = vld [vmem:[%s9022_s1 + $0x1c4] ss:$16 sps:$4 sm:$0xff]   ;;  %v6394_v14 = vld [vmem:[%s9022_s1 + $0x1cc] ss:$16 sps:$4 sm:$0xff]  }
  0x5a   : > { %784 = vmatprep.subr.bf16.mxu0 %v6296_v15  ;;  %827 = vmatprep.subr.bf16.mxu1 %v6298_v16  ;;  %v6389_v15 = vld [vmem:[%s9022_s1 + $0x1c0] ss:$16 sps:$4 sm:$0xff]   ;;  %v6392_v16 = vld [vmem:[%s9022_s1 + $0x1c8] ss:$16 sps:$4 sm:$0xff]  }
  0x5d   : > { %785 = vmatpush1.bf16.msra.mxu0 %v6300_v17  ;;  %828 = vmatpush1.bf16.msra.mxu1 %v6301_v18  ;;  %v6397_v17 = vld [vmem:[%s9022_s1 + $0x1e4] ss:$16 sps:$4 sm:$0xff]   ;;  %v6400_v18 = vld [vmem:[%s9022_s1 + $0x1ec] ss:$16 sps:$4 sm:$0xff]  }
  0x5e   : > { %1170 = vmatprep.subr.bf16.mxu0 %v6307_v19  ;;  %1213 = vmatprep.subr.bf16.mxu1 %v6310_v20  ;;  %v6395_v19 = vld [vmem:[%s9022_s1 + $0x1e0] ss:$16 sps:$4 sm:$0xff]   ;;  %v6398_v20 = vld [vmem:[%s9022_s1 + $0x1e8] ss:$16 sps:$4 sm:$0xff]  }
  0x60   : > { %787 = vmatmul.mubr.bf16.vlgmr.msra.gmra.mrb[0].mxu0 %v6302_v21  ;;  %830 = vmatmul.mubr.bf16.vlgmr.msra.gmra.mrb[0].mxu1 %v6302_v21  ;;  %v6406_v21 = vld [vmem:[%s9022_s1 + $0x404] ss:$16 sps:$4 sm:$0xff]  }
  0x61   : > { %1171 = vmatpush1.bf16.msra.mxu0 %v6305_v22  ;;  %1214 = vmatpush1.bf16.msra.mxu1 %v6308_v23  ;;  %v6409_v22 = vld [vmem:[%s9022_s1 + $0x40c] ss:$16 sps:$4 sm:$0xff]   ;;  %v6401_v23 = vld [vmem:[%s7368_s7] ss:$8 sps:$4 sm:$0xff]  }
  0x62   : > { %1172 = vmatprep.subr.bf16.mxu0 %v6313_v24  ;;  %1215 = vmatprep.subr.bf16.mxu1 %v6316_v25  ;;  %v6404_v24 = vld [vmem:[%s9022_s1 + $0x400] ss:$16 sps:$4 sm:$0xff]   ;;  %v6407_v25 = vld [vmem:[%s9022_s1 + $0x408] ss:$16 sps:$4 sm:$0xff]  }
  0x63   : > { %1202 = vmatprep.mubr.bf16.mxu0 %v6403_v48  ;;  %1245 = vmatprep.mubr.bf16.mxu1 %v6403_v48  ;;  %v6445_v48 = vld [vmem:[%s9022_s1 + $0x4cc] ss:$16 sps:$4 sm:$0xff]  }
  0x65   : > { %1173 = vmatpush1.bf16.msra.mxu0 %v6311_v26  ;;  %1216 = vmatpush1.bf16.msra.mxu1 %v6314_v27  ;;  %v6412_v26 = vld [vmem:[%s9022_s1 + $0x424] ss:$16 sps:$4 sm:$0xff]   ;;  %v6415_v27 = vld [vmem:[%s9022_s1 + $0x42c] ss:$16 sps:$4 sm:$0xff]  }
  0x66   : > { %1174 = vmatprep.subr.bf16.mxu0 %v6319_v28  ;;  %1217 = vmatprep.subr.bf16.mxu1 %v6322_v29  ;;  %v6410_v28 = vld [vmem:[%s9022_s1 + $0x420] ss:$16 sps:$4 sm:$0xff]   ;;  %v6413_v29 = vld [vmem:[%s9022_s1 + $0x428] ss:$16 sps:$4 sm:$0xff]  }
  0x69   : > { %1175 = vmatpush1.bf16.msra.mxu0 %v6317_v30  ;;  %1218 = vmatpush1.bf16.msra.mxu1 %v6320_v31  ;;  %v6502_v30 = vld [vmem:[%s7368_s7 + $0x34] ss:$8 sps:$4 sm:$0xff]  }
  0x6a   : > { %1176 = vmatprep.subr.bf16.mxu0 %v6325_v32  ;;  %1219 = vmatprep.subr.bf16.mxu1 %v6328_v33  ;;  %v6418_v31 = vld [vmem:[%s9022_s1 + $0x444] ss:$16 sps:$4 sm:$0xff]   ;;  %v6421_v32 = vld [vmem:[%s9022_s1 + $0x44c] ss:$16 sps:$4 sm:$0xff]   ;;  %v6416_v33 = vld [vmem:[%s9022_s1 + $0x440] ss:$16 sps:$4 sm:$0xff]  }
  0x6d   : > { %1177 = vmatpush1.bf16.msra.mxu0 %v6323_v34  ;;  %1220 = vmatpush1.bf16.msra.mxu1 %v6326_v35  ;;  %v6419_v34 = vld [vmem:[%s9022_s1 + $0x448] ss:$16 sps:$4 sm:$0xff]   ;;  %v6424_v35 = vld [vmem:[%s9022_s1 + $0x464] ss:$16 sps:$4 sm:$0xff]  }
  0x6e   : > { %1178 = vmatprep.subr.bf16.mxu0 %v6331_v36  ;;  %1221 = vmatprep.subr.bf16.mxu1 %v6334_v37  ;;  %v6427_v36 = vld [vmem:[%s9022_s1 + $0x46c] ss:$16 sps:$4 sm:$0xff]   ;;  %v6422_v37 = vld [vmem:[%s9022_s1 + $0x460] ss:$16 sps:$4 sm:$0xff]  }
  0x71   : > { %1179 = vmatpush1.bf16.msra.mxu0 %v6329_v38  ;;  %1222 = vmatpush1.bf16.msra.mxu1 %v6332_v39  ;;  %v6425_v38 = vld [vmem:[%s9022_s1 + $0x468] ss:$16 sps:$4 sm:$0xff]   ;;  %v6430_v39 = vld [vmem:[%s9022_s1 + $0x484] ss:$16 sps:$4 sm:$0xff]  }
  0x72   : > { %1180 = vmatprep.subr.bf16.mxu0 %v6337_v40  ;;  %1223 = vmatprep.subr.bf16.mxu1 %v6340_v41  ;;  %v6433_v40 = vld [vmem:[%s9022_s1 + $0x48c] ss:$16 sps:$4 sm:$0xff]   ;;  %v6428_v41 = vld [vmem:[%s9022_s1 + $0x480] ss:$16 sps:$4 sm:$0xff]  }
  0x75   : > { %1181 = vmatpush1.bf16.msra.mxu0 %v6335_v42  ;;  %1224 = vmatpush1.bf16.msra.mxu1 %v6338_v43  ;;  %v6431_v42 = vld [vmem:[%s9022_s1 + $0x488] ss:$16 sps:$4 sm:$0xff]   ;;  %v6436_v43 = vld [vmem:[%s9022_s1 + $0x4a4] ss:$16 sps:$4 sm:$0xff]  }
  0x76   : > { %1182 = vmatprep.subr.bf16.mxu0 %v6343_v44  ;;  %1225 = vmatprep.subr.bf16.mxu1 %v6346_v45  ;;  %v6439_v44 = vld [vmem:[%s9022_s1 + $0x4ac] ss:$16 sps:$4 sm:$0xff]   ;;  %v6434_v45 = vld [vmem:[%s9022_s1 + $0x4a0] ss:$16 sps:$4 sm:$0xff]  }
  0x79   : > { %1183 = vmatpush1.bf16.msra.mxu0 %v6341_v46  ;;  %1226 = vmatpush1.bf16.msra.mxu1 %v6344_v47  ;;  %v6437_v46 = vld [vmem:[%s9022_s1 + $0x4a8] ss:$16 sps:$4 sm:$0xff]   ;;  %v6442_v47 = vld [vmem:[%s9022_s1 + $0x4c4] ss:$16 sps:$4 sm:$0xff]  }
  0x7a   : > { %1184 = vmatprep.subr.bf16.mxu0 %v6349_v49  ;;  %1227 = vmatprep.subr.bf16.mxu1 %v6352_v50  ;;  %v6440_v49 = vld [vmem:[%s9022_s1 + $0x4c0] ss:$16 sps:$4 sm:$0xff]   ;;  %v6443_v50 = vld [vmem:[%s9022_s1 + $0x4c8] ss:$16 sps:$4 sm:$0xff]  }
  0x7d   : > { %1185 = vmatpush1.bf16.msra.mxu0 %v6347_v51  ;;  %1228 = vmatpush1.bf16.msra.mxu1 %v6350_v52  ;;  %v6448_v51 = vld [vmem:[%s9022_s1 + $0x4e4] ss:$16 sps:$4 sm:$0xff]   ;;  %v6451_v52 = vld [vmem:[%s9022_s1 + $0x4ec] ss:$16 sps:$4 sm:$0xff]  }
  0x7e   : > { %1186 = vmatprep.subr.bf16.mxu0 %v6355_v53  ;;  %1229 = vmatprep.subr.bf16.mxu1 %v6358_v54  ;;  %v6446_v53 = vld [vmem:[%s9022_s1 + $0x4e0] ss:$16 sps:$4 sm:$0xff]   ;;  %v6449_v54 = vld [vmem:[%s9022_s1 + $0x4e8] ss:$16 sps:$4 sm:$0xff]  }
  0x81   : > { %1187 = vmatpush1.bf16.msra.mxu0 %v6353_v55  ;;  %1230 = vmatpush1.bf16.msra.mxu1 %v6356_v56  ;;  %v6454_v55 = vld [vmem:[%s9022_s1 + $0x504] ss:$16 sps:$4 sm:$0xff]   ;;  %v6457_v56 = vld [vmem:[%s9022_s1 + $0x50c] ss:$16 sps:$4 sm:$0xff]  }
  0x82   : > { %1188 = vmatprep.subr.bf16.mxu0 %v6361_v57  ;;  %1231 = vmatprep.subr.bf16.mxu1 %v6364_v58  ;;  %v6452_v57 = vld [vmem:[%s9022_s1 + $0x500] ss:$16 sps:$4 sm:$0xff]   ;;  %v6455_v58 = vld [vmem:[%s9022_s1 + $0x508] ss:$16 sps:$4 sm:$0xff]  }
  0x85   : > { %1189 = vmatpush1.bf16.msra.mxu0 %v6359_v59  ;;  %1232 = vmatpush1.bf16.msra.mxu1 %v6362_v60  ;;  %v6460_v59 = vld [vmem:[%s9022_s1 + $0x524] ss:$16 sps:$4 sm:$0xff]   ;;  %v6463_v60 = vld [vmem:[%s9022_s1 + $0x52c] ss:$16 sps:$4 sm:$0xff]  }
  0x86   : > { %1190 = vmatprep.subr.bf16.mxu0 %v6367_v61  ;;  %1233 = vmatprep.subr.bf16.mxu1 %v6370_v62  ;;  %v6458_v61 = vld [vmem:[%s9022_s1 + $0x520] ss:$16 sps:$4 sm:$0xff]   ;;  %v6461_v62 = vld [vmem:[%s9022_s1 + $0x528] ss:$16 sps:$4 sm:$0xff]  }
  0x89   : > { %1191 = vmatpush1.bf16.msra.mxu0 %v6365_v63  ;;  %1234 = vmatpush1.bf16.msra.mxu1 %v6368_v0  ;;  %v6466_v63 = vld [vmem:[%s9022_s1 + $0x544] ss:$16 sps:$4 sm:$0xff]   ;;  %v6469_v0 = vld [vmem:[%s9022_s1 + $0x54c] ss:$16 sps:$4 sm:$0xff]  }
  0x8a   : > { %1192 = vmatprep.subr.bf16.mxu0 %v6373_v1  ;;  %1235 = vmatprep.subr.bf16.mxu1 %v6376_v2  ;;  %v6464_v1 = vld [vmem:[%s9022_s1 + $0x540] ss:$16 sps:$4 sm:$0xff]   ;;  %v6467_v2 = vld [vmem:[%s9022_s1 + $0x548] ss:$16 sps:$4 sm:$0xff]  }
  0x8d   : > { %1193 = vmatpush1.bf16.msra.mxu0 %v6371_v3  ;;  %1236 = vmatpush1.bf16.msra.mxu1 %v6374_v4  ;;  %v6472_v3 = vld [vmem:[%s9022_s1 + $0x564] ss:$16 sps:$4 sm:$0xff]   ;;  %v6475_v4 = vld [vmem:[%s9022_s1 + $0x56c] ss:$16 sps:$4 sm:$0xff]  }
  0x8e   : > { %1194 = vmatprep.subr.bf16.mxu0 %v6379_v5  ;;  %1237 = vmatprep.subr.bf16.mxu1 %v6382_v6  ;;  %v6470_v5 = vld [vmem:[%s9022_s1 + $0x560] ss:$16 sps:$4 sm:$0xff]   ;;  %v6473_v6 = vld [vmem:[%s9022_s1 + $0x568] ss:$16 sps:$4 sm:$0xff]  }
  0x91   : > { %1195 = vmatpush1.bf16.msra.mxu0 %v6377_v7  ;;  %1238 = vmatpush1.bf16.msra.mxu1 %v6380_v8  ;;  %v6478_v7 = vld [vmem:[%s9022_s1 + $0x584] ss:$16 sps:$4 sm:$0xff]   ;;  %v6481_v8 = vld [vmem:[%s9022_s1 + $0x58c] ss:$16 sps:$4 sm:$0xff]  }
  0x92   : > { %1196 = vmatprep.subr.bf16.mxu0 %v6385_v9  ;;  %1239 = vmatprep.subr.bf16.mxu1 %v6388_v10  ;;  %v6476_v9 = vld [vmem:[%s9022_s1 + $0x580] ss:$16 sps:$4 sm:$0xff]   ;;  %v6479_v10 = vld [vmem:[%s9022_s1 + $0x588] ss:$16 sps:$4 sm:$0xff]  }
  0x95   : > { %1197 = vmatpush1.bf16.msra.mxu0 %v6383_v11  ;;  %1240 = vmatpush1.bf16.msra.mxu1 %v6386_v12  ;;  %v6484_v11 = vld [vmem:[%s9022_s1 + $0x5a4] ss:$16 sps:$4 sm:$0xff]   ;;  %v6487_v12 = vld [vmem:[%s9022_s1 + $0x5ac] ss:$16 sps:$4 sm:$0xff]  }
  0x96   : > { %1198 = vmatprep.subr.bf16.mxu0 %v6391_v13  ;;  %1241 = vmatprep.subr.bf16.mxu1 %v6394_v14  ;;  %v6482_v13 = vld [vmem:[%s9022_s1 + $0x5a0] ss:$16 sps:$4 sm:$0xff]   ;;  %v6485_v14 = vld [vmem:[%s9022_s1 + $0x5a8] ss:$16 sps:$4 sm:$0xff]  }
  0x99   : > { %1199 = vmatpush1.bf16.msra.mxu0 %v6389_v15  ;;  %1242 = vmatpush1.bf16.msra.mxu1 %v6392_v16  ;;  %v6490_v15 = vld [vmem:[%s9022_s1 + $0x5c4] ss:$16 sps:$4 sm:$0xff]   ;;  %v6493_v16 = vld [vmem:[%s9022_s1 + $0x5cc] ss:$16 sps:$4 sm:$0xff]  }
  0x9a   : > { %1200 = vmatprep.subr.bf16.mxu0 %v6397_v17  ;;  %1243 = vmatprep.subr.bf16.mxu1 %v6400_v18  ;;  %v6488_v17 = vld [vmem:[%s9022_s1 + $0x5c0] ss:$16 sps:$4 sm:$0xff]   ;;  %v6491_v18 = vld [vmem:[%s9022_s1 + $0x5c8] ss:$16 sps:$4 sm:$0xff]  }
  0x9d   : > { %1201 = vmatpush1.bf16.msra.mxu0 %v6395_v19  ;;  %1244 = vmatpush1.bf16.msra.mxu1 %v6398_v20  ;;  %v6496_v19 = vld [vmem:[%s9022_s1 + $0x5e4] ss:$16 sps:$4 sm:$0xff]   ;;  %v6499_v20 = vld [vmem:[%s9022_s1 + $0x5ec] ss:$16 sps:$4 sm:$0xff]  }
  0x9e   : > { %1654 = vmatprep.subr.bf16.mxu0 %v6406_v21  ;;  %1697 = vmatprep.subr.bf16.mxu1 %v6409_v22  ;;  %v6494_v21 = vld [vmem:[%s9022_s1 + $0x5e0] ss:$16 sps:$4 sm:$0xff]   ;;  %v6497_v22 = vld [vmem:[%s9022_s1 + $0x5e8] ss:$16 sps:$4 sm:$0xff]  }
  0xa0   : > { %1203 = vmatmul.mubr.bf16.vlgmr.msra.gmra.mrb[0].mxu0 %v6401_v23  ;;  %1246 = vmatmul.mubr.bf16.vlgmr.msra.gmra.mrb[0].mxu1 %v6401_v23  ;;  %v6505_v23 = vld [vmem:[%s9022_s1 + $0x604] ss:$16 sps:$4 sm:$0xff]  }
  0xa1   : > { %1655 = vmatpush1.bf16.msra.mxu0 %v6404_v24  ;;  %1698 = vmatpush1.bf16.msra.mxu1 %v6407_v25  ;;  %v6508_v24 = vld [vmem:[%s9022_s1 + $0x60c] ss:$16 sps:$4 sm:$0xff]   ;;  %v6500_v25 = vld [vmem:[%s7368_s7 + $0x30] ss:$8 sps:$4 sm:$0xff]  }
  0xa2   : > { %1656 = vmatprep.subr.bf16.mxu0 %v6412_v26  ;;  %1699 = vmatprep.subr.bf16.mxu1 %v6415_v27  ;;  %v6503_v26 = vld [vmem:[%s9022_s1 + $0x600] ss:$16 sps:$4 sm:$0xff]   ;;  %v6506_v27 = vld [vmem:[%s9022_s1 + $0x608] ss:$16 sps:$4 sm:$0xff]  }
  0xa3   : > { %1686 = vmatprep.mubr.bf16.mxu0 %v6502_v30  ;;  %1729 = vmatprep.mubr.bf16.mxu1 %v6502_v30  ;;  %v6601_v30 = vld [vmem:[%s7368_s7 + $0x4c] ss:$8 sps:$4 sm:$0xff]  }
  0xa5   : > { %1657 = vmatpush1.bf16.msra.mxu0 %v6410_v28  ;;  %1700 = vmatpush1.bf16.msra.mxu1 %v6413_v29  ;;  %v6511_v28 = vld [vmem:[%s9022_s1 + $0x624] ss:$16 sps:$4 sm:$0xff]   ;;  %v6514_v29 = vld [vmem:[%s9022_s1 + $0x62c] ss:$16 sps:$4 sm:$0xff]  }
  0xa6   : > { %1658 = vmatprep.subr.bf16.mxu0 %v6418_v31  ;;  %1701 = vmatprep.subr.bf16.mxu1 %v6421_v32  ;;  %v6509_v31 = vld [vmem:[%s9022_s1 + $0x620] ss:$16 sps:$4 sm:$0xff]   ;;  %v6512_v32 = vld [vmem:[%s9022_s1 + $0x628] ss:$16 sps:$4 sm:$0xff]  }
  0xa9   : > { %1659 = vmatpush1.bf16.msra.mxu0 %v6416_v33  ;;  %1702 = vmatpush1.bf16.msra.mxu1 %v6419_v34  ;;  %v6517_v33 = vld [vmem:[%s9022_s1 + $0x644] ss:$16 sps:$4 sm:$0xff]   ;;  %v6520_v34 = vld [vmem:[%s9022_s1 + $0x64c] ss:$16 sps:$4 sm:$0xff]  }
  0xaa   : > { %1660 = vmatprep.subr.bf16.mxu0 %v6424_v35  ;;  %1703 = vmatprep.subr.bf16.mxu1 %v6427_v36  ;;  %v6515_v35 = vld [vmem:[%s9022_s1 + $0x640] ss:$16 sps:$4 sm:$0xff]   ;;  %v6518_v36 = vld [vmem:[%s9022_s1 + $0x648] ss:$16 sps:$4 sm:$0xff]  }
  0xad   : > { %1661 = vmatpush1.bf16.msra.mxu0 %v6422_v37  ;;  %1704 = vmatpush1.bf16.msra.mxu1 %v6425_v38  ;;  %v6523_v37 = vld [vmem:[%s9022_s1 + $0x664] ss:$16 sps:$4 sm:$0xff]   ;;  %v6526_v38 = vld [vmem:[%s9022_s1 + $0x66c] ss:$16 sps:$4 sm:$0xff]  }
  0xae   : > { %1662 = vmatprep.subr.bf16.mxu0 %v6430_v39  ;;  %1705 = vmatprep.subr.bf16.mxu1 %v6433_v40  ;;  %v6521_v39 = vld [vmem:[%s9022_s1 + $0x660] ss:$16 sps:$4 sm:$0xff]   ;;  %v6524_v40 = vld [vmem:[%s9022_s1 + $0x668] ss:$16 sps:$4 sm:$0xff]  }
  0xb1   : > { %1663 = vmatpush1.bf16.msra.mxu0 %v6428_v41  ;;  %1706 = vmatpush1.bf16.msra.mxu1 %v6431_v42  ;;  %v6529_v41 = vld [vmem:[%s9022_s1 + $0x684] ss:$16 sps:$4 sm:$0xff]   ;;  %v6532_v42 = vld [vmem:[%s9022_s1 + $0x68c] ss:$16 sps:$4 sm:$0xff]  }
  0xb2   : > { %1664 = vmatprep.subr.bf16.mxu0 %v6436_v43  ;;  %1707 = vmatprep.subr.bf16.mxu1 %v6439_v44  ;;  %v6527_v43 = vld [vmem:[%s9022_s1 + $0x680] ss:$16 sps:$4 sm:$0xff]   ;;  %v6530_v44 = vld [vmem:[%s9022_s1 + $0x688] ss:$16 sps:$4 sm:$0xff]  }
  0xb5   : > { %1665 = vmatpush1.bf16.msra.mxu0 %v6434_v45  ;;  %1708 = vmatpush1.bf16.msra.mxu1 %v6437_v46  ;;  %v6535_v45 = vld [vmem:[%s9022_s1 + $0x6a4] ss:$16 sps:$4 sm:$0xff]   ;;  %v6538_v46 = vld [vmem:[%s9022_s1 + $0x6ac] ss:$16 sps:$4 sm:$0xff]  }
  0xb6   : > { %1666 = vmatprep.subr.bf16.mxu0 %v6442_v47  ;;  %1709 = vmatprep.subr.bf16.mxu1 %v6445_v48  ;;  %v6533_v47 = vld [vmem:[%s9022_s1 + $0x6a0] ss:$16 sps:$4 sm:$0xff]   ;;  %v6536_v48 = vld [vmem:[%s9022_s1 + $0x6a8] ss:$16 sps:$4 sm:$0xff]  }
  0xb9   : > { %1667 = vmatpush1.bf16.msra.mxu0 %v6440_v49  ;;  %1710 = vmatpush1.bf16.msra.mxu1 %v6443_v50  ;;  %v6541_v49 = vld [vmem:[%s9022_s1 + $0x6c4] ss:$16 sps:$4 sm:$0xff]   ;;  %v6544_v50 = vld [vmem:[%s9022_s1 + $0x6cc] ss:$16 sps:$4 sm:$0xff]  }
  0xba   : > { %1668 = vmatprep.subr.bf16.mxu0 %v6448_v51  ;;  %1711 = vmatprep.subr.bf16.mxu1 %v6451_v52  ;;  %v6539_v51 = vld [vmem:[%s9022_s1 + $0x6c0] ss:$16 sps:$4 sm:$0xff]   ;;  %v6542_v52 = vld [vmem:[%s9022_s1 + $0x6c8] ss:$16 sps:$4 sm:$0xff]  }
  0xbd   : > { %1669 = vmatpush1.bf16.msra.mxu0 %v6446_v53  ;;  %1712 = vmatpush1.bf16.msra.mxu1 %v6449_v54  ;;  %v6547_v53 = vld [vmem:[%s9022_s1 + $0x6e4] ss:$16 sps:$4 sm:$0xff]   ;;  %v6550_v54 = vld [vmem:[%s9022_s1 + $0x6ec] ss:$16 sps:$4 sm:$0xff]  }
  0xbe   : > { %1670 = vmatprep.subr.bf16.mxu0 %v6454_v55  ;;  %1713 = vmatprep.subr.bf16.mxu1 %v6457_v56  ;;  %v6545_v55 = vld [vmem:[%s9022_s1 + $0x6e0] ss:$16 sps:$4 sm:$0xff]   ;;  %v6548_v56 = vld [vmem:[%s9022_s1 + $0x6e8] ss:$16 sps:$4 sm:$0xff]  }
  0xc1   : > { %1671 = vmatpush1.bf16.msra.mxu0 %v6452_v57  ;;  %1714 = vmatpush1.bf16.msra.mxu1 %v6455_v58  ;;  %v6553_v57 = vld [vmem:[%s9022_s1 + $0x704] ss:$16 sps:$4 sm:$0xff]   ;;  %v6556_v58 = vld [vmem:[%s9022_s1 + $0x70c] ss:$16 sps:$4 sm:$0xff]  }
  0xc2   : > { %1672 = vmatprep.subr.bf16.mxu0 %v6460_v59  ;;  %1715 = vmatprep.subr.bf16.mxu1 %v6463_v60  ;;  %v6551_v59 = vld [vmem:[%s9022_s1 + $0x700] ss:$16 sps:$4 sm:$0xff]   ;;  %v6554_v60 = vld [vmem:[%s9022_s1 + $0x708] ss:$16 sps:$4 sm:$0xff]  }
  0xc5   : > { %1673 = vmatpush1.bf16.msra.mxu0 %v6458_v61  ;;  %1716 = vmatpush1.bf16.msra.mxu1 %v6461_v62  ;;  %v6559_v61 = vld [vmem:[%s9022_s1 + $0x724] ss:$16 sps:$4 sm:$0xff]   ;;  %v6562_v62 = vld [vmem:[%s9022_s1 + $0x72c] ss:$16 sps:$4 sm:$0xff]  }
  0xc6   : > { %1674 = vmatprep.subr.bf16.mxu0 %v6466_v63  ;;  %1717 = vmatprep.subr.bf16.mxu1 %v6469_v0  ;;  %v6557_v63 = vld [vmem:[%s9022_s1 + $0x720] ss:$16 sps:$4 sm:$0xff]   ;;  %v6560_v0 = vld [vmem:[%s9022_s1 + $0x728] ss:$16 sps:$4 sm:$0xff]  }
  0xc9   : > { %1675 = vmatpush1.bf16.msra.mxu0 %v6464_v1  ;;  %1718 = vmatpush1.bf16.msra.mxu1 %v6467_v2  ;;  %v6565_v1 = vld [vmem:[%s9022_s1 + $0x744] ss:$16 sps:$4 sm:$0xff]   ;;  %v6568_v2 = vld [vmem:[%s9022_s1 + $0x74c] ss:$16 sps:$4 sm:$0xff]  }
  0xca   : > { %1676 = vmatprep.subr.bf16.mxu0 %v6472_v3  ;;  %1719 = vmatprep.subr.bf16.mxu1 %v6475_v4  ;;  %v6563_v3 = vld [vmem:[%s9022_s1 + $0x740] ss:$16 sps:$4 sm:$0xff]   ;;  %v6566_v4 = vld [vmem:[%s9022_s1 + $0x748] ss:$16 sps:$4 sm:$0xff]  }
  0xcd   : > { %1677 = vmatpush1.bf16.msra.mxu0 %v6470_v5  ;;  %1720 = vmatpush1.bf16.msra.mxu1 %v6473_v6  ;;  %v6571_v5 = vld [vmem:[%s9022_s1 + $0x764] ss:$16 sps:$4 sm:$0xff]   ;;  %v6574_v6 = vld [vmem:[%s9022_s1 + $0x76c] ss:$16 sps:$4 sm:$0xff]  }
  0xce   : > { %1678 = vmatprep.subr.bf16.mxu0 %v6478_v7  ;;  %1721 = vmatprep.subr.bf16.mxu1 %v6481_v8  ;;  %v6569_v7 = vld [vmem:[%s9022_s1 + $0x760] ss:$16 sps:$4 sm:$0xff]   ;;  %v6572_v8 = vld [vmem:[%s9022_s1 + $0x768] ss:$16 sps:$4 sm:$0xff]  }
  0xd1   : > { %1679 = vmatpush1.bf16.msra.mxu0 %v6476_v9  ;;  %1722 = vmatpush1.bf16.msra.mxu1 %v6479_v10  ;;  %v6577_v9 = vld [vmem:[%s9022_s1 + $0x784] ss:$16 sps:$4 sm:$0xff]   ;;  %v6580_v10 = vld [vmem:[%s9022_s1 + $0x78c] ss:$16 sps:$4 sm:$0xff]  }
  0xd2   : > { %1680 = vmatprep.subr.bf16.mxu0 %v6484_v11  ;;  %1723 = vmatprep.subr.bf16.mxu1 %v6487_v12  ;;  %v6575_v11 = vld [vmem:[%s9022_s1 + $0x780] ss:$16 sps:$4 sm:$0xff]   ;;  %v6578_v12 = vld [vmem:[%s9022_s1 + $0x788] ss:$16 sps:$4 sm:$0xff]  }
  0xd5   : > { %1681 = vmatpush1.bf16.msra.mxu0 %v6482_v13  ;;  %1724 = vmatpush1.bf16.msra.mxu1 %v6485_v14  ;;  %v6583_v13 = vld [vmem:[%s9022_s1 + $0x7a4] ss:$16 sps:$4 sm:$0xff]   ;;  %v6586_v14 = vld [vmem:[%s9022_s1 + $0x7ac] ss:$16 sps:$4 sm:$0xff]  }
  0xd6   : > { %1682 = vmatprep.subr.bf16.mxu0 %v6490_v15  ;;  %1725 = vmatprep.subr.bf16.mxu1 %v6493_v16  ;;  %v6581_v15 = vld [vmem:[%s9022_s1 + $0x7a0] ss:$16 sps:$4 sm:$0xff]   ;;  %v6584_v16 = vld [vmem:[%s9022_s1 + $0x7a8] ss:$16 sps:$4 sm:$0xff]  }
  0xd9   : > { %1683 = vmatpush1.bf16.msra.mxu0 %v6488_v17  ;;  %1726 = vmatpush1.bf16.msra.mxu1 %v6491_v18  ;;  %v6589_v17 = vld [vmem:[%s9022_s1 + $0x7c4] ss:$16 sps:$4 sm:$0xff]   ;;  %v6592_v18 = vld [vmem:[%s9022_s1 + $0x7cc] ss:$16 sps:$4 sm:$0xff]  }
  0xda   : > { %1684 = vmatprep.subr.bf16.mxu0 %v6496_v19  ;;  %1727 = vmatprep.subr.bf16.mxu1 %v6499_v20  ;;  %v6587_v19 = vld [vmem:[%s9022_s1 + $0x7c0] ss:$16 sps:$4 sm:$0xff]   ;;  %v6590_v20 = vld [vmem:[%s9022_s1 + $0x7c8] ss:$16 sps:$4 sm:$0xff]  }
  0xdd   : > { %1685 = vmatpush1.bf16.msra.mxu0 %v6494_v21  ;;  %1728 = vmatpush1.bf16.msra.mxu1 %v6497_v22  ;;  %v6595_v21 = vld [vmem:[%s9022_s1 + $0x7e4] ss:$16 sps:$4 sm:$0xff]   ;;  %v6598_v22 = vld [vmem:[%s9022_s1 + $0x7ec] ss:$16 sps:$4 sm:$0xff]  }
  0xde   : > { %2146 = vmatprep.subr.bf16.mxu0 %v6505_v23  ;;  %2189 = vmatprep.subr.bf16.mxu1 %v6508_v24  ;;  %v6593_v23 = vld [vmem:[%s9022_s1 + $0x7e0] ss:$16 sps:$4 sm:$0xff]   ;;  %v6596_v24 = vld [vmem:[%s9022_s1 + $0x7e8] ss:$16 sps:$4 sm:$0xff]  }
  0xe0   : > { %1687 = vmatmul.mubr.bf16.vlgmr.msra.gmra.mrb[0].mxu0 %v6500_v25  ;;  %1730 = vmatmul.mubr.bf16.vlgmr.msra.gmra.mrb[0].mxu1 %v6500_v25  ;;  %v6604_v25 = vld [vmem:[%s9022_s1 + $0x804] ss:$16 sps:$4 sm:$0xff]  }
  0xe1   : > { %2147 = vmatpush1.bf16.msra.mxu0 %v6503_v26  ;;  %2190 = vmatpush1.bf16.msra.mxu1 %v6506_v27  ;;  %v6607_v26 = vld [vmem:[%s9022_s1 + $0x80c] ss:$16 sps:$4 sm:$0xff]   ;;  %v6599_v27 = vld [vmem:[%s7368_s7 + $0x48] ss:$8 sps:$4 sm:$0xff]  }
  0xe2   : > { %2148 = vmatprep.subr.bf16.mxu0 %v6511_v28  ;;  %2191 = vmatprep.subr.bf16.mxu1 %v6514_v29  ;;  %v6602_v28 = vld [vmem:[%s9022_s1 + $0x800] ss:$16 sps:$4 sm:$0xff]   ;;  %v6605_v29 = vld [vmem:[%s9022_s1 + $0x808] ss:$16 sps:$4 sm:$0xff]  }
  0xe3   : > { %2178 = vmatprep.mubr.bf16.mxu0 %v6601_v30  ;;  %2221 = vmatprep.mubr.bf16.mxu1 %v6601_v30  ;;  %v6610_v30 = vld [vmem:[%s9022_s1 + $0x824] ss:$16 sps:$4 sm:$0xff]  }
  0xe5   : > { %2149 = vmatpush1.bf16.msra.mxu0 %v6509_v31  ;;  %2192 = vmatpush1.bf16.msra.mxu1 %v6512_v32  ;;  %v6613_v31 = vld [vmem:[%s9022_s1 + $0x82c] ss:$16 sps:$4 sm:$0xff]  }
  0xe6   : > { %2150 = vmatprep.subr.bf16.mxu0 %v6517_v33  ;;  %2193 = vmatprep.subr.bf16.mxu1 %v6520_v34  ;;  %v6700_v32 = vld [vmem:[%s7368_s7 + $0x64] ss:$8 sps:$4 sm:$0xff]   ;;  %v6608_v33 = vld [vmem:[%s9022_s1 + $0x820] ss:$16 sps:$4 sm:$0xff]   ;;  %v6611_v34 = vld [vmem:[%s9022_s1 + $0x828] ss:$16 sps:$4 sm:$0xff]  }
  0xe9   : > { %2151 = vmatpush1.bf16.msra.mxu0 %v6515_v35  ;;  %2194 = vmatpush1.bf16.msra.mxu1 %v6518_v36  ;;  %v6616_v35 = vld [vmem:[%s9022_s1 + $0x844] ss:$16 sps:$4 sm:$0xff]   ;;  %v6619_v36 = vld [vmem:[%s9022_s1 + $0x84c] ss:$16 sps:$4 sm:$0xff]  }
  0xea   : > { %2152 = vmatprep.subr.bf16.mxu0 %v6523_v37  ;;  %2195 = vmatprep.subr.bf16.mxu1 %v6526_v38  ;;  %v6614_v37 = vld [vmem:[%s9022_s1 + $0x840] ss:$16 sps:$4 sm:$0xff]   ;;  %v6617_v38 = vld [vmem:[%s9022_s1 + $0x848] ss:$16 sps:$4 sm:$0xff]  }
  0xed   : > { %2153 = vmatpush1.bf16.msra.mxu0 %v6521_v39  ;;  %2196 = vmatpush1.bf16.msra.mxu1 %v6524_v40  ;;  %v6622_v39 = vld [vmem:[%s9022_s1 + $0x864] ss:$16 sps:$4 sm:$0xff]   ;;  %v6625_v40 = vld [vmem:[%s9022_s1 + $0x86c] ss:$16 sps:$4 sm:$0xff]  }
  0xee   : > { %2154 = vmatprep.subr.bf16.mxu0 %v6529_v41  ;;  %2197 = vmatprep.subr.bf16.mxu1 %v6532_v42  ;;  %v6620_v41 = vld [vmem:[%s9022_s1 + $0x860] ss:$16 sps:$4 sm:$0xff]   ;;  %v6623_v42 = vld [vmem:[%s9022_s1 + $0x868] ss:$16 sps:$4 sm:$0xff]  }
  0xf1   : > { %2155 = vmatpush1.bf16.msra.mxu0 %v6527_v43  ;;  %2198 = vmatpush1.bf16.msra.mxu1 %v6530_v44  ;;  %v6628_v43 = vld [vmem:[%s9022_s1 + $0x884] ss:$16 sps:$4 sm:$0xff]   ;;  %v6631_v44 = vld [vmem:[%s9022_s1 + $0x88c] ss:$16 sps:$4 sm:$0xff]  }
  0xf2   : > { %2156 = vmatprep.subr.bf16.mxu0 %v6535_v45  ;;  %2199 = vmatprep.subr.bf16.mxu1 %v6538_v46  ;;  %v6626_v45 = vld [vmem:[%s9022_s1 + $0x880] ss:$16 sps:$4 sm:$0xff]   ;;  %v6629_v46 = vld [vmem:[%s9022_s1 + $0x888] ss:$16 sps:$4 sm:$0xff]  }
  0xf5   : > { %2157 = vmatpush1.bf16.msra.mxu0 %v6533_v47  ;;  %2200 = vmatpush1.bf16.msra.mxu1 %v6536_v48  ;;  %v6634_v47 = vld [vmem:[%s9022_s1 + $0x8a4] ss:$16 sps:$4 sm:$0xff]   ;;  %v6637_v48 = vld [vmem:[%s9022_s1 + $0x8ac] ss:$16 sps:$4 sm:$0xff]  }
  0xf6   : > { %2158 = vmatprep.subr.bf16.mxu0 %v6541_v49  ;;  %2201 = vmatprep.subr.bf16.mxu1 %v6544_v50  ;;  %v6632_v49 = vld [vmem:[%s9022_s1 + $0x8a0] ss:$16 sps:$4 sm:$0xff]   ;;  %v6635_v50 = vld [vmem:[%s9022_s1 + $0x8a8] ss:$16 sps:$4 sm:$0xff]  }
  0xf9   : > { %2159 = vmatpush1.bf16.msra.mxu0 %v6539_v51  ;;  %2202 = vmatpush1.bf16.msra.mxu1 %v6542_v52  ;;  %v6640_v51 = vld [vmem:[%s9022_s1 + $0x8c4] ss:$16 sps:$4 sm:$0xff]   ;;  %v6643_v52 = vld [vmem:[%s9022_s1 + $0x8cc] ss:$16 sps:$4 sm:$0xff]  }
  0xfa   : > { %2160 = vmatprep.subr.bf16.mxu0 %v6547_v53  ;;  %2203 = vmatprep.subr.bf16.mxu1 %v6550_v54  ;;  %v6638_v53 = vld [vmem:[%s9022_s1 + $0x8c0] ss:$16 sps:$4 sm:$0xff]   ;;  %v6641_v54 = vld [vmem:[%s9022_s1 + $0x8c8] ss:$16 sps:$4 sm:$0xff]  }
  0xfd   : > { %2161 = vmatpush1.bf16.msra.mxu0 %v6545_v55  ;;  %2204 = vmatpush1.bf16.msra.mxu1 %v6548_v56  ;;  %v6646_v55 = vld [vmem:[%s9022_s1 + $0x8e4] ss:$16 sps:$4 sm:$0xff]   ;;  %v6649_v56 = vld [vmem:[%s9022_s1 + $0x8ec] ss:$16 sps:$4 sm:$0xff]  }
  0xfe   : > { %2162 = vmatprep.subr.bf16.mxu0 %v6553_v57  ;;  %2205 = vmatprep.subr.bf16.mxu1 %v6556_v58  ;;  %v6644_v57 = vld [vmem:[%s9022_s1 + $0x8e0] ss:$16 sps:$4 sm:$0xff]   ;;  %v6647_v58 = vld [vmem:[%s9022_s1 + $0x8e8] ss:$16 sps:$4 sm:$0xff]  }
 0x101   : > { %2163 = vmatpush1.bf16.msra.mxu0 %v6551_v59  ;;  %2206 = vmatpush1.bf16.msra.mxu1 %v6554_v60  ;;  %v6652_v59 = vld [vmem:[%s9022_s1 + $0x904] ss:$16 sps:$4 sm:$0xff]   ;;  %v6655_v60 = vld [vmem:[%s9022_s1 + $0x90c] ss:$16 sps:$4 sm:$0xff]  }
 0x102   : > { %2164 = vmatprep.subr.bf16.mxu0 %v6559_v61  ;;  %2207 = vmatprep.subr.bf16.mxu1 %v6562_v62  ;;  %v6650_v61 = vld [vmem:[%s9022_s1 + $0x900] ss:$16 sps:$4 sm:$0xff]   ;;  %v6653_v62 = vld [vmem:[%s9022_s1 + $0x908] ss:$16 sps:$4 sm:$0xff]  }
 0x105   : > { %2165 = vmatpush1.bf16.msra.mxu0 %v6557_v63  ;;  %2208 = vmatpush1.bf16.msra.mxu1 %v6560_v0  ;;  %v6658_v63 = vld [vmem:[%s9022_s1 + $0x924] ss:$16 sps:$4 sm:$0xff]   ;;  %v6661_v0 = vld [vmem:[%s9022_s1 + $0x92c] ss:$16 sps:$4 sm:$0xff]  }
 0x106   : > { %2166 = vmatprep.subr.bf16.mxu0 %v6565_v1  ;;  %2209 = vmatprep.subr.bf16.mxu1 %v6568_v2  ;;  %v6656_v1 = vld [vmem:[%s9022_s1 + $0x920] ss:$16 sps:$4 sm:$0xff]   ;;  %v6659_v2 = vld [vmem:[%s9022_s1 + $0x928] ss:$16 sps:$4 sm:$0xff]  }
 0x109   : > { %2167 = vmatpush1.bf16.msra.mxu0 %v6563_v3  ;;  %2210 = vmatpush1.bf16.msra.mxu1 %v6566_v4  ;;  %v6664_v3 = vld [vmem:[%s9022_s1 + $0x944] ss:$16 sps:$4 sm:$0xff]   ;;  %v6667_v4 = vld [vmem:[%s9022_s1 + $0x94c] ss:$16 sps:$4 sm:$0xff]  }
 0x10a   : > { %2168 = vmatprep.subr.bf16.mxu0 %v6571_v5  ;;  %2211 = vmatprep.subr.bf16.mxu1 %v6574_v6  ;;  %v6662_v5 = vld [vmem:[%s9022_s1 + $0x940] ss:$16 sps:$4 sm:$0xff]   ;;  %v6665_v6 = vld [vmem:[%s9022_s1 + $0x948] ss:$16 sps:$4 sm:$0xff]  }
 0x10d   : > { %2169 = vmatpush1.bf16.msra.mxu0 %v6569_v7  ;;  %2212 = vmatpush1.bf16.msra.mxu1 %v6572_v8  ;;  %v6670_v7 = vld [vmem:[%s9022_s1 + $0x964] ss:$16 sps:$4 sm:$0xff]   ;;  %v6673_v8 = vld [vmem:[%s9022_s1 + $0x96c] ss:$16 sps:$4 sm:$0xff]  }
 0x10e   : > { %2170 = vmatprep.subr.bf16.mxu0 %v6577_v9  ;;  %2213 = vmatprep.subr.bf16.mxu1 %v6580_v10  ;;  %v6668_v9 = vld [vmem:[%s9022_s1 + $0x960] ss:$16 sps:$4 sm:$0xff]   ;;  %v6671_v10 = vld [vmem:[%s9022_s1 + $0x968] ss:$16 sps:$4 sm:$0xff]  }
 0x111   : > { %2171 = vmatpush1.bf16.msra.mxu0 %v6575_v11  ;;  %2214 = vmatpush1.bf16.msra.mxu1 %v6578_v12  ;;  %v6676_v11 = vld [vmem:[%s9022_s1 + $0x984] ss:$16 sps:$4 sm:$0xff]   ;;  %v6679_v12 = vld [vmem:[%s9022_s1 + $0x98c] ss:$16 sps:$4 sm:$0xff]  }
 0x112   : > { %2172 = vmatprep.subr.bf16.mxu0 %v6583_v13  ;;  %2215 = vmatprep.subr.bf16.mxu1 %v6586_v14  ;;  %v6674_v13 = vld [vmem:[%s9022_s1 + $0x980] ss:$16 sps:$4 sm:$0xff]   ;;  %v6677_v14 = vld [vmem:[%s9022_s1 + $0x988] ss:$16 sps:$4 sm:$0xff]  }
 0x115   : > { %2173 = vmatpush1.bf16.msra.mxu0 %v6581_v15  ;;  %2216 = vmatpush1.bf16.msra.mxu1 %v6584_v16  ;;  %v6682_v15 = vld [vmem:[%s9022_s1 + $0x9a4] ss:$16 sps:$4 sm:$0xff]   ;;  %v6685_v16 = vld [vmem:[%s9022_s1 + $0x9ac] ss:$16 sps:$4 sm:$0xff]  }
 0x116   : > { %2174 = vmatprep.subr.bf16.mxu0 %v6589_v17  ;;  %2217 = vmatprep.subr.bf16.mxu1 %v6592_v18  ;;  %v6680_v17 = vld [vmem:[%s9022_s1 + $0x9a0] ss:$16 sps:$4 sm:$0xff]   ;;  %v6683_v18 = vld [vmem:[%s9022_s1 + $0x9a8] ss:$16 sps:$4 sm:$0xff]  }
 0x119   : > { %2175 = vmatpush1.bf16.msra.mxu0 %v6587_v19  ;;  %2218 = vmatpush1.bf16.msra.mxu1 %v6590_v20  ;;  %v6688_v19 = vld [vmem:[%s9022_s1 + $0x9c4] ss:$16 sps:$4 sm:$0xff]   ;;  %v6691_v20 = vld [vmem:[%s9022_s1 + $0x9cc] ss:$16 sps:$4 sm:$0xff]  }
 0x11a   : > { %2176 = vmatprep.subr.bf16.mxu0 %v6595_v21  ;;  %2219 = vmatprep.subr.bf16.mxu1 %v6598_v22  ;;  %v6686_v21 = vld [vmem:[%s9022_s1 + $0x9c0] ss:$16 sps:$4 sm:$0xff]   ;;  %v6689_v22 = vld [vmem:[%s9022_s1 + $0x9c8] ss:$16 sps:$4 sm:$0xff]  }
 0x11d   : > { %2177 = vmatpush1.bf16.msra.mxu0 %v6593_v23  ;;  %2220 = vmatpush1.bf16.msra.mxu1 %v6596_v24  ;;  %v6694_v23 = vld [vmem:[%s9022_s1 + $0x9e4] ss:$16 sps:$4 sm:$0xff]   ;;  %v6697_v24 = vld [vmem:[%s9022_s1 + $0x9ec] ss:$16 sps:$4 sm:$0xff]  }
 0x11e   : > { %2638 = vmatprep.subr.bf16.mxu0 %v6604_v25  ;;  %2681 = vmatprep.subr.bf16.mxu1 %v6607_v26  ;;  %v6692_v25 = vld [vmem:[%s9022_s1 + $0x9e0] ss:$16 sps:$4 sm:$0xff]   ;;  %v6695_v26 = vld [vmem:[%s9022_s1 + $0x9e8] ss:$16 sps:$4 sm:$0xff]  }
 0x120   : > { %2179 = vmatmul.mubr.bf16.vlgmr.msra.gmra.mrb[0].mxu0 %v6599_v27  ;;  %2222 = vmatmul.mubr.bf16.vlgmr.msra.gmra.mrb[0].mxu1 %v6599_v27  ;;  %v6703_v27 = vld [vmem:[%s9022_s1 + $0xa04] ss:$16 sps:$4 sm:$0xff]  }
 0x121   : > { %2639 = vmatpush1.bf16.msra.mxu0 %v6602_v28  ;;  %2682 = vmatpush1.bf16.msra.mxu1 %v6605_v29  ;;  %v6706_v28 = vld [vmem:[%s9022_s1 + $0xa0c] ss:$16 sps:$4 sm:$0xff]   ;;  %v6698_v29 = vld [vmem:[%s7368_s7 + $0x60] ss:$8 sps:$4 sm:$0xff]  }
 0x122   : > { %2640 = vmatprep.subr.bf16.mxu0 %v6610_v30  ;;  %2683 = vmatprep.subr.bf16.mxu1 %v6613_v31  ;;  %v6701_v30 = vld [vmem:[%s9022_s1 + $0xa00] ss:$16 sps:$4 sm:$0xff]   ;;  %v6704_v31 = vld [vmem:[%s9022_s1 + $0xa08] ss:$16 sps:$4 sm:$0xff]  }
 0x123   : > { %2670 = vmatprep.mubr.bf16.mxu0 %v6700_v32  ;;  %2713 = vmatprep.mubr.bf16.mxu1 %v6700_v32  ;;  %v6709_v32 = vld [vmem:[%s9022_s1 + $0xa24] ss:$16 sps:$4 sm:$0xff]  }
 0x125   : > { %2641 = vmatpush1.bf16.msra.mxu0 %v6608_v33  ;;  %2684 = vmatpush1.bf16.msra.mxu1 %v6611_v34  ;;  %v6712_v33 = vld [vmem:[%s9022_s1 + $0xa2c] ss:$16 sps:$4 sm:$0xff]  }
 0x126   : > { %2642 = vmatprep.subr.bf16.mxu0 %v6616_v35  ;;  %2685 = vmatprep.subr.bf16.mxu1 %v6619_v36  ;;  %v6799_v34 = vld [vmem:[%s7368_s7 + $0x7c] ss:$8 sps:$4 sm:$0xff]   ;;  %v6707_v35 = vld [vmem:[%s9022_s1 + $0xa20] ss:$16 sps:$4 sm:$0xff]   ;;  %v6710_v36 = vld [vmem:[%s9022_s1 + $0xa28] ss:$16 sps:$4 sm:$0xff]  }
 0x129   : > { %2643 = vmatpush1.bf16.msra.mxu0 %v6614_v37  ;;  %2686 = vmatpush1.bf16.msra.mxu1 %v6617_v38  ;;  %v6715_v37 = vld [vmem:[%s9022_s1 + $0xa44] ss:$16 sps:$4 sm:$0xff]   ;;  %v6718_v38 = vld [vmem:[%s9022_s1 + $0xa4c] ss:$16 sps:$4 sm:$0xff]  }
 0x12a   : > { %2644 = vmatprep.subr.bf16.mxu0 %v6622_v39  ;;  %2687 = vmatprep.subr.bf16.mxu1 %v6625_v40  ;;  %v6713_v39 = vld [vmem:[%s9022_s1 + $0xa40] ss:$16 sps:$4 sm:$0xff]   ;;  %v6716_v40 = vld [vmem:[%s9022_s1 + $0xa48] ss:$16 sps:$4 sm:$0xff]  }
 0x12d   : > { %2645 = vmatpush1.bf16.msra.mxu0 %v6620_v41  ;;  %2688 = vmatpush1.bf16.msra.mxu1 %v6623_v42  ;;  %v6721_v41 = vld [vmem:[%s9022_s1 + $0xa64] ss:$16 sps:$4 sm:$0xff]   ;;  %v6724_v42 = vld [vmem:[%s9022_s1 + $0xa6c] ss:$16 sps:$4 sm:$0xff]  }
 0x12e   : > { %2646 = vmatprep.subr.bf16.mxu0 %v6628_v43  ;;  %2689 = vmatprep.subr.bf16.mxu1 %v6631_v44  ;;  %v6719_v43 = vld [vmem:[%s9022_s1 + $0xa60] ss:$16 sps:$4 sm:$0xff]   ;;  %v6722_v44 = vld [vmem:[%s9022_s1 + $0xa68] ss:$16 sps:$4 sm:$0xff]  }
 0x131   : > { %2647 = vmatpush1.bf16.msra.mxu0 %v6626_v45  ;;  %2690 = vmatpush1.bf16.msra.mxu1 %v6629_v46  ;;  %v6727_v45 = vld [vmem:[%s9022_s1 + $0xa84] ss:$16 sps:$4 sm:$0xff]   ;;  %v6730_v46 = vld [vmem:[%s9022_s1 + $0xa8c] ss:$16 sps:$4 sm:$0xff]  }
 0x132   : > { %2648 = vmatprep.subr.bf16.mxu0 %v6634_v47  ;;  %2691 = vmatprep.subr.bf16.mxu1 %v6637_v48  ;;  %v6725_v47 = vld [vmem:[%s9022_s1 + $0xa80] ss:$16 sps:$4 sm:$0xff]   ;;  %v6728_v48 = vld [vmem:[%s9022_s1 + $0xa88] ss:$16 sps:$4 sm:$0xff]  }
 0x135   : > { %2649 = vmatpush1.bf16.msra.mxu0 %v6632_v49  ;;  %2692 = vmatpush1.bf16.msra.mxu1 %v6635_v50  ;;  %v6733_v49 = vld [vmem:[%s9022_s1 + $0xaa4] ss:$16 sps:$4 sm:$0xff]   ;;  %v6736_v50 = vld [vmem:[%s9022_s1 + $0xaac] ss:$16 sps:$4 sm:$0xff]  }
 0x136   : > { %2650 = vmatprep.subr.bf16.mxu0 %v6640_v51  ;;  %2693 = vmatprep.subr.bf16.mxu1 %v6643_v52  ;;  %v6731_v51 = vld [vmem:[%s9022_s1 + $0xaa0] ss:$16 sps:$4 sm:$0xff]   ;;  %v6734_v52 = vld [vmem:[%s9022_s1 + $0xaa8] ss:$16 sps:$4 sm:$0xff]  }
 0x139   : > { %2651 = vmatpush1.bf16.msra.mxu0 %v6638_v53  ;;  %2694 = vmatpush1.bf16.msra.mxu1 %v6641_v54  ;;  %v6739_v53 = vld [vmem:[%s9022_s1 + $0xac4] ss:$16 sps:$4 sm:$0xff]   ;;  %v6742_v54 = vld [vmem:[%s9022_s1 + $0xacc] ss:$16 sps:$4 sm:$0xff]  }
 0x13a   : > { %2652 = vmatprep.subr.bf16.mxu0 %v6646_v55  ;;  %2695 = vmatprep.subr.bf16.mxu1 %v6649_v56  ;;  %v6737_v55 = vld [vmem:[%s9022_s1 + $0xac0] ss:$16 sps:$4 sm:$0xff]   ;;  %v6740_v56 = vld [vmem:[%s9022_s1 + $0xac8] ss:$16 sps:$4 sm:$0xff]  }
 0x13d   : > { %2653 = vmatpush1.bf16.msra.mxu0 %v6644_v57  ;;  %2696 = vmatpush1.bf16.msra.mxu1 %v6647_v58  ;;  %v6745_v57 = vld [vmem:[%s9022_s1 + $0xae4] ss:$16 sps:$4 sm:$0xff]   ;;  %v6748_v58 = vld [vmem:[%s9022_s1 + $0xaec] ss:$16 sps:$4 sm:$0xff]  }
 0x13e   : > { %2654 = vmatprep.subr.bf16.mxu0 %v6652_v59  ;;  %2697 = vmatprep.subr.bf16.mxu1 %v6655_v60  ;;  %v6743_v59 = vld [vmem:[%s9022_s1 + $0xae0] ss:$16 sps:$4 sm:$0xff]   ;;  %v6746_v60 = vld [vmem:[%s9022_s1 + $0xae8] ss:$16 sps:$4 sm:$0xff]  }
 0x141   : > { %2655 = vmatpush1.bf16.msra.mxu0 %v6650_v61  ;;  %2698 = vmatpush1.bf16.msra.mxu1 %v6653_v62  ;;  %v6751_v61 = vld [vmem:[%s9022_s1 + $0xb04] ss:$16 sps:$4 sm:$0xff]   ;;  %v6754_v62 = vld [vmem:[%s9022_s1 + $0xb0c] ss:$16 sps:$4 sm:$0xff]  }
 0x142   : > { %2656 = vmatprep.subr.bf16.mxu0 %v6658_v63  ;;  %2699 = vmatprep.subr.bf16.mxu1 %v6661_v0  ;;  %v6749_v63 = vld [vmem:[%s9022_s1 + $0xb00] ss:$16 sps:$4 sm:$0xff]   ;;  %v6752_v0 = vld [vmem:[%s9022_s1 + $0xb08] ss:$16 sps:$4 sm:$0xff]  }
 0x145   : > { %2657 = vmatpush1.bf16.msra.mxu0 %v6656_v1  ;;  %2700 = vmatpush1.bf16.msra.mxu1 %v6659_v2  ;;  %v6757_v1 = vld [vmem:[%s9022_s1 + $0xb24] ss:$16 sps:$4 sm:$0xff]   ;;  %v6760_v2 = vld [vmem:[%s9022_s1 + $0xb2c] ss:$16 sps:$4 sm:$0xff]  }
 0x146   : > { %2658 = vmatprep.subr.bf16.mxu0 %v6664_v3  ;;  %2701 = vmatprep.subr.bf16.mxu1 %v6667_v4  ;;  %v6755_v3 = vld [vmem:[%s9022_s1 + $0xb20] ss:$16 sps:$4 sm:$0xff]   ;;  %v6758_v4 = vld [vmem:[%s9022_s1 + $0xb28] ss:$16 sps:$4 sm:$0xff]  }
 0x149   : > { %2659 = vmatpush1.bf16.msra.mxu0 %v6662_v5  ;;  %2702 = vmatpush1.bf16.msra.mxu1 %v6665_v6  ;;  %v6763_v5 = vld [vmem:[%s9022_s1 + $0xb44] ss:$16 sps:$4 sm:$0xff]   ;;  %v6766_v6 = vld [vmem:[%s9022_s1 + $0xb4c] ss:$16 sps:$4 sm:$0xff]  }
 0x14a   : > { %2660 = vmatprep.subr.bf16.mxu0 %v6670_v7  ;;  %2703 = vmatprep.subr.bf16.mxu1 %v6673_v8  ;;  %v6761_v7 = vld [vmem:[%s9022_s1 + $0xb40] ss:$16 sps:$4 sm:$0xff]   ;;  %v6764_v8 = vld [vmem:[%s9022_s1 + $0xb48] ss:$16 sps:$4 sm:$0xff]  }
 0x14d   : > { %2661 = vmatpush1.bf16.msra.mxu0 %v6668_v9  ;;  %2704 = vmatpush1.bf16.msra.mxu1 %v6671_v10  ;;  %v6769_v9 = vld [vmem:[%s9022_s1 + $0xb64] ss:$16 sps:$4 sm:$0xff]   ;;  %v6772_v10 = vld [vmem:[%s9022_s1 + $0xb6c] ss:$16 sps:$4 sm:$0xff]  }
 0x14e   : > { %2662 = vmatprep.subr.bf16.mxu0 %v6676_v11  ;;  %2705 = vmatprep.subr.bf16.mxu1 %v6679_v12  ;;  %v6767_v11 = vld [vmem:[%s9022_s1 + $0xb60] ss:$16 sps:$4 sm:$0xff]   ;;  %v6770_v12 = vld [vmem:[%s9022_s1 + $0xb68] ss:$16 sps:$4 sm:$0xff]  }
 0x151   : > { %2663 = vmatpush1.bf16.msra.mxu0 %v6674_v13  ;;  %2706 = vmatpush1.bf16.msra.mxu1 %v6677_v14  ;;  %v6775_v13 = vld [vmem:[%s9022_s1 + $0xb84] ss:$16 sps:$4 sm:$0xff]   ;;  %v6778_v14 = vld [vmem:[%s9022_s1 + $0xb8c] ss:$16 sps:$4 sm:$0xff]  }
 0x152   : > { %2664 = vmatprep.subr.bf16.mxu0 %v6682_v15  ;;  %2707 = vmatprep.subr.bf16.mxu1 %v6685_v16  ;;  %v6773_v15 = vld [vmem:[%s9022_s1 + $0xb80] ss:$16 sps:$4 sm:$0xff]   ;;  %v6776_v16 = vld [vmem:[%s9022_s1 + $0xb88] ss:$16 sps:$4 sm:$0xff]  }
 0x155   : > { %2665 = vmatpush1.bf16.msra.mxu0 %v6680_v17  ;;  %2708 = vmatpush1.bf16.msra.mxu1 %v6683_v18  ;;  %v6781_v17 = vld [vmem:[%s9022_s1 + $0xba4] ss:$16 sps:$4 sm:$0xff]   ;;  %v6784_v18 = vld [vmem:[%s9022_s1 + $0xbac] ss:$16 sps:$4 sm:$0xff]  }
 0x156   : > { %2666 = vmatprep.subr.bf16.mxu0 %v6688_v19  ;;  %2709 = vmatprep.subr.bf16.mxu1 %v6691_v20  ;;  %v6779_v19 = vld [vmem:[%s9022_s1 + $0xba0] ss:$16 sps:$4 sm:$0xff]   ;;  %v6782_v20 = vld [vmem:[%s9022_s1 + $0xba8] ss:$16 sps:$4 sm:$0xff]  }
 0x159   : > { %2667 = vmatpush1.bf16.msra.mxu0 %v6686_v21  ;;  %2710 = vmatpush1.bf16.msra.mxu1 %v6689_v22  ;;  %v6787_v21 = vld [vmem:[%s9022_s1 + $0xbc4] ss:$16 sps:$4 sm:$0xff]   ;;  %v6790_v22 = vld [vmem:[%s9022_s1 + $0xbcc] ss:$16 sps:$4 sm:$0xff]  }
 0x15a   : > { %2668 = vmatprep.subr.bf16.mxu0 %v6694_v23  ;;  %2711 = vmatprep.subr.bf16.mxu1 %v6697_v24  ;;  %v6785_v23 = vld [vmem:[%s9022_s1 + $0xbc0] ss:$16 sps:$4 sm:$0xff]   ;;  %v6788_v24 = vld [vmem:[%s9022_s1 + $0xbc8] ss:$16 sps:$4 sm:$0xff]  }
 0x15d   : > { %2669 = vmatpush1.bf16.msra.mxu0 %v6692_v25  ;;  %2712 = vmatpush1.bf16.msra.mxu1 %v6695_v26  ;;  %v8381_v25 = vld [vmem:[%s7368_s7 + $0x10] sm:$0x33] }
 0x15e   : > { %3130 = vmatprep.subr.bf16.mxu0 %v6703_v27  ;;  %3173 = vmatprep.subr.bf16.mxu1 %v6706_v28  ;;  %v6793_v26 = vld [vmem:[%s9022_s1 + $0xbe4] ss:$16 sps:$4 sm:$0xff]   ;;  %v6796_v27 = vld [vmem:[%s9022_s1 + $0xbec] ss:$16 sps:$4 sm:$0xff]  }
 0x15f   : > { %v6896_v28 = vld [vmem:[%s7368_s7 + $0x4] ss:$8 sps:$4 sm:$0xfc]  }
 0x160   : > { %2671 = vmatmul.mubr.bf16.vlgmr.msra.gmra.mrb[0].mxu0 %v6698_v29  ;;  %2714 = vmatmul.mubr.bf16.vlgmr.msra.gmra.mrb[0].mxu1 %v6698_v29  ;;  %v5767_v29 = vcombine.high %v8381_v25, %v8381_v25 }
 0x161   : > { %3131 = vmatpush1.bf16.msra.mxu0 %v6701_v30  ;;  %3174 = vmatpush1.bf16.msra.mxu1 %v6704_v31  ;;  %v6791_v30 = vld [vmem:[%s9022_s1 + $0xbe0] ss:$16 sps:$4 sm:$0xff]   ;;  %v6794_v31 = vld [vmem:[%s9022_s1 + $0xbe8] ss:$16 sps:$4 sm:$0xff]  }
 0x162   : > { %3132 = vmatprep.subr.bf16.mxu0 %v6709_v32  ;;  %3175 = vmatprep.subr.bf16.mxu1 %v6712_v33  ;;  %v6802_v32 = vld [vmem:[%s9022_s1 + $0xc04] ss:$16 sps:$4 sm:$0xff]   ;;  %v6805_v33 = vld [vmem:[%s9022_s1 + $0xc0c] ss:$16 sps:$4 sm:$0xff]  }
 0x163   : > { %3162 = vmatprep.mubr.bf16.mxu0 %v6799_v34  ;;  %3205 = vmatprep.mubr.bf16.mxu1 %v6799_v34  ;;  %v6797_v34 = vld [vmem:[%s7368_s7 + $0x78] ss:$8 sps:$4 sm:$0xff]  }
 0x165   : > { %3133 = vmatpush1.bf16.msra.mxu0 %v6707_v35  ;;  %3176 = vmatpush1.bf16.msra.mxu1 %v6710_v36  ;;  %v3309_v35 = vrot.slane %v6896_v28, 2  ;;  %v3310_v36 = vrot.slane %v5767_v29, 2  ;;  %v6881_v28 = vld [vmem:[%s9022_s1 + $0xda8] ss:$16 sps:$4 sm:$0xff]   ;;  %v6886_v29 = vld [vmem:[%s9022_s1 + $0xdc4] ss:$16 sps:$4 sm:$0xff]  }
 0x166   : > { %3134 = vmatprep.subr.bf16.mxu0 %v6715_v37  ;;  %3177 = vmatprep.subr.bf16.mxu1 %v6718_v38  ;;  %v6800_v37 = vld [vmem:[%s9022_s1 + $0xc00] ss:$16 sps:$4 sm:$0xff]   ;;  %v6803_v38 = vld [vmem:[%s9022_s1 + $0xc08] ss:$16 sps:$4 sm:$0xff]  }
 0x169   : > { %3135 = vmatpush1.bf16.msra.mxu0 %v6713_v39  ;;  %3178 = vmatpush1.bf16.msra.mxu1 %v6716_v40  ;;  %v6808_v39 = vld [vmem:[%s9022_s1 + $0xc24] ss:$16 sps:$4 sm:$0xff]   ;;  %v6811_v40 = vld [vmem:[%s9022_s1 + $0xc2c] ss:$16 sps:$4 sm:$0xff]  }
 0x16a   : > { %3136 = vmatprep.subr.bf16.mxu0 %v6721_v41  ;;  %3179 = vmatprep.subr.bf16.mxu1 %v6724_v42  ;;  %v3311_v41 = vsel %vm3305_vm0, %v3309_v35, %v3310_v36  ;;  %v6806_v42 = vld [vmem:[%s9022_s1 + $0xc20] ss:$16 sps:$4 sm:$0xff]   ;;  %v8584_v35 = vld [vmem:[%s7368_s7 + $0x28] sm:$0x33]  ;;  %v6892_v36 = vld [vmem:[%s9022_s1 + $0xde4] ss:$16 sps:$4 sm:$0xff]  }
 0x16d   : > { %3137 = vmatpush1.bf16.msra.mxu0 %v6719_v43  ;;  %3180 = vmatpush1.bf16.msra.mxu1 %v6722_v44  ;;  %v6809_v43 = vld [vmem:[%s9022_s1 + $0xc28] ss:$16 sps:$4 sm:$0xff]   ;;  %v6814_v44 = vld [vmem:[%s9022_s1 + $0xc44] ss:$16 sps:$4 sm:$0xff]  }
 0x16e   : > { %3138 = vmatprep.subr.bf16.mxu0 %v6727_v45  ;;  %3181 = vmatprep.subr.bf16.mxu1 %v6730_v46  ;;  %v6817_v45 = vld [vmem:[%s9022_s1 + $0xc4c] ss:$16 sps:$4 sm:$0xff]   ;;  %v6812_v46 = vld [vmem:[%s9022_s1 + $0xc40] ss:$16 sps:$4 sm:$0xff]  }
 0x171   : > { %3139 = vmatpush1.bf16.msra.mxu0 %v6725_v47  ;;  %3182 = vmatpush1.bf16.msra.mxu1 %v6728_v48  ;;  %v6815_v47 = vld [vmem:[%s9022_s1 + $0xc48] ss:$16 sps:$4 sm:$0xff]   ;;  %v6820_v48 = vld [vmem:[%s9022_s1 + $0xc64] ss:$16 sps:$4 sm:$0xff]  }
 0x172   : > { %3140 = vmatprep.subr.bf16.mxu0 %v6733_v49  ;;  %3183 = vmatprep.subr.bf16.mxu1 %v6736_v50  ;;  %v6823_v49 = vld [vmem:[%s9022_s1 + $0xc6c] ss:$16 sps:$4 sm:$0xff]   ;;  %v6818_v50 = vld [vmem:[%s9022_s1 + $0xc60] ss:$16 sps:$4 sm:$0xff]  }
 0x175   : > { %3141 = vmatpush1.bf16.msra.mxu0 %v6731_v51  ;;  %3184 = vmatpush1.bf16.msra.mxu1 %v6734_v52  ;;  %v6821_v51 = vld [vmem:[%s9022_s1 + $0xc68] ss:$16 sps:$4 sm:$0xff]   ;;  %v6826_v52 = vld [vmem:[%s9022_s1 + $0xc84] ss:$16 sps:$4 sm:$0xff]  }
 0x176   : > { %3142 = vmatprep.subr.bf16.mxu0 %v6739_v53  ;;  %3185 = vmatprep.subr.bf16.mxu1 %v6742_v54  ;;  %v6829_v53 = vld [vmem:[%s9022_s1 + $0xc8c] ss:$16 sps:$4 sm:$0xff]   ;;  %v6824_v54 = vld [vmem:[%s9022_s1 + $0xc80] ss:$16 sps:$4 sm:$0xff]  }
 0x179   : > { %3143 = vmatpush1.bf16.msra.mxu0 %v6737_v55  ;;  %3186 = vmatpush1.bf16.msra.mxu1 %v6740_v56  ;;  %v6827_v55 = vld [vmem:[%s9022_s1 + $0xc88] ss:$16 sps:$4 sm:$0xff]   ;;  %v6832_v56 = vld [vmem:[%s9022_s1 + $0xca4] ss:$16 sps:$4 sm:$0xff]  }
 0x17a   : > { %3144 = vmatprep.subr.bf16.mxu0 %v6745_v57  ;;  %3187 = vmatprep.subr.bf16.mxu1 %v6748_v58  ;;  %v6835_v57 = vld [vmem:[%s9022_s1 + $0xcac] ss:$16 sps:$4 sm:$0xff]   ;;  %v6830_v58 = vld [vmem:[%s9022_s1 + $0xca0] ss:$16 sps:$4 sm:$0xff]  }
 0x17d   : > { %3145 = vmatpush1.bf16.msra.mxu0 %v6743_v59  ;;  %3188 = vmatpush1.bf16.msra.mxu1 %v6746_v60  ;;  %v6833_v59 = vld [vmem:[%s9022_s1 + $0xca8] ss:$16 sps:$4 sm:$0xff]   ;;  %v6838_v60 = vld [vmem:[%s9022_s1 + $0xcc4] ss:$16 sps:$4 sm:$0xff]  }
 0x17e   : > { %3146 = vmatprep.subr.bf16.mxu0 %v6751_v61  ;;  %3189 = vmatprep.subr.bf16.mxu1 %v6754_v62  ;;  %v6841_v61 = vld [vmem:[%s9022_s1 + $0xccc] ss:$16 sps:$4 sm:$0xff]   ;;  %v6836_v62 = vld [vmem:[%s9022_s1 + $0xcc0] ss:$16 sps:$4 sm:$0xff]  }
 0x181   : > { %3147 = vmatpush1.bf16.msra.mxu0 %v6749_v63  ;;  %3190 = vmatpush1.bf16.msra.mxu1 %v6752_v0  ;;  %v6839_v63 = vld [vmem:[%s9022_s1 + $0xcc8] ss:$16 sps:$4 sm:$0xff]   ;;  %v6844_v0 = vld [vmem:[%s9022_s1 + $0xce4] ss:$16 sps:$4 sm:$0xff]  }
 0x182   : > { %3148 = vmatprep.subr.bf16.mxu0 %v6757_v1  ;;  %3191 = vmatprep.subr.bf16.mxu1 %v6760_v2  ;;  %v6847_v1 = vld [vmem:[%s9022_s1 + $0xcec] ss:$16 sps:$4 sm:$0xff]   ;;  %v6842_v2 = vld [vmem:[%s9022_s1 + $0xce0] ss:$16 sps:$4 sm:$0xff]  }
 0x185   : > { %3149 = vmatpush1.bf16.msra.mxu0 %v6755_v3  ;;  %3192 = vmatpush1.bf16.msra.mxu1 %v6758_v4  ;;  %v6845_v3 = vld [vmem:[%s9022_s1 + $0xce8] ss:$16 sps:$4 sm:$0xff]   ;;  %v6850_v4 = vld [vmem:[%s9022_s1 + $0xd04] ss:$16 sps:$4 sm:$0xff]  }
 0x186   : > { %3150 = vmatprep.subr.bf16.mxu0 %v6763_v5  ;;  %3193 = vmatprep.subr.bf16.mxu1 %v6766_v6  ;;  %v6853_v5 = vld [vmem:[%s9022_s1 + $0xd0c] ss:$16 sps:$4 sm:$0xff]   ;;  %v6848_v6 = vld [vmem:[%s9022_s1 + $0xd00] ss:$16 sps:$4 sm:$0xff]  }
 0x189   : > { %3151 = vmatpush1.bf16.msra.mxu0 %v6761_v7  ;;  %3194 = vmatpush1.bf16.msra.mxu1 %v6764_v8  ;;  %v6851_v7 = vld [vmem:[%s9022_s1 + $0xd08] ss:$16 sps:$4 sm:$0xff]   ;;  %v6856_v8 = vld [vmem:[%s9022_s1 + $0xd24] ss:$16 sps:$4 sm:$0xff]  }
 0x18a   : > { %3152 = vmatprep.subr.bf16.mxu0 %v6769_v9  ;;  %3195 = vmatprep.subr.bf16.mxu1 %v6772_v10  ;;  %v6859_v9 = vld [vmem:[%s9022_s1 + $0xd2c] ss:$16 sps:$4 sm:$0xff]   ;;  %v6854_v10 = vld [vmem:[%s9022_s1 + $0xd20] ss:$16 sps:$4 sm:$0xff]  }
 0x18d   : > { %3153 = vmatpush1.bf16.msra.mxu0 %v6767_v11  ;;  %3196 = vmatpush1.bf16.msra.mxu1 %v6770_v12  ;;  %v6857_v11 = vld [vmem:[%s9022_s1 + $0xd28] ss:$16 sps:$4 sm:$0xff]   ;;  %v6862_v12 = vld [vmem:[%s9022_s1 + $0xd44] ss:$16 sps:$4 sm:$0xff]  }
 0x18e   : > { %3154 = vmatprep.subr.bf16.mxu0 %v6775_v13  ;;  %3197 = vmatprep.subr.bf16.mxu1 %v6778_v14  ;;  %v6865_v13 = vld [vmem:[%s9022_s1 + $0xd4c] ss:$16 sps:$4 sm:$0xff]   ;;  %v6860_v14 = vld [vmem:[%s9022_s1 + $0xd40] ss:$16 sps:$4 sm:$0xff]  }
 0x191   : > { %3155 = vmatpush1.bf16.msra.mxu0 %v6773_v15  ;;  %3198 = vmatpush1.bf16.msra.mxu1 %v6776_v16  ;;  %v6863_v15 = vld [vmem:[%s9022_s1 + $0xd48] ss:$16 sps:$4 sm:$0xff]   ;;  %v6868_v16 = vld [vmem:[%s9022_s1 + $0xd64] ss:$16 sps:$4 sm:$0xff]  }
 0x192   : > { %3156 = vmatprep.subr.bf16.mxu0 %v6781_v17  ;;  %3199 = vmatprep.subr.bf16.mxu1 %v6784_v18  ;;  %v6871_v17 = vld [vmem:[%s9022_s1 + $0xd6c] ss:$16 sps:$4 sm:$0xff]   ;;  %v6866_v18 = vld [vmem:[%s9022_s1 + $0xd60] ss:$16 sps:$4 sm:$0xff]  }
 0x195   : > { %3157 = vmatpush1.bf16.msra.mxu0 %v6779_v19  ;;  %3200 = vmatpush1.bf16.msra.mxu1 %v6782_v20  ;;  %v6869_v19 = vld [vmem:[%s9022_s1 + $0xd68] ss:$16 sps:$4 sm:$0xff]   ;;  %v6874_v20 = vld [vmem:[%s9022_s1 + $0xd84] ss:$16 sps:$4 sm:$0xff]  }
 0x196   : > { %3158 = vmatprep.subr.bf16.mxu0 %v6787_v21  ;;  %3201 = vmatprep.subr.bf16.mxu1 %v6790_v22  ;;  %v6877_v21 = vld [vmem:[%s9022_s1 + $0xd8c] ss:$16 sps:$4 sm:$0xff]   ;;  %v6872_v22 = vld [vmem:[%s9022_s1 + $0xd80] ss:$16 sps:$4 sm:$0xff]  }
 0x199   : > { %3159 = vmatpush1.bf16.msra.mxu0 %v6785_v23  ;;  %3202 = vmatpush1.bf16.msra.mxu1 %v6788_v24  ;;  %v6875_v23 = vld [vmem:[%s9022_s1 + $0xd88] ss:$16 sps:$4 sm:$0xff]   ;;  %v6880_v24 = vld [vmem:[%s9022_s1 + $0xda4] ss:$16 sps:$4 sm:$0xff]  }
 0x19a   : > { %3160 = vmatprep.subr.bf16.mxu0 %v6793_v26  ;;  %3203 = vmatprep.subr.bf16.mxu1 %v6796_v27  ;;  %v6883_v26 = vld [vmem:[%s9022_s1 + $0xdac] ss:$16 sps:$4 sm:$0xff]   ;;  %v6878_v27 = vld [vmem:[%s9022_s1 + $0xda0] ss:$16 sps:$4 sm:$0xff]  }
 0x19d   : > { %3161 = vmatpush1.bf16.msra.mxu0 %v6791_v30  ;;  %3204 = vmatpush1.bf16.msra.mxu1 %v6794_v31  ;;  %v6889_v30 = vld [vmem:[%s9022_s1 + $0xdcc] ss:$16 sps:$4 sm:$0xff]   ;;  %v6884_v31 = vld [vmem:[%s9022_s1 + $0xdc0] ss:$16 sps:$4 sm:$0xff]  }
 0x19e   : > { %3634 = vmatprep.subr.bf16.mxu0 %v6802_v32  ;;  %3677 = vmatprep.subr.bf16.mxu1 %v6805_v33  ;;  %v6887_v32 = vld [vmem:[%s9022_s1 + $0xdc8] ss:$16 sps:$4 sm:$0xff]  }
 0x19f   : > { %v6905_v33 = vld [vmem:[%s7368_s7] ss:$8 sps:$4 sm:$0xfc]  }
 0x1a0   : > { %3163 = vmatmul.mubr.bf16.vlgmr.msra.gmra.mrb[0].mxu0 %v6797_v34  ;;  %3206 = vmatmul.mubr.bf16.vlgmr.msra.gmra.mrb[0].mxu1 %v6797_v34  ;;  %v5766_v34 = vcombine.low %v8381_v25, %v8381_v25  ;;  %v6890_v25 = vld [vmem:[%s9022_s1 + $0xde0] ss:$16 sps:$4 sm:$0xff]  }
 0x1a1   : > { %3635 = vmatpush1.bf16.msra.mxu0 %v6800_v37  ;;  %3678 = vmatpush1.bf16.msra.mxu1 %v6803_v38  ;;  %v6895_v37 = vld [vmem:[%s9022_s1 + $0xdec] ss:$16 sps:$4 sm:$0xff]  }
 0x1a2   : > { %3636 = vmatprep.subr.bf16.mxu0 %v6808_v39  ;;  %3679 = vmatprep.subr.bf16.mxu1 %v6811_v40  ;;  %v6997_v38 = vld [vmem:[%s7368_s7 + $0x1c] ss:$8 sps:$4 sm:$0xfc]   ;;  %v5902_v39 = vcombine.high %v8584_v35, %v8584_v35  ;;  %v6893_v40 = vld [vmem:[%s9022_s1 + $0xde8] ss:$16 sps:$4 sm:$0xff]  }
 0x1a3   : > { %3666 = vmatprep.mubr.bf16.mxu0 %v3311_v41  ;;  %3709 = vmatprep.mubr.bf16.mxu1 %v3311_v41  ;;  %v3306_v41 = vrot.slane %v6905_v33, 2  ;;  %v6978_v33 = vld [vmem:[%s9022_s1 + $0xf8c] ss:$16 sps:$4 sm:$0xff]  }
 0x1a5   : > { %3637 = vmatpush1.bf16.msra.mxu0 %v6806_v42  ;;  %3680 = vmatpush1.bf16.msra.mxu1 %v6809_v43  ;;  %v3307_v42 = vrot.slane %v5766_v34, 2  ;;  %v6901_v43 = vld [vmem:[%s9022_s1 + $0xe04] ss:$16 sps:$4 sm:$0xff]   ;;  %v6973_v34 = vld [vmem:[%s9022_s1 + $0xf80] ss:$16 sps:$4 sm:$0xff]  }
 0x1a6   : > { %3638 = vmatprep.subr.bf16.mxu0 %v6814_v44  ;;  %3681 = vmatprep.subr.bf16.mxu1 %v6817_v45  ;;  %v6904_v44 = vld [vmem:[%s9022_s1 + $0xe0c] ss:$16 sps:$4 sm:$0xff]   ;;  %v3812_v45 = vrot.slane %v6997_v38, 2 }
 0x1a7   : > { %v6984_v38 = vld [vmem:[%s9022_s1 + $0xfac] ss:$16 sps:$4 sm:$0xff]  }
 0x1a9   : > { %3639 = vmatpush1.bf16.msra.mxu0 %v6812_v46  ;;  %3682 = vmatpush1.bf16.msra.mxu1 %v6815_v47  ;;  %v3813_v46 = vrot.slane %v5902_v39, 2  ;;  %v6899_v47 = vld [vmem:[%s9022_s1 + $0xe00] ss:$16 sps:$4 sm:$0xff]  }
 0x1aa   : > { %3640 = vmatprep.subr.bf16.mxu0 %v6820_v48  ;;  %3683 = vmatprep.subr.bf16.mxu1 %v6823_v49  ;;  %v6902_v48 = vld [vmem:[%s9022_s1 + $0xe08] ss:$16 sps:$4 sm:$0xff]   ;;  %v3308_v49 = vsel %vm3305_vm0, %v3306_v41, %v3307_v42  ;;  %v6979_v39 = vld [vmem:[%s9022_s1 + $0xfa0] ss:$16 sps:$4 sm:$0xff]   ;;  %v6990_v41 = vld [vmem:[%s9022_s1 + $0xfcc] ss:$16 sps:$4 sm:$0xff]  }
 0x1ab   : > { %v6985_v42 = vld [vmem:[%s9022_s1 + $0xfc0] ss:$16 sps:$4 sm:$0xff]  }
 0x1ad   : > { %3641 = vmatpush1.bf16.msra.mxu0 %v6818_v50  ;;  %3684 = vmatpush1.bf16.msra.mxu1 %v6821_v51  ;;  %v6909_v50 = vld [vmem:[%s9022_s1 + $0xe24] ss:$16 sps:$4 sm:$0xff]   ;;  %v6912_v51 = vld [vmem:[%s9022_s1 + $0xe2c] ss:$16 sps:$4 sm:$0xff]  }
 0x1ae   : > { %3642 = vmatprep.subr.bf16.mxu0 %v6826_v52  ;;  %3685 = vmatprep.subr.bf16.mxu1 %v6829_v53  ;;  %v3814_v52 = vsel %vm3305_vm0, %v3812_v45, %v3813_v46  ;;  %v6907_v53 = vld [vmem:[%s9022_s1 + $0xe20] ss:$16 sps:$4 sm:$0xff]   ;;  %v5901_v45 = vcombine.low %v8584_v35, %v8584_v35 }
 0x1af   : > { %v8787_v46 = vld [vmem:[%s7368_s7 + $0x40] sm:$0x33] }
 0x1b0   : > { %v6991_v35 = vld [vmem:[%s9022_s1 + $0xfe0] ss:$16 sps:$4 sm:$0xff]  }
 0x1b1   : > { %3643 = vmatpush1.bf16.msra.mxu0 %v6824_v54  ;;  %3686 = vmatpush1.bf16.msra.mxu1 %v6827_v55  ;;  %v6910_v54 = vld [vmem:[%s9022_s1 + $0xe28] ss:$16 sps:$4 sm:$0xff]   ;;  %v6915_v55 = vld [vmem:[%s9022_s1 + $0xe44] ss:$16 sps:$4 sm:$0xff]  }
 0x1b2   : > { %3644 = vmatprep.subr.bf16.mxu0 %v6832_v56  ;;  %3687 = vmatprep.subr.bf16.mxu1 %v6835_v57  ;;  %v6918_v56 = vld [vmem:[%s9022_s1 + $0xe4c] ss:$16 sps:$4 sm:$0xff]   ;;  %v6913_v57 = vld [vmem:[%s9022_s1 + $0xe40] ss:$16 sps:$4 sm:$0xff]  }
 0x1b5   : > { %3645 = vmatpush1.bf16.msra.mxu0 %v6830_v58  ;;  %3688 = vmatpush1.bf16.msra.mxu1 %v6833_v59  ;;  %v6916_v58 = vld [vmem:[%s9022_s1 + $0xe48] ss:$16 sps:$4 sm:$0xff]   ;;  %v6921_v59 = vld [vmem:[%s9022_s1 + $0xe64] ss:$16 sps:$4 sm:$0xff]  }
 0x1b6   : > { %3646 = vmatprep.subr.bf16.mxu0 %v6838_v60  ;;  %3689 = vmatprep.subr.bf16.mxu1 %v6841_v61  ;;  %v6924_v60 = vld [vmem:[%s9022_s1 + $0xe6c] ss:$16 sps:$4 sm:$0xff]   ;;  %v6919_v61 = vld [vmem:[%s9022_s1 + $0xe60] ss:$16 sps:$4 sm:$0xff]  }
 0x1b9   : > { %3647 = vmatpush1.bf16.msra.mxu0 %v6836_v62  ;;  %3690 = vmatpush1.bf16.msra.mxu1 %v6839_v63  ;;  %v6922_v62 = vld [vmem:[%s9022_s1 + $0xe68] ss:$16 sps:$4 sm:$0xff]   ;;  %v6927_v63 = vld [vmem:[%s9022_s1 + $0xe84] ss:$16 sps:$4 sm:$0xff]  }
 0x1ba   : > { %3648 = vmatprep.subr.bf16.mxu0 %v6844_v0  ;;  %3691 = vmatprep.subr.bf16.mxu1 %v6847_v1  ;;  %v6930_v0 = vld [vmem:[%s9022_s1 + $0xe8c] ss:$16 sps:$4 sm:$0xff]   ;;  %v6925_v1 = vld [vmem:[%s9022_s1 + $0xe80] ss:$16 sps:$4 sm:$0xff]  }
 0x1bd   : > { %3649 = vmatpush1.bf16.msra.mxu0 %v6842_v2  ;;  %3692 = vmatpush1.bf16.msra.mxu1 %v6845_v3  ;;  %v6928_v2 = vld [vmem:[%s9022_s1 + $0xe88] ss:$16 sps:$4 sm:$0xff]   ;;  %v6933_v3 = vld [vmem:[%s9022_s1 + $0xea4] ss:$16 sps:$4 sm:$0xff]  }
 0x1be   : > { %3650 = vmatprep.subr.bf16.mxu0 %v6850_v4  ;;  %3693 = vmatprep.subr.bf16.mxu1 %v6853_v5  ;;  %v6936_v4 = vld [vmem:[%s9022_s1 + $0xeac] ss:$16 sps:$4 sm:$0xff]   ;;  %v6931_v5 = vld [vmem:[%s9022_s1 + $0xea0] ss:$16 sps:$4 sm:$0xff]  }
 0x1c1   : > { %3651 = vmatpush1.bf16.msra.mxu0 %v6848_v6  ;;  %3694 = vmatpush1.bf16.msra.mxu1 %v6851_v7  ;;  %v6934_v6 = vld [vmem:[%s9022_s1 + $0xea8] ss:$16 sps:$4 sm:$0xff]   ;;  %v6939_v7 = vld [vmem:[%s9022_s1 + $0xec4] ss:$16 sps:$4 sm:$0xff]  }
 0x1c2   : > { %3652 = vmatprep.subr.bf16.mxu0 %v6856_v8  ;;  %3695 = vmatprep.subr.bf16.mxu1 %v6859_v9  ;;  %v6942_v8 = vld [vmem:[%s9022_s1 + $0xecc] ss:$16 sps:$4 sm:$0xff]   ;;  %v6937_v9 = vld [vmem:[%s9022_s1 + $0xec0] ss:$16 sps:$4 sm:$0xff]  }
 0x1c5   : > { %3653 = vmatpush1.bf16.msra.mxu0 %v6854_v10  ;;  %3696 = vmatpush1.bf16.msra.mxu1 %v6857_v11  ;;  %v6940_v10 = vld [vmem:[%s9022_s1 + $0xec8] ss:$16 sps:$4 sm:$0xff]   ;;  %v6945_v11 = vld [vmem:[%s9022_s1 + $0xee4] ss:$16 sps:$4 sm:$0xff]  }
 0x1c6   : > { %3654 = vmatprep.subr.bf16.mxu0 %v6862_v12  ;;  %3697 = vmatprep.subr.bf16.mxu1 %v6865_v13  ;;  %v6948_v12 = vld [vmem:[%s9022_s1 + $0xeec] ss:$16 sps:$4 sm:$0xff]   ;;  %v6943_v13 = vld [vmem:[%s9022_s1 + $0xee0] ss:$16 sps:$4 sm:$0xff]  }
 0x1c9   : > { %3655 = vmatpush1.bf16.msra.mxu0 %v6860_v14  ;;  %3698 = vmatpush1.bf16.msra.mxu1 %v6863_v15  ;;  %v6946_v14 = vld [vmem:[%s9022_s1 + $0xee8] ss:$16 sps:$4 sm:$0xff]   ;;  %v6951_v15 = vld [vmem:[%s9022_s1 + $0xf04] ss:$16 sps:$4 sm:$0xff]  }
 0x1ca   : > { %3656 = vmatprep.subr.bf16.mxu0 %v6868_v16  ;;  %3699 = vmatprep.subr.bf16.mxu1 %v6871_v17  ;;  %v6954_v16 = vld [vmem:[%s9022_s1 + $0xf0c] ss:$16 sps:$4 sm:$0xff]   ;;  %v6949_v17 = vld [vmem:[%s9022_s1 + $0xf00] ss:$16 sps:$4 sm:$0xff]  }
 0x1cd   : > { %3657 = vmatpush1.bf16.msra.mxu0 %v6866_v18  ;;  %3700 = vmatpush1.bf16.msra.mxu1 %v6869_v19  ;;  %v6952_v18 = vld [vmem:[%s9022_s1 + $0xf08] ss:$16 sps:$4 sm:$0xff]   ;;  %v6957_v19 = vld [vmem:[%s9022_s1 + $0xf24] ss:$16 sps:$4 sm:$0xff]  }
 0x1ce   : > { %3658 = vmatprep.subr.bf16.mxu0 %v6874_v20  ;;  %3701 = vmatprep.subr.bf16.mxu1 %v6877_v21  ;;  %v6960_v20 = vld [vmem:[%s9022_s1 + $0xf2c] ss:$16 sps:$4 sm:$0xff]   ;;  %v6955_v21 = vld [vmem:[%s9022_s1 + $0xf20] ss:$16 sps:$4 sm:$0xff]  }
 0x1d1   : > { %3659 = vmatpush1.bf16.msra.mxu0 %v6872_v22  ;;  %3702 = vmatpush1.bf16.msra.mxu1 %v6875_v23  ;;  %v6958_v22 = vld [vmem:[%s9022_s1 + $0xf28] ss:$16 sps:$4 sm:$0xff]   ;;  %v6963_v23 = vld [vmem:[%s9022_s1 + $0xf44] ss:$16 sps:$4 sm:$0xff]  }
 0x1d2   : > { %3660 = vmatprep.subr.bf16.mxu0 %v6880_v24  ;;  %3703 = vmatprep.subr.bf16.mxu1 %v6883_v26  ;;  %v6966_v24 = vld [vmem:[%s9022_s1 + $0xf4c] ss:$16 sps:$4 sm:$0xff]   ;;  %v6961_v26 = vld [vmem:[%s9022_s1 + $0xf40] ss:$16 sps:$4 sm:$0xff]  }
 0x1d5   : > { %3661 = vmatpush1.bf16.msra.mxu0 %v6878_v27  ;;  %3704 = vmatpush1.bf16.msra.mxu1 %v6881_v28  ;;  %v6964_v27 = vld [vmem:[%s9022_s1 + $0xf48] ss:$16 sps:$4 sm:$0xff]   ;;  %v6969_v28 = vld [vmem:[%s9022_s1 + $0xf64] ss:$16 sps:$4 sm:$0xff]  }
 0x1d6   : > { %3662 = vmatprep.subr.bf16.mxu0 %v6886_v29  ;;  %3705 = vmatprep.subr.bf16.mxu1 %v6889_v30  ;;  %v6972_v29 = vld [vmem:[%s9022_s1 + $0xf6c] ss:$16 sps:$4 sm:$0xff]   ;;  %v6967_v30 = vld [vmem:[%s9022_s1 + $0xf60] ss:$16 sps:$4 sm:$0xff]  }
 0x1d9   : > { %3663 = vmatpush1.bf16.msra.mxu0 %v6884_v31  ;;  %3706 = vmatpush1.bf16.msra.mxu1 %v6887_v32  ;;  %v6970_v31 = vld [vmem:[%s9022_s1 + $0xf68] ss:$16 sps:$4 sm:$0xff]   ;;  %v6975_v32 = vld [vmem:[%s9022_s1 + $0xf84] ss:$16 sps:$4 sm:$0xff]  }
 0x1da   : > { %3664 = vmatprep.subr.bf16.mxu0 %v6892_v36  ;;  %3707 = vmatprep.subr.bf16.mxu1 %v6895_v37  ;;  %v6976_v36 = vld [vmem:[%s9022_s1 + $0xf88] ss:$16 sps:$4 sm:$0xff]   ;;  %v6981_v37 = vld [vmem:[%s9022_s1 + $0xfa4] ss:$16 sps:$4 sm:$0xff]  }
 0x1dd   : > { %3665 = vmatpush1.bf16.msra.mxu0 %v6890_v25  ;;  %3708 = vmatpush1.bf16.msra.mxu1 %v6893_v40  ;;  %v6982_v25 = vld [vmem:[%s9022_s1 + $0xfa8] ss:$16 sps:$4 sm:$0xff]   ;;  %v6987_v40 = vld [vmem:[%s9022_s1 + $0xfc4] ss:$16 sps:$4 sm:$0xff]  }
 0x1de   : > { %4137 = vmatprep.subr.bf16.mxu0 %v6901_v43  ;;  %4180 = vmatprep.subr.bf16.mxu1 %v6904_v44  ;;  %v6988_v43 = vld [vmem:[%s9022_s1 + $0xfc8] ss:$16 sps:$4 sm:$0xff]  }
 0x1df   : > { %v7006_v44 = vld [vmem:[%s7368_s7 + $0x18] ss:$8 sps:$4 sm:$0xfc]  }
 0x1e0   : > { %3667 = vmatmul.mubr.bf16.vlgmr.msra.gmra.mrb[0].mxu0 %v3308_v49  ;;  %3710 = vmatmul.mubr.bf16.vlgmr.msra.gmra.mrb[0].mxu1 %v3308_v49  ;;  %v7098_v49 = vld [vmem:[%s7368_s7 + $0x34] ss:$8 sps:$4 sm:$0xfc]  }
 0x1e1   : > { %4138 = vmatpush1.bf16.msra.mxu0 %v6899_v47  ;;  %4181 = vmatpush1.bf16.msra.mxu1 %v6902_v48  ;;  %v6993_v47 = vld [vmem:[%s9022_s1 + $0xfe4] ss:$16 sps:$4 sm:$0xff]   ;;  %v6996_v48 = vld [vmem:[%s9022_s1 + $0xfec] ss:$16 sps:$4 sm:$0xff]  }
 0x1e2   : > { %4139 = vmatprep.subr.bf16.mxu0 %v6909_v50  ;;  %4182 = vmatprep.subr.bf16.mxu1 %v6912_v51  ;;  %v6037_v50 = vcombine.high %v8787_v46, %v8787_v46  ;;  %v6994_v51 = vld [vmem:[%s9022_s1 + $0xfe8] ss:$16 sps:$4 sm:$0xff]  }
 0x1e3   : > { %4169 = vmatprep.mubr.bf16.mxu0 %v3814_v52  ;;  %4212 = vmatprep.mubr.bf16.mxu1 %v3814_v52  ;;  %v3809_v52 = vrot.slane %v7006_v44, 2  ;;  %v7079_v44 = vld [vmem:[%s9022_s1 + $0x118c] ss:$16 sps:$4 sm:$0xff]  }
 0x1e5   : > { %4140 = vmatpush1.bf16.msra.mxu0 %v6907_v53  ;;  %4183 = vmatpush1.bf16.msra.mxu1 %v6910_v54  ;;  %v3810_v53 = vrot.slane %v5901_v45, 2  ;;  %v7002_v54 = vld [vmem:[%s9022_s1 + $0x1004] ss:$16 sps:$4 sm:$0xff]   ;;  %v7074_v45 = vld [vmem:[%s9022_s1 + $0x1180] ss:$16 sps:$4 sm:$0xff]  }
 0x1e6   : > { %4141 = vmatprep.subr.bf16.mxu0 %v6915_v55  ;;  %4184 = vmatprep.subr.bf16.mxu1 %v6918_v56  ;;  %v7005_v55 = vld [vmem:[%s9022_s1 + $0x100c] ss:$16 sps:$4 sm:$0xff]   ;;  %v4315_v56 = vrot.slane %v7098_v49, 2 }
 0x1e7   : > { %v7085_v49 = vld [vmem:[%s9022_s1 + $0x11ac] ss:$16 sps:$4 sm:$0xff]  }
 0x1e9   : > { %4142 = vmatpush1.bf16.msra.mxu0 %v6913_v57  ;;  %4185 = vmatpush1.bf16.msra.mxu1 %v6916_v58  ;;  %v4316_v57 = vrot.slane %v6037_v50, 2  ;;  %v7000_v58 = vld [vmem:[%s9022_s1 + $0x1000] ss:$16 sps:$4 sm:$0xff]  }
 0x1ea   : > { %4143 = vmatprep.subr.bf16.mxu0 %v6921_v59  ;;  %4186 = vmatprep.subr.bf16.mxu1 %v6924_v60  ;;  %v7003_v59 = vld [vmem:[%s9022_s1 + $0x1008] ss:$16 sps:$4 sm:$0xff]   ;;  %v3811_v60 = vsel %vm3305_vm0, %v3809_v52, %v3810_v53  ;;  %v7080_v50 = vld [vmem:[%s9022_s1 + $0x11a0] ss:$16 sps:$4 sm:$0xff]   ;;  %v7091_v52 = vld [vmem:[%s9022_s1 + $0x11cc] ss:$16 sps:$4 sm:$0xff]  }
 0x1eb   : > { %v7086_v53 = vld [vmem:[%s9022_s1 + $0x11c0] ss:$16 sps:$4 sm:$0xff]  }
 0x1ed   : > { %4144 = vmatpush1.bf16.msra.mxu0 %v6919_v61  ;;  %4187 = vmatpush1.bf16.msra.mxu1 %v6922_v62  ;;  %v7010_v61 = vld [vmem:[%s9022_s1 + $0x1024] ss:$16 sps:$4 sm:$0xff]   ;;  %v7013_v62 = vld [vmem:[%s9022_s1 + $0x102c] ss:$16 sps:$4 sm:$0xff]  }
 0x1ee   : > { %4145 = vmatprep.subr.bf16.mxu0 %v6927_v63  ;;  %4188 = vmatprep.subr.bf16.mxu1 %v6930_v0  ;;  %v4317_v63 = vsel %vm3305_vm0, %v4315_v56, %v4316_v57  ;;  %v7008_v0 = vld [vmem:[%s9022_s1 + $0x1020] ss:$16 sps:$4 sm:$0xff]   ;;  %v6036_v56 = vcombine.low %v8787_v46, %v8787_v46  ;;  %v7094_v57 = vld [vmem:[%s9022_s1 + $0x11e4] ss:$16 sps:$4 sm:$0xff]   ;;  %v7095_v46 = vld [vmem:[%s9022_s1 + $0x11e8] ss:$16 sps:$4 sm:$0xff]  }
 0x1f1   : > { %4146 = vmatpush1.bf16.msra.mxu0 %v6925_v1  ;;  %4189 = vmatpush1.bf16.msra.mxu1 %v6928_v2  ;;  %v7011_v1 = vld [vmem:[%s9022_s1 + $0x1028] ss:$16 sps:$4 sm:$0xff]   ;;  %v7016_v2 = vld [vmem:[%s9022_s1 + $0x1044] ss:$16 sps:$4 sm:$0xff]  }
 0x1f2   : > { %4147 = vmatprep.subr.bf16.mxu0 %v6933_v3  ;;  %4190 = vmatprep.subr.bf16.mxu1 %v6936_v4  ;;  %v7019_v3 = vld [vmem:[%s9022_s1 + $0x104c] ss:$16 sps:$4 sm:$0xff]   ;;  %v7014_v4 = vld [vmem:[%s9022_s1 + $0x1040] ss:$16 sps:$4 sm:$0xff]  }
 0x1f5   : > { %4148 = vmatpush1.bf16.msra.mxu0 %v6931_v5  ;;  %4191 = vmatpush1.bf16.msra.mxu1 %v6934_v6  ;;  %v7017_v5 = vld [vmem:[%s9022_s1 + $0x1048] ss:$16 sps:$4 sm:$0xff]   ;;  %v7022_v6 = vld [vmem:[%s9022_s1 + $0x1064] ss:$16 sps:$4 sm:$0xff]  }
 0x1f6   : > { %4149 = vmatprep.subr.bf16.mxu0 %v6939_v7  ;;  %4192 = vmatprep.subr.bf16.mxu1 %v6942_v8  ;;  %v7025_v7 = vld [vmem:[%s9022_s1 + $0x106c] ss:$16 sps:$4 sm:$0xff]   ;;  %v7020_v8 = vld [vmem:[%s9022_s1 + $0x1060] ss:$16 sps:$4 sm:$0xff]  }
 0x1f9   : > { %4150 = vmatpush1.bf16.msra.mxu0 %v6937_v9  ;;  %4193 = vmatpush1.bf16.msra.mxu1 %v6940_v10  ;;  %v7023_v9 = vld [vmem:[%s9022_s1 + $0x1068] ss:$16 sps:$4 sm:$0xff]   ;;  %v7028_v10 = vld [vmem:[%s9022_s1 + $0x1084] ss:$16 sps:$4 sm:$0xff]  }
 0x1fa   : > { %4151 = vmatprep.subr.bf16.mxu0 %v6945_v11  ;;  %4194 = vmatprep.subr.bf16.mxu1 %v6948_v12  ;;  %v7031_v11 = vld [vmem:[%s9022_s1 + $0x108c] ss:$16 sps:$4 sm:$0xff]   ;;  %v7026_v12 = vld [vmem:[%s9022_s1 + $0x1080] ss:$16 sps:$4 sm:$0xff]  }
 0x1fd   : > { %4152 = vmatpush1.bf16.msra.mxu0 %v6943_v13  ;;  %4195 = vmatpush1.bf16.msra.mxu1 %v6946_v14  ;;  %v7029_v13 = vld [vmem:[%s9022_s1 + $0x1088] ss:$16 sps:$4 sm:$0xff]   ;;  %v7034_v14 = vld [vmem:[%s9022_s1 + $0x10a4] ss:$16 sps:$4 sm:$0xff]  }
 0x1fe   : > { %4153 = vmatprep.subr.bf16.mxu0 %v6951_v15  ;;  %4196 = vmatprep.subr.bf16.mxu1 %v6954_v16  ;;  %v7037_v15 = vld [vmem:[%s9022_s1 + $0x10ac] ss:$16 sps:$4 sm:$0xff]   ;;  %v7032_v16 = vld [vmem:[%s9022_s1 + $0x10a0] ss:$16 sps:$4 sm:$0xff]  }
 0x201   : > { %4154 = vmatpush1.bf16.msra.mxu0 %v6949_v17  ;;  %4197 = vmatpush1.bf16.msra.mxu1 %v6952_v18  ;;  %v7035_v17 = vld [vmem:[%s9022_s1 + $0x10a8] ss:$16 sps:$4 sm:$0xff]   ;;  %v7040_v18 = vld [vmem:[%s9022_s1 + $0x10c4] ss:$16 sps:$4 sm:$0xff]  }
 0x202   : > { %4155 = vmatprep.subr.bf16.mxu0 %v6957_v19  ;;  %4198 = vmatprep.subr.bf16.mxu1 %v6960_v20  ;;  %v7043_v19 = vld [vmem:[%s9022_s1 + $0x10cc] ss:$16 sps:$4 sm:$0xff]   ;;  %v7038_v20 = vld [vmem:[%s9022_s1 + $0x10c0] ss:$16 sps:$4 sm:$0xff]  }
 0x205   : > { %4156 = vmatpush1.bf16.msra.mxu0 %v6955_v21  ;;  %4199 = vmatpush1.bf16.msra.mxu1 %v6958_v22  ;;  %v7041_v21 = vld [vmem:[%s9022_s1 + $0x10c8] ss:$16 sps:$4 sm:$0xff]   ;;  %v7046_v22 = vld [vmem:[%s9022_s1 + $0x10e4] ss:$16 sps:$4 sm:$0xff]  }
 0x206   : > { %4157 = vmatprep.subr.bf16.mxu0 %v6963_v23  ;;  %4200 = vmatprep.subr.bf16.mxu1 %v6966_v24  ;;  %v7049_v23 = vld [vmem:[%s9022_s1 + $0x10ec] ss:$16 sps:$4 sm:$0xff]   ;;  %v7044_v24 = vld [vmem:[%s9022_s1 + $0x10e0] ss:$16 sps:$4 sm:$0xff]  }
 0x209   : > { %4158 = vmatpush1.bf16.msra.mxu0 %v6961_v26  ;;  %4201 = vmatpush1.bf16.msra.mxu1 %v6964_v27  ;;  %v7047_v26 = vld [vmem:[%s9022_s1 + $0x10e8] ss:$16 sps:$4 sm:$0xff]   ;;  %v7052_v27 = vld [vmem:[%s9022_s1 + $0x1104] ss:$16 sps:$4 sm:$0xff]  }
 0x20a   : > { %4159 = vmatprep.subr.bf16.mxu0 %v6969_v28  ;;  %4202 = vmatprep.subr.bf16.mxu1 %v6972_v29  ;;  %v7055_v28 = vld [vmem:[%s9022_s1 + $0x110c] ss:$16 sps:$4 sm:$0xff]   ;;  %v7050_v29 = vld [vmem:[%s9022_s1 + $0x1100] ss:$16 sps:$4 sm:$0xff]  }
 0x20d   : > { %4160 = vmatpush1.bf16.msra.mxu0 %v6967_v30  ;;  %4203 = vmatpush1.bf16.msra.mxu1 %v6970_v31  ;;  %v7053_v30 = vld [vmem:[%s9022_s1 + $0x1108] ss:$16 sps:$4 sm:$0xff]   ;;  %v7058_v31 = vld [vmem:[%s9022_s1 + $0x1124] ss:$16 sps:$4 sm:$0xff]  }
 0x20e   : > { %4161 = vmatprep.subr.bf16.mxu0 %v6975_v32  ;;  %4204 = vmatprep.subr.bf16.mxu1 %v6978_v33  ;;  %v7061_v32 = vld [vmem:[%s9022_s1 + $0x112c] ss:$16 sps:$4 sm:$0xff]   ;;  %v7056_v33 = vld [vmem:[%s9022_s1 + $0x1120] ss:$16 sps:$4 sm:$0xff]  }
 0x211   : > { %4162 = vmatpush1.bf16.msra.mxu0 %v6973_v34  ;;  %4205 = vmatpush1.bf16.msra.mxu1 %v6976_v36  ;;  %v7059_v34 = vld [vmem:[%s9022_s1 + $0x1128] ss:$16 sps:$4 sm:$0xff]   ;;  %v7064_v36 = vld [vmem:[%s9022_s1 + $0x1144] ss:$16 sps:$4 sm:$0xff]  }
 0x212   : > { %4163 = vmatprep.subr.bf16.mxu0 %v6981_v37  ;;  %4206 = vmatprep.subr.bf16.mxu1 %v6984_v38  ;;  %v7067_v37 = vld [vmem:[%s9022_s1 + $0x114c] ss:$16 sps:$4 sm:$0xff]   ;;  %v7062_v38 = vld [vmem:[%s9022_s1 + $0x1140] ss:$16 sps:$4 sm:$0xff]  }
 0x215   : > { %4164 = vmatpush1.bf16.msra.mxu0 %v6979_v39  ;;  %4207 = vmatpush1.bf16.msra.mxu1 %v6982_v25  ;;  %v7065_v39 = vld [vmem:[%s9022_s1 + $0x1148] ss:$16 sps:$4 sm:$0xff]   ;;  %v7070_v25 = vld [vmem:[%s9022_s1 + $0x1164] ss:$16 sps:$4 sm:$0xff]  }
 0x216   : > { %4165 = vmatprep.subr.bf16.mxu0 %v6987_v40  ;;  %4208 = vmatprep.subr.bf16.mxu1 %v6990_v41  ;;  %v7073_v40 = vld [vmem:[%s9022_s1 + $0x116c] ss:$16 sps:$4 sm:$0xff]   ;;  %v7068_v41 = vld [vmem:[%s9022_s1 + $0x1160] ss:$16 sps:$4 sm:$0xff]  }
 0x219   : > { %4166 = vmatpush1.bf16.msra.mxu0 %v6985_v42  ;;  %4209 = vmatpush1.bf16.msra.mxu1 %v6988_v43  ;;  %v7071_v42 = vld [vmem:[%s9022_s1 + $0x1168] ss:$16 sps:$4 sm:$0xff]   ;;  %v7076_v43 = vld [vmem:[%s9022_s1 + $0x1184] ss:$16 sps:$4 sm:$0xff]  }
 0x21a   : > { %4167 = vmatprep.subr.bf16.mxu0 %v6993_v47  ;;  %4210 = vmatprep.subr.bf16.mxu1 %v6996_v48  ;;  %v7077_v47 = vld [vmem:[%s9022_s1 + $0x1188] ss:$16 sps:$4 sm:$0xff]   ;;  %v7082_v48 = vld [vmem:[%s9022_s1 + $0x11a4] ss:$16 sps:$4 sm:$0xff]  }
 0x21d   : > { %4168 = vmatpush1.bf16.msra.mxu0 %v6991_v35  ;;  %4211 = vmatpush1.bf16.msra.mxu1 %v6994_v51  ;;  %v7083_v35 = vld [vmem:[%s9022_s1 + $0x11a8] ss:$16 sps:$4 sm:$0xff]   ;;  %v7088_v51 = vld [vmem:[%s9022_s1 + $0x11c4] ss:$16 sps:$4 sm:$0xff]  }
 0x21e   : > { %4640 = vmatprep.subr.bf16.mxu0 %v7002_v54  ;;  %4683 = vmatprep.subr.bf16.mxu1 %v7005_v55  ;;  %v7089_v54 = vld [vmem:[%s9022_s1 + $0x11c8] ss:$16 sps:$4 sm:$0xff]  }
 0x21f   : > { %v7101_v55 = vld [vmem:[%s7368_s7 + $0x30] ss:$8 sps:$4 sm:$0xfc]  }
 0x220   : > { %4170 = vmatmul.mubr.bf16.vlgmr.msra.gmra.mrb[0].mxu0 %v3811_v60  ;;  %4213 = vmatmul.mubr.bf16.vlgmr.msra.gmra.mrb[0].mxu1 %v3811_v60  ;;  %v4312_v60 = vrot.slane %v7101_v55, 2 }
 0x221   : > { %4641 = vmatpush1.bf16.msra.mxu0 %v7000_v58  ;;  %4684 = vmatpush1.bf16.msra.mxu1 %v7003_v59  ;;  %v7097_v58 = vld [vmem:[%s9022_s1 + $0x11ec] ss:$16 sps:$4 sm:$0xff]   ;;  %v7092_v59 = vld [vmem:[%s9022_s1 + $0x11e0] ss:$16 sps:$4 sm:$0xff]  }
 0x222   : > { %4642 = vmatprep.subr.bf16.mxu0 %v7010_v61  ;;  %4685 = vmatprep.subr.bf16.mxu1 %v7013_v62  ;;  %v4313_v61 = vrot.slane %v6036_v56, 2 }
 0x223   : > { %4672 = vmatprep.mubr.bf16.mxu0 %v4317_v63  ;;  %4715 = vmatprep.mubr.bf16.mxu1 %v4317_v63 }
 0x224   : > { %v4314_v62 = vsel %vm3305_vm0, %v4312_v60, %v4313_v61 }
 0x225   : > { %4643 = vmatpush1.bf16.msra.mxu0 %v7008_v0  ;;  %4686 = vmatpush1.bf16.msra.mxu1 %v7011_v1 }
 0x226   : > { %4644 = vmatprep.subr.bf16.mxu0 %v7016_v2  ;;  %4687 = vmatprep.subr.bf16.mxu1 %v7019_v3 }
 0x229   : > { %4645 = vmatpush1.bf16.msra.mxu0 %v7014_v4  ;;  %4688 = vmatpush1.bf16.msra.mxu1 %v7017_v5 }
 0x22a   : > { %4646 = vmatprep.subr.bf16.mxu0 %v7022_v6  ;;  %4689 = vmatprep.subr.bf16.mxu1 %v7025_v7 }
 0x22d   : > { %4647 = vmatpush1.bf16.msra.mxu0 %v7020_v8  ;;  %4690 = vmatpush1.bf16.msra.mxu1 %v7023_v9 }
 0x22e   : > { %4648 = vmatprep.subr.bf16.mxu0 %v7028_v10  ;;  %4691 = vmatprep.subr.bf16.mxu1 %v7031_v11 }
 0x231   : > { %4649 = vmatpush1.bf16.msra.mxu0 %v7026_v12  ;;  %4692 = vmatpush1.bf16.msra.mxu1 %v7029_v13 }
 0x232   : > { %4650 = vmatprep.subr.bf16.mxu0 %v7034_v14  ;;  %4693 = vmatprep.subr.bf16.mxu1 %v7037_v15 }
 0x235   : > { %4651 = vmatpush1.bf16.msra.mxu0 %v7032_v16  ;;  %4694 = vmatpush1.bf16.msra.mxu1 %v7035_v17 }
 0x236   : > { %4652 = vmatprep.subr.bf16.mxu0 %v7040_v18  ;;  %4695 = vmatprep.subr.bf16.mxu1 %v7043_v19 }
 0x239   : > { %4653 = vmatpush1.bf16.msra.mxu0 %v7038_v20  ;;  %4696 = vmatpush1.bf16.msra.mxu1 %v7041_v21 }
 0x23a   : > { %4654 = vmatprep.subr.bf16.mxu0 %v7046_v22  ;;  %4697 = vmatprep.subr.bf16.mxu1 %v7049_v23 }
 0x23d   : > { %4655 = vmatpush1.bf16.msra.mxu0 %v7044_v24  ;;  %4698 = vmatpush1.bf16.msra.mxu1 %v7047_v26 }
 0x23e   : > { %4656 = vmatprep.subr.bf16.mxu0 %v7052_v27  ;;  %4699 = vmatprep.subr.bf16.mxu1 %v7055_v28 }
 0x241   : > { %4657 = vmatpush1.bf16.msra.mxu0 %v7050_v29  ;;  %4700 = vmatpush1.bf16.msra.mxu1 %v7053_v30 }
 0x242   : > { %4658 = vmatprep.subr.bf16.mxu0 %v7058_v31  ;;  %4701 = vmatprep.subr.bf16.mxu1 %v7061_v32 }
 0x245   : > { %4659 = vmatpush1.bf16.msra.mxu0 %v7056_v33  ;;  %4702 = vmatpush1.bf16.msra.mxu1 %v7059_v34 }
 0x246   : > { %4660 = vmatprep.subr.bf16.mxu0 %v7064_v36  ;;  %4703 = vmatprep.subr.bf16.mxu1 %v7067_v37 }
 0x249   : > { %4661 = vmatpush1.bf16.msra.mxu0 %v7062_v38  ;;  %4704 = vmatpush1.bf16.msra.mxu1 %v7065_v39 }
 0x24a   : > { %4662 = vmatprep.subr.bf16.mxu0 %v7070_v25  ;;  %4705 = vmatprep.subr.bf16.mxu1 %v7073_v40 }
 0x24d   : > { %4663 = vmatpush1.bf16.msra.mxu0 %v7068_v41  ;;  %4706 = vmatpush1.bf16.msra.mxu1 %v7071_v42 }
 0x24e   : > { %4664 = vmatprep.subr.bf16.mxu0 %v7076_v43  ;;  %4707 = vmatprep.subr.bf16.mxu1 %v7079_v44 }
 0x251   : > { %4665 = vmatpush1.bf16.msra.mxu0 %v7074_v45  ;;  %4708 = vmatpush1.bf16.msra.mxu1 %v7077_v47 }
 0x252   : > { %4666 = vmatprep.subr.bf16.mxu0 %v7082_v48  ;;  %4709 = vmatprep.subr.bf16.mxu1 %v7085_v49 }
 0x255   : > { %4667 = vmatpush1.bf16.msra.mxu0 %v7080_v50  ;;  %4710 = vmatpush1.bf16.msra.mxu1 %v7083_v35 }
 0x256   : > { %4668 = vmatprep.subr.bf16.mxu0 %v7088_v51  ;;  %4711 = vmatprep.subr.bf16.mxu1 %v7091_v52 }
 0x259   : > { %4669 = vmatpush1.bf16.msra.mxu0 %v7086_v53  ;;  %4712 = vmatpush1.bf16.msra.mxu1 %v7089_v54 }
 0x25a   : > { %4670 = vmatprep.subr.bf16.mxu0 %v7094_v57  ;;  %4713 = vmatprep.subr.bf16.mxu1 %v7097_v58 }
 0x25d   : > { %4671 = vmatpush1.bf16.msra.mxu0 %v7092_v59  ;;  %4714 = vmatpush1.bf16.msra.mxu1 %v7095_v46 }
 0x260   : > { %4673 = vmatmul.mubr.bf16.vlgmr.msra.gmra.mrb[0].mxu0 %v4314_v62  ;;  %4716 = vmatmul.mubr.bf16.vlgmr.msra.gmra.mrb[0].mxu1 %v4314_v62 }
 0x333   : > { %v4674_v63 = vpop.f32.mrb[0].mxu0  ;;  %v4717_v0 = vpop.f32.mrb[0].mxu1 }
 0x334   : > { %v4676_v1 = vpop.f32.mrb[1].mxu0  ;;  %v4719_v2 = vpop.f32.mrb[1].mxu1 }
 0x335   : > { %v6110_v3 = vpack.c.bf16 %v4676_v1, %v4674_v63  ;;  %v6111_v4 = vpack.c.bf16 %v4719_v2, %v4717_v0  ;;  %v4678_v5 = vpop.f32.mrb[2].mxu0  ;;  %v4721_v6 = vpop.f32.mrb[2].mxu1 }
 0x336   : > { %v4762_v7 = vadd.f32 %v4678_v5, %v4674_v63  ;;  %v4776_v8 = vadd.f32 %v4721_v6, %v4717_v0  ;;  %v4680_v9 = vpop.f32.mrb[3].mxu0  ;;  %v4723_v10 = vpop.f32.mrb[3].mxu1 }
 0x337   : > { %4758 = vst [vmem:[%s283_s17] sm:$0xff] %v6110_v3  ;;  %4759 = vst [vmem:[%s283_s17 + $0x8] sm:$0xff] %v6111_v4  ;;  %v6112_v11 = vpack.c.bf16 %v4680_v9, %v4678_v5  ;;  %v4769_v12 = vadd.f32 %v4680_v9, %v4676_v1  ;;  %v6113_v13 = vpack.c.bf16 %v4723_v10, %v4721_v6 }
 0x338   : > { %v4783_v14 = vadd.f32 %v4723_v10, %v4719_v2  ;;  %v4763_v15 = vrot.slane %v4762_v7, 4  ;;  %v4777_v16 = vrot.slane %v4776_v8, 4 }
 0x339   : > { %4760 = vst [vmem:[%s283_s17 + $0x10] sm:$0xff] %v6112_v11  ;;  %v4770_v17 = vrot.slane %v4769_v12, 4  ;;  %4761 = vst [vmem:[%s283_s17 + $0x18] sm:$0xff] %v6113_v13  ;;  %v4852_v11 = vlaneseq }
 0x33a   : > { %v4784_v18 = vrot.slane %v4783_v14, 4  ;;  %v4764_v19 = vadd.f32 %v4763_v15, %v4762_v7  ;;  %v4778_v20 = vadd.f32 %v4777_v16, %v4776_v8 }
 0x33b   : > { %v4771_v21 = vadd.f32 %v4770_v17, %v4769_v12 }
 0x33c   : > { %v4785_v22 = vadd.f32 %v4784_v18, %v4783_v14  ;;  %v4765_v23 = vrot.slane %v4764_v19, 2  ;;  %v4779_v24 = vrot.slane %v4778_v20, 2 }
 0x33d   : > { %v4772_v26 = vrot.slane %v4771_v21, 2 }
 0x33e   : > { %v4786_v27 = vrot.slane %v4785_v22, 2  ;;  %v4766_v28 = vadd.f32 %v4765_v23, %v4764_v19  ;;  %v4780_v29 = vadd.f32 %v4779_v24, %v4778_v20 }
 0x33f   : > { %v4773_v30 = vadd.f32 %v4772_v26, %v4771_v21  ;;  %v4853_v21 = vshrl.u32 %v4852_v11, 7 }
 0x340   : > { %v4787_v31 = vadd.f32 %v4786_v27, %v4785_v22  ;;  %v4767_v32 = vrot.slane %v4766_v28, 1  ;;  %v4781_v33 = vrot.slane %v4780_v29, 1 }
 0x341   : > { %v4774_v34 = vrot.slane %v4773_v30, 1 }
 0x342   : > { %v4788_v36 = vrot.slane %v4787_v31, 1  ;;  %v4768_v37 = vadd.f32 %v4767_v32, %v4766_v28  ;;  %v4782_v38 = vadd.f32 %v4781_v33, %v4780_v29 }
 0x343   : > { %v4775_v39 = vadd.f32 %v4774_v34, %v4773_v30 }
 0x344   : > { %v4789_v25 = vadd.f32 %v4788_v36, %v4787_v31  ;;  %v4790_v40 = vmul.f32 0.0625, %v4768_v37  ;;  %v4792_v41 = vmul.f32 0.0625, %v4782_v38 }
 0x345   : > { %v4791_v42 = vmul.f32 0.0625, %v4775_v39 }
 0x346   : > { %v4793_v43 = vmul.f32 0.0625, %v4789_v25  ;;  %v4794_v44 = vsub.f32 %v4674_v63, %v4790_v40  ;;  %v4798_v45 = vsub.f32 %v4678_v5, %v4790_v40  ;;  %v4796_v47 = vsub.f32 %v4717_v0, %v4792_v41 }
 0x347   : > { %v4800_v48 = vsub.f32 %v4721_v6, %v4792_v41  ;;  %v4795_v49 = vsub.f32 %v4676_v1, %v4791_v42  ;;  %v4799_v50 = vsub.f32 %v4680_v9, %v4791_v42  ;;  %v7127_v9 = vmov 1983009808  }
 0x348   : > { %v4797_v35 = vsub.f32 %v4719_v2, %v4793_v43  ;;  %v4801_v51 = vsub.f32 %v4723_v10, %v4793_v43  ;;  %v4802_v52 = vmul.f32 %v4794_v44, %v4794_v44  ;;  %v4806_v53 = vmul.f32 %v4798_v45, %v4798_v45 }
 0x349   : > { %v4804_v54 = vmul.f32 %v4796_v47, %v4796_v47  ;;  %v4808_v55 = vmul.f32 %v4800_v48, %v4800_v48  ;;  %v4803_v56 = vmul.f32 %v4795_v49, %v4795_v49  ;;  %v4807_v57 = vmul.f32 %v4799_v50, %v4799_v50 }
 0x34a   : > { %v4805_v58 = vmul.f32 %v4797_v35, %v4797_v35  ;;  %v4809_v59 = vmul.f32 %v4801_v51, %v4801_v51  ;;  %v4810_v46 = vadd.f32 %v4806_v53, %v4802_v52  ;;  %v4850_v10 = vunpack.c.l.s4 %v7127_v9 }
 0x34b   : > { %v4824_v60 = vadd.f32 %v4808_v55, %v4804_v54  ;;  %v4817_v61 = vadd.f32 %v4807_v57, %v4803_v56 }
 0x34c   : > { %v4831_v62 = vadd.f32 %v4809_v59, %v4805_v58  ;;  %v4811_v63 = vrot.slane %v4810_v46, 4  ;;  %v4851_v20 = vunpack.c.0.s8 %v4850_v10 }
 0x34d   : > { %v4825_v3 = vrot.slane %v4824_v60, 4  ;;  %v4818_v0 = vrot.slane %v4817_v61, 4 }
 0x34e   : > { %v4832_v1 = vrot.slane %v4831_v62, 4  ;;  %v4812_v4 = vadd.f32 %v4811_v63, %v4810_v46  ;;  %v4854_v31 = vsub.s32 %v4851_v20, %v4853_v21 }
 0x34f   : > { %v4826_v2 = vadd.f32 %v4825_v3, %v4824_v60  ;;  %v4819_v5 = vadd.f32 %v4818_v0, %v4817_v61 }
 0x350   : > { %v4833_v6 = vadd.f32 %v4832_v1, %v4831_v62  ;;  %v4813_v7 = vrot.slane %v4812_v4, 2 }
 0x351   : > { %v4827_v8 = vrot.slane %v4826_v2, 2  ;;  %v4820_v12 = vrot.slane %v4819_v5, 2 }
 0x352   : > { %v4834_v13 = vrot.slane %v4833_v6, 2  ;;  %v4814_v14 = vadd.f32 %v4813_v7, %v4812_v4 }
 0x353   : > { %v4828_v15 = vadd.f32 %v4827_v8, %v4826_v2  ;;  %v4821_v16 = vadd.f32 %v4820_v12, %v4819_v5 }
 0x354   : > { %v4835_v17 = vadd.f32 %v4834_v13, %v4833_v6  ;;  %v4815_v18 = vrot.slane %v4814_v14, 1 }
 0x355   : > { %v4829_v19 = vrot.slane %v4828_v15, 1  ;;  %v4822_v22 = vrot.slane %v4821_v16, 1 }
 0x356   : > { %v4836_v23 = vrot.slane %v4835_v17, 1  ;;  %v4816_v24 = vadd.f32 %v4815_v18, %v4814_v14 }
 0x357   : > { %v4830_v26 = vadd.f32 %v4829_v19, %v4828_v15  ;;  %v4823_v27 = vadd.f32 %v4822_v22, %v4821_v16 }
 0x358   : > { %v4837_v28 = vadd.f32 %v4836_v23, %v4835_v17  ;;  %v4839_v29 = vsel %vm4838_vm1, %v4768_v37, %v4816_v24 }
 0x359   : > { %v4841_v30 = vsel %vm4838_vm1, %v4782_v38, %v4830_v26  ;;  %v4840_v32 = vsel %vm4838_vm1, %v4775_v39, %v4823_v27 }
 0x35a   : > { %v4842_v33 = vsel %vm4838_vm1, %v4789_v25, %v4837_v28  ;;  %v4847_v34 = vcombine.low %v4839_v29, %v4840_v32 }
 0x35b   : > { %v4848_v36 = vcombine.low %v4841_v30, %v4842_v33 }
 0x35c   : > { %v4855_v40 = vrot.slane %v4847_v34, %v4854_v31 }
 0x35d   : > { %v4862_v41 = vrot.slane %v4848_v36, %v4854_v31 }
 0x35f   : > { %v4863_v42 = vcombine.low %v4855_v40, %v4862_v41 }
 0x361   : > { %4865 = vst [vmem:[%s289_s22] sm:$0xff] %v4863_v42 }
 0x362 PF: > { %p11_p10 = scmp.ge.s32.totalorder %s7167_s16, 4   ;;  %s9025_s12 = smov %s7121_s13 }
 0x363   : > { %s9026_s13 = smov %s7176_s19  ;;  %s9027_s14 = smov %s7167_s16 }
 0x364   :  { %13 = sbr.rel (!%p11_p10) target bundleno = 2 (0x2), region = 126 }

</bundles_post_ra>
